<compile_context>
chip_gen: v5e
topology: v5e:2x2
jax: 0.10.0
libtpu: 0.0.40
codegen_flags: <defaults>
</compile_context>

<pallas_src>
import functools
import math

import jax
import jax.numpy as jnp
from jax.experimental import pallas as pl
from jax.experimental.pallas import tpu as pltpu

D_IN = 2
D_MODEL = 32


def _attn_kernel(x_ref, p_ref, *out_refs, t, d_in, d_model, bb, store_attn):
    # x_ref:     [D_IN, T, BB]          x[b, t, i] stored at [i, t, b]  (batch in lanes)
    # p_ref:     [3*D_MODEL, D_IN + 1]  rows = output channels (q | k | v),
    #                                   cols 0..D_IN-1 = W^T, last col = bias
    # out_refs:  out_ref [T, D_MODEL, BB]  (+ attnw_ref [T, T, BB] if store_attn)
    out_ref = out_refs[0]
    attnw_ref = out_refs[1] if store_attn else None

    scale = 1.0 / math.sqrt(float(d_model))

    p = p_ref[...]                                      # [3*D_MODEL, D_IN+1]

    def wcol(base, col):
        # one weight/bias column, lane-broadcast to the batch-in-lanes tile.
        return jnp.broadcast_to(p[base:base + d_model, col:col + 1], (d_model, bb))

    # Hoisted (computed once per grid step) weight / bias broadcasts.
    wq = [wcol(0, i) for i in range(d_in)]
    wk = [wcol(d_model, i) for i in range(d_in)]
    wv = [wcol(2 * d_model, i) for i in range(d_in)]
    bq = wcol(0, d_in)
    bk = wcol(d_model, d_in)
    bv = wcol(2 * d_model, d_in)

    x_rows = [x_ref[i] for i in range(d_in)]            # each [T, BB]

    def x_bcast(tt):
        # x[:, tt, i] broadcast over the channel (sublane) axis -> [D_MODEL, BB]
        return [jnp.broadcast_to(x_rows[i][tt:tt + 1, :], (d_model, bb))
                for i in range(d_in)]

    # K / V projection (persist across query rows): channels in sublanes,
    # batch in lanes. K = d_in = 2 is far too small for the MXU -> VPU FMAs.
    k_planes, v_planes = [], []
    for tt in range(t):
        xb = x_bcast(tt)
        kt, vt = bk, bv
        for i in range(d_in):
            kt = kt + xb[i] * wk[i]
            vt = vt + xb[i] * wv[i]
        k_planes.append(kt)
        v_planes.append(vt)
    k_all = jnp.stack(k_planes, axis=0)                 # [T, D_MODEL, BB]

    for tq in range(t):
        # Q row for this query time step (used once -> computed on the fly).
        xb = x_bcast(tq)
        q_tq = bq
        for i in range(d_in):
            q_tq = q_tq + xb[i] * wq[i]                 # [D_MODEL, BB]

        # scores row: s[tk, b] = scale * sum_d q[tq, d, b] * k[tk, d, b]
        s_row = jnp.sum(q_tq[None, :, :] * k_all, axis=1) * scale      # [T, BB]

        # TODO(synk): optional boolean `mask` (masked_fill with -inf) is not
        # wired in; the reference forward is exercised with mask=None.

        # softmax over the key axis (sublanes); f32, max-subtracted.
        m = jnp.max(s_row, axis=0, keepdims=True)       # [1, BB]
        e = jnp.exp(s_row - m)
        denom = jnp.sum(e, axis=0, keepdims=True)
        w_row = e * pl.reciprocal(denom, approx=False)  # [T, BB]

        # dropout(p=0) is the identity, so attn_weights are stored as-is.
        if attnw_ref is not None:
            attnw_ref[tq] = w_row

        # out[tq] = sum_tk w[tq, tk] * v[tk] + v[tq]   (pure VPU FMAs)
        acc = v_planes[tq]
        for tk in range(t):
            wb = jnp.broadcast_to(w_row[tk:tk + 1, :], (d_model, bb))
            acc = acc + wb * v_planes[tk]
        out_ref[tq] = acc                               # [D_MODEL, BB]


def scaled_dot_product_attention(x, wq, bq, wk, bk, wv, bv, *,
                                 batch_block=None, return_attn_weights=True):
    """x: [B, T, D_IN] f32. w*: [D_IN, D_MODEL]. b*: [1, D_MODEL].

    Returns (output [B, T, D_MODEL], attn_weights [B, T, T] or None).
    """
    B, T, d_in = x.shape
    d_model = wq.shape[1]

    # Batch block = lane width multiple; 256 for large B amortizes the per-step
    # overhead further while keeping num_blocks >= 2 (v7x 2-TC sharding).
    if batch_block is None:
        batch_block = 256 if B >= 512 else 128
    BB = max(128, -(-int(batch_block) // 128) * 128)
    num_blocks = pl.cdiv(B, BB)
    B_pad = num_blocks * BB
    if B_pad != B:
        x = jnp.pad(x, ((0, B_pad - B), (0, 0), (0, 0)))

    # Batch-in-lanes input slab: [D_IN, T, B_pad] (lane-dense, contiguous rows).
    x_t = jnp.transpose(x, (2, 1, 0))

    # [3*D_MODEL, D_IN+1]: rows = output channels (q | k | v), cols = W^T | bias.
    params = jnp.concatenate([
        jnp.concatenate([wq.T, bq.T], axis=1),
        jnp.concatenate([wk.T, bk.T], axis=1),
        jnp.concatenate([wv.T, bv.T], axis=1),
    ], axis=0)

    kernel = functools.partial(_attn_kernel, t=T, d_in=d_in, d_model=d_model,
                               bb=BB, store_attn=return_attn_weights)

    out_shapes = [jax.ShapeDtypeStruct((T, d_model, B_pad), jnp.float32)]
    out_specs = [pl.BlockSpec((T, d_model, BB), lambda i: (0, 0, i))]
    if return_attn_weights:
        out_shapes.append(jax.ShapeDtypeStruct((T, T, B_pad), jnp.float32))
        out_specs.append(pl.BlockSpec((T, T, BB), lambda i: (0, 0, i)))

    results = pl.pallas_call(
        kernel,
        out_shape=tuple(out_shapes),
        grid_spec=pltpu.PrefetchScalarGridSpec(
            num_scalar_prefetch=0,
            grid=(num_blocks,),
            in_specs=[
                pl.BlockSpec((d_in, T, BB), lambda i: (0, 0, i)),
                pl.BlockSpec((3 * d_model, d_in + 1), lambda i: (0, 0)),
            ],
            out_specs=out_specs,
        ),
        compiler_params=pltpu.CompilerParams(
            dimension_semantics=("parallel",),
            vmem_limit_bytes=32 * 1024 * 1024,
        ),
    )(x_t, params)

    out = jnp.transpose(results[0], (2, 0, 1))[:B]            # [B, T, D_MODEL]
    if not return_attn_weights:
        return out, None
    attnw = jnp.transpose(results[1], (2, 0, 1))[:B]          # [B, T, T]
    return out, attnw


def _reference(x, wq, bq, wk, bk, wv, bv):
    q = x @ wq + bq
    k = x @ wk + bk
    v = x @ wv + bv
    attn = jnp.einsum("btd,bsd->bts", q, k) / math.sqrt(wq.shape[1])
    w = jax.nn.softmax(attn, axis=-1)
    out = jnp.einsum("bts,bsd->btd", w, v) + v
    return out, w


if __name__ == "__main__":
    key = jax.random.PRNGKey(0)
    kx, kq, kbq, kk, kbk, kv, kbv, kx2 = jax.random.split(key, 8)

    B, T = 2, 8
    x = jax.random.normal(kx, (B, T, D_IN), dtype=jnp.float32)

    # PyTorch Linear default init: uniform(-1/sqrt(fan_in), 1/sqrt(fan_in)).
    bound = 1.0 / math.sqrt(D_IN)
    wq = jax.random.uniform(kq,  (D_IN, D_MODEL), jnp.float32, -bound, bound)
    bq = jax.random.uniform(kbq, (1, D_MODEL),    jnp.float32, -bound, bound)
    wk = jax.random.uniform(kk,  (D_IN, D_MODEL), jnp.float32, -bound, bound)
    bk = jax.random.uniform(kbk, (1, D_MODEL),    jnp.float32, -bound, bound)
    wv = jax.random.uniform(kv,  (D_IN, D_MODEL), jnp.float32, -bound, bound)
    bv = jax.random.uniform(kbv, (1, D_MODEL),    jnp.float32, -bound, bound)

    out, attnw = scaled_dot_product_attention(x, wq, bq, wk, bk, wv, bv)
    jax.block_until_ready((out, attnw))

    out_ref, w_ref = _reference(x, wq, bq, wk, bk, wv, bv)
    assert out.shape == (B, T, D_MODEL) and attnw.shape == (B, T, T)
    assert jnp.allclose(out, out_ref, atol=1e-4, rtol=1e-4)
    assert jnp.allclose(attnw, w_ref, atol=1e-4, rtol=1e-4)

    # Multi-block grid + batch-padding path (B not a multiple of the 128 block).
    B2 = 130
    x2 = jax.random.normal(kx2, (B2, T, D_IN), dtype=jnp.float32)
    out2, attnw2 = scaled_dot_product_attention(x2, wq, bq, wk, bk, wv, bv)
    jax.block_until_ready((out2, attnw2))
    out2_ref, w2_ref = _reference(x2, wq, bq, wk, bk, wv, bv)
    assert jnp.allclose(out2, out2_ref, atol=1e-4, rtol=1e-4)
    assert jnp.allclose(attnw2, w2_ref, atol=1e-4, rtol=1e-4)

    # Optional-output variant: skips the attn_weights writeback entirely.
    out3, none_w = scaled_dot_product_attention(
        x, wq, bq, wk, bk, wv, bv, return_attn_weights=False)
    jax.block_until_ready(out3)
    assert none_w is None
    assert jnp.allclose(out3, out_ref, atol=1e-4, rtol=1e-4)

    print("KERNEL_OK")
</pallas_src>

<mosaic_0001>
module attributes {stable_mosaic.version = 11 : i64} {
  func.func @_attn_kernel(%arg0: i32, %arg1: memref<2x8x128xf32, #tpu.memory_space<vmem>>, %arg2: memref<96x3xf32, #tpu.memory_space<vmem>>, %arg3: memref<8x32x128xf32, #tpu.memory_space<vmem>>, %arg4: memref<8x8x128xf32, #tpu.memory_space<vmem>>) attributes {dimension_semantics = [#tpu.dimension_semantics<parallel>], iteration_bounds = array<i64: 1>, scalar_prefetch = 0 : i64, scratch_operands = 0 : i64, tpu.core_type = #tpu.core_type<tc>, window_params = [{transform_indices = @transform_0, window_bounds = array<i64: 2, 8, 128>}, {pipeline_mode = #tpu.pipeline_mode<synchronous>, transform_indices = @transform_1, window_bounds = array<i64: 96, 3>}, {transform_indices = @transform_2, window_bounds = array<i64: 8, 32, 128>}, {transform_indices = @transform_3, window_bounds = array<i64: 8, 8, 128>}]} {
    %c0 = arith.constant 0 : index
    %c0_0 = arith.constant 0 : index
    %0 = vector.load %arg2[%c0, %c0_0] : memref<96x3xf32, #tpu.memory_space<vmem>>, vector<96x3xf32>
    %1 = vector.extract_strided_slice %0 {offsets = [0, 0], sizes = [32, 1], strides = [1, 1]} : vector<96x3xf32> to vector<32x1xf32>
    %2 = vector.shape_cast %1 : vector<32x1xf32> to vector<32x1xf32>
    %3 = vector.broadcast %2 : vector<32x1xf32> to vector<32x128xf32>
    %4 = vector.extract_strided_slice %0 {offsets = [0, 1], sizes = [32, 1], strides = [1, 1]} : vector<96x3xf32> to vector<32x1xf32>
    %5 = vector.shape_cast %4 : vector<32x1xf32> to vector<32x1xf32>
    %6 = vector.broadcast %5 : vector<32x1xf32> to vector<32x128xf32>
    %7 = vector.extract_strided_slice %0 {offsets = [32, 0], sizes = [32, 1], strides = [1, 1]} : vector<96x3xf32> to vector<32x1xf32>
    %8 = vector.shape_cast %7 : vector<32x1xf32> to vector<32x1xf32>
    %9 = vector.broadcast %8 : vector<32x1xf32> to vector<32x128xf32>
    %10 = vector.extract_strided_slice %0 {offsets = [32, 1], sizes = [32, 1], strides = [1, 1]} : vector<96x3xf32> to vector<32x1xf32>
    %11 = vector.shape_cast %10 : vector<32x1xf32> to vector<32x1xf32>
    %12 = vector.broadcast %11 : vector<32x1xf32> to vector<32x128xf32>
    %13 = vector.extract_strided_slice %0 {offsets = [64, 0], sizes = [32, 1], strides = [1, 1]} : vector<96x3xf32> to vector<32x1xf32>
    %14 = vector.shape_cast %13 : vector<32x1xf32> to vector<32x1xf32>
    %15 = vector.broadcast %14 : vector<32x1xf32> to vector<32x128xf32>
    %16 = vector.extract_strided_slice %0 {offsets = [64, 1], sizes = [32, 1], strides = [1, 1]} : vector<96x3xf32> to vector<32x1xf32>
    %17 = vector.shape_cast %16 : vector<32x1xf32> to vector<32x1xf32>
    %18 = vector.broadcast %17 : vector<32x1xf32> to vector<32x128xf32>
    %19 = vector.extract_strided_slice %0 {offsets = [0, 2], sizes = [32, 1], strides = [1, 1]} : vector<96x3xf32> to vector<32x1xf32>
    %20 = vector.shape_cast %19 : vector<32x1xf32> to vector<32x1xf32>
    %21 = vector.broadcast %20 : vector<32x1xf32> to vector<32x128xf32>
    %22 = vector.extract_strided_slice %0 {offsets = [32, 2], sizes = [32, 1], strides = [1, 1]} : vector<96x3xf32> to vector<32x1xf32>
    %23 = vector.shape_cast %22 : vector<32x1xf32> to vector<32x1xf32>
    %24 = vector.broadcast %23 : vector<32x1xf32> to vector<32x128xf32>
    %25 = vector.extract_strided_slice %0 {offsets = [64, 2], sizes = [32, 1], strides = [1, 1]} : vector<96x3xf32> to vector<32x1xf32>
    %26 = vector.shape_cast %25 : vector<32x1xf32> to vector<32x1xf32>
    %27 = vector.broadcast %26 : vector<32x1xf32> to vector<32x128xf32>
    %c0_1 = arith.constant 0 : index
    %c0_2 = arith.constant 0 : index
    %c0_3 = arith.constant 0 : index
    %28 = vector.load %arg1[%c0_1, %c0_2, %c0_3] : memref<2x8x128xf32, #tpu.memory_space<vmem>>, vector<1x8x128xf32>
    %29 = vector.shape_cast %28 : vector<1x8x128xf32> to vector<8x128xf32>
    %c1 = arith.constant 1 : index
    %c0_4 = arith.constant 0 : index
    %c0_5 = arith.constant 0 : index
    %30 = vector.load %arg1[%c1, %c0_4, %c0_5] : memref<2x8x128xf32, #tpu.memory_space<vmem>>, vector<1x8x128xf32>
    %31 = vector.shape_cast %30 : vector<1x8x128xf32> to vector<8x128xf32>
    %32 = vector.extract_strided_slice %29 {offsets = [0, 0], sizes = [1, 128], strides = [1, 1]} : vector<8x128xf32> to vector<1x128xf32>
    %33 = vector.shape_cast %32 : vector<1x128xf32> to vector<1x128xf32>
    %34 = vector.broadcast %33 : vector<1x128xf32> to vector<32x128xf32>
    %35 = vector.extract_strided_slice %31 {offsets = [0, 0], sizes = [1, 128], strides = [1, 1]} : vector<8x128xf32> to vector<1x128xf32>
    %36 = vector.shape_cast %35 : vector<1x128xf32> to vector<1x128xf32>
    %37 = vector.broadcast %36 : vector<1x128xf32> to vector<32x128xf32>
    %38 = arith.mulf %34, %9 : vector<32x128xf32>
    %39 = arith.addf %24, %38 : vector<32x128xf32>
    %40 = arith.mulf %34, %15 : vector<32x128xf32>
    %41 = arith.addf %27, %40 : vector<32x128xf32>
    %42 = arith.mulf %37, %12 : vector<32x128xf32>
    %43 = arith.addf %39, %42 : vector<32x128xf32>
    %44 = arith.mulf %37, %18 : vector<32x128xf32>
    %45 = arith.addf %41, %44 : vector<32x128xf32>
    %46 = vector.extract_strided_slice %29 {offsets = [1, 0], sizes = [1, 128], strides = [1, 1]} : vector<8x128xf32> to vector<1x128xf32>
    %47 = vector.shape_cast %46 : vector<1x128xf32> to vector<1x128xf32>
    %48 = vector.broadcast %47 : vector<1x128xf32> to vector<32x128xf32>
    %49 = vector.extract_strided_slice %31 {offsets = [1, 0], sizes = [1, 128], strides = [1, 1]} : vector<8x128xf32> to vector<1x128xf32>
    %50 = vector.shape_cast %49 : vector<1x128xf32> to vector<1x128xf32>
    %51 = vector.broadcast %50 : vector<1x128xf32> to vector<32x128xf32>
    %52 = arith.mulf %48, %9 : vector<32x128xf32>
    %53 = arith.addf %24, %52 : vector<32x128xf32>
    %54 = arith.mulf %48, %15 : vector<32x128xf32>
    %55 = arith.addf %27, %54 : vector<32x128xf32>
    %56 = arith.mulf %51, %12 : vector<32x128xf32>
    %57 = arith.addf %53, %56 : vector<32x128xf32>
    %58 = arith.mulf %51, %18 : vector<32x128xf32>
    %59 = arith.addf %55, %58 : vector<32x128xf32>
    %60 = vector.extract_strided_slice %29 {offsets = [2, 0], sizes = [1, 128], strides = [1, 1]} : vector<8x128xf32> to vector<1x128xf32>
    %61 = vector.shape_cast %60 : vector<1x128xf32> to vector<1x128xf32>
    %62 = vector.broadcast %61 : vector<1x128xf32> to vector<32x128xf32>
    %63 = vector.extract_strided_slice %31 {offsets = [2, 0], sizes = [1, 128], strides = [1, 1]} : vector<8x128xf32> to vector<1x128xf32>
    %64 = vector.shape_cast %63 : vector<1x128xf32> to vector<1x128xf32>
    %65 = vector.broadcast %64 : vector<1x128xf32> to vector<32x128xf32>
    %66 = arith.mulf %62, %9 : vector<32x128xf32>
    %67 = arith.addf %24, %66 : vector<32x128xf32>
    %68 = arith.mulf %62, %15 : vector<32x128xf32>
    %69 = arith.addf %27, %68 : vector<32x128xf32>
    %70 = arith.mulf %65, %12 : vector<32x128xf32>
    %71 = arith.addf %67, %70 : vector<32x128xf32>
    %72 = arith.mulf %65, %18 : vector<32x128xf32>
    %73 = arith.addf %69, %72 : vector<32x128xf32>
    %74 = vector.extract_strided_slice %29 {offsets = [3, 0], sizes = [1, 128], strides = [1, 1]} : vector<8x128xf32> to vector<1x128xf32>
    %75 = vector.shape_cast %74 : vector<1x128xf32> to vector<1x128xf32>
    %76 = vector.broadcast %75 : vector<1x128xf32> to vector<32x128xf32>
    %77 = vector.extract_strided_slice %31 {offsets = [3, 0], sizes = [1, 128], strides = [1, 1]} : vector<8x128xf32> to vector<1x128xf32>
    %78 = vector.shape_cast %77 : vector<1x128xf32> to vector<1x128xf32>
    %79 = vector.broadcast %78 : vector<1x128xf32> to vector<32x128xf32>
    %80 = arith.mulf %76, %9 : vector<32x128xf32>
    %81 = arith.addf %24, %80 : vector<32x128xf32>
    %82 = arith.mulf %76, %15 : vector<32x128xf32>
    %83 = arith.addf %27, %82 : vector<32x128xf32>
    %84 = arith.mulf %79, %12 : vector<32x128xf32>
    %85 = arith.addf %81, %84 : vector<32x128xf32>
    %86 = arith.mulf %79, %18 : vector<32x128xf32>
    %87 = arith.addf %83, %86 : vector<32x128xf32>
    %88 = vector.extract_strided_slice %29 {offsets = [4, 0], sizes = [1, 128], strides = [1, 1]} : vector<8x128xf32> to vector<1x128xf32>
    %89 = vector.shape_cast %88 : vector<1x128xf32> to vector<1x128xf32>
    %90 = vector.broadcast %89 : vector<1x128xf32> to vector<32x128xf32>
    %91 = vector.extract_strided_slice %31 {offsets = [4, 0], sizes = [1, 128], strides = [1, 1]} : vector<8x128xf32> to vector<1x128xf32>
    %92 = vector.shape_cast %91 : vector<1x128xf32> to vector<1x128xf32>
    %93 = vector.broadcast %92 : vector<1x128xf32> to vector<32x128xf32>
    %94 = arith.mulf %90, %9 : vector<32x128xf32>
    %95 = arith.addf %24, %94 : vector<32x128xf32>
    %96 = arith.mulf %90, %15 : vector<32x128xf32>
    %97 = arith.addf %27, %96 : vector<32x128xf32>
    %98 = arith.mulf %93, %12 : vector<32x128xf32>
    %99 = arith.addf %95, %98 : vector<32x128xf32>
    %100 = arith.mulf %93, %18 : vector<32x128xf32>
    %101 = arith.addf %97, %100 : vector<32x128xf32>
    %102 = vector.extract_strided_slice %29 {offsets = [5, 0], sizes = [1, 128], strides = [1, 1]} : vector<8x128xf32> to vector<1x128xf32>
    %103 = vector.shape_cast %102 : vector<1x128xf32> to vector<1x128xf32>
    %104 = vector.broadcast %103 : vector<1x128xf32> to vector<32x128xf32>
    %105 = vector.extract_strided_slice %31 {offsets = [5, 0], sizes = [1, 128], strides = [1, 1]} : vector<8x128xf32> to vector<1x128xf32>
    %106 = vector.shape_cast %105 : vector<1x128xf32> to vector<1x128xf32>
    %107 = vector.broadcast %106 : vector<1x128xf32> to vector<32x128xf32>
    %108 = arith.mulf %104, %9 : vector<32x128xf32>
    %109 = arith.addf %24, %108 : vector<32x128xf32>
    %110 = arith.mulf %104, %15 : vector<32x128xf32>
    %111 = arith.addf %27, %110 : vector<32x128xf32>
    %112 = arith.mulf %107, %12 : vector<32x128xf32>
    %113 = arith.addf %109, %112 : vector<32x128xf32>
    %114 = arith.mulf %107, %18 : vector<32x128xf32>
    %115 = arith.addf %111, %114 : vector<32x128xf32>
    %116 = vector.extract_strided_slice %29 {offsets = [6, 0], sizes = [1, 128], strides = [1, 1]} : vector<8x128xf32> to vector<1x128xf32>
    %117 = vector.shape_cast %116 : vector<1x128xf32> to vector<1x128xf32>
    %118 = vector.broadcast %117 : vector<1x128xf32> to vector<32x128xf32>
    %119 = vector.extract_strided_slice %31 {offsets = [6, 0], sizes = [1, 128], strides = [1, 1]} : vector<8x128xf32> to vector<1x128xf32>
    %120 = vector.shape_cast %119 : vector<1x128xf32> to vector<1x128xf32>
    %121 = vector.broadcast %120 : vector<1x128xf32> to vector<32x128xf32>
    %122 = arith.mulf %118, %9 : vector<32x128xf32>
    %123 = arith.addf %24, %122 : vector<32x128xf32>
    %124 = arith.mulf %118, %15 : vector<32x128xf32>
    %125 = arith.addf %27, %124 : vector<32x128xf32>
    %126 = arith.mulf %121, %12 : vector<32x128xf32>
    %127 = arith.addf %123, %126 : vector<32x128xf32>
    %128 = arith.mulf %121, %18 : vector<32x128xf32>
    %129 = arith.addf %125, %128 : vector<32x128xf32>
    %130 = vector.extract_strided_slice %29 {offsets = [7, 0], sizes = [1, 128], strides = [1, 1]} : vector<8x128xf32> to vector<1x128xf32>
    %131 = vector.shape_cast %130 : vector<1x128xf32> to vector<1x128xf32>
    %132 = vector.broadcast %131 : vector<1x128xf32> to vector<32x128xf32>
    %133 = vector.extract_strided_slice %31 {offsets = [7, 0], sizes = [1, 128], strides = [1, 1]} : vector<8x128xf32> to vector<1x128xf32>
    %134 = vector.shape_cast %133 : vector<1x128xf32> to vector<1x128xf32>
    %135 = vector.broadcast %134 : vector<1x128xf32> to vector<32x128xf32>
    %136 = arith.mulf %132, %9 : vector<32x128xf32>
    %137 = arith.addf %24, %136 : vector<32x128xf32>
    %138 = arith.mulf %132, %15 : vector<32x128xf32>
    %139 = arith.addf %27, %138 : vector<32x128xf32>
    %140 = arith.mulf %135, %12 : vector<32x128xf32>
    %141 = arith.addf %137, %140 : vector<32x128xf32>
    %142 = arith.mulf %135, %18 : vector<32x128xf32>
    %143 = arith.addf %139, %142 : vector<32x128xf32>
    %144 = vector.shape_cast %43 : vector<32x128xf32> to vector<1x32x128xf32>
    %145 = vector.shape_cast %57 : vector<32x128xf32> to vector<1x32x128xf32>
    %146 = vector.shape_cast %71 : vector<32x128xf32> to vector<1x32x128xf32>
    %147 = vector.shape_cast %85 : vector<32x128xf32> to vector<1x32x128xf32>
    %148 = vector.shape_cast %99 : vector<32x128xf32> to vector<1x32x128xf32>
    %149 = vector.shape_cast %113 : vector<32x128xf32> to vector<1x32x128xf32>
    %150 = vector.shape_cast %127 : vector<32x128xf32> to vector<1x32x128xf32>
    %151 = vector.shape_cast %141 : vector<32x128xf32> to vector<1x32x128xf32>
    %152 = tpu.concatenate %144, %145, %146, %147, %148, %149, %150, %151 in 0 : vector<1x32x128xf32>, vector<1x32x128xf32>, vector<1x32x128xf32>, vector<1x32x128xf32>, vector<1x32x128xf32>, vector<1x32x128xf32>, vector<1x32x128xf32>, vector<1x32x128xf32> -> vector<8x32x128xf32>
    %153 = vector.extract_strided_slice %29 {offsets = [0, 0], sizes = [1, 128], strides = [1, 1]} : vector<8x128xf32> to vector<1x128xf32>
    %154 = vector.shape_cast %153 : vector<1x128xf32> to vector<1x128xf32>
    %155 = vector.broadcast %154 : vector<1x128xf32> to vector<32x128xf32>
    %156 = vector.extract_strided_slice %31 {offsets = [0, 0], sizes = [1, 128], strides = [1, 1]} : vector<8x128xf32> to vector<1x128xf32>
    %157 = vector.shape_cast %156 : vector<1x128xf32> to vector<1x128xf32>
    %158 = vector.broadcast %157 : vector<1x128xf32> to vector<32x128xf32>
    %159 = arith.mulf %155, %3 : vector<32x128xf32>
    %160 = arith.addf %21, %159 : vector<32x128xf32>
    %161 = arith.mulf %158, %6 : vector<32x128xf32>
    %162 = arith.addf %160, %161 : vector<32x128xf32>
    %163 = vector.shape_cast %162 : vector<32x128xf32> to vector<1x32x128xf32>
    %164 = vector.broadcast %163 : vector<1x32x128xf32> to vector<8x32x128xf32>
    %165 = arith.mulf %164, %152 : vector<8x32x128xf32>
    %cst = arith.constant dense<0.000000e+00> : vector<8x128xf32>
    %166 = vector.multi_reduction <add>, %165, %cst [1] : vector<8x32x128xf32> to vector<8x128xf32>
    %cst_6 = arith.constant 0.176776692 : f32
    %167 = vector.broadcast %cst_6 : f32 to vector<8x128xf32>
    %168 = arith.mulf %166, %167 : vector<8x128xf32>
    %cst_7 = arith.constant dense<0xFF800000> : vector<128xf32>
    %169 = vector.multi_reduction <maximumf>, %168, %cst_7 [0] : vector<8x128xf32> to vector<128xf32>
    %170 = vector.shape_cast %169 : vector<128xf32> to vector<1x128xf32>
    %171 = vector.broadcast %170 : vector<1x128xf32> to vector<8x128xf32>
    %172 = arith.subf %168, %171 : vector<8x128xf32>
    %173 = math.exp %172 : vector<8x128xf32>
    %cst_8 = arith.constant dense<0.000000e+00> : vector<128xf32>
    %174 = vector.multi_reduction <add>, %173, %cst_8 [0] : vector<8x128xf32> to vector<128xf32>
    %175 = vector.shape_cast %174 : vector<128xf32> to vector<1x128xf32>
    %176 = tpu.reciprocal %175 : vector<1x128xf32> -> vector<1x128xf32>
    %177 = vector.broadcast %176 : vector<1x128xf32> to vector<8x128xf32>
    %178 = arith.mulf %173, %177 : vector<8x128xf32>
    %c0_9 = arith.constant 0 : index
    %c0_10 = arith.constant 0 : index
    %c0_11 = arith.constant 0 : index
    %179 = vector.load %arg4[%c0_9, %c0_10, %c0_11] : memref<8x8x128xf32, #tpu.memory_space<vmem>>, vector<1x8x128xf32>
    %180 = vector.shape_cast %179 : vector<1x8x128xf32> to vector<8x128xf32>
    %181 = vector.shape_cast %178 : vector<8x128xf32> to vector<1x8x128xf32>
    tpu.vector_store %arg4[%c0_9, %c0_10, %c0_11], %181 {strides = array<i32>} : memref<8x8x128xf32, #tpu.memory_space<vmem>>, vector<1x8x128xf32>,
    %182 = vector.extract_strided_slice %178 {offsets = [0, 0], sizes = [1, 128], strides = [1, 1]} : vector<8x128xf32> to vector<1x128xf32>
    %183 = vector.shape_cast %182 : vector<1x128xf32> to vector<1x128xf32>
    %184 = vector.broadcast %183 : vector<1x128xf32> to vector<32x128xf32>
    %185 = arith.mulf %184, %45 : vector<32x128xf32>
    %186 = arith.addf %45, %185 : vector<32x128xf32>
    %187 = vector.extract_strided_slice %178 {offsets = [1, 0], sizes = [1, 128], strides = [1, 1]} : vector<8x128xf32> to vector<1x128xf32>
    %188 = vector.shape_cast %187 : vector<1x128xf32> to vector<1x128xf32>
    %189 = vector.broadcast %188 : vector<1x128xf32> to vector<32x128xf32>
    %190 = arith.mulf %189, %59 : vector<32x128xf32>
    %191 = arith.addf %186, %190 : vector<32x128xf32>
    %192 = vector.extract_strided_slice %178 {offsets = [2, 0], sizes = [1, 128], strides = [1, 1]} : vector<8x128xf32> to vector<1x128xf32>
    %193 = vector.shape_cast %192 : vector<1x128xf32> to vector<1x128xf32>
    %194 = vector.broadcast %193 : vector<1x128xf32> to vector<32x128xf32>
    %195 = arith.mulf %194, %73 : vector<32x128xf32>
    %196 = arith.addf %191, %195 : vector<32x128xf32>
    %197 = vector.extract_strided_slice %178 {offsets = [3, 0], sizes = [1, 128], strides = [1, 1]} : vector<8x128xf32> to vector<1x128xf32>
    %198 = vector.shape_cast %197 : vector<1x128xf32> to vector<1x128xf32>
    %199 = vector.broadcast %198 : vector<1x128xf32> to vector<32x128xf32>
    %200 = arith.mulf %199, %87 : vector<32x128xf32>
    %201 = arith.addf %196, %200 : vector<32x128xf32>
    %202 = vector.extract_strided_slice %178 {offsets = [4, 0], sizes = [1, 128], strides = [1, 1]} : vector<8x128xf32> to vector<1x128xf32>
    %203 = vector.shape_cast %202 : vector<1x128xf32> to vector<1x128xf32>
    %204 = vector.broadcast %203 : vector<1x128xf32> to vector<32x128xf32>
    %205 = arith.mulf %204, %101 : vector<32x128xf32>
    %206 = arith.addf %201, %205 : vector<32x128xf32>
    %207 = vector.extract_strided_slice %178 {offsets = [5, 0], sizes = [1, 128], strides = [1, 1]} : vector<8x128xf32> to vector<1x128xf32>
    %208 = vector.shape_cast %207 : vector<1x128xf32> to vector<1x128xf32>
    %209 = vector.broadcast %208 : vector<1x128xf32> to vector<32x128xf32>
    %210 = arith.mulf %209, %115 : vector<32x128xf32>
    %211 = arith.addf %206, %210 : vector<32x128xf32>
    %212 = vector.extract_strided_slice %178 {offsets = [6, 0], sizes = [1, 128], strides = [1, 1]} : vector<8x128xf32> to vector<1x128xf32>
    %213 = vector.shape_cast %212 : vector<1x128xf32> to vector<1x128xf32>
    %214 = vector.broadcast %213 : vector<1x128xf32> to vector<32x128xf32>
    %215 = arith.mulf %214, %129 : vector<32x128xf32>
    %216 = arith.addf %211, %215 : vector<32x128xf32>
    %217 = vector.extract_strided_slice %178 {offsets = [7, 0], sizes = [1, 128], strides = [1, 1]} : vector<8x128xf32> to vector<1x128xf32>
    %218 = vector.shape_cast %217 : vector<1x128xf32> to vector<1x128xf32>
    %219 = vector.broadcast %218 : vector<1x128xf32> to vector<32x128xf32>
    %220 = arith.mulf %219, %143 : vector<32x128xf32>
    %221 = arith.addf %216, %220 : vector<32x128xf32>
    %c0_12 = arith.constant 0 : index
    %c0_13 = arith.constant 0 : index
    %c0_14 = arith.constant 0 : index
    %222 = vector.load %arg3[%c0_12, %c0_13, %c0_14] : memref<8x32x128xf32, #tpu.memory_space<vmem>>, vector<1x32x128xf32>
    %223 = vector.shape_cast %222 : vector<1x32x128xf32> to vector<32x128xf32>
    %224 = vector.shape_cast %221 : vector<32x128xf32> to vector<1x32x128xf32>
    tpu.vector_store %arg3[%c0_12, %c0_13, %c0_14], %224 {strides = array<i32>} : memref<8x32x128xf32, #tpu.memory_space<vmem>>, vector<1x32x128xf32>,
    %225 = vector.extract_strided_slice %29 {offsets = [1, 0], sizes = [1, 128], strides = [1, 1]} : vector<8x128xf32> to vector<1x128xf32>
    %226 = vector.shape_cast %225 : vector<1x128xf32> to vector<1x128xf32>
    %227 = vector.broadcast %226 : vector<1x128xf32> to vector<32x128xf32>
    %228 = vector.extract_strided_slice %31 {offsets = [1, 0], sizes = [1, 128], strides = [1, 1]} : vector<8x128xf32> to vector<1x128xf32>
    %229 = vector.shape_cast %228 : vector<1x128xf32> to vector<1x128xf32>
    %230 = vector.broadcast %229 : vector<1x128xf32> to vector<32x128xf32>
    %231 = arith.mulf %227, %3 : vector<32x128xf32>
    %232 = arith.addf %21, %231 : vector<32x128xf32>
    %233 = arith.mulf %230, %6 : vector<32x128xf32>
    %234 = arith.addf %232, %233 : vector<32x128xf32>
    %235 = vector.shape_cast %234 : vector<32x128xf32> to vector<1x32x128xf32>
    %236 = vector.broadcast %235 : vector<1x32x128xf32> to vector<8x32x128xf32>
    %237 = arith.mulf %236, %152 : vector<8x32x128xf32>
    %cst_15 = arith.constant dense<0.000000e+00> : vector<8x128xf32>
    %238 = vector.multi_reduction <add>, %237, %cst_15 [1] : vector<8x32x128xf32> to vector<8x128xf32>
    %cst_16 = arith.constant 0.176776692 : f32
    %239 = vector.broadcast %cst_16 : f32 to vector<8x128xf32>
    %240 = arith.mulf %238, %239 : vector<8x128xf32>
    %cst_17 = arith.constant dense<0xFF800000> : vector<128xf32>
    %241 = vector.multi_reduction <maximumf>, %240, %cst_17 [0] : vector<8x128xf32> to vector<128xf32>
    %242 = vector.shape_cast %241 : vector<128xf32> to vector<1x128xf32>
    %243 = vector.broadcast %242 : vector<1x128xf32> to vector<8x128xf32>
    %244 = arith.subf %240, %243 : vector<8x128xf32>
    %245 = math.exp %244 : vector<8x128xf32>
    %cst_18 = arith.constant dense<0.000000e+00> : vector<128xf32>
    %246 = vector.multi_reduction <add>, %245, %cst_18 [0] : vector<8x128xf32> to vector<128xf32>
    %247 = vector.shape_cast %246 : vector<128xf32> to vector<1x128xf32>
    %248 = tpu.reciprocal %247 : vector<1x128xf32> -> vector<1x128xf32>
    %249 = vector.broadcast %248 : vector<1x128xf32> to vector<8x128xf32>
    %250 = arith.mulf %245, %249 : vector<8x128xf32>
    %c1_19 = arith.constant 1 : index
    %c0_20 = arith.constant 0 : index
    %c0_21 = arith.constant 0 : index
    %251 = vector.load %arg4[%c1_19, %c0_20, %c0_21] : memref<8x8x128xf32, #tpu.memory_space<vmem>>, vector<1x8x128xf32>
    %252 = vector.shape_cast %251 : vector<1x8x128xf32> to vector<8x128xf32>
    %253 = vector.shape_cast %250 : vector<8x128xf32> to vector<1x8x128xf32>
    tpu.vector_store %arg4[%c1_19, %c0_20, %c0_21], %253 {strides = array<i32>} : memref<8x8x128xf32, #tpu.memory_space<vmem>>, vector<1x8x128xf32>,
    %254 = vector.extract_strided_slice %250 {offsets = [0, 0], sizes = [1, 128], strides = [1, 1]} : vector<8x128xf32> to vector<1x128xf32>
    %255 = vector.shape_cast %254 : vector<1x128xf32> to vector<1x128xf32>
    %256 = vector.broadcast %255 : vector<1x128xf32> to vector<32x128xf32>
    %257 = arith.mulf %256, %45 : vector<32x128xf32>
    %258 = arith.addf %59, %257 : vector<32x128xf32>
    %259 = vector.extract_strided_slice %250 {offsets = [1, 0], sizes = [1, 128], strides = [1, 1]} : vector<8x128xf32> to vector<1x128xf32>
    %260 = vector.shape_cast %259 : vector<1x128xf32> to vector<1x128xf32>
    %261 = vector.broadcast %260 : vector<1x128xf32> to vector<32x128xf32>
    %262 = arith.mulf %261, %59 : vector<32x128xf32>
    %263 = arith.addf %258, %262 : vector<32x128xf32>
    %264 = vector.extract_strided_slice %250 {offsets = [2, 0], sizes = [1, 128], strides = [1, 1]} : vector<8x128xf32> to vector<1x128xf32>
    %265 = vector.shape_cast %264 : vector<1x128xf32> to vector<1x128xf32>
    %266 = vector.broadcast %265 : vector<1x128xf32> to vector<32x128xf32>
    %267 = arith.mulf %266, %73 : vector<32x128xf32>
    %268 = arith.addf %263, %267 : vector<32x128xf32>
    %269 = vector.extract_strided_slice %250 {offsets = [3, 0], sizes = [1, 128], strides = [1, 1]} : vector<8x128xf32> to vector<1x128xf32>
    %270 = vector.shape_cast %269 : vector<1x128xf32> to vector<1x128xf32>
    %271 = vector.broadcast %270 : vector<1x128xf32> to vector<32x128xf32>
    %272 = arith.mulf %271, %87 : vector<32x128xf32>
    %273 = arith.addf %268, %272 : vector<32x128xf32>
    %274 = vector.extract_strided_slice %250 {offsets = [4, 0], sizes = [1, 128], strides = [1, 1]} : vector<8x128xf32> to vector<1x128xf32>
    %275 = vector.shape_cast %274 : vector<1x128xf32> to vector<1x128xf32>
    %276 = vector.broadcast %275 : vector<1x128xf32> to vector<32x128xf32>
    %277 = arith.mulf %276, %101 : vector<32x128xf32>
    %278 = arith.addf %273, %277 : vector<32x128xf32>
    %279 = vector.extract_strided_slice %250 {offsets = [5, 0], sizes = [1, 128], strides = [1, 1]} : vector<8x128xf32> to vector<1x128xf32>
    %280 = vector.shape_cast %279 : vector<1x128xf32> to vector<1x128xf32>
    %281 = vector.broadcast %280 : vector<1x128xf32> to vector<32x128xf32>
    %282 = arith.mulf %281, %115 : vector<32x128xf32>
    %283 = arith.addf %278, %282 : vector<32x128xf32>
    %284 = vector.extract_strided_slice %250 {offsets = [6, 0], sizes = [1, 128], strides = [1, 1]} : vector<8x128xf32> to vector<1x128xf32>
    %285 = vector.shape_cast %284 : vector<1x128xf32> to vector<1x128xf32>
    %286 = vector.broadcast %285 : vector<1x128xf32> to vector<32x128xf32>
    %287 = arith.mulf %286, %129 : vector<32x128xf32>
    %288 = arith.addf %283, %287 : vector<32x128xf32>
    %289 = vector.extract_strided_slice %250 {offsets = [7, 0], sizes = [1, 128], strides = [1, 1]} : vector<8x128xf32> to vector<1x128xf32>
    %290 = vector.shape_cast %289 : vector<1x128xf32> to vector<1x128xf32>
    %291 = vector.broadcast %290 : vector<1x128xf32> to vector<32x128xf32>
    %292 = arith.mulf %291, %143 : vector<32x128xf32>
    %293 = arith.addf %288, %292 : vector<32x128xf32>
    %c1_22 = arith.constant 1 : index
    %c0_23 = arith.constant 0 : index
    %c0_24 = arith.constant 0 : index
    %294 = vector.load %arg3[%c1_22, %c0_23, %c0_24] : memref<8x32x128xf32, #tpu.memory_space<vmem>>, vector<1x32x128xf32>
    %295 = vector.shape_cast %294 : vector<1x32x128xf32> to vector<32x128xf32>
    %296 = vector.shape_cast %293 : vector<32x128xf32> to vector<1x32x128xf32>
    tpu.vector_store %arg3[%c1_22, %c0_23, %c0_24], %296 {strides = array<i32>} : memref<8x32x128xf32, #tpu.memory_space<vmem>>, vector<1x32x128xf32>,
    %297 = vector.extract_strided_slice %29 {offsets = [2, 0], sizes = [1, 128], strides = [1, 1]} : vector<8x128xf32> to vector<1x128xf32>
    %298 = vector.shape_cast %297 : vector<1x128xf32> to vector<1x128xf32>
    %299 = vector.broadcast %298 : vector<1x128xf32> to vector<32x128xf32>
    %300 = vector.extract_strided_slice %31 {offsets = [2, 0], sizes = [1, 128], strides = [1, 1]} : vector<8x128xf32> to vector<1x128xf32>
    %301 = vector.shape_cast %300 : vector<1x128xf32> to vector<1x128xf32>
    %302 = vector.broadcast %301 : vector<1x128xf32> to vector<32x128xf32>
    %303 = arith.mulf %299, %3 : vector<32x128xf32>
    %304 = arith.addf %21, %303 : vector<32x128xf32>
    %305 = arith.mulf %302, %6 : vector<32x128xf32>
    %306 = arith.addf %304, %305 : vector<32x128xf32>
    %307 = vector.shape_cast %306 : vector<32x128xf32> to vector<1x32x128xf32>
    %308 = vector.broadcast %307 : vector<1x32x128xf32> to vector<8x32x128xf32>
    %309 = arith.mulf %308, %152 : vector<8x32x128xf32>
    %cst_25 = arith.constant dense<0.000000e+00> : vector<8x128xf32>
    %310 = vector.multi_reduction <add>, %309, %cst_25 [1] : vector<8x32x128xf32> to vector<8x128xf32>
    %cst_26 = arith.constant 0.176776692 : f32
    %311 = vector.broadcast %cst_26 : f32 to vector<8x128xf32>
    %312 = arith.mulf %310, %311 : vector<8x128xf32>
    %cst_27 = arith.constant dense<0xFF800000> : vector<128xf32>
    %313 = vector.multi_reduction <maximumf>, %312, %cst_27 [0] : vector<8x128xf32> to vector<128xf32>
    %314 = vector.shape_cast %313 : vector<128xf32> to vector<1x128xf32>
    %315 = vector.broadcast %314 : vector<1x128xf32> to vector<8x128xf32>
    %316 = arith.subf %312, %315 : vector<8x128xf32>
    %317 = math.exp %316 : vector<8x128xf32>
    %cst_28 = arith.constant dense<0.000000e+00> : vector<128xf32>
    %318 = vector.multi_reduction <add>, %317, %cst_28 [0] : vector<8x128xf32> to vector<128xf32>
    %319 = vector.shape_cast %318 : vector<128xf32> to vector<1x128xf32>
    %320 = tpu.reciprocal %319 : vector<1x128xf32> -> vector<1x128xf32>
    %321 = vector.broadcast %320 : vector<1x128xf32> to vector<8x128xf32>
    %322 = arith.mulf %317, %321 : vector<8x128xf32>
    %c2 = arith.constant 2 : index
    %c0_29 = arith.constant 0 : index
    %c0_30 = arith.constant 0 : index
    %323 = vector.load %arg4[%c2, %c0_29, %c0_30] : memref<8x8x128xf32, #tpu.memory_space<vmem>>, vector<1x8x128xf32>
    %324 = vector.shape_cast %323 : vector<1x8x128xf32> to vector<8x128xf32>
    %325 = vector.shape_cast %322 : vector<8x128xf32> to vector<1x8x128xf32>
    tpu.vector_store %arg4[%c2, %c0_29, %c0_30], %325 {strides = array<i32>} : memref<8x8x128xf32, #tpu.memory_space<vmem>>, vector<1x8x128xf32>,
    %326 = vector.extract_strided_slice %322 {offsets = [0, 0], sizes = [1, 128], strides = [1, 1]} : vector<8x128xf32> to vector<1x128xf32>
    %327 = vector.shape_cast %326 : vector<1x128xf32> to vector<1x128xf32>
    %328 = vector.broadcast %327 : vector<1x128xf32> to vector<32x128xf32>
    %329 = arith.mulf %328, %45 : vector<32x128xf32>
    %330 = arith.addf %73, %329 : vector<32x128xf32>
    %331 = vector.extract_strided_slice %322 {offsets = [1, 0], sizes = [1, 128], strides = [1, 1]} : vector<8x128xf32> to vector<1x128xf32>
    %332 = vector.shape_cast %331 : vector<1x128xf32> to vector<1x128xf32>
    %333 = vector.broadcast %332 : vector<1x128xf32> to vector<32x128xf32>
    %334 = arith.mulf %333, %59 : vector<32x128xf32>
    %335 = arith.addf %330, %334 : vector<32x128xf32>
    %336 = vector.extract_strided_slice %322 {offsets = [2, 0], sizes = [1, 128], strides = [1, 1]} : vector<8x128xf32> to vector<1x128xf32>
    %337 = vector.shape_cast %336 : vector<1x128xf32> to vector<1x128xf32>
    %338 = vector.broadcast %337 : vector<1x128xf32> to vector<32x128xf32>
    %339 = arith.mulf %338, %73 : vector<32x128xf32>
    %340 = arith.addf %335, %339 : vector<32x128xf32>
    %341 = vector.extract_strided_slice %322 {offsets = [3, 0], sizes = [1, 128], strides = [1, 1]} : vector<8x128xf32> to vector<1x128xf32>
    %342 = vector.shape_cast %341 : vector<1x128xf32> to vector<1x128xf32>
    %343 = vector.broadcast %342 : vector<1x128xf32> to vector<32x128xf32>
    %344 = arith.mulf %343, %87 : vector<32x128xf32>
    %345 = arith.addf %340, %344 : vector<32x128xf32>
    %346 = vector.extract_strided_slice %322 {offsets = [4, 0], sizes = [1, 128], strides = [1, 1]} : vector<8x128xf32> to vector<1x128xf32>
    %347 = vector.shape_cast %346 : vector<1x128xf32> to vector<1x128xf32>
    %348 = vector.broadcast %347 : vector<1x128xf32> to vector<32x128xf32>
    %349 = arith.mulf %348, %101 : vector<32x128xf32>
    %350 = arith.addf %345, %349 : vector<32x128xf32>
    %351 = vector.extract_strided_slice %322 {offsets = [5, 0], sizes = [1, 128], strides = [1, 1]} : vector<8x128xf32> to vector<1x128xf32>
    %352 = vector.shape_cast %351 : vector<1x128xf32> to vector<1x128xf32>
    %353 = vector.broadcast %352 : vector<1x128xf32> to vector<32x128xf32>
    %354 = arith.mulf %353, %115 : vector<32x128xf32>
    %355 = arith.addf %350, %354 : vector<32x128xf32>
    %356 = vector.extract_strided_slice %322 {offsets = [6, 0], sizes = [1, 128], strides = [1, 1]} : vector<8x128xf32> to vector<1x128xf32>
    %357 = vector.shape_cast %356 : vector<1x128xf32> to vector<1x128xf32>
    %358 = vector.broadcast %357 : vector<1x128xf32> to vector<32x128xf32>
    %359 = arith.mulf %358, %129 : vector<32x128xf32>
    %360 = arith.addf %355, %359 : vector<32x128xf32>
    %361 = vector.extract_strided_slice %322 {offsets = [7, 0], sizes = [1, 128], strides = [1, 1]} : vector<8x128xf32> to vector<1x128xf32>
    %362 = vector.shape_cast %361 : vector<1x128xf32> to vector<1x128xf32>
    %363 = vector.broadcast %362 : vector<1x128xf32> to vector<32x128xf32>
    %364 = arith.mulf %363, %143 : vector<32x128xf32>
    %365 = arith.addf %360, %364 : vector<32x128xf32>
    %c2_31 = arith.constant 2 : index
    %c0_32 = arith.constant 0 : index
    %c0_33 = arith.constant 0 : index
    %366 = vector.load %arg3[%c2_31, %c0_32, %c0_33] : memref<8x32x128xf32, #tpu.memory_space<vmem>>, vector<1x32x128xf32>
    %367 = vector.shape_cast %366 : vector<1x32x128xf32> to vector<32x128xf32>
    %368 = vector.shape_cast %365 : vector<32x128xf32> to vector<1x32x128xf32>
    tpu.vector_store %arg3[%c2_31, %c0_32, %c0_33], %368 {strides = array<i32>} : memref<8x32x128xf32, #tpu.memory_space<vmem>>, vector<1x32x128xf32>,
    %369 = vector.extract_strided_slice %29 {offsets = [3, 0], sizes = [1, 128], strides = [1, 1]} : vector<8x128xf32> to vector<1x128xf32>
    %370 = vector.shape_cast %369 : vector<1x128xf32> to vector<1x128xf32>
    %371 = vector.broadcast %370 : vector<1x128xf32> to vector<32x128xf32>
    %372 = vector.extract_strided_slice %31 {offsets = [3, 0], sizes = [1, 128], strides = [1, 1]} : vector<8x128xf32> to vector<1x128xf32>
    %373 = vector.shape_cast %372 : vector<1x128xf32> to vector<1x128xf32>
    %374 = vector.broadcast %373 : vector<1x128xf32> to vector<32x128xf32>
    %375 = arith.mulf %371, %3 : vector<32x128xf32>
    %376 = arith.addf %21, %375 : vector<32x128xf32>
    %377 = arith.mulf %374, %6 : vector<32x128xf32>
    %378 = arith.addf %376, %377 : vector<32x128xf32>
    %379 = vector.shape_cast %378 : vector<32x128xf32> to vector<1x32x128xf32>
    %380 = vector.broadcast %379 : vector<1x32x128xf32> to vector<8x32x128xf32>
    %381 = arith.mulf %380, %152 : vector<8x32x128xf32>
    %cst_34 = arith.constant dense<0.000000e+00> : vector<8x128xf32>
    %382 = vector.multi_reduction <add>, %381, %cst_34 [1] : vector<8x32x128xf32> to vector<8x128xf32>
    %cst_35 = arith.constant 0.176776692 : f32
    %383 = vector.broadcast %cst_35 : f32 to vector<8x128xf32>
    %384 = arith.mulf %382, %383 : vector<8x128xf32>
    %cst_36 = arith.constant dense<0xFF800000> : vector<128xf32>
    %385 = vector.multi_reduction <maximumf>, %384, %cst_36 [0] : vector<8x128xf32> to vector<128xf32>
    %386 = vector.shape_cast %385 : vector<128xf32> to vector<1x128xf32>
    %387 = vector.broadcast %386 : vector<1x128xf32> to vector<8x128xf32>
    %388 = arith.subf %384, %387 : vector<8x128xf32>
    %389 = math.exp %388 : vector<8x128xf32>
    %cst_37 = arith.constant dense<0.000000e+00> : vector<128xf32>
    %390 = vector.multi_reduction <add>, %389, %cst_37 [0] : vector<8x128xf32> to vector<128xf32>
    %391 = vector.shape_cast %390 : vector<128xf32> to vector<1x128xf32>
    %392 = tpu.reciprocal %391 : vector<1x128xf32> -> vector<1x128xf32>
    %393 = vector.broadcast %392 : vector<1x128xf32> to vector<8x128xf32>
    %394 = arith.mulf %389, %393 : vector<8x128xf32>
    %c3 = arith.constant 3 : index
    %c0_38 = arith.constant 0 : index
    %c0_39 = arith.constant 0 : index
    %395 = vector.load %arg4[%c3, %c0_38, %c0_39] : memref<8x8x128xf32, #tpu.memory_space<vmem>>, vector<1x8x128xf32>
    %396 = vector.shape_cast %395 : vector<1x8x128xf32> to vector<8x128xf32>
    %397 = vector.shape_cast %394 : vector<8x128xf32> to vector<1x8x128xf32>
    tpu.vector_store %arg4[%c3, %c0_38, %c0_39], %397 {strides = array<i32>} : memref<8x8x128xf32, #tpu.memory_space<vmem>>, vector<1x8x128xf32>,
    %398 = vector.extract_strided_slice %394 {offsets = [0, 0], sizes = [1, 128], strides = [1, 1]} : vector<8x128xf32> to vector<1x128xf32>
    %399 = vector.shape_cast %398 : vector<1x128xf32> to vector<1x128xf32>
    %400 = vector.broadcast %399 : vector<1x128xf32> to vector<32x128xf32>
    %401 = arith.mulf %400, %45 : vector<32x128xf32>
    %402 = arith.addf %87, %401 : vector<32x128xf32>
    %403 = vector.extract_strided_slice %394 {offsets = [1, 0], sizes = [1, 128], strides = [1, 1]} : vector<8x128xf32> to vector<1x128xf32>
    %404 = vector.shape_cast %403 : vector<1x128xf32> to vector<1x128xf32>
    %405 = vector.broadcast %404 : vector<1x128xf32> to vector<32x128xf32>
    %406 = arith.mulf %405, %59 : vector<32x128xf32>
    %407 = arith.addf %402, %406 : vector<32x128xf32>
    %408 = vector.extract_strided_slice %394 {offsets = [2, 0], sizes = [1, 128], strides = [1, 1]} : vector<8x128xf32> to vector<1x128xf32>
    %409 = vector.shape_cast %408 : vector<1x128xf32> to vector<1x128xf32>
    %410 = vector.broadcast %409 : vector<1x128xf32> to vector<32x128xf32>
    %411 = arith.mulf %410, %73 : vector<32x128xf32>
    %412 = arith.addf %407, %411 : vector<32x128xf32>
    %413 = vector.extract_strided_slice %394 {offsets = [3, 0], sizes = [1, 128], strides = [1, 1]} : vector<8x128xf32> to vector<1x128xf32>
    %414 = vector.shape_cast %413 : vector<1x128xf32> to vector<1x128xf32>
    %415 = vector.broadcast %414 : vector<1x128xf32> to vector<32x128xf32>
    %416 = arith.mulf %415, %87 : vector<32x128xf32>
    %417 = arith.addf %412, %416 : vector<32x128xf32>
    %418 = vector.extract_strided_slice %394 {offsets = [4, 0], sizes = [1, 128], strides = [1, 1]} : vector<8x128xf32> to vector<1x128xf32>
    %419 = vector.shape_cast %418 : vector<1x128xf32> to vector<1x128xf32>
    %420 = vector.broadcast %419 : vector<1x128xf32> to vector<32x128xf32>
    %421 = arith.mulf %420, %101 : vector<32x128xf32>
    %422 = arith.addf %417, %421 : vector<32x128xf32>
    %423 = vector.extract_strided_slice %394 {offsets = [5, 0], sizes = [1, 128], strides = [1, 1]} : vector<8x128xf32> to vector<1x128xf32>
    %424 = vector.shape_cast %423 : vector<1x128xf32> to vector<1x128xf32>
    %425 = vector.broadcast %424 : vector<1x128xf32> to vector<32x128xf32>
    %426 = arith.mulf %425, %115 : vector<32x128xf32>
    %427 = arith.addf %422, %426 : vector<32x128xf32>
    %428 = vector.extract_strided_slice %394 {offsets = [6, 0], sizes = [1, 128], strides = [1, 1]} : vector<8x128xf32> to vector<1x128xf32>
    %429 = vector.shape_cast %428 : vector<1x128xf32> to vector<1x128xf32>
    %430 = vector.broadcast %429 : vector<1x128xf32> to vector<32x128xf32>
    %431 = arith.mulf %430, %129 : vector<32x128xf32>
    %432 = arith.addf %427, %431 : vector<32x128xf32>
    %433 = vector.extract_strided_slice %394 {offsets = [7, 0], sizes = [1, 128], strides = [1, 1]} : vector<8x128xf32> to vector<1x128xf32>
    %434 = vector.shape_cast %433 : vector<1x128xf32> to vector<1x128xf32>
    %435 = vector.broadcast %434 : vector<1x128xf32> to vector<32x128xf32>
    %436 = arith.mulf %435, %143 : vector<32x128xf32>
    %437 = arith.addf %432, %436 : vector<32x128xf32>
    %c3_40 = arith.constant 3 : index
    %c0_41 = arith.constant 0 : index
    %c0_42 = arith.constant 0 : index
    %438 = vector.load %arg3[%c3_40, %c0_41, %c0_42] : memref<8x32x128xf32, #tpu.memory_space<vmem>>, vector<1x32x128xf32>
    %439 = vector.shape_cast %438 : vector<1x32x128xf32> to vector<32x128xf32>
    %440 = vector.shape_cast %437 : vector<32x128xf32> to vector<1x32x128xf32>
    tpu.vector_store %arg3[%c3_40, %c0_41, %c0_42], %440 {strides = array<i32>} : memref<8x32x128xf32, #tpu.memory_space<vmem>>, vector<1x32x128xf32>,
    %441 = vector.extract_strided_slice %29 {offsets = [4, 0], sizes = [1, 128], strides = [1, 1]} : vector<8x128xf32> to vector<1x128xf32>
    %442 = vector.shape_cast %441 : vector<1x128xf32> to vector<1x128xf32>
    %443 = vector.broadcast %442 : vector<1x128xf32> to vector<32x128xf32>
    %444 = vector.extract_strided_slice %31 {offsets = [4, 0], sizes = [1, 128], strides = [1, 1]} : vector<8x128xf32> to vector<1x128xf32>
    %445 = vector.shape_cast %444 : vector<1x128xf32> to vector<1x128xf32>
    %446 = vector.broadcast %445 : vector<1x128xf32> to vector<32x128xf32>
    %447 = arith.mulf %443, %3 : vector<32x128xf32>
    %448 = arith.addf %21, %447 : vector<32x128xf32>
    %449 = arith.mulf %446, %6 : vector<32x128xf32>
    %450 = arith.addf %448, %449 : vector<32x128xf32>
    %451 = vector.shape_cast %450 : vector<32x128xf32> to vector<1x32x128xf32>
    %452 = vector.broadcast %451 : vector<1x32x128xf32> to vector<8x32x128xf32>
    %453 = arith.mulf %452, %152 : vector<8x32x128xf32>
    %cst_43 = arith.constant dense<0.000000e+00> : vector<8x128xf32>
    %454 = vector.multi_reduction <add>, %453, %cst_43 [1] : vector<8x32x128xf32> to vector<8x128xf32>
    %cst_44 = arith.constant 0.176776692 : f32
    %455 = vector.broadcast %cst_44 : f32 to vector<8x128xf32>
    %456 = arith.mulf %454, %455 : vector<8x128xf32>
    %cst_45 = arith.constant dense<0xFF800000> : vector<128xf32>
    %457 = vector.multi_reduction <maximumf>, %456, %cst_45 [0] : vector<8x128xf32> to vector<128xf32>
    %458 = vector.shape_cast %457 : vector<128xf32> to vector<1x128xf32>
    %459 = vector.broadcast %458 : vector<1x128xf32> to vector<8x128xf32>
    %460 = arith.subf %456, %459 : vector<8x128xf32>
    %461 = math.exp %460 : vector<8x128xf32>
    %cst_46 = arith.constant dense<0.000000e+00> : vector<128xf32>
    %462 = vector.multi_reduction <add>, %461, %cst_46 [0] : vector<8x128xf32> to vector<128xf32>
    %463 = vector.shape_cast %462 : vector<128xf32> to vector<1x128xf32>
    %464 = tpu.reciprocal %463 : vector<1x128xf32> -> vector<1x128xf32>
    %465 = vector.broadcast %464 : vector<1x128xf32> to vector<8x128xf32>
    %466 = arith.mulf %461, %465 : vector<8x128xf32>
    %c4 = arith.constant 4 : index
    %c0_47 = arith.constant 0 : index
    %c0_48 = arith.constant 0 : index
    %467 = vector.load %arg4[%c4, %c0_47, %c0_48] : memref<8x8x128xf32, #tpu.memory_space<vmem>>, vector<1x8x128xf32>
    %468 = vector.shape_cast %467 : vector<1x8x128xf32> to vector<8x128xf32>
    %469 = vector.shape_cast %466 : vector<8x128xf32> to vector<1x8x128xf32>
    tpu.vector_store %arg4[%c4, %c0_47, %c0_48], %469 {strides = array<i32>} : memref<8x8x128xf32, #tpu.memory_space<vmem>>, vector<1x8x128xf32>,
    %470 = vector.extract_strided_slice %466 {offsets = [0, 0], sizes = [1, 128], strides = [1, 1]} : vector<8x128xf32> to vector<1x128xf32>
    %471 = vector.shape_cast %470 : vector<1x128xf32> to vector<1x128xf32>
    %472 = vector.broadcast %471 : vector<1x128xf32> to vector<32x128xf32>
    %473 = arith.mulf %472, %45 : vector<32x128xf32>
    %474 = arith.addf %101, %473 : vector<32x128xf32>
    %475 = vector.extract_strided_slice %466 {offsets = [1, 0], sizes = [1, 128], strides = [1, 1]} : vector<8x128xf32> to vector<1x128xf32>
    %476 = vector.shape_cast %475 : vector<1x128xf32> to vector<1x128xf32>
    %477 = vector.broadcast %476 : vector<1x128xf32> to vector<32x128xf32>
    %478 = arith.mulf %477, %59 : vector<32x128xf32>
    %479 = arith.addf %474, %478 : vector<32x128xf32>
    %480 = vector.extract_strided_slice %466 {offsets = [2, 0], sizes = [1, 128], strides = [1, 1]} : vector<8x128xf32> to vector<1x128xf32>
    %481 = vector.shape_cast %480 : vector<1x128xf32> to vector<1x128xf32>
    %482 = vector.broadcast %481 : vector<1x128xf32> to vector<32x128xf32>
    %483 = arith.mulf %482, %73 : vector<32x128xf32>
    %484 = arith.addf %479, %483 : vector<32x128xf32>
    %485 = vector.extract_strided_slice %466 {offsets = [3, 0], sizes = [1, 128], strides = [1, 1]} : vector<8x128xf32> to vector<1x128xf32>
    %486 = vector.shape_cast %485 : vector<1x128xf32> to vector<1x128xf32>
    %487 = vector.broadcast %486 : vector<1x128xf32> to vector<32x128xf32>
    %488 = arith.mulf %487, %87 : vector<32x128xf32>
    %489 = arith.addf %484, %488 : vector<32x128xf32>
    %490 = vector.extract_strided_slice %466 {offsets = [4, 0], sizes = [1, 128], strides = [1, 1]} : vector<8x128xf32> to vector<1x128xf32>
    %491 = vector.shape_cast %490 : vector<1x128xf32> to vector<1x128xf32>
    %492 = vector.broadcast %491 : vector<1x128xf32> to vector<32x128xf32>
    %493 = arith.mulf %492, %101 : vector<32x128xf32>
    %494 = arith.addf %489, %493 : vector<32x128xf32>
    %495 = vector.extract_strided_slice %466 {offsets = [5, 0], sizes = [1, 128], strides = [1, 1]} : vector<8x128xf32> to vector<1x128xf32>
    %496 = vector.shape_cast %495 : vector<1x128xf32> to vector<1x128xf32>
    %497 = vector.broadcast %496 : vector<1x128xf32> to vector<32x128xf32>
    %498 = arith.mulf %497, %115 : vector<32x128xf32>
    %499 = arith.addf %494, %498 : vector<32x128xf32>
    %500 = vector.extract_strided_slice %466 {offsets = [6, 0], sizes = [1, 128], strides = [1, 1]} : vector<8x128xf32> to vector<1x128xf32>
    %501 = vector.shape_cast %500 : vector<1x128xf32> to vector<1x128xf32>
    %502 = vector.broadcast %501 : vector<1x128xf32> to vector<32x128xf32>
    %503 = arith.mulf %502, %129 : vector<32x128xf32>
    %504 = arith.addf %499, %503 : vector<32x128xf32>
    %505 = vector.extract_strided_slice %466 {offsets = [7, 0], sizes = [1, 128], strides = [1, 1]} : vector<8x128xf32> to vector<1x128xf32>
    %506 = vector.shape_cast %505 : vector<1x128xf32> to vector<1x128xf32>
    %507 = vector.broadcast %506 : vector<1x128xf32> to vector<32x128xf32>
    %508 = arith.mulf %507, %143 : vector<32x128xf32>
    %509 = arith.addf %504, %508 : vector<32x128xf32>
    %c4_49 = arith.constant 4 : index
    %c0_50 = arith.constant 0 : index
    %c0_51 = arith.constant 0 : index
    %510 = vector.load %arg3[%c4_49, %c0_50, %c0_51] : memref<8x32x128xf32, #tpu.memory_space<vmem>>, vector<1x32x128xf32>
    %511 = vector.shape_cast %510 : vector<1x32x128xf32> to vector<32x128xf32>
    %512 = vector.shape_cast %509 : vector<32x128xf32> to vector<1x32x128xf32>
    tpu.vector_store %arg3[%c4_49, %c0_50, %c0_51], %512 {strides = array<i32>} : memref<8x32x128xf32, #tpu.memory_space<vmem>>, vector<1x32x128xf32>,
    %513 = vector.extract_strided_slice %29 {offsets = [5, 0], sizes = [1, 128], strides = [1, 1]} : vector<8x128xf32> to vector<1x128xf32>
    %514 = vector.shape_cast %513 : vector<1x128xf32> to vector<1x128xf32>
    %515 = vector.broadcast %514 : vector<1x128xf32> to vector<32x128xf32>
    %516 = vector.extract_strided_slice %31 {offsets = [5, 0], sizes = [1, 128], strides = [1, 1]} : vector<8x128xf32> to vector<1x128xf32>
    %517 = vector.shape_cast %516 : vector<1x128xf32> to vector<1x128xf32>
    %518 = vector.broadcast %517 : vector<1x128xf32> to vector<32x128xf32>
    %519 = arith.mulf %515, %3 : vector<32x128xf32>
    %520 = arith.addf %21, %519 : vector<32x128xf32>
    %521 = arith.mulf %518, %6 : vector<32x128xf32>
    %522 = arith.addf %520, %521 : vector<32x128xf32>
    %523 = vector.shape_cast %522 : vector<32x128xf32> to vector<1x32x128xf32>
    %524 = vector.broadcast %523 : vector<1x32x128xf32> to vector<8x32x128xf32>
    %525 = arith.mulf %524, %152 : vector<8x32x128xf32>
    %cst_52 = arith.constant dense<0.000000e+00> : vector<8x128xf32>
    %526 = vector.multi_reduction <add>, %525, %cst_52 [1] : vector<8x32x128xf32> to vector<8x128xf32>
    %cst_53 = arith.constant 0.176776692 : f32
    %527 = vector.broadcast %cst_53 : f32 to vector<8x128xf32>
    %528 = arith.mulf %526, %527 : vector<8x128xf32>
    %cst_54 = arith.constant dense<0xFF800000> : vector<128xf32>
    %529 = vector.multi_reduction <maximumf>, %528, %cst_54 [0] : vector<8x128xf32> to vector<128xf32>
    %530 = vector.shape_cast %529 : vector<128xf32> to vector<1x128xf32>
    %531 = vector.broadcast %530 : vector<1x128xf32> to vector<8x128xf32>
    %532 = arith.subf %528, %531 : vector<8x128xf32>
    %533 = math.exp %532 : vector<8x128xf32>
    %cst_55 = arith.constant dense<0.000000e+00> : vector<128xf32>
    %534 = vector.multi_reduction <add>, %533, %cst_55 [0] : vector<8x128xf32> to vector<128xf32>
    %535 = vector.shape_cast %534 : vector<128xf32> to vector<1x128xf32>
    %536 = tpu.reciprocal %535 : vector<1x128xf32> -> vector<1x128xf32>
    %537 = vector.broadcast %536 : vector<1x128xf32> to vector<8x128xf32>
    %538 = arith.mulf %533, %537 : vector<8x128xf32>
    %c5 = arith.constant 5 : index
    %c0_56 = arith.constant 0 : index
    %c0_57 = arith.constant 0 : index
    %539 = vector.load %arg4[%c5, %c0_56, %c0_57] : memref<8x8x128xf32, #tpu.memory_space<vmem>>, vector<1x8x128xf32>
    %540 = vector.shape_cast %539 : vector<1x8x128xf32> to vector<8x128xf32>
    %541 = vector.shape_cast %538 : vector<8x128xf32> to vector<1x8x128xf32>
    tpu.vector_store %arg4[%c5, %c0_56, %c0_57], %541 {strides = array<i32>} : memref<8x8x128xf32, #tpu.memory_space<vmem>>, vector<1x8x128xf32>,
    %542 = vector.extract_strided_slice %538 {offsets = [0, 0], sizes = [1, 128], strides = [1, 1]} : vector<8x128xf32> to vector<1x128xf32>
    %543 = vector.shape_cast %542 : vector<1x128xf32> to vector<1x128xf32>
    %544 = vector.broadcast %543 : vector<1x128xf32> to vector<32x128xf32>
    %545 = arith.mulf %544, %45 : vector<32x128xf32>
    %546 = arith.addf %115, %545 : vector<32x128xf32>
    %547 = vector.extract_strided_slice %538 {offsets = [1, 0], sizes = [1, 128], strides = [1, 1]} : vector<8x128xf32> to vector<1x128xf32>
    %548 = vector.shape_cast %547 : vector<1x128xf32> to vector<1x128xf32>
    %549 = vector.broadcast %548 : vector<1x128xf32> to vector<32x128xf32>
    %550 = arith.mulf %549, %59 : vector<32x128xf32>
    %551 = arith.addf %546, %550 : vector<32x128xf32>
    %552 = vector.extract_strided_slice %538 {offsets = [2, 0], sizes = [1, 128], strides = [1, 1]} : vector<8x128xf32> to vector<1x128xf32>
    %553 = vector.shape_cast %552 : vector<1x128xf32> to vector<1x128xf32>
    %554 = vector.broadcast %553 : vector<1x128xf32> to vector<32x128xf32>
    %555 = arith.mulf %554, %73 : vector<32x128xf32>
    %556 = arith.addf %551, %555 : vector<32x128xf32>
    %557 = vector.extract_strided_slice %538 {offsets = [3, 0], sizes = [1, 128], strides = [1, 1]} : vector<8x128xf32> to vector<1x128xf32>
    %558 = vector.shape_cast %557 : vector<1x128xf32> to vector<1x128xf32>
    %559 = vector.broadcast %558 : vector<1x128xf32> to vector<32x128xf32>
    %560 = arith.mulf %559, %87 : vector<32x128xf32>
    %561 = arith.addf %556, %560 : vector<32x128xf32>
    %562 = vector.extract_strided_slice %538 {offsets = [4, 0], sizes = [1, 128], strides = [1, 1]} : vector<8x128xf32> to vector<1x128xf32>
    %563 = vector.shape_cast %562 : vector<1x128xf32> to vector<1x128xf32>
    %564 = vector.broadcast %563 : vector<1x128xf32> to vector<32x128xf32>
    %565 = arith.mulf %564, %101 : vector<32x128xf32>
    %566 = arith.addf %561, %565 : vector<32x128xf32>
    %567 = vector.extract_strided_slice %538 {offsets = [5, 0], sizes = [1, 128], strides = [1, 1]} : vector<8x128xf32> to vector<1x128xf32>
    %568 = vector.shape_cast %567 : vector<1x128xf32> to vector<1x128xf32>
    %569 = vector.broadcast %568 : vector<1x128xf32> to vector<32x128xf32>
    %570 = arith.mulf %569, %115 : vector<32x128xf32>
    %571 = arith.addf %566, %570 : vector<32x128xf32>
    %572 = vector.extract_strided_slice %538 {offsets = [6, 0], sizes = [1, 128], strides = [1, 1]} : vector<8x128xf32> to vector<1x128xf32>
    %573 = vector.shape_cast %572 : vector<1x128xf32> to vector<1x128xf32>
    %574 = vector.broadcast %573 : vector<1x128xf32> to vector<32x128xf32>
    %575 = arith.mulf %574, %129 : vector<32x128xf32>
    %576 = arith.addf %571, %575 : vector<32x128xf32>
    %577 = vector.extract_strided_slice %538 {offsets = [7, 0], sizes = [1, 128], strides = [1, 1]} : vector<8x128xf32> to vector<1x128xf32>
    %578 = vector.shape_cast %577 : vector<1x128xf32> to vector<1x128xf32>
    %579 = vector.broadcast %578 : vector<1x128xf32> to vector<32x128xf32>
    %580 = arith.mulf %579, %143 : vector<32x128xf32>
    %581 = arith.addf %576, %580 : vector<32x128xf32>
    %c5_58 = arith.constant 5 : index
    %c0_59 = arith.constant 0 : index
    %c0_60 = arith.constant 0 : index
    %582 = vector.load %arg3[%c5_58, %c0_59, %c0_60] : memref<8x32x128xf32, #tpu.memory_space<vmem>>, vector<1x32x128xf32>
    %583 = vector.shape_cast %582 : vector<1x32x128xf32> to vector<32x128xf32>
    %584 = vector.shape_cast %581 : vector<32x128xf32> to vector<1x32x128xf32>
    tpu.vector_store %arg3[%c5_58, %c0_59, %c0_60], %584 {strides = array<i32>} : memref<8x32x128xf32, #tpu.memory_space<vmem>>, vector<1x32x128xf32>,
    %585 = vector.extract_strided_slice %29 {offsets = [6, 0], sizes = [1, 128], strides = [1, 1]} : vector<8x128xf32> to vector<1x128xf32>
    %586 = vector.shape_cast %585 : vector<1x128xf32> to vector<1x128xf32>
    %587 = vector.broadcast %586 : vector<1x128xf32> to vector<32x128xf32>
    %588 = vector.extract_strided_slice %31 {offsets = [6, 0], sizes = [1, 128], strides = [1, 1]} : vector<8x128xf32> to vector<1x128xf32>
    %589 = vector.shape_cast %588 : vector<1x128xf32> to vector<1x128xf32>
    %590 = vector.broadcast %589 : vector<1x128xf32> to vector<32x128xf32>
    %591 = arith.mulf %587, %3 : vector<32x128xf32>
    %592 = arith.addf %21, %591 : vector<32x128xf32>
    %593 = arith.mulf %590, %6 : vector<32x128xf32>
    %594 = arith.addf %592, %593 : vector<32x128xf32>
    %595 = vector.shape_cast %594 : vector<32x128xf32> to vector<1x32x128xf32>
    %596 = vector.broadcast %595 : vector<1x32x128xf32> to vector<8x32x128xf32>
    %597 = arith.mulf %596, %152 : vector<8x32x128xf32>
    %cst_61 = arith.constant dense<0.000000e+00> : vector<8x128xf32>
    %598 = vector.multi_reduction <add>, %597, %cst_61 [1] : vector<8x32x128xf32> to vector<8x128xf32>
    %cst_62 = arith.constant 0.176776692 : f32
    %599 = vector.broadcast %cst_62 : f32 to vector<8x128xf32>
    %600 = arith.mulf %598, %599 : vector<8x128xf32>
    %cst_63 = arith.constant dense<0xFF800000> : vector<128xf32>
    %601 = vector.multi_reduction <maximumf>, %600, %cst_63 [0] : vector<8x128xf32> to vector<128xf32>
    %602 = vector.shape_cast %601 : vector<128xf32> to vector<1x128xf32>
    %603 = vector.broadcast %602 : vector<1x128xf32> to vector<8x128xf32>
    %604 = arith.subf %600, %603 : vector<8x128xf32>
    %605 = math.exp %604 : vector<8x128xf32>
    %cst_64 = arith.constant dense<0.000000e+00> : vector<128xf32>
    %606 = vector.multi_reduction <add>, %605, %cst_64 [0] : vector<8x128xf32> to vector<128xf32>
    %607 = vector.shape_cast %606 : vector<128xf32> to vector<1x128xf32>
    %608 = tpu.reciprocal %607 : vector<1x128xf32> -> vector<1x128xf32>
    %609 = vector.broadcast %608 : vector<1x128xf32> to vector<8x128xf32>
    %610 = arith.mulf %605, %609 : vector<8x128xf32>
    %c6 = arith.constant 6 : index
    %c0_65 = arith.constant 0 : index
    %c0_66 = arith.constant 0 : index
    %611 = vector.load %arg4[%c6, %c0_65, %c0_66] : memref<8x8x128xf32, #tpu.memory_space<vmem>>, vector<1x8x128xf32>
    %612 = vector.shape_cast %611 : vector<1x8x128xf32> to vector<8x128xf32>
    %613 = vector.shape_cast %610 : vector<8x128xf32> to vector<1x8x128xf32>
    tpu.vector_store %arg4[%c6, %c0_65, %c0_66], %613 {strides = array<i32>} : memref<8x8x128xf32, #tpu.memory_space<vmem>>, vector<1x8x128xf32>,
    %614 = vector.extract_strided_slice %610 {offsets = [0, 0], sizes = [1, 128], strides = [1, 1]} : vector<8x128xf32> to vector<1x128xf32>
    %615 = vector.shape_cast %614 : vector<1x128xf32> to vector<1x128xf32>
    %616 = vector.broadcast %615 : vector<1x128xf32> to vector<32x128xf32>
    %617 = arith.mulf %616, %45 : vector<32x128xf32>
    %618 = arith.addf %129, %617 : vector<32x128xf32>
    %619 = vector.extract_strided_slice %610 {offsets = [1, 0], sizes = [1, 128], strides = [1, 1]} : vector<8x128xf32> to vector<1x128xf32>
    %620 = vector.shape_cast %619 : vector<1x128xf32> to vector<1x128xf32>
    %621 = vector.broadcast %620 : vector<1x128xf32> to vector<32x128xf32>
    %622 = arith.mulf %621, %59 : vector<32x128xf32>
    %623 = arith.addf %618, %622 : vector<32x128xf32>
    %624 = vector.extract_strided_slice %610 {offsets = [2, 0], sizes = [1, 128], strides = [1, 1]} : vector<8x128xf32> to vector<1x128xf32>
    %625 = vector.shape_cast %624 : vector<1x128xf32> to vector<1x128xf32>
    %626 = vector.broadcast %625 : vector<1x128xf32> to vector<32x128xf32>
    %627 = arith.mulf %626, %73 : vector<32x128xf32>
    %628 = arith.addf %623, %627 : vector<32x128xf32>
    %629 = vector.extract_strided_slice %610 {offsets = [3, 0], sizes = [1, 128], strides = [1, 1]} : vector<8x128xf32> to vector<1x128xf32>
    %630 = vector.shape_cast %629 : vector<1x128xf32> to vector<1x128xf32>
    %631 = vector.broadcast %630 : vector<1x128xf32> to vector<32x128xf32>
    %632 = arith.mulf %631, %87 : vector<32x128xf32>
    %633 = arith.addf %628, %632 : vector<32x128xf32>
    %634 = vector.extract_strided_slice %610 {offsets = [4, 0], sizes = [1, 128], strides = [1, 1]} : vector<8x128xf32> to vector<1x128xf32>
    %635 = vector.shape_cast %634 : vector<1x128xf32> to vector<1x128xf32>
    %636 = vector.broadcast %635 : vector<1x128xf32> to vector<32x128xf32>
    %637 = arith.mulf %636, %101 : vector<32x128xf32>
    %638 = arith.addf %633, %637 : vector<32x128xf32>
    %639 = vector.extract_strided_slice %610 {offsets = [5, 0], sizes = [1, 128], strides = [1, 1]} : vector<8x128xf32> to vector<1x128xf32>
    %640 = vector.shape_cast %639 : vector<1x128xf32> to vector<1x128xf32>
    %641 = vector.broadcast %640 : vector<1x128xf32> to vector<32x128xf32>
    %642 = arith.mulf %641, %115 : vector<32x128xf32>
    %643 = arith.addf %638, %642 : vector<32x128xf32>
    %644 = vector.extract_strided_slice %610 {offsets = [6, 0], sizes = [1, 128], strides = [1, 1]} : vector<8x128xf32> to vector<1x128xf32>
    %645 = vector.shape_cast %644 : vector<1x128xf32> to vector<1x128xf32>
    %646 = vector.broadcast %645 : vector<1x128xf32> to vector<32x128xf32>
    %647 = arith.mulf %646, %129 : vector<32x128xf32>
    %648 = arith.addf %643, %647 : vector<32x128xf32>
    %649 = vector.extract_strided_slice %610 {offsets = [7, 0], sizes = [1, 128], strides = [1, 1]} : vector<8x128xf32> to vector<1x128xf32>
    %650 = vector.shape_cast %649 : vector<1x128xf32> to vector<1x128xf32>
    %651 = vector.broadcast %650 : vector<1x128xf32> to vector<32x128xf32>
    %652 = arith.mulf %651, %143 : vector<32x128xf32>
    %653 = arith.addf %648, %652 : vector<32x128xf32>
    %c6_67 = arith.constant 6 : index
    %c0_68 = arith.constant 0 : index
    %c0_69 = arith.constant 0 : index
    %654 = vector.load %arg3[%c6_67, %c0_68, %c0_69] : memref<8x32x128xf32, #tpu.memory_space<vmem>>, vector<1x32x128xf32>
    %655 = vector.shape_cast %654 : vector<1x32x128xf32> to vector<32x128xf32>
    %656 = vector.shape_cast %653 : vector<32x128xf32> to vector<1x32x128xf32>
    tpu.vector_store %arg3[%c6_67, %c0_68, %c0_69], %656 {strides = array<i32>} : memref<8x32x128xf32, #tpu.memory_space<vmem>>, vector<1x32x128xf32>,
    %657 = vector.extract_strided_slice %29 {offsets = [7, 0], sizes = [1, 128], strides = [1, 1]} : vector<8x128xf32> to vector<1x128xf32>
    %658 = vector.shape_cast %657 : vector<1x128xf32> to vector<1x128xf32>
    %659 = vector.broadcast %658 : vector<1x128xf32> to vector<32x128xf32>
    %660 = vector.extract_strided_slice %31 {offsets = [7, 0], sizes = [1, 128], strides = [1, 1]} : vector<8x128xf32> to vector<1x128xf32>
    %661 = vector.shape_cast %660 : vector<1x128xf32> to vector<1x128xf32>
    %662 = vector.broadcast %661 : vector<1x128xf32> to vector<32x128xf32>
    %663 = arith.mulf %659, %3 : vector<32x128xf32>
    %664 = arith.addf %21, %663 : vector<32x128xf32>
    %665 = arith.mulf %662, %6 : vector<32x128xf32>
    %666 = arith.addf %664, %665 : vector<32x128xf32>
    %667 = vector.shape_cast %666 : vector<32x128xf32> to vector<1x32x128xf32>
    %668 = vector.broadcast %667 : vector<1x32x128xf32> to vector<8x32x128xf32>
    %669 = arith.mulf %668, %152 : vector<8x32x128xf32>
    %cst_70 = arith.constant dense<0.000000e+00> : vector<8x128xf32>
    %670 = vector.multi_reduction <add>, %669, %cst_70 [1] : vector<8x32x128xf32> to vector<8x128xf32>
    %cst_71 = arith.constant 0.176776692 : f32
    %671 = vector.broadcast %cst_71 : f32 to vector<8x128xf32>
    %672 = arith.mulf %670, %671 : vector<8x128xf32>
    %cst_72 = arith.constant dense<0xFF800000> : vector<128xf32>
    %673 = vector.multi_reduction <maximumf>, %672, %cst_72 [0] : vector<8x128xf32> to vector<128xf32>
    %674 = vector.shape_cast %673 : vector<128xf32> to vector<1x128xf32>
    %675 = vector.broadcast %674 : vector<1x128xf32> to vector<8x128xf32>
    %676 = arith.subf %672, %675 : vector<8x128xf32>
    %677 = math.exp %676 : vector<8x128xf32>
    %cst_73 = arith.constant dense<0.000000e+00> : vector<128xf32>
    %678 = vector.multi_reduction <add>, %677, %cst_73 [0] : vector<8x128xf32> to vector<128xf32>
    %679 = vector.shape_cast %678 : vector<128xf32> to vector<1x128xf32>
    %680 = tpu.reciprocal %679 : vector<1x128xf32> -> vector<1x128xf32>
    %681 = vector.broadcast %680 : vector<1x128xf32> to vector<8x128xf32>
    %682 = arith.mulf %677, %681 : vector<8x128xf32>
    %c7 = arith.constant 7 : index
    %c0_74 = arith.constant 0 : index
    %c0_75 = arith.constant 0 : index
    %683 = vector.load %arg4[%c7, %c0_74, %c0_75] : memref<8x8x128xf32, #tpu.memory_space<vmem>>, vector<1x8x128xf32>
    %684 = vector.shape_cast %683 : vector<1x8x128xf32> to vector<8x128xf32>
    %685 = vector.shape_cast %682 : vector<8x128xf32> to vector<1x8x128xf32>
    tpu.vector_store %arg4[%c7, %c0_74, %c0_75], %685 {strides = array<i32>} : memref<8x8x128xf32, #tpu.memory_space<vmem>>, vector<1x8x128xf32>,
    %686 = vector.extract_strided_slice %682 {offsets = [0, 0], sizes = [1, 128], strides = [1, 1]} : vector<8x128xf32> to vector<1x128xf32>
    %687 = vector.shape_cast %686 : vector<1x128xf32> to vector<1x128xf32>
    %688 = vector.broadcast %687 : vector<1x128xf32> to vector<32x128xf32>
    %689 = arith.mulf %688, %45 : vector<32x128xf32>
    %690 = arith.addf %143, %689 : vector<32x128xf32>
    %691 = vector.extract_strided_slice %682 {offsets = [1, 0], sizes = [1, 128], strides = [1, 1]} : vector<8x128xf32> to vector<1x128xf32>
    %692 = vector.shape_cast %691 : vector<1x128xf32> to vector<1x128xf32>
    %693 = vector.broadcast %692 : vector<1x128xf32> to vector<32x128xf32>
    %694 = arith.mulf %693, %59 : vector<32x128xf32>
    %695 = arith.addf %690, %694 : vector<32x128xf32>
    %696 = vector.extract_strided_slice %682 {offsets = [2, 0], sizes = [1, 128], strides = [1, 1]} : vector<8x128xf32> to vector<1x128xf32>
    %697 = vector.shape_cast %696 : vector<1x128xf32> to vector<1x128xf32>
    %698 = vector.broadcast %697 : vector<1x128xf32> to vector<32x128xf32>
    %699 = arith.mulf %698, %73 : vector<32x128xf32>
    %700 = arith.addf %695, %699 : vector<32x128xf32>
    %701 = vector.extract_strided_slice %682 {offsets = [3, 0], sizes = [1, 128], strides = [1, 1]} : vector<8x128xf32> to vector<1x128xf32>
    %702 = vector.shape_cast %701 : vector<1x128xf32> to vector<1x128xf32>
    %703 = vector.broadcast %702 : vector<1x128xf32> to vector<32x128xf32>
    %704 = arith.mulf %703, %87 : vector<32x128xf32>
    %705 = arith.addf %700, %704 : vector<32x128xf32>
    %706 = vector.extract_strided_slice %682 {offsets = [4, 0], sizes = [1, 128], strides = [1, 1]} : vector<8x128xf32> to vector<1x128xf32>
    %707 = vector.shape_cast %706 : vector<1x128xf32> to vector<1x128xf32>
    %708 = vector.broadcast %707 : vector<1x128xf32> to vector<32x128xf32>
    %709 = arith.mulf %708, %101 : vector<32x128xf32>
    %710 = arith.addf %705, %709 : vector<32x128xf32>
    %711 = vector.extract_strided_slice %682 {offsets = [5, 0], sizes = [1, 128], strides = [1, 1]} : vector<8x128xf32> to vector<1x128xf32>
    %712 = vector.shape_cast %711 : vector<1x128xf32> to vector<1x128xf32>
    %713 = vector.broadcast %712 : vector<1x128xf32> to vector<32x128xf32>
    %714 = arith.mulf %713, %115 : vector<32x128xf32>
    %715 = arith.addf %710, %714 : vector<32x128xf32>
    %716 = vector.extract_strided_slice %682 {offsets = [6, 0], sizes = [1, 128], strides = [1, 1]} : vector<8x128xf32> to vector<1x128xf32>
    %717 = vector.shape_cast %716 : vector<1x128xf32> to vector<1x128xf32>
    %718 = vector.broadcast %717 : vector<1x128xf32> to vector<32x128xf32>
    %719 = arith.mulf %718, %129 : vector<32x128xf32>
    %720 = arith.addf %715, %719 : vector<32x128xf32>
    %721 = vector.extract_strided_slice %682 {offsets = [7, 0], sizes = [1, 128], strides = [1, 1]} : vector<8x128xf32> to vector<1x128xf32>
    %722 = vector.shape_cast %721 : vector<1x128xf32> to vector<1x128xf32>
    %723 = vector.broadcast %722 : vector<1x128xf32> to vector<32x128xf32>
    %724 = arith.mulf %723, %143 : vector<32x128xf32>
    %725 = arith.addf %720, %724 : vector<32x128xf32>
    %c7_76 = arith.constant 7 : index
    %c0_77 = arith.constant 0 : index
    %c0_78 = arith.constant 0 : index
    %726 = vector.load %arg3[%c7_76, %c0_77, %c0_78] : memref<8x32x128xf32, #tpu.memory_space<vmem>>, vector<1x32x128xf32>
    %727 = vector.shape_cast %726 : vector<1x32x128xf32> to vector<32x128xf32>
    %728 = vector.shape_cast %725 : vector<32x128xf32> to vector<1x32x128xf32>
    tpu.vector_store %arg3[%c7_76, %c0_77, %c0_78], %728 {strides = array<i32>} : memref<8x32x128xf32, #tpu.memory_space<vmem>>, vector<1x32x128xf32>,
    return
  }
  func.func @transform_0(%arg0: i32) -> (i32, i32, i32) {
    %c0_i32 = arith.constant 0 : i32
    %c0_i32_0 = arith.constant 0 : i32
    %c0_i32_1 = arith.constant 0 : i32
    return %c0_i32, %c0_i32_0, %arg0 : i32, i32, i32
  }
  func.func @transform_1(%arg0: i32) -> (i32, i32) {
    %c0_i32 = arith.constant 0 : i32
    %c0_i32_0 = arith.constant 0 : i32
    %c0_i32_1 = arith.constant 0 : i32
    return %c0_i32, %c0_i32_0 : i32, i32
  }
  func.func @transform_2(%arg0: i32) -> (i32, i32, i32) {
    %c0_i32 = arith.constant 0 : i32
    %c0_i32_0 = arith.constant 0 : i32
    %c0_i32_1 = arith.constant 0 : i32
    return %c0_i32, %c0_i32_0, %arg0 : i32, i32, i32
  }
  func.func @transform_3(%arg0: i32) -> (i32, i32, i32) {
    %c0_i32 = arith.constant 0 : i32
    %c0_i32_0 = arith.constant 0 : i32
    %c0_i32_1 = arith.constant 0 : i32
    return %c0_i32, %c0_i32_0, %arg0 : i32, i32, i32
  }
}

</mosaic_0001>

<bundles_post_ra>
// kernel: tpu_custom_call.1
= control target key start
LH: loop header
LB: loop body
LE: loop exit
PB: predicated region body
PF: predicated region fallthrough
CT: control target
= control target key end

     0   :  { %9 = vsyncpa [#allocation3], 0  ;;  %v3230_v2 = vmov 1   ;;  %v3231_v3 = vmov 0   ;;  %s6995_s0 = inlined_call_operand.vmem [shape: f32[2,8,128], index: 0, kind: input, shape index: {}]   ;;  %s6996_s1 = inlined_call_operand.vmem [shape: f32[96,3], index: 1, kind: input, shape index: {}]   ;;  %s6997_s2 = inlined_call_operand.hbm [shape: f32[8,32,128], index: 2, kind: output, shape index: {0}]   ;;  %s6998_s3 = inlined_call_operand.hbm [shape: f32[8,8,128], index: 3, kind: output, shape index: {1}]  }
   0x1   :  { %v17_v0 = vld [vmem:[%s6996_s1 + $0x10] sm:$0xff]  ;;  %v15_v1 = vld [vmem:[%s6996_s1] sm:$0xff]  ;;  %3013 = vset.pattern.permute.xlu2 %v3230_v2  ;;  %3012 = vset.pattern.permute.xlu1 %v3231_v3 }
   0x2   :  { %3011 = vset.pattern.permute.xlu0 %v3231_v3  ;;  %39 = vperm.xlu1 %3012, %v17_v0  }
   0x3   :  { %10 = vsyncpa [#allocation5], 0  ;;  %48 = vperm.xlu2 %3013, %v15_v1   ;;  %29 = vperm.xlu0 %3011, %v15_v1   ;;  %v18_v4 = vld [vmem:[%s6996_s1 + $0x18] sm:$0xff]  ;;  %v16_v5 = vld [vmem:[%s6996_s1 + $0x8] sm:$0xff]  ;;  %v3232_v10 = vmov 2   ;;  %vm626_vm0 = vcmask 1041409  }
   0x4   :  { %v22_v6 = vld [vmem:[%s6996_s1 + $0x38] sm:$0xff]  ;;  %v19_v7 = vld [vmem:[%s6996_s1 + $0x20] sm:$0xff]  ;;  %v21_v8 = vld [vmem:[%s6996_s1 + $0x30] sm:$0xff]  ;;  %vm629_vm1 = vcmask 1042434   ;;  %vm632_vm2 = vcmask 1043459   ;;  %vm635_vm3 = vcmask 1044484  }
   0x5   :  { %v20_v9 = vld [vmem:[%s6996_s1 + $0x28] sm:$0xff]  ;;  %v25_v11 = vld [vmem:[%s6996_s1 + $0x50] sm:$0xff]  ;;  %v23_v12 = vld [vmem:[%s6996_s1 + $0x40] sm:$0xff]  ;;  %vm638_vm4 = vcmask 1045509   ;;  %vm641_vm5 = vcmask 1046534   ;;  %vm644_vm6 = vcmask 1047559  }
   0x6   :  { %v24_v13 = vld [vmem:[%s6996_s1 + $0x48] sm:$0xff]  ;;  %v26_v14 = vld [vmem:[%s6996_s1 + $0x58] sm:$0xff]  ;;  %v183_v22 = vld [vmem:[%s6995_s0] sm:$0xff]  ;;  %s2973_s15 = sshll.u32 %s6997_s2, 4  ;;  %s3234_s2 = smov 128   ;;  %s2974_s15 = int_to_ptr.hbm [resolvable:$true] %s2973_s15 }
   0x7   :  { %v3003_v21 = vld [vmem:[%s6995_s0 + $0x8] sm:$0xff]  ;;  %v3330_v32 = vperm.slane %v183_v22, 0  ;;  %v3332_v33 = vperm.slane %v183_v22, 1  ;;  %v3334_v34 = vperm.slane %v183_v22, 2  ;;  %v3336_v35 = vperm.slane %v183_v22, 3  ;;  %s3233_s0 = smov [#allocation2]  }
   0x8   :  { %v3312_v23 = vperm.slane %v3003_v21, 0  ;;  %v3314_v24 = vperm.slane %v3003_v21, 1  ;;  %v3316_v25 = vperm.slane %v3003_v21, 2  ;;  %v3318_v26 = vperm.slane %v3003_v21, 3  ;;  %s6882_s12 = sshll.u32 %s3233_s0, 4  ;;  %s3235_s16 = smov 8   ;;  %s2972_s12 = int_to_ptr.vmem [resolvable:$true] %s6882_s12 }
   0x9   :  { %v3320_v27 = vperm.slane %v3003_v21, 4  ;;  %v3324_v29 = vperm.slane %v3003_v21, 5  ;;  %v3326_v30 = vperm.slane %v3003_v21, 6  ;;  %v3328_v31 = vperm.slane %v3003_v21, 7  ;;  %7299 = vst [vmem:[#allocation17_spill] sm:$0xff] %v3330_v32  ;;  %s3236_s17 = smov [#allocation4]  }
   0xa   :  { %44 = vperm.xlu1 %3012, %v18_v4   ;;  %7290 = vst [vmem:[#allocation8_spill] sm:$0xff] %v3312_v23  ;;  %v3338_v36 = vperm.slane %v183_v22, 4  ;;  %v3343_v38 = vperm.slane %v183_v22, 5  ;;  %v3345_v39 = vperm.slane %v183_v22, 6  ;;  %v3347_v40 = vperm.slane %v183_v22, 7  ;;  %s2984_s18 = sshll.u32 %s3236_s17, 4  ;;  %s2985_s18 = int_to_ptr.vmem [resolvable:$true] %s2984_s18 }
   0xb   :  { %52 = vperm.xlu2 %3013, %v16_v5   ;;  %34 = vperm.xlu0 %3011, %v16_v5   ;;  %7291 = vst [vmem:[#allocation9_spill] sm:$0xff] %v3314_v24  ;;  %s2986_s21 = sshll.u32 %s6998_s3, 4  ;;  %s2987_s21 = int_to_ptr.hbm [resolvable:$true] %s2986_s21 }
   0xc   :  { %7292 = vst [vmem:[#allocation10_spill] sm:$0xff] %v3316_v25 }
   0xd   :  { %7293 = vst [vmem:[#allocation11_spill] sm:$0xff] %v3318_v26 }
   0xe   :  { %7294 = vst [vmem:[#allocation12_spill] sm:$0xff] %v3320_v27 }
   0xf   :  { %7296 = vst [vmem:[#allocation14_spill] sm:$0xff] %v3324_v29 }
  0x10   :  { %7297 = vst [vmem:[#allocation15_spill] sm:$0xff] %v3326_v30 }
  0x11   :  { %7298 = vst [vmem:[#allocation16_spill] sm:$0xff] %v3328_v31 }
  0x12   :  { %3014 = vset.pattern.permute.xlu1 %v3230_v2  ;;  %7300 = vst [vmem:[#allocation18_spill] sm:$0xff] %v3332_v33 }
  0x13   :  { %3015 = vset.pattern.permute.xlu2 %v3231_v3  ;;  %80 = vperm.xlu0 %3011, %v22_v6   ;;  %7301 = vst [vmem:[#allocation19_spill] sm:$0xff] %v3334_v34 }
  0x14   :  { %60 = vperm.xlu1 %3014, %v18_v4   ;;  %65 = vperm.xlu2 %3015, %v19_v7   ;;  %7302 = vst [vmem:[#allocation20_spill] sm:$0xff] %v3336_v35 }
  0x15   :  { %7303 = vst [vmem:[#allocation21_spill] sm:$0xff] %v3338_v36 }
  0x16   :  { %7305 = vst [vmem:[#allocation23_spill] sm:$0xff] %v3343_v38 }
  0x17   :  { %7306 = vst [vmem:[#allocation24_spill] sm:$0xff] %v3345_v39 }
  0x18   :  { %7307 = vst [vmem:[#allocation25_spill] sm:$0xff] %v3347_v40 }
  0x1b   :  { %3021 = vset.pattern.permute.xlu0 %v3232_v10 }
  0x1c   :  { %3016 = vset.pattern.permute.xlu1 %v3231_v3  ;;  %75 = vperm.xlu2 %3015, %v21_v8  }
  0x1d   :  { %152 = vperm.xlu0 %3021, %v19_v7   ;;  %70 = vperm.xlu1 %3016, %v20_v9  }
  0x24   :  { %3018 = vset.pattern.permute.xlu2 %v3230_v2 }
  0x25   :  { %3017 = vset.pattern.permute.xlu1 %v3230_v2  ;;  %88 = vperm.xlu2 %3018, %v20_v9  }
  0x26   :  { %84 = vperm.xlu1 %3017, %v19_v7   ;;  %3022 = vset.pattern.permute.xlu0 %v3230_v2 }
  0x27   :  { %56 = vperm.xlu0 %3022, %v17_v0  }
  0x2d   :  { %3020 = vset.pattern.permute.xlu2 %v3232_v10 }
  0x2e   :  { %3019 = vset.pattern.permute.xlu1 %v3232_v10  ;;  %140 = vperm.xlu2 %3020, %v16_v5  }
  0x2f   :  { %136 = vperm.xlu1 %3019, %v15_v1   ;;  %96 = vperm.xlu0 %3022, %v22_v6  }
  0x36   :  { %3023 = vset.pattern.permute.xlu2 %v3230_v2 }
  0x37   :  { %156 = vperm.xlu1 %3019, %v20_v9   ;;  %92 = vperm.xlu2 %3023, %v21_v8  }
  0x38   :  { %3027 = vset.pattern.permute.xlu0 %v3231_v3 }
  0x39   :  { %111 = vperm.xlu0 %3027, %v25_v11  }
  0x3f   :  { %144 = vperm.xlu1 %3019, %v17_v0   ;;  %3024 = vset.pattern.permute.xlu2 %v3232_v10 }
  0x40   :  { %160 = vperm.xlu2 %3024, %v21_v8  }
  0x41   :  { %3030 = vset.pattern.permute.xlu0 %v3230_v2 }
  0x42   :  { %132 = vperm.xlu0 %3030, %v26_v14  }
  0x47   :  { %148 = vperm.xlu1 %3019, %v18_v4  }
  0x48   :  { %164 = vperm.xlu2 %3024, %v22_v6  }
  0x4a   :  { %3033 = vset.pattern.permute.xlu0 %v3232_v10 }
  0x4f   :  { %3025 = vset.pattern.permute.xlu1 %v3231_v3 }
  0x50   :  { %101 = vperm.xlu1 %3025, %v23_v12   ;;  %3026 = vset.pattern.permute.xlu2 %v3231_v3 }
  0x51   :  { %106 = vperm.xlu2 %3026, %v24_v13  }
  0x58   :  { %116 = vperm.xlu1 %3025, %v26_v14  }
  0x59   :  { %3028 = vset.pattern.permute.xlu2 %v3230_v2 }
  0x5a   :  { %120 = vperm.xlu2 %3028, %v23_v12  }
  0x5d   :  { %v49_v15 = vpop.permute.xlu2 %48 }
  0x5e   :  { %v3341_v37 = vmul.f32 %v3312_v23, %v49_v15  ;;  %v3352_v42 = vmul.f32 %v3314_v24, %v49_v15  ;;  %v3355_v43 = vmul.f32 %v3316_v25, %v49_v15  ;;  %v3358_v44 = vmul.f32 %v3318_v26, %v49_v15 }
  0x5f   :  { %v3361_v45 = vmul.f32 %v3320_v27, %v49_v15  ;;  %v3364_v47 = vmul.f32 %v3324_v29, %v49_v15  ;;  %v3367_v48 = vmul.f32 %v3326_v30, %v49_v15  ;;  %v3370_v49 = vmul.f32 %v3328_v31, %v49_v15 }
  0x60   :  { %3029 = vset.pattern.permute.xlu1 %v3230_v2  ;;  %7304 = vst [vmem:[#allocation22_spill] sm:$0xff] %v3341_v37 }
  0x61   :  { %124 = vperm.xlu1 %3029, %v24_v13   ;;  %7308 = vst [vmem:[#allocation26_spill] sm:$0xff] %v3352_v42 }
  0x62   :  { %128 = vperm.xlu2 %3028, %v25_v11   ;;  %7309 = vst [vmem:[#allocation27_spill] sm:$0xff] %v3355_v43 }
  0x63   :  { %7310 = vst [vmem:[#allocation28_spill] sm:$0xff] %v3358_v44 }
  0x64   :  { %7311 = vst [vmem:[#allocation29_spill] sm:$0xff] %v3361_v45 }
  0x65   :  { %v53_v16 = vpop.permute.xlu2 %52  ;;  %7312 = vst [vmem:[#allocation30_spill] sm:$0xff] %v3364_v47 }
  0x66   :  { %7313 = vst [vmem:[#allocation31_spill] sm:$0xff] %v3367_v48  ;;  %v3373_v50 = vmul.f32 %v3312_v23, %v53_v16  ;;  %v3376_v51 = vmul.f32 %v3314_v24, %v53_v16  ;;  %v3379_v52 = vmul.f32 %v3316_v25, %v53_v16  ;;  %v3382_v53 = vmul.f32 %v3318_v26, %v53_v16 }
  0x67   :  { %7314 = vst [vmem:[#allocation32_spill] sm:$0xff] %v3370_v49  ;;  %v3385_v54 = vmul.f32 %v3320_v27, %v53_v16  ;;  %v2037_v55 = vmul.f32 %v3324_v29, %v53_v16  ;;  %v2350_v56 = vmul.f32 %v3326_v30, %v53_v16  ;;  %v2663_v57 = vmul.f32 %v3328_v31, %v53_v16 }
  0x69   :  { %3031 = vset.pattern.permute.xlu1 %v3232_v10 }
  0x6a   :  { %168 = vperm.xlu1 %3031, %v23_v12   ;;  %3032 = vset.pattern.permute.xlu2 %v3232_v10 }
  0x6b   :  { %172 = vperm.xlu2 %3032, %v24_v13  }
  0x6e   :  { %v66_v17 = vpop.permute.xlu2 %65 }
  0x6f   :  { %v3391_v58 = vmul.f32 %v3330_v32, %v66_v17  ;;  %v3394_v59 = vmul.f32 %v3332_v33, %v66_v17  ;;  %v3397_v60 = vmul.f32 %v3334_v34, %v66_v17  ;;  %v3400_v61 = vmul.f32 %v3336_v35, %v66_v17 }
  0x70   :  { %v3403_v62 = vmul.f32 %v3338_v36, %v66_v17  ;;  %v3406_v63 = vmul.f32 %v3343_v38, %v66_v17  ;;  %v3409_v0 = vmul.f32 %v3345_v39, %v66_v17  ;;  %v3412_v1 = vmul.f32 %v3347_v40, %v66_v17 }
  0x72   :  { %176 = vperm.xlu1 %3031, %v25_v11  }
  0x73   :  { %180 = vperm.xlu2 %3032, %v26_v14  }
  0x74   :  { %v40_v18 = vpop.permute.xlu1 %39 }
  0x75   :  { %v3302_v19 = vpop.permute.xlu0 %29  ;;  %v3415_v2 = vmul.f32 %v3330_v32, %v40_v18  ;;  %v3418_v3 = vmul.f32 %v3332_v33, %v40_v18  ;;  %v3421_v4 = vmul.f32 %v3334_v34, %v40_v18  ;;  %v3424_v5 = vmul.f32 %v3336_v35, %v40_v18 }
  0x76   :  { %v3304_v20 = vpop.permute.xlu2 %75  ;;  %v3427_v6 = vmul.f32 %v3338_v36, %v40_v18  ;;  %v3432_v8 = vmul.f32 %v3343_v38, %v40_v18  ;;  %v3438_v12 = vmul.f32 %v3345_v39, %v40_v18  ;;  %v3441_v13 = vmul.f32 %v3347_v40, %v40_v18 }
  0x77   :  { %7315 = vst [vmem:[#allocation33_spill] sm:$0xff] %v3415_v2  ;;  %v3445_v14 = vmul.f32 %v3330_v32, %v3302_v19  ;;  %v3449_v15 = vmul.f32 %v3332_v33, %v3302_v19  ;;  %v3453_v17 = vmul.f32 %v3334_v34, %v3302_v19  ;;  %v3457_v21 = vmul.f32 %v3336_v35, %v3302_v19 }
  0x78   :  { %7316 = vst [vmem:[#allocation34_spill] sm:$0xff] %v3418_v3  ;;  %v3461_v18 = vmul.f32 %v3338_v36, %v3302_v19  ;;  %v3465_v22 = vmul.f32 %v3343_v38, %v3302_v19  ;;  %v3493_v43 = vmul.f32 %v3338_v36, %v3304_v20  ;;  %v3497_v42 = vmul.f32 %v3343_v38, %v3304_v20 }
  0x79   :  { %7317 = vst [vmem:[#allocation35_spill] sm:$0xff] %v3421_v4  ;;  %v3485_v4 = vmul.f32 %v3334_v34, %v3304_v20  ;;  %v3501_v37 = vmul.f32 %v3345_v39, %v3304_v20 }
  0x7a   :  { %7318 = vst [vmem:[#allocation36_spill] sm:$0xff] %v3424_v5 }
  0x7b   :  { %7319 = vst [vmem:[#allocation37_spill] sm:$0xff] %v3427_v6  ;;  %v3477_v6 = vmul.f32 %v3330_v32, %v3304_v20 }
  0x7c   :  { %v3322_v28 = vpop.permute.xlu1 %44  ;;  %7321 = vst [vmem:[#allocation39_spill] sm:$0xff] %v3432_v8  ;;  %v3473_v8 = vmul.f32 %v3347_v40, %v3302_v19 }
  0x7d   :  { %7295 = vst [vmem:[#allocation13_spill] sm:$0xff] %v3322_v28  ;;  %v35_v46 = vpop.permute.xlu0 %34 }
  0x7e   :  { %v2029_v9 = vmul.f32 %v3343_v38, %v35_v46  ;;  %v2342_v10 = vmul.f32 %v3345_v39, %v35_v46  ;;  %v2655_v11 = vmul.f32 %v3347_v40, %v35_v46  ;;  %7322 = vst [vmem:[#allocation40_spill] sm:$0xff] %v3438_v12  ;;  %v3469_v12 = vmul.f32 %v3345_v39, %v3302_v19 }
  0x7f   :  { %v3349_v41 = vpop.permute.xlu2 %88  ;;  %7323 = vst [vmem:[#allocation41_spill] sm:$0xff] %v3441_v13  ;;  %v3481_v13 = vmul.f32 %v3332_v33, %v3304_v20  ;;  %v3489_v19 = vmul.f32 %v3336_v35, %v3304_v20  ;;  %v777_v48 = vmul.f32 %v3332_v33, %v35_v46  ;;  %v1090_v47 = vmul.f32 %v3334_v34, %v35_v46 }
  0x80   :  { %7324 = vst [vmem:[#allocation42_spill] sm:$0xff] %v3453_v17  ;;  %v1403_v45 = vmul.f32 %v3336_v35, %v35_v46  ;;  %v3516_v17 = vmul.f32 %v3347_v40, %v3304_v20  ;;  %v3536_v20 = vmul.f32 %v3314_v24, %v3349_v41 }
  0x81   :  { %7325 = vst [vmem:[#allocation43_spill] sm:$0xff] %v3457_v21  ;;  %v1716_v21 = vmul.f32 %v3338_v36, %v35_v46 }
  0x82   :  { %7333 = vst [vmem:[#allocation51_spill] sm:$0xff] %v3536_v20 }
  0x85   :  { %v81_v5 = vpop.permute.xlu0 %80 }
  0x86   :  { %v3429_v7 = vpop.permute.xlu1 %60 }
  0x87   :  { %7320 = vst [vmem:[#allocation38_spill] sm:$0xff] %v3429_v7 }
  0x88   :  { %v141_v16 = vpop.permute.xlu2 %140 }
  0x89   :  { %v2033_v3 = vadd.f32 %v2029_v9, %v141_v16  ;;  %v2346_v2 = vadd.f32 %v2342_v10, %v141_v16  ;;  %v2659_v44 = vadd.f32 %v2655_v11, %v141_v16  ;;  %v459_v9 = vmul.f32 %v3330_v32, %v35_v46 }
  0x8a   :  { %v3532_v46 = vmul.f32 %v3312_v23, %v3349_v41 }
  0x8b   :  { %v3504_v10 = vadd.f32 %v2037_v55, %v2033_v3  ;;  %v3506_v11 = vadd.f32 %v2350_v56, %v2346_v2  ;;  %v3508_v49 = vadd.f32 %v2663_v57, %v2659_v44  ;;  %v3520_v55 = vmul.f32 %v3330_v32, %v3322_v28 }
  0x8c   :  { %v3524_v44 = vmul.f32 %v3332_v33, %v3322_v28  ;;  %v3528_v56 = vmul.f32 %v3334_v34, %v3322_v28  ;;  %7332 = vst [vmem:[#allocation50_spill] sm:$0xff] %v3532_v46  ;;  %v3540_v2 = vmul.f32 %v3316_v25, %v3349_v41  ;;  %v3544_v3 = vmul.f32 %v3318_v26, %v3349_v41 }
  0x8d   :  { %7326 = vst [vmem:[#allocation44_spill] sm:$0xff] %v3504_v10  ;;  %v3552_v28 = vmul.f32 %v3324_v29, %v3349_v41  ;;  %v1407_v10 = vadd.f32 %v1403_v45, %v141_v16  ;;  %v3566_v46 = vmul.f32 %v3332_v33, %v81_v5  ;;  %v3577_v45 = vmul.f32 %v3314_v24, %v3429_v7 }
  0x8e   :  { %7327 = vst [vmem:[#allocation45_spill] sm:$0xff] %v3506_v11  ;;  %v1094_v11 = vadd.f32 %v1090_v47, %v141_v16  ;;  %v3583_v47 = vmul.f32 %v3338_v36, %v81_v5 }
  0x8f   :  { %7328 = vst [vmem:[#allocation46_spill] sm:$0xff] %v3508_v49  ;;  %v71_v57 = vpop.permute.xlu1 %70  ;;  %v781_v49 = vadd.f32 %v777_v48, %v141_v16  ;;  %v3573_v48 = vmul.f32 %v3312_v23, %v3429_v7 }
  0x90   :  { %7329 = vst [vmem:[#allocation47_spill] sm:$0xff] %v3520_v55  ;;  %v463_v55 = vadd.f32 %v459_v9, %v141_v16  ;;  %v3589_v9 = vmul.f32 %v3345_v39, %v81_v5 }
  0x91   :  { %7330 = vst [vmem:[#allocation48_spill] sm:$0xff] %v3524_v44  ;;  %v3556_v44 = vmul.f32 %v3326_v30, %v3349_v41  ;;  %v93_v20 = vpop.permute.xlu2 %92  ;;  %v3598_v7 = vadd.f32 %v3376_v51, %v781_v49 }
  0x92   :  { %7331 = vst [vmem:[#allocation49_spill] sm:$0xff] %v3528_v56  ;;  %v3548_v56 = vmul.f32 %v3320_v27, %v3349_v41 }
  0x93   :  { %7334 = vst [vmem:[#allocation52_spill] sm:$0xff] %v3540_v2  ;;  %v1720_v2 = vadd.f32 %v1716_v21, %v141_v16  ;;  %v153_v16 = vpop.permute.xlu0 %152  ;;  %v3586_v21 = vmul.f32 %v3343_v38, %v81_v5 }
  0x94   :  { %7335 = vst [vmem:[#allocation53_spill] sm:$0xff] %v3544_v3  ;;  %v3560_v3 = vmul.f32 %v3328_v31, %v3349_v41  ;;  %v3580_v41 = vmul.f32 %v3336_v35, %v81_v5  ;;  %v328_v49 = vadd.f32 %v3403_v62, %v153_v16  ;;  %v362_v51 = vadd.f32 %v3406_v63, %v153_v16 }
  0x95   :  { %7336 = vst [vmem:[#allocation54_spill] sm:$0xff] %v3548_v56  ;;  %v3563_v56 = vmul.f32 %v3330_v32, %v81_v5  ;;  %v3633_v62 = vmul.f32 %v3343_v38, %v71_v57  ;;  %v3636_v63 = vmul.f32 %v3345_v39, %v71_v57 }
  0x96   :  { %7337 = vst [vmem:[#allocation55_spill] sm:$0xff] %v3552_v28  ;;  %v3569_v28 = vmul.f32 %v3334_v34, %v81_v5 }
  0x97   :  { %7338 = vst [vmem:[#allocation56_spill] sm:$0xff] %v3556_v44  ;;  %v3604_v44 = vadd.f32 %v3382_v53, %v1407_v10  ;;  %v430_v53 = vadd.f32 %v3412_v1, %v153_v16  ;;  %v206_v1 = vmul.f32 %v3312_v23, %v93_v20 }
  0x98   :  { %7339 = vst [vmem:[#allocation57_spill] sm:$0xff] %v3560_v3  ;;  %v3592_v3 = vmul.f32 %v3347_v40, %v81_v5  ;;  %v226_v5 = vadd.f32 %v3394_v59, %v153_v16  ;;  %v85_v10 = vpop.permute.xlu1 %84  ;;  %v3624_v59 = vmul.f32 %v3334_v34, %v71_v57 }
  0x99   :  { %7340 = vst [vmem:[#allocation58_spill] sm:$0xff] %v3573_v48  ;;  %v3595_v48 = vadd.f32 %v3373_v50, %v463_v55  ;;  %v294_v50 = vadd.f32 %v3400_v61, %v153_v16  ;;  %v3630_v61 = vmul.f32 %v3338_v36, %v71_v57  ;;  %v274_v55 = vmul.f32 %v3316_v25, %v93_v20 }
  0x9a   :  { %7341 = vst [vmem:[#allocation59_spill] sm:$0xff] %v3577_v45  ;;  %v3601_v45 = vadd.f32 %v3379_v52, %v1094_v11  ;;  %v396_v52 = vadd.f32 %v3409_v0, %v153_v16  ;;  %v3639_v0 = vmul.f32 %v3347_v40, %v71_v57  ;;  %v240_v11 = vmul.f32 %v3314_v24, %v93_v20  ;;  %v161_v39 = vpop.permute.xlu2 %160 }
  0x9b   :  { %7342 = vst [vmem:[#allocation60_spill] sm:$0xff] %v3586_v21  ;;  %v3607_v21 = vadd.f32 %v3385_v54, %v1720_v2  ;;  %v3618_v54 = vmul.f32 %v3330_v32, %v71_v57  ;;  %v204_v2 = vmul.f32 %v3312_v23, %v85_v10  ;;  %v272_v34 = vmul.f32 %v3316_v25, %v85_v10 }
  0x9c   :  { %7343 = vst [vmem:[#allocation61_spill] sm:$0xff] %v3589_v9  ;;  %v192_v9 = vadd.f32 %v3391_v58, %v153_v16  ;;  %v3621_v58 = vmul.f32 %v3332_v33, %v71_v57  ;;  %v306_v33 = vmul.f32 %v3318_v26, %v85_v10  ;;  %v340_v32 = vmul.f32 %v3320_v27, %v85_v10 }
  0x9d   :  { %7344 = vst [vmem:[#allocation62_spill] sm:$0xff] %v3592_v3  ;;  %v260_v3 = vadd.f32 %v3397_v60, %v153_v16  ;;  %v3627_v60 = vmul.f32 %v3336_v35, %v71_v57  ;;  %v238_v16 = vmul.f32 %v3314_v24, %v85_v10  ;;  %v308_v57 = vmul.f32 %v3318_v26, %v93_v20 }
  0x9e   :  { %7345 = vst [vmem:[#allocation63_spill] sm:$0xff] %v3595_v48  ;;  %v374_v40 = vmul.f32 %v3324_v29, %v85_v10  ;;  %v408_v38 = vmul.f32 %v3326_v30, %v85_v10  ;;  %v442_v36 = vmul.f32 %v3328_v31, %v85_v10  ;;  %v342_v35 = vmul.f32 %v3320_v27, %v93_v20 }
  0x9f   :  { %7346 = vst [vmem:[#allocation64_spill] sm:$0xff] %v3598_v7  ;;  %v3657_v7 = vadd.f32 %v204_v2, %v192_v9  ;;  %v194_v48 = vadd.f32 %v3477_v6, %v161_v39  ;;  %v3666_v10 = vadd.f32 %v306_v33, %v294_v50  ;;  %v296_v6 = vadd.f32 %v3489_v19, %v161_v39 }
  0xa0   :  { %7347 = vst [vmem:[#allocation65_spill] sm:$0xff] %v3601_v45  ;;  %v444_v45 = vmul.f32 %v3328_v31, %v93_v20  ;;  %v432_v33 = vadd.f32 %v3516_v17, %v161_v39 }
  0xa1   :  { %7348 = vst [vmem:[#allocation66_spill] sm:$0xff] %v3604_v44  ;;  %v410_v44 = vmul.f32 %v3326_v30, %v93_v20  ;;  %v137_v9 = vpop.permute.xlu1 %136 }
  0xa2   :  { %7349 = vst [vmem:[#allocation67_spill] sm:$0xff] %v3607_v21  ;;  %v376_v21 = vmul.f32 %v3324_v29, %v93_v20  ;;  %v3674_v20 = vadd.f32 %v442_v36, %v430_v53  ;;  %v462_v36 = vadd.f32 %v3445_v14, %v137_v9  ;;  %v2032_v19 = vadd.f32 %v3465_v22, %v137_v9  ;;  %v7366_v22 = vld [vmem:[#allocation32_spill] sm:$0xff] }
  0xa3   :  { %7350 = vst [vmem:[#allocation68_spill] sm:$0xff] %v3621_v58  ;;  %v3672_v58 = vadd.f32 %v408_v38, %v396_v52  ;;  %v1719_v38 = vadd.f32 %v3461_v18, %v137_v9  ;;  %v7364_v52 = vld [vmem:[#allocation30_spill] sm:$0xff]  ;;  %v7365_v18 = vld [vmem:[#allocation31_spill] sm:$0xff] }
  0xa4   :  { %7351 = vst [vmem:[#allocation69_spill] sm:$0xff] %v3624_v59  ;;  %v3670_v59 = vadd.f32 %v374_v40, %v362_v51  ;;  %v3699_v14 = vadd.f32 %v7364_v52, %v2032_v19 }
  0xa5   :  { %7352 = vst [vmem:[#allocation70_spill] sm:$0xff] %v3627_v60  ;;  %v3668_v60 = vadd.f32 %v340_v32, %v328_v49  ;;  %v7363_v49 = vld [vmem:[#allocation29_spill] sm:$0xff] }
  0xa6   :  { %7353 = vst [vmem:[#allocation71_spill] sm:$0xff] %v3630_v61  ;;  %v3664_v61 = vadd.f32 %v272_v34, %v260_v3  ;;  %v398_v34 = vadd.f32 %v3501_v37, %v161_v39  ;;  %v3681_v3 = vadd.f32 %v206_v1, %v194_v48  ;;  %v780_v37 = vadd.f32 %v3449_v15, %v137_v9  ;;  %v7362_v48 = vld [vmem:[#allocation43_spill] sm:$0xff]  ;;  %v7370_v1 = vld [vmem:[#allocation22_spill] sm:$0xff] }
  0xa7   :  { %7354 = vst [vmem:[#allocation72_spill] sm:$0xff] %v3633_v62  ;;  %v3662_v62 = vadd.f32 %v238_v16, %v226_v5  ;;  %v3692_v5 = vadd.f32 %v308_v57, %v296_v6  ;;  %v1406_v50 = vadd.f32 %v7362_v48, %v137_v9  ;;  %v1727_v51 = vadd.f32 %v7363_v49, %v1719_v38 }
  0xa8   :  { %7355 = vst [vmem:[#allocation73_spill] sm:$0xff] %v3636_v63  ;;  %v262_v63 = vadd.f32 %v3485_v4, %v161_v39  ;;  %v364_v4 = vadd.f32 %v3497_v42, %v161_v39  ;;  %v2658_v42 = vadd.f32 %v3473_v8, %v137_v9  ;;  %v3711_v15 = vadd.f32 %v410_v44, %v398_v34 }
  0xa9   :  { %7356 = vst [vmem:[#allocation74_spill] sm:$0xff] %v3639_v0  ;;  %v228_v0 = vadd.f32 %v3481_v13, %v161_v39  ;;  %v330_v13 = vadd.f32 %v3493_v43, %v161_v39  ;;  %v2345_v43 = vadd.f32 %v3469_v12, %v137_v9  ;;  %v7361_v39 = vld [vmem:[#allocation42_spill] sm:$0xff] }
  0xaa   :  { %7357 = vst [vmem:[#allocation75_spill] sm:$0xff] %v3681_v3  ;;  %v3685_v40 = vadd.f32 %v274_v55, %v262_v63  ;;  %v1093_v17 = vadd.f32 %v7361_v39, %v137_v9  ;;  %v3705_v12 = vadd.f32 %v7366_v22, %v2658_v42  ;;  %v3709_v63 = vadd.f32 %v376_v21, %v364_v4  ;;  %v7381_v4 = vld [vmem:[#allocation27_spill] sm:$0xff] }
  0xab   :  { %v3683_v32 = vadd.f32 %v240_v11, %v228_v0  ;;  %7360 = vst [vmem:[#allocation78_spill] sm:$0xff] %v3692_v5  ;;  %v3702_v53 = vadd.f32 %v7365_v18, %v2345_v43  ;;  %v3707_v8 = vadd.f32 %v342_v35, %v330_v13  ;;  %v57_v0 = vpop.permute.xlu0 %56  ;;  %v470_v11 = vadd.f32 %v7370_v1, %v462_v36 }
  0xac   :  { %7359 = vst [vmem:[#allocation77_spill] sm:$0xff] %v3685_v40  ;;  %v3714_v55 = vadd.f32 %v444_v45, %v432_v33  ;;  %v3717_v2 = vmul.f32 %v3312_v23, %v57_v0  ;;  %v3720_v16 = vmul.f32 %v3314_v24, %v57_v0  ;;  %v3723_v57 = vmul.f32 %v3316_v25, %v57_v0  ;;  %v7378_v45 = vld [vmem:[#allocation26_spill] sm:$0xff]  ;;  %v7382_v33 = vld [vmem:[#allocation28_spill] sm:$0xff] }
  0xad   :  { %7358 = vst [vmem:[#allocation76_spill] sm:$0xff] %v3683_v32  ;;  %v3726_v35 = vmul.f32 %v3318_v26, %v57_v0  ;;  %v3729_v44 = vmul.f32 %v3320_v27, %v57_v0  ;;  %v3732_v21 = vmul.f32 %v3324_v29, %v57_v0  ;;  %v788_v6 = vadd.f32 %v7378_v45, %v780_v37 }
  0xae   :  { %7367 = vst [vmem:[#allocation42_spill] sm:$0xff] %v3707_v8  ;;  %v3736_v9 = vmul.f32 %v3326_v30, %v57_v0  ;;  %v3739_v13 = vmul.f32 %v3328_v31, %v57_v0  ;;  %v1101_v34 = vadd.f32 %v7381_v4, %v1093_v17  ;;  %v1414_v36 = vadd.f32 %v7382_v33, %v1406_v50 }
  0xaf   :  { %7368 = vst [vmem:[#allocation43_spill] sm:$0xff] %v3709_v63  ;;  %v3744_v38 = vmul.f32 %v470_v11, %v3657_v7  ;;  %v3747_v19 = vmul.f32 %v470_v11, %v3662_v62  ;;  %v3750_v43 = vmul.f32 %v470_v11, %v3664_v61  ;;  %v3753_v42 = vmul.f32 %v470_v11, %v3666_v10 }
  0xb0   :  { %7369 = vst [vmem:[#allocation29_spill] sm:$0xff] %v3711_v15  ;;  %v3756_v37 = vmul.f32 %v470_v11, %v3668_v60  ;;  %v3759_v39 = vmul.f32 %v470_v11, %v3670_v59  ;;  %v3762_v17 = vmul.f32 %v470_v11, %v3672_v58  ;;  %v3765_v48 = vmul.f32 %v470_v11, %v3674_v20 }
  0xb1   :  { %7371 = vst [vmem:[#allocation30_spill] sm:$0xff] %v3714_v55  ;;  %v3768_v50 = vmul.f32 %v788_v6, %v3657_v7  ;;  %v3771_v49 = vmul.f32 %v788_v6, %v3662_v62  ;;  %v3774_v52 = vmul.f32 %v788_v6, %v3664_v61  ;;  %v3777_v18 = vmul.f32 %v788_v6, %v3666_v10 }
  0xb2   :  { %7372 = vst [vmem:[#allocation31_spill] sm:$0xff] %v3717_v2  ;;  %v3780_v22 = vmul.f32 %v788_v6, %v3668_v60  ;;  %v3783_v0 = vmul.f32 %v788_v6, %v3670_v59  ;;  %v3786_v1 = vmul.f32 %v788_v6, %v3672_v58  ;;  %v3789_v11 = vmul.f32 %v788_v6, %v3674_v20 }
  0xb3   :  { %7373 = vst [vmem:[#allocation32_spill] sm:$0xff] %v3720_v16  ;;  %v3792_v45 = vmul.f32 %v1101_v34, %v3657_v7  ;;  %v3795_v4 = vmul.f32 %v1101_v34, %v3662_v62  ;;  %v3798_v33 = vmul.f32 %v1101_v34, %v3664_v61  ;;  %v3810_v6 = vmul.f32 %v1101_v34, %v3672_v58 }
  0xb4   :  { %7374 = vst [vmem:[#allocation22_spill] sm:$0xff] %v3723_v57  ;;  %v3819_v55 = vmul.f32 %v1414_v36, %v3662_v62  ;;  %v3822_v15 = vmul.f32 %v1414_v36, %v3664_v61  ;;  %v3825_v63 = vmul.f32 %v1414_v36, %v3666_v10  ;;  %v3828_v8 = vmul.f32 %v1414_v36, %v3668_v60 }
  0xb5   :  { %7375 = vst [vmem:[#allocation79_spill] sm:$0xff] %v3726_v35  ;;  %v3831_v5 = vmul.f32 %v1414_v36, %v3670_v59  ;;  %v3837_v40 = vmul.f32 %v1414_v36, %v3674_v20  ;;  %v3840_v32 = vmul.f32 %v1727_v51, %v3657_v7  ;;  %v3852_v3 = vmul.f32 %v1727_v51, %v3668_v60 }
  0xb6   :  { %7376 = vst [vmem:[#allocation80_spill] sm:$0xff] %v3729_v44  ;;  %v3849_v44 = vmul.f32 %v1727_v51, %v3666_v10  ;;  %v3855_v35 = vmul.f32 %v1727_v51, %v3670_v59  ;;  %v3861_v57 = vmul.f32 %v1727_v51, %v3674_v20  ;;  %v3873_v16 = vmul.f32 %v3699_v14, %v3664_v61 }
  0xb7   :  { %7377 = vst [vmem:[#allocation81_spill] sm:$0xff] %v3732_v21  ;;  %v3846_v21 = vmul.f32 %v1727_v51, %v3664_v61  ;;  %v3909_v2 = vmul.f32 %v3702_v53, %v3666_v10 }
  0xb8   :  { %7379 = vst [vmem:[#allocation26_spill] sm:$0xff] %v3736_v9  ;;  %v3843_v9 = vmul.f32 %v1727_v51, %v3662_v62 }
  0xb9   :  { %7380 = vst [vmem:[#allocation82_spill] sm:$0xff] %v3739_v13  ;;  %v3893_v13 = vmul.f32 %v3699_v14, %v3674_v20 }
  0xba   :  { %7383 = vst [vmem:[#allocation27_spill] sm:$0xff] %v3753_v42  ;;  %v3816_v42 = vmul.f32 %v1414_v36, %v3657_v7 }
  0xbb   :  { %7384 = vst [vmem:[#allocation28_spill] sm:$0xff] %v3756_v37  ;;  %v3813_v37 = vmul.f32 %v1101_v34, %v3674_v20 }
  0xbc   :  { %7385 = vst [vmem:[#allocation83_spill] sm:$0xff] %v3759_v39  ;;  %v3807_v39 = vmul.f32 %v1101_v34, %v3670_v59 }
  0xbd   :  { %7386 = vst [vmem:[#allocation84_spill] sm:$0xff] %v3762_v17  ;;  %v3804_v17 = vmul.f32 %v1101_v34, %v3668_v60 }
  0xbe   :  { %7387 = vst [vmem:[#allocation85_spill] sm:$0xff] %v3765_v48  ;;  %v3801_v48 = vmul.f32 %v1101_v34, %v3666_v10  ;;  %v3834_v34 = vmul.f32 %v1414_v36, %v3672_v58  ;;  %v3858_v36 = vmul.f32 %v1727_v51, %v3672_v58  ;;  %v3881_v51 = vmul.f32 %v3699_v14, %v3668_v60 }
  0xbf   :  { %7388 = vst [vmem:[#allocation86_spill] sm:$0xff] %v3768_v50  ;;  %v3905_v50 = vmul.f32 %v3702_v53, %v3664_v61 }
  0xc0   :  { %7389 = vst [vmem:[#allocation87_spill] sm:$0xff] %v3771_v49  ;;  %v3901_v49 = vmul.f32 %v3702_v53, %v3662_v62 }
  0xc1   :  { %7390 = vst [vmem:[#allocation88_spill] sm:$0xff] %v3774_v52  ;;  %v3897_v52 = vmul.f32 %v3702_v53, %v3657_v7 }
  0xc2   :  { %7391 = vst [vmem:[#allocation89_spill] sm:$0xff] %v3777_v18  ;;  %v3889_v18 = vmul.f32 %v3699_v14, %v3672_v58 }
  0xc3   :  { %7392 = vst [vmem:[#allocation90_spill] sm:$0xff] %v3780_v22  ;;  %v3885_v22 = vmul.f32 %v3699_v14, %v3670_v59 }
  0xc4   :  { %7393 = vst [vmem:[#allocation91_spill] sm:$0xff] %v3783_v0  ;;  %v3877_v0 = vmul.f32 %v3699_v14, %v3666_v10 }
  0xc5   :  { %7394 = vst [vmem:[#allocation92_spill] sm:$0xff] %v3786_v1  ;;  %v3869_v1 = vmul.f32 %v3699_v14, %v3662_v62 }
  0xc6   :  { %7395 = vst [vmem:[#allocation93_spill] sm:$0xff] %v3789_v11  ;;  %v3865_v11 = vmul.f32 %v3699_v14, %v3657_v7  ;;  %v3913_v14 = vmul.f32 %v3702_v53, %v3668_v60 }
  0xc7   :  { %7396 = vst [vmem:[#allocation94_spill] sm:$0xff] %v3861_v57 }
  0xc8   :  { %7397 = vst [vmem:[#allocation95_spill] sm:$0xff] %v3865_v11 }
  0xc9   :  { %7398 = vst [vmem:[#allocation96_spill] sm:$0xff] %v3869_v1 }
  0xca   :  { %7399 = vst [vmem:[#allocation97_spill] sm:$0xff] %v3873_v16 }
  0xcb   :  { %7400 = vst [vmem:[#allocation98_spill] sm:$0xff] %v3877_v0 }
  0xcc   :  { %7401 = vst [vmem:[#allocation99_spill] sm:$0xff] %v3881_v51 }
  0xcd   :  { %7402 = vst [vmem:[#allocation100_spill] sm:$0xff] %v3885_v22 }
  0xce   :  { %7403 = vst [vmem:[#allocation101_spill] sm:$0xff] %v3889_v18  ;;  %v97_v18 = vpop.permute.xlu0 %96 }
  0xcf   :  { %7404 = vst [vmem:[#allocation102_spill] sm:$0xff] %v3893_v13  ;;  %v3917_v13 = vmul.f32 %v3702_v53, %v3670_v59 }
  0xd0   :  { %7405 = vst [vmem:[#allocation103_spill] sm:$0xff] %v3897_v52  ;;  %v3921_v52 = vmul.f32 %v3702_v53, %v3672_v58 }
  0xd1   :  { %7406 = vst [vmem:[#allocation104_spill] sm:$0xff] %v3901_v49  ;;  %v3925_v49 = vmul.f32 %v3702_v53, %v3674_v20  ;;  %v3945_v53 = vmul.f32 %v3705_v12, %v3668_v60 }
  0xd2   :  { %7407 = vst [vmem:[#allocation105_spill] sm:$0xff] %v3905_v50  ;;  %v165_v50 = vpop.permute.xlu2 %164 }
  0xd3   :  { %7408 = vst [vmem:[#allocation106_spill] sm:$0xff] %v3909_v2  ;;  %v3929_v2 = vmul.f32 %v3705_v12, %v3657_v7  ;;  %v3949_v7 = vmul.f32 %v3705_v12, %v3670_v59  ;;  %v263_v60 = vadd.f32 %v3569_v28, %v165_v50  ;;  %v331_v59 = vadd.f32 %v3583_v47, %v165_v50  ;;  %v7427_v28 = vld [vmem:[#allocation71_spill] sm:$0xff]  ;;  %v7429_v47 = vld [vmem:[#allocation73_spill] sm:$0xff] }
  0xd4   :  { %7409 = vst [vmem:[#allocation107_spill] sm:$0xff] %v3913_v14  ;;  %v3933_v14 = vmul.f32 %v3705_v12, %v3662_v62  ;;  %v3953_v62 = vmul.f32 %v3705_v12, %v3672_v58 }
  0xd5   :  { %7410 = vst [vmem:[#allocation108_spill] sm:$0xff] %v3917_v13  ;;  %v3937_v13 = vmul.f32 %v3705_v12, %v3664_v61  ;;  %v3957_v61 = vmul.f32 %v3705_v12, %v3674_v20 }
  0xd6   :  { %7411 = vst [vmem:[#allocation109_spill] sm:$0xff] %v3921_v52  ;;  %v3941_v52 = vmul.f32 %v3705_v12, %v3666_v10  ;;  %v195_v10 = vadd.f32 %v3563_v56, %v165_v50  ;;  %v7424_v12 = vld [vmem:[#allocation68_spill] sm:$0xff]  ;;  %v7425_v56 = vld [vmem:[#allocation69_spill] sm:$0xff] }
  0xd7   :  { %7412 = vst [vmem:[#allocation110_spill] sm:$0xff] %v3925_v49 }
  0xd8   :  { %7413 = vst [vmem:[#allocation111_spill] sm:$0xff] %v3929_v2  ;;  %v7422_v2 = vld [vmem:[#allocation61_spill] sm:$0xff] }
  0xd9   :  { %7414 = vst [vmem:[#allocation112_spill] sm:$0xff] %v3933_v14  ;;  %v399_v58 = vadd.f32 %v7422_v2, %v165_v50  ;;  %v207_v2 = vmul.f32 %v3312_v23, %v97_v18  ;;  %v7437_v23 = vld [vmem:[#allocation56_spill] sm:$0xff] }
  0xda   :  { %7415 = vst [vmem:[#allocation113_spill] sm:$0xff] %v3937_v13  ;;  %v157_v13 = vpop.permute.xlu1 %156 }
  0xdb   :  { %7416 = vst [vmem:[#allocation114_spill] sm:$0xff] %v3941_v52  ;;  %v229_v52 = vadd.f32 %v3566_v46, %v165_v50  ;;  %v193_v20 = vadd.f32 %v3618_v54, %v157_v13  ;;  %v261_v22 = vadd.f32 %v7425_v56, %v157_v13  ;;  %v7426_v46 = vld [vmem:[#allocation70_spill] sm:$0xff]  ;;  %v329_v0 = vadd.f32 %v7427_v28, %v157_v13  ;;  %v7432_v54 = vld [vmem:[#allocation51_spill] sm:$0xff] }
  0xdc   :  { %7417 = vst [vmem:[#allocation115_spill] sm:$0xff] %v3945_v53  ;;  %v297_v53 = vadd.f32 %v3580_v41, %v165_v50  ;;  %v295_v51 = vadd.f32 %v7426_v46, %v157_v13  ;;  %v7428_v41 = vld [vmem:[#allocation72_spill] sm:$0xff]  ;;  %v397_v1 = vadd.f32 %v7429_v47, %v157_v13  ;;  %v241_v46 = vmul.f32 %v3314_v24, %v97_v18 }
  0xdd   :  { %7418 = vst [vmem:[#allocation116_spill] sm:$0xff] %v3949_v7  ;;  %v7421_v7 = vld [vmem:[#allocation60_spill] sm:$0xff]  ;;  %v363_v16 = vadd.f32 %v7428_v41, %v157_v13  ;;  %v275_v28 = vmul.f32 %v3316_v25, %v97_v18  ;;  %v309_v41 = vmul.f32 %v3318_v26, %v97_v18  ;;  %v343_v47 = vmul.f32 %v3320_v27, %v97_v18  ;;  %v7438_v26 = vld [vmem:[#allocation57_spill] sm:$0xff] }
  0xde   :  { %7419 = vst [vmem:[#allocation117_spill] sm:$0xff] %v3953_v62  ;;  %v365_v14 = vadd.f32 %v7421_v7, %v165_v50  ;;  %v7423_v62 = vld [vmem:[#allocation62_spill] sm:$0xff]  ;;  %v4002_v25 = vadd.f32 %v7437_v23, %v397_v1 }
  0xdf   :  { %7420 = vst [vmem:[#allocation118_spill] sm:$0xff] %v3957_v61  ;;  %v433_v49 = vadd.f32 %v7423_v62, %v165_v50  ;;  %v227_v61 = vadd.f32 %v7424_v12, %v157_v13  ;;  %v7430_v7 = vld [vmem:[#allocation74_spill] sm:$0xff]  ;;  %v7433_v12 = vld [vmem:[#allocation52_spill] sm:$0xff]  ;;  %v4019_v23 = vadd.f32 %v309_v41, %v297_v53  ;;  %v4021_v1 = vadd.f32 %v343_v47, %v331_v59 }
  0xe0   :  { %v431_v11 = vadd.f32 %v7430_v7, %v157_v13  ;;  %v7431_v50 = vld [vmem:[#allocation50_spill] sm:$0xff]  ;;  %v3983_v56 = vadd.f32 %v7433_v12, %v261_v22  ;;  %v377_v13 = vmul.f32 %v3324_v29, %v97_v18  ;;  %v411_v7 = vmul.f32 %v3326_v30, %v97_v18  ;;  %v7436_v12 = vld [vmem:[#allocation55_spill] sm:$0xff] }
  0xe1   :  { %v3977_v62 = vadd.f32 %v7431_v50, %v193_v20  ;;  %v3980_v57 = vadd.f32 %v7432_v54, %v227_v61  ;;  %v445_v20 = vmul.f32 %v3328_v31, %v97_v18  ;;  %v7434_v50 = vld [vmem:[#allocation53_spill] sm:$0xff]  ;;  %v7435_v54 = vld [vmem:[#allocation54_spill] sm:$0xff]  ;;  %v3999_v24 = vadd.f32 %v7436_v12, %v363_v16  ;;  %v7440_v30 = vld [vmem:[#allocation63_spill] sm:$0xff]  ;;  %7443 = vst [vmem:[#allocation68_spill] sm:$0xff] %v4019_v23 }
  0xe2   :  { %v3993_v61 = vadd.f32 %v7434_v50, %v295_v51  ;;  %v3996_v22 = vadd.f32 %v7435_v54, %v329_v0  ;;  %v4005_v27 = vadd.f32 %v7438_v26, %v431_v11  ;;  %v4007_v29 = vadd.f32 %v207_v2, %v195_v10  ;;  %7444 = vst [vmem:[#allocation69_spill] sm:$0xff] %v4021_v1 }
  0xe3   :  { %v475_v18 = vmul.f32 %v7440_v30, %v3977_v62  ;;  %v479_v51 = vmul.f32 %v7440_v30, %v3980_v57  ;;  %v483_v0 = vmul.f32 %v7440_v30, %v3983_v56  ;;  %v4015_v50 = vadd.f32 %v241_v46, %v229_v52  ;;  %v7456_v46 = vld [vmem:[#allocation64_spill] sm:$0xff] }
  0xe4   :  { %7439 = vst [vmem:[#allocation60_spill] sm:$0xff] %v4007_v29  ;;  %v4017_v16 = vadd.f32 %v275_v28, %v263_v60  ;;  %v4023_v26 = vadd.f32 %v377_v13, %v365_v14  ;;  %v4025_v11 = vadd.f32 %v411_v7, %v399_v58  ;;  %v4027_v10 = vadd.f32 %v445_v20, %v433_v49  ;;  %v7468_v29 = vld [vmem:[#allocation99_spill] sm:$0xff] }
  0xe5   :  { %7441 = vst [vmem:[#allocation61_spill] sm:$0xff] %v4015_v50  ;;  %v4031_v2 = vmul.f32 %v7440_v30, %v3993_v61  ;;  %v4035_v52 = vmul.f32 %v7440_v30, %v3996_v22  ;;  %v4039_v53 = vmul.f32 %v7440_v30, %v3999_v24  ;;  %v4043_v14 = vmul.f32 %v7440_v30, %v4002_v25 }
  0xe6   :  { %7442 = vst [vmem:[#allocation62_spill] sm:$0xff] %v4017_v16  ;;  %v4047_v49 = vmul.f32 %v7440_v30, %v4005_v27  ;;  %v4050_v60 = vadd.f32 %v475_v18, %v3744_v38  ;;  %v4053_v59 = vadd.f32 %v479_v51, %v3747_v19  ;;  %v4056_v58 = vadd.f32 %v483_v0, %v3750_v43  ;;  %v7457_v43 = vld [vmem:[#allocation65_spill] sm:$0xff]  ;;  %v7466_v16 = vld [vmem:[#allocation98_spill] sm:$0xff] }
  0xe7   :  { %7445 = vst [vmem:[#allocation70_spill] sm:$0xff] %v4023_v26  ;;  %v4060_v28 = vmul.f32 %v7456_v46, %v3977_v62  ;;  %v4064_v41 = vmul.f32 %v7456_v46, %v3980_v57  ;;  %v4068_v30 = vmul.f32 %v7456_v46, %v3983_v56  ;;  %v4072_v38 = vmul.f32 %v7456_v46, %v3993_v61 }
  0xe8   :  { %7446 = vst [vmem:[#allocation71_spill] sm:$0xff] %v4025_v11  ;;  %v4076_v19 = vmul.f32 %v7456_v46, %v3996_v22  ;;  %v1106_v47 = vmul.f32 %v7457_v43, %v3977_v62  ;;  %v1110_v13 = vmul.f32 %v7457_v43, %v3980_v57  ;;  %v1114_v7 = vmul.f32 %v7457_v43, %v3983_v56 }
  0xe9   :  { %7447 = vst [vmem:[#allocation72_spill] sm:$0xff] %v4027_v10  ;;  %v1118_v20 = vmul.f32 %v7457_v43, %v3993_v61  ;;  %v1122_v54 = vmul.f32 %v7457_v43, %v3996_v22  ;;  %v1126_v12 = vmul.f32 %v7457_v43, %v3999_v24  ;;  %v1130_v18 = vmul.f32 %v7457_v43, %v4002_v25 }
  0xea   :  { %7448 = vst [vmem:[#allocation73_spill] sm:$0xff] %v4031_v2  ;;  %v1134_v51 = vmul.f32 %v7457_v43, %v4005_v27  ;;  %v4095_v0 = vadd.f32 %v1106_v47, %v3792_v45  ;;  %v4098_v31 = vadd.f32 %v1110_v13, %v3795_v4  ;;  %v4101_v10 = vadd.f32 %v1114_v7, %v3798_v33  ;;  %v7458_v4 = vld [vmem:[#allocation66_spill] sm:$0xff]  ;;  %v7485_v2 = vld [vmem:[#allocation107_spill] sm:$0xff] }
  0xeb   :  { %7449 = vst [vmem:[#allocation74_spill] sm:$0xff] %v4035_v52  ;;  %v4104_v11 = vadd.f32 %v1118_v20, %v3801_v48  ;;  %v4107_v26 = vadd.f32 %v1122_v54, %v3804_v17  ;;  %v4110_v1 = vadd.f32 %v1126_v12, %v3807_v39  ;;  %v4113_v43 = vadd.f32 %v1130_v18, %v3810_v6 }
  0xec   :  { %7450 = vst [vmem:[#allocation50_spill] sm:$0xff] %v4039_v53  ;;  %v4116_v45 = vadd.f32 %v1134_v51, %v3813_v37  ;;  %v1419_v47 = vmul.f32 %v7458_v4, %v3977_v62  ;;  %v1423_v33 = vmul.f32 %v7458_v4, %v3980_v57  ;;  %v1427_v48 = vmul.f32 %v7458_v4, %v3983_v56  ;;  %v7483_v53 = vld [vmem:[#allocation106_spill] sm:$0xff] }
  0xed   :  { %7451 = vst [vmem:[#allocation51_spill] sm:$0xff] %v4043_v14  ;;  %v1431_v17 = vmul.f32 %v7458_v4, %v3993_v61  ;;  %v1435_v39 = vmul.f32 %v7458_v4, %v3996_v22  ;;  %v1439_v6 = vmul.f32 %v7458_v4, %v3999_v24  ;;  %v1443_v37 = vmul.f32 %v7458_v4, %v4002_v25 }
  0xee   :  { %7452 = vst [vmem:[#allocation52_spill] sm:$0xff] %v4047_v49  ;;  %v1447_v13 = vmul.f32 %v7458_v4, %v4005_v27  ;;  %v4135_v7 = vadd.f32 %v1419_v47, %v3816_v42  ;;  %v4138_v20 = vadd.f32 %v1423_v33, %v3819_v55  ;;  %v4141_v54 = vadd.f32 %v1427_v48, %v3822_v15  ;;  %v7459_v55 = vld [vmem:[#allocation67_spill] sm:$0xff]  ;;  %v7472_v49 = vld [vmem:[#allocation101_spill] sm:$0xff] }
  0xef   :  { %7453 = vst [vmem:[#allocation53_spill] sm:$0xff] %v4050_v60  ;;  %v4144_v12 = vadd.f32 %v1431_v17, %v3825_v63  ;;  %v4147_v18 = vadd.f32 %v1435_v39, %v3828_v8  ;;  %v4150_v51 = vadd.f32 %v1439_v6, %v3831_v5  ;;  %v4153_v4 = vadd.f32 %v1443_v37, %v3834_v34 }
  0xf0   :  { %7454 = vst [vmem:[#allocation54_spill] sm:$0xff] %v4053_v59  ;;  %v4156_v42 = vadd.f32 %v1447_v13, %v3837_v40  ;;  %v1732_v47 = vmul.f32 %v7459_v55, %v3977_v62  ;;  %v1736_v15 = vmul.f32 %v7459_v55, %v3980_v57  ;;  %v1740_v63 = vmul.f32 %v7459_v55, %v3983_v56  ;;  %v7470_v59 = vld [vmem:[#allocation100_spill] sm:$0xff] }
  0xf1   :  { %7455 = vst [vmem:[#allocation55_spill] sm:$0xff] %v4056_v58  ;;  %v1744_v8 = vmul.f32 %v7459_v55, %v3993_v61  ;;  %v1748_v5 = vmul.f32 %v7459_v55, %v3996_v22  ;;  %v1752_v34 = vmul.f32 %v7459_v55, %v3999_v24  ;;  %v1756_v40 = vmul.f32 %v7459_v55, %v4002_v25 }
  0xf2   :  { %v1760_v33 = vmul.f32 %v7459_v55, %v4005_v27  ;;  %v4175_v48 = vadd.f32 %v1732_v47, %v3840_v32  ;;  %v4178_v17 = vadd.f32 %v1736_v15, %v3843_v9  ;;  %v4181_v39 = vadd.f32 %v1740_v63, %v3846_v21  ;;  %v7460_v32 = vld [vmem:[#allocation94_spill] sm:$0xff]  ;;  %v7461_v9 = vld [vmem:[#allocation44_spill] sm:$0xff] }
  0xf3   :  { %v4184_v6 = vadd.f32 %v1744_v8, %v3849_v44  ;;  %v4187_v37 = vadd.f32 %v1748_v5, %v3852_v3  ;;  %v4190_v13 = vadd.f32 %v1752_v34, %v3855_v35  ;;  %v4193_v55 = vadd.f32 %v1756_v40, %v3858_v36  ;;  %v7462_v5 = vld [vmem:[#allocation95_spill] sm:$0xff]  ;;  %v7463_v40 = vld [vmem:[#allocation96_spill] sm:$0xff] }
  0xf4   :  { %v4196_v47 = vadd.f32 %v1760_v33, %v7460_v32  ;;  %v2045_v15 = vmul.f32 %v7461_v9, %v3977_v62  ;;  %v2049_v21 = vmul.f32 %v7461_v9, %v3980_v57  ;;  %v2053_v44 = vmul.f32 %v7461_v9, %v3983_v56  ;;  %v7464_v32 = vld [vmem:[#allocation97_spill] sm:$0xff] }
  0xf5   :  { %v2057_v3 = vmul.f32 %v7461_v9, %v3993_v61  ;;  %v2061_v35 = vmul.f32 %v7461_v9, %v3996_v22  ;;  %v2065_v36 = vmul.f32 %v7461_v9, %v3999_v24  ;;  %v2069_v63 = vmul.f32 %v7461_v9, %v4002_v25 }
  0xf6   :  { %v2073_v8 = vmul.f32 %v7461_v9, %v4005_v27  ;;  %v4215_v34 = vadd.f32 %v2045_v15, %v7462_v5  ;;  %v4218_v33 = vadd.f32 %v2049_v21, %v7463_v40  ;;  %v4221_v23 = vadd.f32 %v2053_v44, %v7464_v32  ;;  %v7474_v15 = vld [vmem:[#allocation102_spill] sm:$0xff]  ;;  %v7476_v21 = vld [vmem:[#allocation45_spill] sm:$0xff] }
  0xf7   :  { %v4224_v50 = vadd.f32 %v2057_v3, %v7466_v16  ;;  %v4227_v58 = vadd.f32 %v2061_v35, %v7468_v29  ;;  %v4230_v60 = vadd.f32 %v2065_v36, %v7470_v59  ;;  %v4233_v9 = vadd.f32 %v2069_v63, %v7472_v49  ;;  %v7477_v36 = vld [vmem:[#allocation103_spill] sm:$0xff] }
  0xf8   :  { %7465 = vst [vmem:[#allocation56_spill] sm:$0xff] %v4221_v23  ;;  %v4236_v5 = vadd.f32 %v2073_v8, %v7474_v15  ;;  %v2358_v40 = vmul.f32 %v7476_v21, %v3977_v62  ;;  %v2362_v44 = vmul.f32 %v7476_v21, %v3980_v57  ;;  %v2366_v16 = vmul.f32 %v7476_v21, %v3983_v56  ;;  %v7479_v8 = vld [vmem:[#allocation104_spill] sm:$0xff]  ;;  %v7481_v15 = vld [vmem:[#allocation105_spill] sm:$0xff] }
  0xf9   :  { %7467 = vst [vmem:[#allocation57_spill] sm:$0xff] %v4224_v50  ;;  %v2370_v29 = vmul.f32 %v7476_v21, %v3993_v61  ;;  %v2374_v59 = vmul.f32 %v7476_v21, %v3996_v22  ;;  %v2378_v49 = vmul.f32 %v7476_v21, %v3999_v24  ;;  %v2382_v3 = vmul.f32 %v7476_v21, %v4002_v25 }
  0xfa   :  { %7469 = vst [vmem:[#allocation63_spill] sm:$0xff] %v4227_v58  ;;  %v2386_v35 = vmul.f32 %v7476_v21, %v4005_v27  ;;  %v4255_v63 = vadd.f32 %v2358_v40, %v7477_v36  ;;  %v4258_v32 = vadd.f32 %v2362_v44, %v7479_v8  ;;  %v4261_v14 = vadd.f32 %v2366_v16, %v7481_v15  ;;  %v7489_v58 = vld [vmem:[#allocation109_spill] sm:$0xff]  ;;  %v7491_v40 = vld [vmem:[#allocation110_spill] sm:$0xff] }
  0xfb   :  { %7471 = vst [vmem:[#allocation64_spill] sm:$0xff] %v4230_v60  ;;  %v4264_v52 = vadd.f32 %v2370_v29, %v7483_v53  ;;  %v4273_v21 = vadd.f32 %v2382_v3, %v7489_v58  ;;  %v7493_v44 = vld [vmem:[#allocation46_spill] sm:$0xff] }
  0xfc   :  { %7473 = vst [vmem:[#allocation65_spill] sm:$0xff] %v4233_v9  ;;  %v7487_v9 = vld [vmem:[#allocation108_spill] sm:$0xff]  ;;  %v4276_v36 = vadd.f32 %v2386_v35, %v7491_v40  ;;  %v2671_v8 = vmul.f32 %v7493_v44, %v3977_v62  ;;  %v2675_v16 = vmul.f32 %v7493_v44, %v3980_v57  ;;  %v2679_v53 = vmul.f32 %v7493_v44, %v3983_v56  ;;  %v7494_v57 = vld [vmem:[#allocation111_spill] sm:$0xff] }
  0xfd   :  { %7475 = vst [vmem:[#allocation66_spill] sm:$0xff] %v4236_v5  ;;  %v4267_v5 = vadd.f32 %v2374_v59, %v7485_v2  ;;  %v4270_v60 = vadd.f32 %v2378_v49, %v7487_v9  ;;  %v2683_v2 = vmul.f32 %v7493_v44, %v3993_v61  ;;  %v2687_v9 = vmul.f32 %v7493_v44, %v3996_v22  ;;  %v145_v59 = vpop.permute.xlu1 %144  ;;  %v7496_v56 = vld [vmem:[#allocation112_spill] sm:$0xff]  ;;  %v7498_v61 = vld [vmem:[#allocation113_spill] sm:$0xff]  ;;  %v7500_v22 = vld [vmem:[#allocation114_spill] sm:$0xff] }
  0xfe   :  { %7478 = vst [vmem:[#allocation67_spill] sm:$0xff] %v4255_v63  ;;  %v2691_v58 = vmul.f32 %v7493_v44, %v3999_v24  ;;  %v2695_v29 = vmul.f32 %v7493_v44, %v4002_v25  ;;  %v2699_v62 = vmul.f32 %v7493_v44, %v4005_v27  ;;  %v4295_v49 = vadd.f32 %v2671_v8, %v7494_v57  ;;  %v7502_v40 = vld [vmem:[#allocation115_spill] sm:$0xff]  ;;  %v7506_v44 = vld [vmem:[#allocation117_spill] sm:$0xff]  ;;  %v7508_v8 = vld [vmem:[#allocation118_spill] sm:$0xff] }
  0xff   :  { %7480 = vst [vmem:[#allocation94_spill] sm:$0xff] %v4258_v32  ;;  %v4298_v3 = vadd.f32 %v2675_v16, %v7496_v56  ;;  %v4301_v35 = vadd.f32 %v2679_v53, %v7498_v61  ;;  %v4304_v15 = vadd.f32 %v2683_v2, %v7500_v22  ;;  %v813_v16 = vmul.f32 %v7456_v46, %v3999_v24  ;;  %v7510_v2 = vld [vmem:[#allocation33_spill] sm:$0xff]  ;;  %v7511_v61 = vld [vmem:[#allocation34_spill] sm:$0xff] }
 0x100   :  { %7482 = vst [vmem:[#allocation44_spill] sm:$0xff] %v4261_v14  ;;  %v4316_v57 = vadd.f32 %v2699_v62, %v7508_v8  ;;  %v817_v53 = vmul.f32 %v7456_v46, %v4002_v25  ;;  %v464_v56 = vadd.f32 %v7510_v2, %v145_v59  ;;  %v7515_v8 = vld [vmem:[#allocation31_spill] sm:$0xff]  ;;  %v7517_v24 = vld [vmem:[#allocation37_spill] sm:$0xff] }
 0x101   :  { %7484 = vst [vmem:[#allocation95_spill] sm:$0xff] %v4264_v52  ;;  %v7530_v52 = vld [vmem:[#allocation93_spill] sm:$0xff] }
 0x102   :  { %7486 = vst [vmem:[#allocation96_spill] sm:$0xff] %v4267_v5  ;;  %v4313_v5 = vadd.f32 %v2695_v29, %v7506_v44  ;;  %v7513_v29 = vld [vmem:[#allocation36_spill] sm:$0xff]  ;;  %v7514_v44 = vld [vmem:[#allocation41_spill] sm:$0xff] }
 0x103   :  { %7488 = vst [vmem:[#allocation97_spill] sm:$0xff] %v4270_v60  ;;  %v2660_v62 = vadd.f32 %v7514_v44, %v145_v59 }
 0x104   :  { %7490 = vst [vmem:[#allocation98_spill] sm:$0xff] %v4273_v21  ;;  %v7504_v21 = vld [vmem:[#allocation116_spill] sm:$0xff] }
 0x105   :  { %7492 = vst [vmem:[#allocation99_spill] sm:$0xff] %v4276_v36  ;;  %v4307_v36 = vadd.f32 %v2687_v9, %v7502_v40  ;;  %v4310_v60 = vadd.f32 %v2691_v58, %v7504_v21  ;;  %v782_v9 = vadd.f32 %v7511_v61, %v145_v59  ;;  %v821_v21 = vmul.f32 %v7456_v46, %v4005_v27  ;;  %v7512_v58 = vld [vmem:[#allocation35_spill] sm:$0xff]  ;;  %v7522_v46 = vld [vmem:[#allocation88_spill] sm:$0xff] }
 0x106   :  { %7495 = vst [vmem:[#allocation100_spill] sm:$0xff] %v4295_v49  ;;  %v1095_v22 = vadd.f32 %v7512_v58, %v145_v59  ;;  %v1408_v40 = vadd.f32 %v7513_v29, %v145_v59  ;;  %v842_v58 = vadd.f32 %v4068_v30, %v7522_v46  ;;  %v7523_v29 = vld [vmem:[#allocation82_spill] sm:$0xff]  ;;  %v7532_v30 = vld [vmem:[#allocation79_spill] sm:$0xff] }
 0x107   :  { %7497 = vst [vmem:[#allocation101_spill] sm:$0xff] %v4298_v3  ;;  %v4342_v44 = vadd.f32 %v7523_v29, %v2660_v62  ;;  %v7527_v3 = vld [vmem:[#allocation91_spill] sm:$0xff] }
 0x108   :  { %7499 = vst [vmem:[#allocation102_spill] sm:$0xff] %v4301_v35  ;;  %v7521_v35 = vld [vmem:[#allocation87_spill] sm:$0xff]  ;;  %v1416_v46 = vadd.f32 %v7532_v30, %v1408_v40 }
 0x109   :  { %7501 = vst [vmem:[#allocation45_spill] sm:$0xff] %v4304_v15  ;;  %v7520_v15 = vld [vmem:[#allocation86_spill] sm:$0xff]  ;;  %v833_v27 = vadd.f32 %v4064_v41, %v7521_v35  ;;  %v887_v41 = vadd.f32 %v821_v21, %v7530_v52  ;;  %v7533_v62 = vld [vmem:[#allocation75_spill] sm:$0xff]  ;;  %v7541_v52 = vld [vmem:[#allocation77_spill] sm:$0xff] }
 0x10a   :  { %7503 = vst [vmem:[#allocation103_spill] sm:$0xff] %v4307_v36  ;;  %v7519_v36 = vld [vmem:[#allocation40_spill] sm:$0xff]  ;;  %v824_v61 = vadd.f32 %v4060_v28, %v7520_v15  ;;  %v7531_v35 = vld [vmem:[#allocation22_spill] sm:$0xff] }
 0x10b   :  { %7505 = vst [vmem:[#allocation104_spill] sm:$0xff] %v4310_v60  ;;  %v7518_v60 = vld [vmem:[#allocation39_spill] sm:$0xff]  ;;  %v2347_v2 = vadd.f32 %v7519_v36, %v145_v59  ;;  %v869_v36 = vadd.f32 %v813_v16, %v7527_v3  ;;  %v7529_v28 = vld [vmem:[#allocation92_spill] sm:$0xff]  ;;  %v1103_v14 = vadd.f32 %v7531_v35, %v1095_v22  ;;  %v7537_v3 = vld [vmem:[#allocation26_spill] sm:$0xff] }
 0x10c   :  { %7507 = vst [vmem:[#allocation105_spill] sm:$0xff] %v4313_v5  ;;  %v1721_v5 = vadd.f32 %v7517_v24, %v145_v59  ;;  %v2034_v25 = vadd.f32 %v7518_v60, %v145_v59  ;;  %v7526_v24 = vld [vmem:[#allocation90_spill] sm:$0xff]  ;;  %v7528_v59 = vld [vmem:[#allocation32_spill] sm:$0xff]  ;;  %v878_v15 = vadd.f32 %v817_v53, %v7529_v28  ;;  %v7547_v35 = vld [vmem:[#allocation43_spill] sm:$0xff] }
 0x10d   :  { %7509 = vst [vmem:[#allocation106_spill] sm:$0xff] %v4316_v57  ;;  %v4330_v57 = vadd.f32 %v7515_v8, %v464_v56  ;;  %v7525_v56 = vld [vmem:[#allocation89_spill] sm:$0xff]  ;;  %v860_v60 = vadd.f32 %v4076_v19, %v7526_v24  ;;  %v790_v49 = vadd.f32 %v7528_v59, %v782_v9  ;;  %v4363_v16 = vadd.f32 %v7537_v3, %v2347_v2  ;;  %v7539_v9 = vld [vmem:[#allocation76_spill] sm:$0xff]  ;;  %v7543_v22 = vld [vmem:[#allocation78_spill] sm:$0xff] }
 0x10e   :  { %7524 = vst [vmem:[#allocation108_spill] sm:$0xff] %v4342_v44  ;;  %v851_v8 = vadd.f32 %v4072_v38, %v7525_v56  ;;  %v7535_v38 = vld [vmem:[#allocation80_spill] sm:$0xff]  ;;  %v7536_v44 = vld [vmem:[#allocation81_spill] sm:$0xff]  ;;  %v7545_v24 = vld [vmem:[#allocation42_spill] sm:$0xff]  ;;  %v1107_v23 = vmul.f32 %v1103_v14, %v7533_v62 }
 0x10f   :  { %7516 = vst [vmem:[#allocation107_spill] sm:$0xff] %v4330_v57  ;;  %v4356_v29 = vmul.f32 %v4330_v57, %v7533_v62  ;;  %v1729_v56 = vadd.f32 %v7535_v38, %v1721_v5  ;;  %v4360_v19 = vadd.f32 %v7536_v44, %v2034_v25  ;;  %v4367_v53 = vmul.f32 %v4330_v57, %v7539_v9  ;;  %v7548_v38 = vld [vmem:[#allocation29_spill] sm:$0xff] }
 0x110   :  { %7538 = vst [vmem:[#allocation110_spill] sm:$0xff] %v4363_v16  ;;  %v4371_v21 = vmul.f32 %v4330_v57, %v7541_v52  ;;  %v4375_v40 = vmul.f32 %v4330_v57, %v7543_v22  ;;  %v4379_v5 = vmul.f32 %v4330_v57, %v7545_v24  ;;  %v794_v25 = vmul.f32 %v790_v49, %v7533_v62 }
 0x111   :  { %7534 = vst [vmem:[#allocation109_spill] sm:$0xff] %v4356_v29  ;;  %v798_v2 = vmul.f32 %v790_v49, %v7539_v9  ;;  %v802_v44 = vmul.f32 %v790_v49, %v7541_v52  ;;  %v806_v59 = vmul.f32 %v790_v49, %v7543_v22  ;;  %v810_v28 = vmul.f32 %v790_v49, %v7545_v24 }
 0x112   :  { %7540 = vst [vmem:[#allocation46_spill] sm:$0xff] %v4367_v53  ;;  %v814_v30 = vmul.f32 %v790_v49, %v7547_v35  ;;  %v818_v3 = vmul.f32 %v790_v49, %v7548_v38  ;;  %v4389_v53 = vadd.f32 %v824_v61, %v794_v25  ;;  %v1115_v61 = vmul.f32 %v1103_v14, %v7541_v52 }
 0x113   :  { %7542 = vst [vmem:[#allocation111_spill] sm:$0xff] %v4371_v21  ;;  %v7549_v21 = vld [vmem:[#allocation30_spill] sm:$0xff]  ;;  %v4391_v29 = vadd.f32 %v833_v27, %v798_v2  ;;  %v4395_v57 = vadd.f32 %v851_v8, %v806_v59  ;;  %v4397_v32 = vadd.f32 %v860_v60, %v810_v28  ;;  %v1119_v27 = vmul.f32 %v1103_v14, %v7543_v22 }
 0x114   :  { %7544 = vst [vmem:[#allocation112_spill] sm:$0xff] %v4375_v40  ;;  %v822_v40 = vmul.f32 %v790_v49, %v7549_v21  ;;  %v4399_v63 = vadd.f32 %v869_v36, %v814_v30  ;;  %v4401_v16 = vadd.f32 %v878_v15, %v818_v3  ;;  %v1111_v49 = vmul.f32 %v1103_v14, %v7539_v9 }
 0x115   :  { %7546 = vst [vmem:[#allocation113_spill] sm:$0xff] %v4379_v5  ;;  %v4393_v5 = vadd.f32 %v842_v58, %v802_v44  ;;  %v1123_v58 = vmul.f32 %v1103_v14, %v7545_v24  ;;  %v1127_v8 = vmul.f32 %v1103_v14, %v7547_v35  ;;  %v1131_v60 = vmul.f32 %v1103_v14, %v7548_v38 }
 0x116   :  { %v4403_v50 = vadd.f32 %v887_v41, %v822_v40  ;;  %v1135_v36 = vmul.f32 %v1103_v14, %v7549_v21  ;;  %v4414_v15 = vadd.f32 %v4095_v0, %v1107_v23  ;;  %v4417_v41 = vadd.f32 %v4098_v31, %v1111_v49 }
 0x117   :  { %v4420_v40 = vadd.f32 %v4101_v10, %v1115_v61  ;;  %v4423_v25 = vadd.f32 %v4104_v11, %v1119_v27  ;;  %v4426_v2 = vadd.f32 %v4107_v26, %v1123_v58  ;;  %v4429_v44 = vadd.f32 %v4110_v1, %v1127_v8 }
 0x118   :  { %v4432_v14 = vadd.f32 %v4113_v43, %v1131_v60  ;;  %v4435_v23 = vadd.f32 %v4116_v45, %v1135_v36  ;;  %v1420_v31 = vmul.f32 %v1416_v46, %v7533_v62  ;;  %v1424_v10 = vmul.f32 %v1416_v46, %v7539_v9 }
 0x119   :  { %v1428_v0 = vmul.f32 %v1416_v46, %v7541_v52  ;;  %v1432_v11 = vmul.f32 %v1416_v46, %v7543_v22  ;;  %v1436_v26 = vmul.f32 %v1416_v46, %v7545_v24  ;;  %v1440_v59 = vmul.f32 %v1416_v46, %v7547_v35 }
 0x11a   :  { %v1444_v1 = vmul.f32 %v1416_v46, %v7548_v38  ;;  %v1448_v43 = vmul.f32 %v1416_v46, %v7549_v21  ;;  %v4446_v28 = vadd.f32 %v4135_v7, %v1420_v31  ;;  %v4449_v45 = vadd.f32 %v4138_v20, %v1424_v10 }
 0x11b   :  { %v4452_v30 = vadd.f32 %v4141_v54, %v1428_v0  ;;  %v4455_v3 = vadd.f32 %v4144_v12, %v1432_v11  ;;  %v4458_v49 = vadd.f32 %v4147_v18, %v1436_v26  ;;  %v4461_v61 = vadd.f32 %v4150_v51, %v1440_v59  ;;  %v7566_v59 = vld [vmem:[#allocation56_spill] sm:$0xff] }
 0x11c   :  { %v4464_v46 = vadd.f32 %v4153_v4, %v1444_v1  ;;  %v4467_v7 = vadd.f32 %v4156_v42, %v1448_v43  ;;  %v1733_v20 = vmul.f32 %v1729_v56, %v7533_v62  ;;  %v1737_v54 = vmul.f32 %v1729_v56, %v7539_v9  ;;  %v7568_v43 = vld [vmem:[#allocation57_spill] sm:$0xff] }
 0x11d   :  { %7550 = vst [vmem:[#allocation114_spill] sm:$0xff] %v4452_v30  ;;  %v1741_v27 = vmul.f32 %v1729_v56, %v7541_v52  ;;  %v1745_v12 = vmul.f32 %v1729_v56, %v7543_v22  ;;  %v1749_v18 = vmul.f32 %v1729_v56, %v7545_v24  ;;  %v1753_v58 = vmul.f32 %v1729_v56, %v7547_v35 }
 0x11e   :  { %7551 = vst [vmem:[#allocation115_spill] sm:$0xff] %v4455_v3  ;;  %v1757_v51 = vmul.f32 %v1729_v56, %v7548_v38  ;;  %v1761_v4 = vmul.f32 %v1729_v56, %v7549_v21  ;;  %v4478_v8 = vadd.f32 %v4175_v48, %v1733_v20  ;;  %v4481_v42 = vadd.f32 %v4178_v17, %v1737_v54  ;;  %v7570_v54 = vld [vmem:[#allocation63_spill] sm:$0xff] }
 0x11f   :  { %7552 = vst [vmem:[#allocation116_spill] sm:$0xff] %v4458_v49  ;;  %v4484_v60 = vadd.f32 %v4181_v39, %v1741_v27  ;;  %v4487_v36 = vadd.f32 %v4184_v6, %v1745_v12  ;;  %v4490_v31 = vadd.f32 %v4187_v37, %v1749_v18  ;;  %v4493_v10 = vadd.f32 %v4190_v13, %v1753_v58  ;;  %v7572_v12 = vld [vmem:[#allocation64_spill] sm:$0xff]  ;;  %v7574_v58 = vld [vmem:[#allocation65_spill] sm:$0xff] }
 0x120   :  { %7553 = vst [vmem:[#allocation117_spill] sm:$0xff] %v4461_v61  ;;  %v4496_v56 = vadd.f32 %v4193_v55, %v1757_v51  ;;  %v4499_v48 = vadd.f32 %v4196_v47, %v1761_v4  ;;  %v2046_v17 = vmul.f32 %v4360_v19, %v7533_v62  ;;  %v2050_v39 = vmul.f32 %v4360_v19, %v7539_v9 }
 0x121   :  { %7554 = vst [vmem:[#allocation118_spill] sm:$0xff] %v4464_v46  ;;  %v2054_v6 = vmul.f32 %v4360_v19, %v7541_v52  ;;  %v2058_v37 = vmul.f32 %v4360_v19, %v7543_v22  ;;  %v2062_v13 = vmul.f32 %v4360_v19, %v7545_v24  ;;  %v2066_v55 = vmul.f32 %v4360_v19, %v7547_v35 }
 0x122   :  { %7555 = vst [vmem:[#allocation33_spill] sm:$0xff] %v4467_v7  ;;  %v2070_v47 = vmul.f32 %v4360_v19, %v7548_v38  ;;  %v2074_v0 = vmul.f32 %v4360_v19, %v7549_v21  ;;  %v4518_v11 = vadd.f32 %v4215_v34, %v2046_v17  ;;  %v4521_v26 = vadd.f32 %v4218_v33, %v2050_v39  ;;  %v7576_v34 = vld [vmem:[#allocation66_spill] sm:$0xff] }
 0x123   :  { %7556 = vst [vmem:[#allocation34_spill] sm:$0xff] %v4478_v8  ;;  %v4524_v1 = vadd.f32 %v7566_v59, %v2054_v6  ;;  %v4527_v20 = vadd.f32 %v7568_v43, %v2058_v37  ;;  %v4530_v27 = vadd.f32 %v7570_v54, %v2062_v13  ;;  %v4533_v18 = vadd.f32 %v7572_v12, %v2066_v55  ;;  %v7578_v33 = vld [vmem:[#allocation110_spill] sm:$0xff]  ;;  %v7583_v12 = vld [vmem:[#allocation44_spill] sm:$0xff] }
 0x124   :  { %7557 = vst [vmem:[#allocation35_spill] sm:$0xff] %v4481_v42  ;;  %v4536_v19 = vadd.f32 %v7574_v58, %v2070_v47  ;;  %v4539_v51 = vadd.f32 %v7576_v34, %v2074_v0  ;;  %v2359_v4 = vmul.f32 %v7578_v33, %v7533_v62  ;;  %v2363_v17 = vmul.f32 %v7578_v33, %v7539_v9  ;;  %v7579_v0 = vld [vmem:[#allocation67_spill] sm:$0xff]  ;;  %v7581_v43 = vld [vmem:[#allocation94_spill] sm:$0xff] }
 0x125   :  { %7558 = vst [vmem:[#allocation36_spill] sm:$0xff] %v4484_v60  ;;  %v2367_v39 = vmul.f32 %v7578_v33, %v7541_v52  ;;  %v2371_v6 = vmul.f32 %v7578_v33, %v7543_v22  ;;  %v2375_v37 = vmul.f32 %v7578_v33, %v7545_v24  ;;  %v2379_v13 = vmul.f32 %v7578_v33, %v7547_v35  ;;  %v7585_v34 = vld [vmem:[#allocation95_spill] sm:$0xff] }
 0x126   :  { %7559 = vst [vmem:[#allocation41_spill] sm:$0xff] %v4487_v36  ;;  %v2383_v55 = vmul.f32 %v7578_v33, %v7548_v38  ;;  %v2387_v47 = vmul.f32 %v7578_v33, %v7549_v21  ;;  %v4558_v59 = vadd.f32 %v7579_v0, %v2359_v4  ;;  %v4561_v54 = vadd.f32 %v7581_v43, %v2363_v17  ;;  %v7593_v4 = vld [vmem:[#allocation99_spill] sm:$0xff]  ;;  %v7595_v17 = vld [vmem:[#allocation108_spill] sm:$0xff] }
 0x127   :  { %7560 = vst [vmem:[#allocation31_spill] sm:$0xff] %v4490_v31  ;;  %v4564_v58 = vadd.f32 %v7583_v12, %v2367_v39  ;;  %v2672_v43 = vmul.f32 %v7595_v17, %v7533_v62  ;;  %v2676_v39 = vmul.f32 %v7595_v17, %v7539_v9  ;;  %v2700_v62 = vmul.f32 %v7595_v17, %v7549_v21  ;;  %v7602_v12 = vld [vmem:[#allocation45_spill] sm:$0xff] }
 0x128   :  { %7561 = vst [vmem:[#allocation37_spill] sm:$0xff] %v4493_v10  ;;  %v4579_v0 = vadd.f32 %v7593_v4, %v2387_v47  ;;  %v7600_v47 = vld [vmem:[#allocation102_spill] sm:$0xff]  ;;  %v7604_v4 = vld [vmem:[#allocation103_spill] sm:$0xff] }
 0x129   :  { %7562 = vst [vmem:[#allocation39_spill] sm:$0xff] %v4496_v56  ;;  %v7638_v56 = vld [vmem:[#allocation68_spill] sm:$0xff] }
 0x12a   :  { %7563 = vst [vmem:[#allocation40_spill] sm:$0xff] %v4499_v48 }
 0x12b   :  { %7564 = vst [vmem:[#allocation86_spill] sm:$0xff] %v4518_v11 }
 0x12c   :  { %7565 = vst [vmem:[#allocation87_spill] sm:$0xff] %v4521_v26  ;;  %v7634_v26 = vld [vmem:[#allocation59_spill] sm:$0xff] }
 0x12d   :  { %7567 = vst [vmem:[#allocation88_spill] sm:$0xff] %v4524_v1  ;;  %v7591_v1 = vld [vmem:[#allocation98_spill] sm:$0xff] }
 0x12e   :  { %7569 = vst [vmem:[#allocation82_spill] sm:$0xff] %v4527_v20  ;;  %v4576_v33 = vadd.f32 %v7591_v1, %v2383_v55  ;;  %v2692_v1 = vmul.f32 %v7595_v17, %v7547_v35  ;;  %v7598_v55 = vld [vmem:[#allocation101_spill] sm:$0xff] }
 0x12f   :  { %7571 = vst [vmem:[#allocation89_spill] sm:$0xff] %v4530_v27  ;;  %v7589_v27 = vld [vmem:[#allocation97_spill] sm:$0xff] }
 0x130   :  { %7573 = vst [vmem:[#allocation90_spill] sm:$0xff] %v4533_v18  ;;  %v4573_v20 = vadd.f32 %v7589_v27, %v2379_v13  ;;  %v2688_v27 = vmul.f32 %v7595_v17, %v7545_v24  ;;  %v7596_v13 = vld [vmem:[#allocation100_spill] sm:$0xff] }
 0x131   :  { %7575 = vst [vmem:[#allocation91_spill] sm:$0xff] %v4536_v19  ;;  %v7587_v19 = vld [vmem:[#allocation96_spill] sm:$0xff]  ;;  %v4598_v9 = vadd.f32 %v7596_v13, %v2672_v43  ;;  %v7610_v13 = vld [vmem:[#allocation106_spill] sm:$0xff] }
 0x132   :  { %7577 = vst [vmem:[#allocation32_spill] sm:$0xff] %v4539_v51  ;;  %v4567_v51 = vadd.f32 %v7585_v34, %v2371_v6  ;;  %v4570_v18 = vadd.f32 %v7587_v19, %v2375_v37  ;;  %v2680_v6 = vmul.f32 %v7595_v17, %v7541_v52  ;;  %v2684_v19 = vmul.f32 %v7595_v17, %v7543_v22  ;;  %v4609_v34 = vpop.permute.xlu1 %148 }
 0x133   :  { %7580 = vst [vmem:[#allocation92_spill] sm:$0xff] %v4558_v59  ;;  %v2696_v37 = vmul.f32 %v7595_v17, %v7548_v38  ;;  %v4601_v52 = vadd.f32 %v7598_v55, %v2676_v39  ;;  %v7608_v17 = vld [vmem:[#allocation105_spill] sm:$0xff]  ;;  %v4621_v39 = vadd.f32 %v7610_v13, %v2700_v62  ;;  %v7612_v55 = vld [vmem:[#allocation27_spill] sm:$0xff]  ;;  %v7619_v62 = vld [vmem:[#allocation84_spill] sm:$0xff] }
 0x134   :  { %7582 = vst [vmem:[#allocation93_spill] sm:$0xff] %v4561_v54  ;;  %v4604_v22 = vadd.f32 %v7600_v47, %v2680_v6  ;;  %v4607_v24 = vadd.f32 %v7602_v12, %v2684_v19  ;;  %v7613_v6 = vld [vmem:[#allocation73_spill] sm:$0xff]  ;;  %v7614_v19 = vld [vmem:[#allocation107_spill] sm:$0xff] }
 0x135   :  { %7584 = vst [vmem:[#allocation22_spill] sm:$0xff] %v4564_v58  ;;  %v4618_v43 = vadd.f32 %v7608_v17, %v2696_v37  ;;  %v533_v47 = vadd.f32 %v7613_v6, %v7612_v55  ;;  %v496_v12 = vmul.f32 %v7614_v19, %v7547_v35  ;;  %v7617_v37 = vld [vmem:[#allocation83_spill] sm:$0xff]  ;;  %v7618_v17 = vld [vmem:[#allocation50_spill] sm:$0xff]  ;;  %v7623_v35 = vld [vmem:[#allocation52_spill] sm:$0xff] }
 0x136   :  { %7586 = vst [vmem:[#allocation79_spill] sm:$0xff] %v4567_v51  ;;  %v7620_v13 = vld [vmem:[#allocation51_spill] sm:$0xff]  ;;  %v7631_v51 = vld [vmem:[#allocation112_spill] sm:$0xff] }
 0x137   :  { %7588 = vst [vmem:[#allocation75_spill] sm:$0xff] %v4570_v18  ;;  %v7621_v55 = vld [vmem:[#allocation47_spill] sm:$0xff] }
 0x138   :  { %7590 = vst [vmem:[#allocation80_spill] sm:$0xff] %v4573_v20  ;;  %v465_v6 = vadd.f32 %v7621_v55, %v4609_v34  ;;  %v7629_v18 = vld [vmem:[#allocation111_spill] sm:$0xff]  ;;  %v7633_v55 = vld [vmem:[#allocation58_spill] sm:$0xff] }
 0x139   :  { %7592 = vst [vmem:[#allocation81_spill] sm:$0xff] %v4576_v33  ;;  %v7606_v33 = vld [vmem:[#allocation104_spill] sm:$0xff] }
 0x13a   :  { %7594 = vst [vmem:[#allocation26_spill] sm:$0xff] %v4579_v0  ;;  %v4612_v0 = vadd.f32 %v7604_v4, %v2688_v27  ;;  %v4615_v20 = vadd.f32 %v7606_v33, %v2692_v1  ;;  %v504_v27 = vmul.f32 %v7614_v19, %v7549_v21  ;;  %v7615_v33 = vld [vmem:[#allocation28_spill] sm:$0xff]  ;;  %v7616_v1 = vld [vmem:[#allocation74_spill] sm:$0xff]  ;;  %v473_v54 = vadd.f32 %v7633_v55, %v465_v6 }
 0x13b   :  { %7597 = vst [vmem:[#allocation76_spill] sm:$0xff] %v4598_v9  ;;  %v542_v4 = vadd.f32 %v7616_v1, %v7615_v33  ;;  %v7626_v9 = vld [vmem:[#allocation46_spill] sm:$0xff]  ;;  %v7628_v33 = vld [vmem:[#allocation48_spill] sm:$0xff] }
 0x13c   :  { %7599 = vst [vmem:[#allocation77_spill] sm:$0xff] %v4601_v52  ;;  %v7627_v21 = vld [vmem:[#allocation54_spill] sm:$0xff]  ;;  %v783_v1 = vadd.f32 %v7628_v33, %v4609_v34 }
 0x13d   :  { %7601 = vst [vmem:[#allocation78_spill] sm:$0xff] %v4604_v22  ;;  %v7624_v22 = vld [vmem:[#allocation109_spill] sm:$0xff]  ;;  %v7637_v33 = vld [vmem:[#allocation62_spill] sm:$0xff] }
 0x13e   :  { %7603 = vst [vmem:[#allocation42_spill] sm:$0xff] %v4607_v24  ;;  %v500_v24 = vmul.f32 %v7614_v19, %v7548_v38  ;;  %v7625_v38 = vld [vmem:[#allocation53_spill] sm:$0xff]  ;;  %v516_v19 = vadd.f32 %v7627_v21, %v7626_v9  ;;  %v485_v48 = vmul.f32 %v473_v54, %v7637_v33 }
 0x13f   :  { %7605 = vst [vmem:[#allocation43_spill] sm:$0xff] %v4612_v0  ;;  %v507_v52 = vadd.f32 %v7625_v38, %v7624_v22  ;;  %v4653_v22 = vadd.f32 %v7634_v26, %v783_v1  ;;  %v7635_v38 = vld [vmem:[#allocation60_spill] sm:$0xff]  ;;  %v7636_v21 = vld [vmem:[#allocation61_spill] sm:$0xff] }
 0x140   :  { %7607 = vst [vmem:[#allocation29_spill] sm:$0xff] %v4615_v20  ;;  %v7622_v20 = vld [vmem:[#allocation85_spill] sm:$0xff]  ;;  %v477_v9 = vmul.f32 %v473_v54, %v7635_v38  ;;  %v481_v11 = vmul.f32 %v473_v54, %v7636_v21 }
 0x141   :  { %7609 = vst [vmem:[#allocation30_spill] sm:$0xff] %v4618_v43  ;;  %v551_v43 = vadd.f32 %v7618_v17, %v7617_v37  ;;  %v569_v0 = vadd.f32 %v7623_v35, %v7622_v20  ;;  %v7630_v37 = vld [vmem:[#allocation55_spill] sm:$0xff] }
 0x142   :  { %7611 = vst [vmem:[#allocation56_spill] sm:$0xff] %v4621_v39  ;;  %v560_v39 = vadd.f32 %v7620_v13, %v7619_v62  ;;  %v525_v17 = vadd.f32 %v7630_v37, %v7629_v18  ;;  %v534_v62 = vadd.f32 %v533_v47, %v7631_v51  ;;  %v7632_v13 = vld [vmem:[#allocation113_spill] sm:$0xff]  ;;  %v489_v18 = vmul.f32 %v473_v54, %v7638_v56  ;;  %v7640_v47 = vld [vmem:[#allocation70_spill] sm:$0xff] }
 0x143   :  { %v543_v58 = vadd.f32 %v542_v4, %v7632_v13  ;;  %v552_v59 = vadd.f32 %v551_v43, %v496_v12  ;;  %v570_v35 = vadd.f32 %v569_v0, %v504_v27  ;;  %v7639_v37 = vld [vmem:[#allocation69_spill] sm:$0xff]  ;;  %v497_v4 = vmul.f32 %v473_v54, %v7640_v47  ;;  %v7641_v13 = vld [vmem:[#allocation71_spill] sm:$0xff]  ;;  %v7642_v43 = vld [vmem:[#allocation72_spill] sm:$0xff] }
 0x144   :  { %v561_v20 = vadd.f32 %v560_v39, %v500_v24  ;;  %v493_v51 = vmul.f32 %v473_v54, %v7639_v37  ;;  %v501_v6 = vmul.f32 %v473_v54, %v7641_v13  ;;  %v505_v24 = vmul.f32 %v473_v54, %v7642_v43 }
 0x145   :  { %v508_v0 = vadd.f32 %v507_v52, %v477_v9  ;;  %v517_v39 = vadd.f32 %v516_v19, %v481_v11  ;;  %v526_v26 = vadd.f32 %v525_v17, %v485_v48  ;;  %v535_v12 = vadd.f32 %v534_v62, %v489_v18 }
 0x146   :  { %v544_v27 = vadd.f32 %v543_v58, %v493_v51  ;;  %v553_v1 = vadd.f32 %v552_v59, %v497_v4  ;;  %v562_v55 = vadd.f32 %v561_v20, %v501_v6  ;;  %v571_v10 = vadd.f32 %v570_v35, %v505_v24 }
 0x147   :  { %v509_v31 = vrot.slane %v508_v0, 4  ;;  %v518_v36 = vrot.slane %v517_v39, 4  ;;  %v527_v60 = vrot.slane %v526_v26, 4  ;;  %v536_v42 = vrot.slane %v535_v12, 4 }
 0x148   :  { %v545_v8 = vrot.slane %v544_v27, 4  ;;  %v554_v7 = vrot.slane %v553_v1, 4  ;;  %v563_v46 = vrot.slane %v562_v55, 4  ;;  %v572_v61 = vrot.slane %v571_v10, 4 }
 0x149   :  { %v510_v49 = vadd.f32 %v509_v31, %v508_v0  ;;  %v519_v3 = vadd.f32 %v518_v36, %v517_v39  ;;  %v528_v30 = vadd.f32 %v527_v60, %v526_v26  ;;  %v537_v54 = vadd.f32 %v536_v42, %v535_v12 }
 0x14a   :  { %v546_v52 = vadd.f32 %v545_v8, %v544_v27  ;;  %v555_v11 = vadd.f32 %v554_v7, %v553_v1  ;;  %v564_v48 = vadd.f32 %v563_v46, %v562_v55  ;;  %v573_v19 = vadd.f32 %v572_v61, %v571_v10 }
 0x14b   :  { %v511_v58 = vrot.slane %v510_v49, 2  ;;  %v520_v59 = vrot.slane %v519_v3, 2  ;;  %v529_v17 = vrot.slane %v528_v30, 2  ;;  %v538_v62 = vrot.slane %v537_v54, 2 }
 0x14c   :  { %v547_v20 = vrot.slane %v546_v52, 2  ;;  %v556_v35 = vrot.slane %v555_v11, 2  ;;  %v565_v9 = vrot.slane %v564_v48, 2  ;;  %v574_v18 = vrot.slane %v573_v19, 2 }
 0x14d   :  { %v512_v51 = vadd.f32 %v511_v58, %v510_v49  ;;  %v521_v4 = vadd.f32 %v520_v59, %v519_v3  ;;  %v530_v6 = vadd.f32 %v529_v17, %v528_v30  ;;  %v539_v24 = vadd.f32 %v538_v62, %v537_v54 }
 0x14e   :  { %v548_v31 = vadd.f32 %v547_v20, %v546_v52  ;;  %v557_v36 = vadd.f32 %v556_v35, %v555_v11  ;;  %v566_v60 = vadd.f32 %v565_v9, %v564_v48  ;;  %v575_v42 = vadd.f32 %v574_v18, %v573_v19 }
 0x14f   :  { %v513_v8 = vrot.slane %v512_v51, 1  ;;  %v522_v7 = vrot.slane %v521_v4, 1  ;;  %v531_v46 = vrot.slane %v530_v6, 1  ;;  %v540_v61 = vrot.slane %v539_v24, 1 }
 0x150   :  { %v549_v10 = vrot.slane %v548_v31, 1  ;;  %v558_v0 = vrot.slane %v557_v36, 1  ;;  %v567_v39 = vrot.slane %v566_v60, 1  ;;  %v576_v26 = vrot.slane %v575_v42, 1 }
 0x151   :  { %v514_v12 = vadd.f32 %v513_v8, %v512_v51  ;;  %v523_v27 = vadd.f32 %v522_v7, %v521_v4  ;;  %v532_v1 = vadd.f32 %v531_v46, %v530_v6  ;;  %v541_v55 = vadd.f32 %v540_v61, %v539_v24 }
 0x152   :  { %v550_v49 = vadd.f32 %v549_v10, %v548_v31  ;;  %v559_v3 = vadd.f32 %v558_v0, %v557_v36  ;;  %v568_v30 = vadd.f32 %v567_v39, %v566_v60  ;;  %v577_v54 = vadd.f32 %v576_v26, %v575_v42  ;;  %v7643_v31 = vld [vmem:[#allocation13_spill] sm:$0xff]  ;;  %v7644_v36 = vld [vmem:[#allocation20_spill] sm:$0xff] }
 0x153   :  { %v578_v52 = vmul.f32 0.17677669, %v514_v12  ;;  %v579_v11 = vmul.f32 0.17677669, %v523_v27  ;;  %v580_v48 = vmul.f32 0.17677669, %v532_v1  ;;  %v795_v19 = vmul.f32 %v4653_v22, %v7635_v38 }
 0x154   :  { %v581_v58 = vmul.f32 0.17677669, %v541_v55  ;;  %v582_v59 = vmul.f32 0.17677669, %v550_v49  ;;  %v583_v17 = vmul.f32 0.17677669, %v559_v3  ;;  %v799_v62 = vmul.f32 %v4653_v22, %v7636_v21 }
 0x155   :  { %v584_v20 = vmul.f32 0.17677669, %v568_v30  ;;  %v4667_v35 = vmul.f32 0.17677669, %v577_v54  ;;  %v803_v9 = vmul.f32 %v4653_v22, %v7637_v33  ;;  %v807_v18 = vmul.f32 %v4653_v22, %v7638_v56  ;;  %v7645_v30 = vld [vmem:[#allocation38_spill] sm:$0xff] }
 0x156   :  { %v586_v51 = vmax.f32 %v578_v52, %v582_v59  ;;  %v587_v4 = vmax.f32 %v579_v11, %v583_v17  ;;  %v811_v6 = vmul.f32 %v4653_v22, %v7639_v37  ;;  %v815_v24 = vmul.f32 %v4653_v22, %v7640_v47  ;;  %v7646_v54 = vld [vmem:[#allocation10_spill] sm:$0xff] }
 0x157   :  { %v4679_v60 = vmul.f32 %v7644_v36, %v7643_v31  ;;  %v588_v42 = vmax.f32 %v580_v48, %v584_v20  ;;  %v589_v8 = vmax.f32 %v581_v58, %v4667_v35  ;;  %v819_v7 = vmul.f32 %v4653_v22, %v7641_v13 }
 0x158   :  { %v590_v46 = vmax.f32 %v586_v51, %v587_v4  ;;  %v826_v61 = vadd.f32 %v4389_v53, %v795_v19  ;;  %v835_v10 = vadd.f32 %v4391_v29, %v799_v62  ;;  %v844_v0 = vadd.f32 %v4393_v5, %v803_v9 }
 0x159   :  { %v591_v39 = vmax.f32 %v588_v42, %v589_v8  ;;  %v853_v26 = vadd.f32 %v4395_v57, %v807_v18  ;;  %v862_v12 = vadd.f32 %v4397_v32, %v811_v6  ;;  %v871_v27 = vadd.f32 %v4399_v63, %v815_v24  ;;  %v7647_v8 = vld [vmem:[#allocation11_spill] sm:$0xff] }
 0x15a   :  { %v827_v1 = vrot.slane %v826_v61, 4  ;;  %v836_v55 = vrot.slane %v835_v10, 4  ;;  %v845_v49 = vrot.slane %v844_v0, 4  ;;  %v4691_v3 = vadd.f32 %v4401_v16, %v819_v7 }
 0x15b   :  { %v4695_v53 = vmul.f32 %v7646_v54, %v7645_v30  ;;  %v592_v29 = vmax.f32 %v590_v46, %v591_v39  ;;  %v854_v19 = vrot.slane %v853_v26, 4  ;;  %v863_v5 = vrot.slane %v862_v12, 4 }
 0x15c   :  { %v828_v62 = vadd.f32 %v827_v1, %v826_v61  ;;  %v837_v9 = vadd.f32 %v836_v55, %v835_v10  ;;  %v846_v57 = vadd.f32 %v845_v49, %v844_v0  ;;  %v872_v18 = vrot.slane %v871_v27, 4 }
 0x15d   :  { %v593_v32 = vsub.f32 %v578_v52, %v592_v29  ;;  %v594_v51 = vsub.f32 %v579_v11, %v592_v29  ;;  %v595_v63 = vsub.f32 %v580_v48, %v592_v29  ;;  %v596_v4 = vsub.f32 %v581_v58, %v592_v29 }
 0x15e   :  { %v597_v6 = vsub.f32 %v582_v59, %v592_v29  ;;  %v598_v24 = vsub.f32 %v583_v17, %v592_v29  ;;  %v599_v42 = vsub.f32 %v584_v20, %v592_v29  ;;  %v881_v16 = vrot.slane %v4691_v3, 4 }
 0x15f   :  { %v4700_v7 = vmul.f32 %v7647_v8, %v7645_v30  ;;  %v601_v46 = vmul.f32 1.442695, %v593_v32  ;;  %v603_v39 = vmul.f32 1.442695, %v594_v51  ;;  %v605_v54 = vmul.f32 1.442695, %v595_v63 }
 0x160   :  { %v600_v61 = vsub.f32 %v4667_v35, %v592_v29  ;;  %v607_v10 = vmul.f32 1.442695, %v596_v4  ;;  %v855_v52 = vadd.f32 %v854_v19, %v853_v26  ;;  %v864_v11 = vadd.f32 %v863_v5, %v862_v12 }
 0x161   :  { %3034 = vpow2.f32 %v601_v46  ;;  %v609_v48 = vmul.f32 1.442695, %v597_v6  ;;  %v611_v58 = vmul.f32 1.442695, %v598_v24  ;;  %v829_v59 = vrot.slane %v828_v62, 2 }
 0x162   :  { %3036 = vpow2.f32 %v603_v39  ;;  %v613_v17 = vmul.f32 1.442695, %v599_v42  ;;  %v838_v20 = vrot.slane %v837_v9, 2  ;;  %v847_v0 = vrot.slane %v846_v57, 2 }
 0x163   :  { %3038 = vpow2.f32 %v605_v54  ;;  %v830_v1 = vadd.f32 %v829_v59, %v828_v62  ;;  %v865_v55 = vrot.slane %v864_v11, 2  ;;  %v873_v49 = vadd.f32 %v872_v18, %v871_v27 }
 0x164   :  { %3040 = vpow2.f32 %v607_v10  ;;  %v839_v32 = vadd.f32 %v838_v20, %v837_v9  ;;  %v848_v35 = vadd.f32 %v847_v0, %v846_v57  ;;  %v856_v29 = vrot.slane %v855_v52, 2 }
 0x165   :  { %3042 = vpow2.f32 %v609_v48  ;;  %v831_v26 = vrot.slane %v830_v1, 1  ;;  %v866_v12 = vadd.f32 %v865_v55, %v864_v11  ;;  %v874_v19 = vrot.slane %v873_v49, 2 }
 0x166   :  { %3044 = vpow2.f32 %v611_v58  ;;  %v823_v5 = vmul.f32 %v4653_v22, %v7642_v43  ;;  %v840_v51 = vrot.slane %v839_v32, 1  ;;  %v849_v63 = vrot.slane %v848_v35, 1 }
 0x167   :  { %v4705_v4 = vpop.eup %3034  ;;  %v867_v54 = vrot.slane %v866_v12, 1  ;;  %v875_v27 = vadd.f32 %v874_v19, %v873_v49  ;;  %3046 = vpow2.f32 %v613_v17  ;;  %v615_v9 = vmul.f32 1.442695, %v600_v61 }
 0x168   :  { %7648 = vst [vmem:[#allocation57_spill] sm:$0xff] %v4705_v4  ;;  %v4707_v62 = vpop.eup %3036  ;;  %v832_v57 = vadd.f32 %v831_v26, %v830_v1  ;;  %v857_v18 = vadd.f32 %v856_v29, %v855_v52  ;;  %v841_v42 = vadd.f32 %v840_v51, %v839_v32  ;;  %v882_v46 = vadd.f32 %v881_v16, %v4691_v3 }
 0x169   :  { %7649 = vst [vmem:[#allocation63_spill] sm:$0xff] %v4707_v62  ;;  %v4709_v6 = vpop.eup %3038  ;;  %v625_v24 = vrot.slane %v4707_v62, 7  ;;  %v876_v22 = vrot.slane %v875_v27, 1  ;;  %v850_v11 = vadd.f32 %v849_v63, %v848_v35  ;;  %v868_v48 = vadd.f32 %v867_v54, %v866_v12 }
 0x16a   :  { %7650 = vst [vmem:[#allocation64_spill] sm:$0xff] %v4709_v6  ;;  %v4713_v39 = vpop.eup %3040  ;;  %v628_v10 = vrot.slane %v4709_v6, 6  ;;  %v889_v58 = vadd.f32 %v4403_v50, %v823_v5  ;;  %v883_v20 = vrot.slane %v882_v46, 2  ;;  %v4726_v55 = vmul.f32 0.17677669, %v832_v57  ;;  %v7655_v57 = vld [vmem:[#allocation49_spill] sm:$0xff] }
 0x16b   :  { %7651 = vst [vmem:[#allocation65_spill] sm:$0xff] %v4713_v39  ;;  %v4717_v59 = vpop.eup %3042  ;;  %v627_v61 = vsel %vm626_vm0, %v625_v24, %v4705_v4  ;;  %v631_v52 = vrot.slane %v4713_v39, 5  ;;  %v877_v17 = vadd.f32 %v876_v22, %v875_v27  ;;  %3048 = vpow2.f32 %v615_v9  ;;  %v7691_v39 = vld [vmem:[#allocation15_spill] sm:$0xff] }
 0x16c   :  { %7652 = vst [vmem:[#allocation66_spill] sm:$0xff] %v4717_v59  ;;  %v4722_v0 = vpop.eup %3044  ;;  %v630_v3 = vsel %vm629_vm1, %v628_v10, %v627_v61  ;;  %v634_v16 = vrot.slane %v4717_v59, 4  ;;  %v890_v1 = vrot.slane %v889_v58, 4  ;;  %v884_v49 = vadd.f32 %v883_v20, %v882_v46 }
 0x16d   :  { %7653 = vst [vmem:[#allocation110_spill] sm:$0xff] %v4722_v0  ;;  %v633_v50 = vsel %vm632_vm2, %v631_v52, %v630_v3  ;;  %v4729_v32 = vmul.f32 0.17677669, %v841_v42  ;;  %v4731_v35 = vpop.eup %3046  ;;  %v858_v26 = vrot.slane %v857_v18, 1  ;;  %v4734_v19 = vmul.f32 0.17677669, %v868_v48 }
 0x16e   :  { %7654 = vst [vmem:[#allocation67_spill] sm:$0xff] %v4731_v35  ;;  %v636_v29 = vsel %vm635_vm3, %v634_v16, %v633_v50  ;;  %v891_v12 = vadd.f32 %v890_v1, %v889_v58  ;;  %v637_v5 = vrot.slane %v4722_v0, 3  ;;  %v885_v51 = vrot.slane %v884_v49, 1 }
 0x16f   :  { %v4737_v63 = vmul.f32 0.17677669, %v877_v17  ;;  %v4739_v27 = vmul.f32 0.17677669, %v850_v11  ;;  %v904_v9 = vmax.f32 %v4726_v55, %v4734_v19  ;;  %v1096_v24 = vadd.f32 %v7655_v57, %v4609_v34 }
 0x170   :  { %v892_v54 = vrot.slane %v891_v12, 2  ;;  %v639_v42 = vsel %vm638_vm4, %v637_v5, %v636_v29  ;;  %v886_v22 = vadd.f32 %v885_v51, %v884_v49  ;;  %v1409_v10 = vadd.f32 %v4679_v60, %v4609_v34 }
 0x171   :  { %v905_v46 = vmax.f32 %v4729_v32, %v4737_v63  ;;  %v640_v48 = vrot.slane %v4731_v35, 2  ;;  %v859_v58 = vadd.f32 %v858_v26, %v857_v18  ;;  %v4752_v61 = vadd.f32 %v4695_v53, %v1096_v24  ;;  %v4754_v52 = vpop.eup %3048 }
 0x172   :  { %v893_v11 = vadd.f32 %v892_v54, %v891_v12  ;;  %7656 = vst [vmem:[#allocation94_spill] sm:$0xff] %v4754_v52  ;;  %v4756_v17 = vmul.f32 0.17677669, %v886_v22  ;;  %v4759_v3 = vadd.f32 %v4700_v7, %v1409_v10  ;;  %v643_v29 = vrot.slane %v4754_v52, 1 }
 0x173   :  { %v908_v20 = vmax.f32 %v904_v9, %v905_v46  ;;  %v642_v16 = vsel %vm641_vm5, %v640_v48, %v639_v42  ;;  %v1108_v60 = vmul.f32 %v4752_v61, %v7635_v38  ;;  %v1112_v18 = vmul.f32 %v4752_v61, %v7636_v21 }
 0x174   :  { %v894_v1 = vrot.slane %v893_v11, 1  ;;  %v906_v53 = vmax.f32 %v4739_v27, %v4756_v17  ;;  %v1116_v50 = vmul.f32 %v4752_v61, %v7637_v33  ;;  %v1120_v49 = vmul.f32 %v4752_v61, %v7638_v56 }
 0x175   :  { %v1124_v7 = vmul.f32 %v4752_v61, %v7639_v37  ;;  %v899_v12 = vmul.f32 0.17677669, %v859_v58  ;;  %v1128_v5 = vmul.f32 %v4752_v61, %v7640_v47  ;;  %v1139_v51 = vadd.f32 %v4414_v15, %v1108_v60 }
 0x176   :  { %v895_v26 = vadd.f32 %v894_v1, %v893_v11  ;;  %v1148_v54 = vadd.f32 %v4417_v41, %v1112_v18  ;;  %v1157_v9 = vadd.f32 %v4420_v40, %v1116_v50  ;;  %v645_v57 = vsel %vm644_vm6, %v643_v29, %v642_v16 }
 0x177   :  { %v1166_v42 = vadd.f32 %v4423_v25, %v1120_v49  ;;  %v1175_v22 = vadd.f32 %v4426_v2, %v1124_v7  ;;  %v1140_v46 = vrot.slane %v1139_v51, 4  ;;  %v1184_v58 = vadd.f32 %v4429_v44, %v1128_v5 }
 0x178   :  { %v903_v24 = vmul.f32 0.17677669, %v895_v26  ;;  %v1149_v10 = vrot.slane %v1148_v54, 4  ;;  %v1158_v48 = vrot.slane %v1157_v9, 4  ;;  %v647_v15 = vrot.slane %v645_v57, 4 }
 0x179   :  { %v1167_v1 = vrot.slane %v1166_v42, 4  ;;  %v1176_v52 = vrot.slane %v1175_v22, 4  ;;  %v1141_v60 = vadd.f32 %v1140_v46, %v1139_v51  ;;  %v1185_v49 = vrot.slane %v1184_v58, 4 }
 0x17a   :  { %v907_v11 = vmax.f32 %v899_v12, %v903_v24  ;;  %v1150_v41 = vadd.f32 %v1149_v10, %v1148_v54  ;;  %v1159_v40 = vadd.f32 %v1158_v48, %v1157_v9  ;;  %v648_v29 = vadd.f32 %v647_v15, %v645_v57 }
 0x17b   :  { %v1168_v50 = vadd.f32 %v1167_v1, %v1166_v42  ;;  %v1177_v16 = vadd.f32 %v1176_v52, %v1175_v22  ;;  %v1142_v25 = vrot.slane %v1141_v60, 2  ;;  %v4985_v6 = vmul.f32 %v7691_v39, %v7645_v30 }
 0x17c   :  { %v909_v18 = vmax.f32 %v906_v53, %v907_v11  ;;  %v1151_v2 = vrot.slane %v1150_v41, 2  ;;  %v1160_v7 = vrot.slane %v1159_v40, 2  ;;  %v649_v46 = vrot.slane %v648_v29, 2 }
 0x17d   :  { %v1169_v35 = vrot.slane %v1168_v50, 2  ;;  %v1178_v0 = vrot.slane %v1177_v16, 2  ;;  %v1143_v22 = vadd.f32 %v1142_v25, %v1141_v60  ;;  %v1186_v11 = vadd.f32 %v1185_v49, %v1184_v58 }
 0x17e   :  { %v910_v26 = vmax.f32 %v908_v20, %v909_v18 }
 0x17f   :  { %v1170_v48 = vadd.f32 %v1169_v35, %v1168_v50 }
 0x180   :  { %v911_v44 = vsub.f32 %v4726_v55, %v910_v26  ;;  %v912_v5 = vsub.f32 %v4729_v32, %v910_v26  ;;  %v913_v59 = vsub.f32 %v4739_v27, %v910_v26  ;;  %v914_v51 = vsub.f32 %v899_v12, %v910_v26 }
 0x181   :  { %v915_v53 = vsub.f32 %v4734_v19, %v910_v26  ;;  %v916_v54 = vsub.f32 %v4737_v63, %v910_v26  ;;  %v917_v52 = vsub.f32 %v4756_v17, %v910_v26  ;;  %v918_v20 = vsub.f32 %v903_v24, %v910_v26 }
 0x182   :  { %v919_v9 = vmul.f32 1.442695, %v911_v44  ;;  %v921_v57 = vmul.f32 1.442695, %v912_v5  ;;  %v923_v42 = vmul.f32 1.442695, %v913_v59  ;;  %v1132_v55 = vmul.f32 %v4752_v61, %v7641_v13 }
 0x183   :  { %v925_v10 = vmul.f32 1.442695, %v914_v51  ;;  %v1152_v32 = vadd.f32 %v1151_v2, %v1150_v41  ;;  %v927_v27 = vmul.f32 1.442695, %v915_v53  ;;  %v1161_v12 = vadd.f32 %v1160_v7, %v1159_v40 }
 0x184   :  { %3050 = vpow2.f32 %v919_v9  ;;  %v929_v19 = vmul.f32 1.442695, %v916_v54  ;;  %v1179_v63 = vadd.f32 %v1178_v0, %v1177_v16  ;;  %v931_v17 = vmul.f32 1.442695, %v917_v52 }
 0x185   :  { %3052 = vpow2.f32 %v921_v57  ;;  %v1136_v59 = vmul.f32 %v4752_v61, %v7642_v43  ;;  %v1144_v24 = vrot.slane %v1143_v22, 1  ;;  %v933_v1 = vmul.f32 1.442695, %v918_v20 }
 0x186   :  { %3054 = vpow2.f32 %v923_v42  ;;  %v1153_v15 = vrot.slane %v1152_v32, 1  ;;  %v1162_v60 = vrot.slane %v1161_v12, 1  ;;  %v1171_v41 = vrot.slane %v1170_v48, 1 }
 0x187   :  { %3056 = vpow2.f32 %v925_v10  ;;  %v1180_v18 = vrot.slane %v1179_v63, 1  ;;  %v1187_v40 = vrot.slane %v1186_v11, 2  ;;  %v1193_v35 = vadd.f32 %v4432_v14, %v1132_v55 }
 0x188   :  { %3058 = vpow2.f32 %v927_v27  ;;  %v4797_v0 = vadd.f32 %v649_v46, %v648_v29  ;;  %v1145_v58 = vadd.f32 %v1144_v24, %v1143_v22  ;;  %v1202_v61 = vadd.f32 %v4435_v23, %v1136_v59 }
 0x189   :  { %3060 = vpow2.f32 %v929_v19  ;;  %v1154_v26 = vadd.f32 %v1153_v15, %v1152_v32  ;;  %v1188_v25 = vadd.f32 %v1187_v40, %v1186_v11  ;;  %v1194_v49 = vrot.slane %v1193_v35, 4 }
 0x18a   :  { %v4795_v50 = vpop.eup %3050  ;;  %3062 = vpow2.f32 %v931_v17  ;;  %v1163_v44 = vadd.f32 %v1162_v60, %v1161_v12  ;;  %v1172_v14 = vadd.f32 %v1171_v41, %v1170_v48  ;;  %v1203_v5 = vrot.slane %v1202_v61, 4 }
 0x18b   :  { %7657 = vst [vmem:[#allocation44_spill] sm:$0xff] %v4795_v50  ;;  %v4800_v16 = vpop.eup %3052  ;;  %3064 = vpow2.f32 %v933_v1  ;;  %v1181_v53 = vadd.f32 %v1180_v18, %v1179_v63  ;;  %v1189_v54 = vrot.slane %v1188_v25, 1  ;;  %v1195_v23 = vadd.f32 %v1194_v49, %v1193_v35 }
 0x18c   :  { %7658 = vst [vmem:[#allocation95_spill] sm:$0xff] %v4800_v16  ;;  %v4802_v2 = vpop.eup %3054  ;;  %v943_v7 = vrot.slane %v4800_v16, 7  ;;  %v1204_v57 = vadd.f32 %v1203_v5, %v1202_v61  ;;  %v4813_v42 = vmul.f32 0.17677669, %v1145_v58  ;;  %v4823_v63 = vmul.f32 0.17677669, %v1154_v26 }
 0x18d   :  { %7659 = vst [vmem:[#allocation96_spill] sm:$0xff] %v4802_v2  ;;  %v4805_v51 = vpop.eup %3056  ;;  %v945_v29 = vrot.slane %v4802_v2, 6  ;;  %v1190_v55 = vadd.f32 %v1189_v54, %v1188_v25  ;;  %v1196_v32 = vrot.slane %v1195_v23, 2  ;;  %v4829_v1 = vmul.f32 0.17677669, %v1181_v53  ;;  %v7688_v16 = vld [vmem:[#allocation37_spill] sm:$0xff] }
 0x18e   :  { %7660 = vst [vmem:[#allocation97_spill] sm:$0xff] %v4805_v51  ;;  %v4808_v52 = vpop.eup %3058  ;;  %v944_v20 = vsel %vm626_vm0, %v943_v7, %v4795_v50  ;;  %v947_v9 = vrot.slane %v4805_v51, 5  ;;  %v1205_v19 = vrot.slane %v1204_v57, 2  ;;  %v1421_v61 = vmul.f32 %v4759_v3, %v7635_v38 }
 0x18f   :  { %7661 = vst [vmem:[#allocation98_spill] sm:$0xff] %v4808_v52  ;;  %v4815_v22 = vpop.eup %3060  ;;  %v946_v46 = vsel %vm629_vm1, %v945_v29, %v944_v20  ;;  %v949_v10 = vrot.slane %v4808_v52, 4  ;;  %v1197_v24 = vadd.f32 %v1196_v32, %v1195_v23  ;;  %v4833_v18 = vmul.f32 0.17677669, %v1190_v55 }
 0x190   :  { %7662 = vst [vmem:[#allocation99_spill] sm:$0xff] %v4815_v22  ;;  %v4819_v27 = vpop.eup %3062  ;;  %v948_v12 = vsel %vm632_vm2, %v947_v9, %v946_v46  ;;  %v951_v48 = vrot.slane %v4815_v22, 3  ;;  %v1206_v41 = vadd.f32 %v1205_v19, %v1204_v57  ;;  %v1217_v58 = vmax.f32 %v4813_v42, %v4829_v1 }
 0x191   :  { %7663 = vst [vmem:[#allocation108_spill] sm:$0xff] %v4819_v27  ;;  %v4825_v11 = vpop.eup %3064  ;;  %v950_v17 = vsel %vm635_vm3, %v949_v10, %v948_v12  ;;  %v953_v59 = vrot.slane %v4819_v27, 2  ;;  %v1198_v35 = vrot.slane %v1197_v24, 1  ;;  %v1218_v49 = vmax.f32 %v4823_v63, %v4833_v18 }
 0x192   :  { %7664 = vst [vmem:[#allocation100_spill] sm:$0xff] %v4825_v11  ;;  %v952_v15 = vsel %vm638_vm4, %v951_v48, %v950_v17  ;;  %v955_v60 = vrot.slane %v4825_v11, 1  ;;  %v1207_v25 = vrot.slane %v1206_v41, 1  ;;  %v1425_v7 = vmul.f32 %v4759_v3, %v7636_v21  ;;  %v7665_v48 = vld [vmem:[#allocation114_spill] sm:$0xff] }
 0x193   :  { %v954_v40 = vsel %vm641_vm5, %v953_v59, %v952_v15  ;;  %v1199_v5 = vadd.f32 %v1198_v35, %v1197_v24  ;;  %v1211_v29 = vmul.f32 0.17677669, %v1163_v44  ;;  %v1429_v53 = vmul.f32 %v4759_v3, %v7637_v33  ;;  %v7666_v59 = vld [vmem:[#allocation115_spill] sm:$0xff]  ;;  %v7667_v24 = vld [vmem:[#allocation116_spill] sm:$0xff] }
 0x194   :  { %v956_v26 = vsel %vm644_vm6, %v955_v60, %v954_v40  ;;  %v1433_v54 = vmul.f32 %v4759_v3, %v7638_v56  ;;  %v1208_v23 = vadd.f32 %v1207_v25, %v1206_v41  ;;  %v1212_v20 = vmul.f32 0.17677669, %v1172_v14 }
 0x195   :  { %v1221_v9 = vmax.f32 %v1217_v58, %v1218_v49  ;;  %v1437_v57 = vmul.f32 %v4759_v3, %v7639_v37  ;;  %v651_v46 = vrot.slane %v4797_v0, 1  ;;  %v1215_v10 = vmul.f32 0.17677669, %v1199_v5  ;;  %v7668_v5 = vld [vmem:[#allocation117_spill] sm:$0xff] }
 0x196   :  { %v1441_v55 = vmul.f32 %v4759_v3, %v7640_v47  ;;  %v1216_v32 = vmul.f32 0.17677669, %v1208_v23  ;;  %v1452_v44 = vadd.f32 %v4446_v28, %v1421_v61  ;;  %v1461_v12 = vadd.f32 %v4449_v45, %v1425_v7 }
 0x197   :  { %v1470_v19 = vadd.f32 %v7665_v48, %v1429_v53  ;;  %v1219_v17 = vmax.f32 %v1211_v29, %v1215_v10  ;;  %v1479_v14 = vadd.f32 %v7666_v59, %v1433_v54  ;;  %v1488_v15 = vadd.f32 %v7667_v24, %v1437_v57  ;;  %v7669_v54 = vld [vmem:[#allocation21_spill] sm:$0xff] }
 0x198   :  { %v1220_v60 = vmax.f32 %v1212_v20, %v1216_v32  ;;  %v1453_v41 = vrot.slane %v1452_v44, 4  ;;  %v1462_v40 = vrot.slane %v1461_v12, 4  ;;  %v4860_v58 = vadd.f32 %v651_v46, %v4797_v0 }
 0x199   :  { %v1471_v35 = vrot.slane %v1470_v19, 4  ;;  %v958_v25 = vrot.slane %v956_v26, 4  ;;  %v1489_v49 = vrot.slane %v1488_v15, 4  ;;  %v1497_v28 = vadd.f32 %v7668_v5, %v1441_v55 }
 0x19a   :  { %v1222_v61 = vmax.f32 %v1219_v17, %v1220_v60  ;;  %v1454_v45 = vadd.f32 %v1453_v41, %v1452_v44  ;;  %v1463_v7 = vadd.f32 %v1462_v40, %v1461_v12  ;;  %v1480_v23 = vrot.slane %v1479_v14, 4 }
 0x19b   :  { %v1472_v53 = vadd.f32 %v1471_v35, %v1470_v19  ;;  %v4865_v48 = vmul.f32 %v7669_v54, %v7643_v31  ;;  %3066 = vrcp.f32 %v4860_v58  ;;  %v959_v59 = vadd.f32 %v958_v25, %v956_v26  ;;  %v7670_v26 = vld [vmem:[#allocation23_spill] sm:$0xff] }
 0x19c   :  { %v1223_v57 = vmax.f32 %v1221_v9, %v1222_v61  ;;  %v1490_v24 = vadd.f32 %v1489_v49, %v1488_v15  ;;  %v1498_v0 = vrot.slane %v1497_v28, 4  ;;  %v1455_v44 = vrot.slane %v1454_v45, 2 }
 0x19d   :  { %v1464_v12 = vrot.slane %v1463_v7, 2  ;;  %v1473_v19 = vrot.slane %v1472_v53, 2  ;;  %v1481_v60 = vadd.f32 %v1480_v23, %v1479_v14  ;;  %v4874_v15 = vmul.f32 %v7670_v26, %v7643_v31 }
 0x19e   :  { %v1224_v46 = vsub.f32 %v4813_v42, %v1223_v57  ;;  %v1225_v11 = vsub.f32 %v4823_v63, %v1223_v57  ;;  %v1226_v55 = vsub.f32 %v1211_v29, %v1223_v57  ;;  %v1227_v17 = vsub.f32 %v1212_v20, %v1223_v57 }
 0x19f   :  { %v1228_v41 = vsub.f32 %v4829_v1, %v1223_v57  ;;  %v1229_v40 = vsub.f32 %v4833_v18, %v1223_v57  ;;  %v1230_v9 = vsub.f32 %v1215_v10, %v1223_v57  ;;  %v1231_v35 = vsub.f32 %v1216_v32, %v1223_v57 }
 0x1a0   :  { %v1232_v25 = vmul.f32 1.442695, %v1224_v46  ;;  %v1234_v42 = vmul.f32 1.442695, %v1225_v11  ;;  %v1499_v49 = vadd.f32 %v1498_v0, %v1497_v28  ;;  %v960_v63 = vrot.slane %v959_v59, 2 }
 0x1a1   :  { %v1236_v29 = vmul.f32 1.442695, %v1226_v55  ;;  %v1238_v20 = vmul.f32 1.442695, %v1227_v17  ;;  %v1491_v5 = vrot.slane %v1490_v24, 2  ;;  %v4876_v61 = vpop.eup %3066  ;;  %v1456_v1 = vadd.f32 %v1455_v44, %v1454_v45 }
 0x1a2   :  { %3068 = vpow2.f32 %v1232_v25  ;;  %v1240_v14 = vmul.f32 1.442695, %v1228_v41  ;;  %v1482_v23 = vrot.slane %v1481_v60, 2  ;;  %v1242_v18 = vmul.f32 1.442695, %v1229_v40  ;;  %v7672_v41 = vld [vmem:[#allocation12_spill] sm:$0xff] }
 0x1a3   :  { %3070 = vpow2.f32 %v1234_v42  ;;  %v1465_v10 = vadd.f32 %v1464_v12, %v1463_v7  ;;  %v1474_v32 = vadd.f32 %v1473_v19, %v1472_v53  ;;  %v1244_v57 = vmul.f32 1.442695, %v1230_v9 }
 0x1a4   :  { %3072 = vpow2.f32 %v1236_v29  ;;  %v1445_v11 = vmul.f32 %v4759_v3, %v7641_v13  ;;  %v1500_v28 = vrot.slane %v1499_v49, 2  ;;  %v4880_v0 = vadd.f32 %v960_v63, %v959_v59  ;;  %v7673_v59 = vld [vmem:[#allocation14_spill] sm:$0xff] }
 0x1a5   :  { %3074 = vpow2.f32 %v1238_v20  ;;  %v1246_v46 = vmul.f32 1.442695, %v1231_v35  ;;  %v1492_v55 = vadd.f32 %v1491_v5, %v1490_v24  ;;  %v1449_v45 = vmul.f32 %v4759_v3, %v7642_v43  ;;  %v7676_v29 = vld [vmem:[#allocation118_spill] sm:$0xff]  ;;  %v7677_v5 = vld [vmem:[#allocation33_spill] sm:$0xff] }
 0x1a6   :  { %3076 = vpow2.f32 %v1240_v14  ;;  %v1457_v17 = vrot.slane %v1456_v1, 1  ;;  %v1483_v44 = vadd.f32 %v1482_v23, %v1481_v60  ;;  %v1466_v7 = vrot.slane %v1465_v10, 1 }
 0x1a7   :  { %3078 = vpow2.f32 %v1242_v18  ;;  %v1475_v53 = vrot.slane %v1474_v32, 1  ;;  %v1501_v12 = vadd.f32 %v1500_v28, %v1499_v49  ;;  %v1726_v40 = vmul.f32 %v7672_v41, %v7645_v30 }
 0x1a8   :  { %v4884_v19 = vpop.eup %3068  ;;  %v2039_v9 = vmul.f32 %v7673_v59, %v7645_v30  ;;  %v4892_v24 = vmul.f32 %v4876_v61, %v4860_v58  ;;  %3080 = vpow2.f32 %v1244_v57  ;;  %v962_v60 = vrot.slane %v4880_v0, 1 }
 0x1a9   :  { %7671 = vst [vmem:[#allocation101_spill] sm:$0xff] %v4884_v19  ;;  %v4894_v3 = vpop.eup %3070  ;;  %3082 = vpow2.f32 %v1246_v46  ;;  %v1493_v35 = vrot.slane %v1492_v55, 1  ;;  %v1502_v25 = vrot.slane %v1501_v12, 1  ;;  %v1458_v63 = vadd.f32 %v1457_v17, %v1456_v1 }
 0x1aa   :  { %7674 = vst [vmem:[#allocation102_spill] sm:$0xff] %v4894_v3  ;;  %v4897_v42 = vpop.eup %3072  ;;  %v1256_v49 = vrot.slane %v4894_v3, 7  ;;  %v1506_v20 = vadd.f32 %v7676_v29, %v1445_v11  ;;  %v1515_v14 = vadd.f32 %v7677_v5, %v1449_v45  ;;  %v1467_v57 = vadd.f32 %v1466_v7, %v1465_v10 }
 0x1ab   :  { %7675 = vst [vmem:[#allocation45_spill] sm:$0xff] %v4897_v42  ;;  %v4902_v23 = vpop.eup %3074  ;;  %v1258_v18 = vrot.slane %v4897_v42, 6  ;;  %v1476_v28 = vadd.f32 %v1475_v53, %v1474_v32  ;;  %v1484_v27 = vrot.slane %v1483_v44, 1  ;;  %v1494_v29 = vadd.f32 %v1493_v35, %v1492_v55 }
 0x1ac   :  { %7678 = vst [vmem:[#allocation103_spill] sm:$0xff] %v4902_v23  ;;  %v4905_v22 = vpop.eup %3076  ;;  %v1257_v46 = vsel %vm626_vm0, %v1256_v49, %v4884_v19  ;;  %v1260_v52 = vrot.slane %v4902_v23, 5  ;;  %v1507_v3 = vrot.slane %v1506_v20, 4  ;;  %v1516_v1 = vrot.slane %v1515_v14, 4 }
 0x1ad   :  { %7679 = vst [vmem:[#allocation104_spill] sm:$0xff] %v4905_v22  ;;  %v4910_v17 = vpop.eup %3078  ;;  %v1259_v11 = vsel %vm629_vm1, %v1258_v18, %v1257_v46  ;;  %v1262_v45 = vrot.slane %v4905_v22, 4  ;;  %v1503_v5 = vadd.f32 %v1502_v25, %v1501_v12  ;;  %v4918_v49 = vmul.f32 0.17677669, %v1458_v63 }
 0x1ae   :  { %7680 = vst [vmem:[#allocation105_spill] sm:$0xff] %v4910_v17  ;;  %v4914_v10 = vpop.eup %3080  ;;  %v1261_v32 = vsel %vm632_vm2, %v1260_v52, %v1259_v11  ;;  %v1264_v7 = vrot.slane %v4910_v17, 3  ;;  %v1508_v53 = vadd.f32 %v1507_v3, %v1506_v20  ;;  %v1517_v18 = vadd.f32 %v1516_v1, %v1515_v14 }
 0x1af   :  { %7681 = vst [vmem:[#allocation106_spill] sm:$0xff] %v4914_v10  ;;  %v4920_v23 = vpop.eup %3082  ;;  %v1263_v42 = vsel %vm635_vm3, %v1262_v45, %v1261_v32  ;;  %v1266_v19 = vrot.slane %v4914_v10, 2  ;;  %v4924_v46 = vmul.f32 0.17677669, %v1467_v57  ;;  %v1485_v35 = vadd.f32 %v1484_v27, %v1483_v44 }
 0x1b0   :  { %7682 = vst [vmem:[#allocation27_spill] sm:$0xff] %v4920_v23  ;;  %v1265_v55 = vsel %vm638_vm4, %v1264_v7, %v1263_v42  ;;  %v1268_v12 = vrot.slane %v4920_v23, 1  ;;  %v1509_v52 = vrot.slane %v1508_v53, 2  ;;  %v1518_v3 = vrot.slane %v1517_v18, 2 }
 0x1b1   :  { %v1267_v25 = vsel %vm641_vm5, %v1266_v19, %v1265_v55  ;;  %v4929_v63 = vmul.f32 0.17677669, %v1494_v29  ;;  %v4931_v20 = vmul.f32 0.17677669, %v1503_v5  ;;  %v1722_v14 = vadd.f32 %v4865_v48, %v4609_v34 }
 0x1b2   :  { %v1269_v11 = vsel %vm644_vm6, %v1268_v12, %v1267_v25  ;;  %v1510_v45 = vadd.f32 %v1509_v52, %v1508_v53  ;;  %v2035_v42 = vadd.f32 %v4874_v15, %v4609_v34  ;;  %v1519_v1 = vadd.f32 %v1518_v3, %v1517_v18 }
 0x1b3   :  { %v1271_v57 = vrot.slane %v1269_v11, 4  ;;  %v1530_v27 = vmax.f32 %v4918_v49, %v4929_v63  ;;  %v1531_v44 = vmax.f32 %v4924_v46, %v4931_v20  ;;  %v4943_v19 = vadd.f32 %v962_v60, %v4880_v0 }
 0x1b4   :  { %v1511_v29 = vrot.slane %v1510_v45, 1  ;;  %v4945_v5 = vadd.f32 %v1726_v40, %v1722_v14  ;;  %v4947_v32 = vadd.f32 %v2039_v9, %v2035_v42  ;;  %v1520_v48 = vrot.slane %v1519_v1, 1  ;;  %v7684_v42 = vld [vmem:[#allocation35_spill] sm:$0xff] }
 0x1b5   :  { %v1524_v7 = vmul.f32 0.17677669, %v1476_v28  ;;  %v1525_v53 = vmul.f32 0.17677669, %v1485_v35  ;;  %v1534_v15 = vmax.f32 %v1530_v27, %v1531_v44  ;;  %v1272_v60 = vadd.f32 %v1271_v57, %v1269_v11  ;;  %v7683_v11 = vld [vmem:[#allocation34_spill] sm:$0xff]  ;;  %v7685_v27 = vld [vmem:[#allocation36_spill] sm:$0xff] }
 0x1b6   :  { %v1512_v55 = vadd.f32 %v1511_v29, %v1510_v45  ;;  %v1734_v18 = vmul.f32 %v4945_v5, %v7635_v38  ;;  %v1738_v12 = vmul.f32 %v4945_v5, %v7636_v21  ;;  %v1742_v0 = vmul.f32 %v4945_v5, %v7637_v33  ;;  %v7686_v29 = vld [vmem:[#allocation41_spill] sm:$0xff] }
 0x1b7   :  { %v1521_v52 = vadd.f32 %v1520_v48, %v1519_v1  ;;  %v1746_v40 = vmul.f32 %v4945_v5, %v7638_v56  ;;  %v1750_v9 = vmul.f32 %v4945_v5, %v7639_v37  ;;  %v655_v28 = vsub.f32 1.0, %v4892_v24  ;;  %v7687_v24 = vld [vmem:[#allocation31_spill] sm:$0xff] }
 0x1b8   :  { %v664_v35 = vand.u32 2147483648, %v4860_v58  ;;  %v1528_v25 = vmul.f32 0.17677669, %v1512_v55  ;;  %v1754_v3 = vmul.f32 %v4945_v5, %v7640_v47  ;;  %3084 = vrcp.f32 %v4943_v19 }
 0x1b9   :  { %v4964_v45 = vmul.f32 0.17677669, %v1521_v52  ;;  %v1765_v14 = vadd.f32 %v7683_v11, %v1734_v18  ;;  %v1774_v57 = vadd.f32 %v7684_v42, %v1738_v12  ;;  %v1783_v44 = vadd.f32 %v7685_v27, %v1742_v0  ;;  %v7689_v42 = vld [vmem:[#allocation24_spill] sm:$0xff] }
 0x1ba   :  { %v1532_v1 = vmax.f32 %v1524_v7, %v1528_v25  ;;  %v1792_v48 = vadd.f32 %v7686_v29, %v1746_v40  ;;  %v1801_v23 = vadd.f32 %v7687_v24, %v1750_v9  ;;  %v1273_v10 = vrot.slane %v1272_v60, 2  ;;  %v7690_v29 = vld [vmem:[#allocation25_spill] sm:$0xff] }
 0x1bb   :  { %v1533_v55 = vmax.f32 %v1525_v53, %v4964_v45  ;;  %v1766_v17 = vrot.slane %v1765_v14, 4  ;;  %v1775_v22 = vrot.slane %v1774_v57, 4  ;;  %v1784_v51 = vrot.slane %v1783_v44, 4 }
 0x1bc   :  { %v1793_v2 = vrot.slane %v1792_v48, 4  ;;  %v1802_v52 = vrot.slane %v1801_v23, 4  ;;  %v1810_v50 = vadd.f32 %v7688_v16, %v1754_v3  ;;  %v4975_v0 = vmul.f32 %v7689_v42, %v7643_v31 }
 0x1bd   :  { %v1535_v18 = vmax.f32 %v1532_v1, %v1533_v55  ;;  %v1767_v11 = vadd.f32 %v1766_v17, %v1765_v14  ;;  %v1776_v12 = vadd.f32 %v1775_v22, %v1774_v57  ;;  %v1785_v40 = vadd.f32 %v1784_v51, %v1783_v44 }
 0x1be   :  { %v1794_v27 = vadd.f32 %v1793_v2, %v1792_v48  ;;  %v4977_v9 = vpop.eup %3084  ;;  %v4981_v24 = vmul.f32 %v7690_v29, %v7643_v31  ;;  %v4988_v17 = vor.u32 1.1754944e-38, %v664_v35  ;;  %v656_v22 = vmul.f32 %v4876_v61, %v655_v28 }
 0x1bf   :  { %v1274_v3 = vadd.f32 %v1273_v10, %v1272_v60  ;;  %v1536_v14 = vmax.f32 %v1534_v15, %v1535_v18  ;;  %v1803_v51 = vadd.f32 %v1802_v52, %v1801_v23  ;;  %v1768_v2 = vrot.slane %v1767_v11, 2 }
 0x1c0   :  { %v1777_v57 = vrot.slane %v1776_v12, 2  ;;  %v1786_v1 = vrot.slane %v1785_v40, 2  ;;  %v1795_v44 = vrot.slane %v1794_v27, 2  ;;  %v4997_v10 = vadd.f32 %v4876_v61, %v656_v22 }
 0x1c1   :  { %v1537_v31 = vsub.f32 %v4918_v49, %v1536_v14  ;;  %v1538_v48 = vsub.f32 %v4924_v46, %v1536_v14  ;;  %v1539_v55 = vsub.f32 %v1524_v7, %v1536_v14  ;;  %v1540_v62 = vsub.f32 %v1525_v53, %v1536_v14 }
 0x1c2   :  { %v1541_v4 = vsub.f32 %v4929_v63, %v1536_v14  ;;  %v1542_v35 = vsub.f32 %v4931_v20, %v1536_v14  ;;  %v1543_v16 = vsub.f32 %v1528_v25, %v1536_v14  ;;  %v1544_v28 = vsub.f32 %v4964_v45, %v1536_v14 }
 0x1c3   :  { %v1545_v23 = vmul.f32 1.442695, %v1537_v31  ;;  %v1547_v15 = vmul.f32 1.442695, %v1538_v48  ;;  %v1549_v60 = vmul.f32 1.442695, %v1539_v55  ;;  %v5001_v49 = vmul.f32 %v4977_v9, %v4943_v19 }
 0x1c4   :  { %v1551_v46 = vmul.f32 1.442695, %v1540_v62  ;;  %v1769_v7 = vadd.f32 %v1768_v2, %v1767_v11  ;;  %v1804_v53 = vrot.slane %v1803_v51, 2  ;;  %v1553_v63 = vmul.f32 1.442695, %v1541_v4 }
 0x1c5   :  { %3086 = vpow2.f32 %v1545_v23  ;;  %v1758_v20 = vmul.f32 %v4945_v5, %v7641_v13  ;;  %v1778_v25 = vadd.f32 %v1777_v57, %v1776_v12  ;;  %v1275_v45 = vrot.slane %v1274_v3, 1  ;;  %v7692_v23 = vld [vmem:[#allocation39_spill] sm:$0xff] }
 0x1c6   :  { %3088 = vpow2.f32 %v1547_v15  ;;  %v1555_v52 = vmul.f32 1.442695, %v1542_v35  ;;  %v1811_v18 = vrot.slane %v1810_v50, 4  ;;  %v1557_v22 = vmul.f32 1.442695, %v1543_v16 }
 0x1c7   :  { %3090 = vpow2.f32 %v1549_v60  ;;  %v1787_v14 = vadd.f32 %v1786_v1, %v1785_v40  ;;  %v1796_v31 = vadd.f32 %v1795_v44, %v1794_v27  ;;  %v1559_v48 = vmul.f32 1.442695, %v1544_v28 }
 0x1c8   :  { %3092 = vpow2.f32 %v1551_v46  ;;  %v1770_v55 = vrot.slane %v1769_v7, 1  ;;  %v1805_v62 = vadd.f32 %v1804_v53, %v1803_v51  ;;  %v1762_v4 = vmul.f32 %v4945_v5, %v7642_v43  ;;  %v7696_v53 = vld [vmem:[#allocation40_spill] sm:$0xff] }
 0x1c9   :  { %3094 = vpow2.f32 %v1553_v63  ;;  %v1779_v11 = vrot.slane %v1778_v25, 1  ;;  %v1788_v2 = vrot.slane %v1787_v14, 1  ;;  %v1797_v12 = vrot.slane %v1796_v31, 1 }
 0x1ca   :  { %3096 = vpow2.f32 %v1555_v52  ;;  %v1812_v57 = vadd.f32 %v1811_v18, %v1810_v50  ;;  %v1819_v35 = vadd.f32 %v7692_v23, %v1758_v20  ;;  %v5011_v27 = vadd.f32 %v1275_v45, %v1274_v3 }
 0x1cb   :  { %v5008_v15 = vpop.eup %3086  ;;  %3098 = vpow2.f32 %v1557_v22  ;;  %v1806_v16 = vrot.slane %v1805_v62, 1  ;;  %v1771_v1 = vadd.f32 %v1770_v55, %v1769_v7  ;;  %v1780_v60 = vadd.f32 %v1779_v11, %v1778_v25 }
 0x1cc   :  { %7693 = vst [vmem:[#allocation73_spill] sm:$0xff] %v5008_v15  ;;  %v5013_v51 = vpop.eup %3088  ;;  %3100 = vpow2.f32 %v1559_v48  ;;  %v1813_v5 = vrot.slane %v1812_v57, 2  ;;  %v1820_v44 = vrot.slane %v1819_v35, 4  ;;  %v1789_v46 = vadd.f32 %v1788_v2, %v1787_v14 }
 0x1cd   :  { %7694 = vst [vmem:[#allocation107_spill] sm:$0xff] %v5013_v51  ;;  %v5015_v28 = vpop.eup %3090  ;;  %v1569_v50 = vrot.slane %v5013_v51, 7  ;;  %v1828_v63 = vadd.f32 %v7696_v53, %v1762_v4  ;;  %vm659_vm7 = vweird.f32 %v4876_v61  ;;  %v1798_v45 = vadd.f32 %v1797_v12, %v1796_v31  ;;  %v7706_v51 = vld [vmem:[#allocation88_spill] sm:$0xff] }
 0x1ce   :  { %7695 = vst [vmem:[#allocation28_spill] sm:$0xff] %v5015_v28  ;;  %v5019_v20 = vpop.eup %3092  ;;  %v1571_v3 = vrot.slane %v5015_v28, 6  ;;  %v1814_v52 = vadd.f32 %v1813_v5, %v1812_v57  ;;  %v1821_v18 = vadd.f32 %v1820_v44, %v1819_v35  ;;  %v1807_v25 = vadd.f32 %v1806_v16, %v1805_v62 }
 0x1cf   :  { %7697 = vst [vmem:[#allocation74_spill] sm:$0xff] %v5019_v20  ;;  %v5023_v7 = vpop.eup %3094  ;;  %v1570_v22 = vsel %vm626_vm0, %v1569_v50, %v5008_v15  ;;  %v1573_v48 = vrot.slane %v5019_v20, 5  ;;  %v1829_v14 = vrot.slane %v1828_v63, 4  ;;  %vm658_vm8 = vweird.f32 %v4860_v58 }
 0x1d0   :  { %7698 = vst [vmem:[#allocation83_spill] sm:$0xff] %v5023_v7  ;;  %v5028_v55 = vpop.eup %3096  ;;  %v1572_v4 = vsel %vm629_vm1, %v1571_v3, %v1570_v22  ;;  %v1575_v11 = vrot.slane %v5023_v7, 4  ;;  %v1815_v31 = vrot.slane %v1814_v52, 1  ;;  %v1822_v2 = vrot.slane %v1821_v18, 2  ;;  %vm5078_vm9 = vmor %vm658_vm8, %vm659_vm7 }
 0x1d1   :  { %7699 = vst [vmem:[#allocation50_spill] sm:$0xff] %v5028_v55  ;;  %v5033_v12 = vpop.eup %3098  ;;  %v1574_v57 = vsel %vm632_vm2, %v1573_v48, %v1572_v4  ;;  %v1577_v23 = vrot.slane %v5028_v55, 3  ;;  %v1830_v35 = vadd.f32 %v1829_v14, %v1828_v63  ;;  %v5037_v5 = vmul.f32 0.17677669, %v1771_v1  ;;  %v7705_v55 = vld [vmem:[#allocation87_spill] sm:$0xff] }
 0x1d2   :  { %7700 = vst [vmem:[#allocation84_spill] sm:$0xff] %v5033_v12  ;;  %v5039_v62 = vpop.eup %3100  ;;  %v1576_v16 = vsel %vm635_vm3, %v1575_v11, %v1574_v57  ;;  %v1579_v44 = vrot.slane %v5033_v12, 2  ;;  %v1816_v50 = vadd.f32 %v1815_v31, %v1814_v52  ;;  %v1823_v53 = vadd.f32 %v1822_v2, %v1821_v18 }
 0x1d3   :  { %7701 = vst [vmem:[#allocation51_spill] sm:$0xff] %v5039_v62  ;;  %v1578_v3 = vsel %vm638_vm4, %v1577_v23, %v1576_v16  ;;  %v1581_v22 = vrot.slane %v5039_v62, 1  ;;  %v1831_v40 = vrot.slane %v1830_v35, 2  ;;  %v5045_v7 = vmul.f32 0.17677669, %v1780_v60  ;;  %v7704_v62 = vld [vmem:[#allocation86_spill] sm:$0xff] }
 0x1d4   :  { %v1580_v48 = vsel %vm641_vm5, %v1579_v44, %v1578_v3  ;;  %v1824_v63 = vrot.slane %v1823_v53, 1  ;;  %v5048_v1 = vmul.f32 0.17677669, %v1789_v46  ;;  %v5050_v14 = vmul.f32 0.17677669, %v1807_v25 }
 0x1d5   :  { %v1582_v4 = vsel %vm644_vm6, %v1581_v22, %v1580_v48  ;;  %v1832_v11 = vadd.f32 %v1831_v40, %v1830_v35  ;;  %v5053_v57 = vmul.f32 0.17677669, %v1816_v50  ;;  %v2047_v52 = vmul.f32 %v4947_v32, %v7635_v38 }
 0x1d6   :  { %v1584_v18 = vrot.slane %v1582_v4, 4  ;;  %v1825_v31 = vadd.f32 %v1824_v63, %v1823_v53  ;;  %v1843_v60 = vmax.f32 %v5037_v5, %v5050_v14  ;;  %v2051_v2 = vmul.f32 %v4947_v32, %v7636_v21 }
 0x1d7   :  { %v1833_v46 = vrot.slane %v1832_v11, 1  ;;  %v1844_v25 = vmax.f32 %v5045_v7, %v5053_v57  ;;  %v2055_v40 = vmul.f32 %v4947_v32, %v7637_v33  ;;  %v2059_v23 = vmul.f32 %v4947_v32, %v7638_v56 }
 0x1d8   :  { %3102 = vrcp.f32 %v5011_v27  ;;  %v5068_v35 = vmul.f32 0.17677669, %v1825_v31  ;;  %v2063_v16 = vmul.f32 %v4947_v32, %v7639_v37  ;;  %v2067_v44 = vmul.f32 %v4947_v32, %v7640_v47 }
 0x1d9   :  { %v1585_v53 = vadd.f32 %v1584_v18, %v1582_v4  ;;  %v1834_v3 = vadd.f32 %v1833_v46, %v1832_v11  ;;  %v1838_v22 = vmul.f32 0.17677669, %v1798_v45  ;;  %v1847_v48 = vmax.f32 %v1843_v60, %v1844_v25  ;;  %v7707_v4 = vld [vmem:[#allocation82_spill] sm:$0xff]  ;;  %v7708_v45 = vld [vmem:[#allocation89_spill] sm:$0xff] }
 0x1da   :  { %v661_v63 = vsel %vm5078_vm9, %v4876_v61, %v4997_v10  ;;  %v1845_v31 = vmax.f32 %v5048_v1, %v5068_v35  ;;  %v2078_v12 = vadd.f32 %v7704_v62, %v2047_v52  ;;  %v2087_v20 = vadd.f32 %v7705_v55, %v2051_v2  ;;  %v7709_v61 = vld [vmem:[#allocation90_spill] sm:$0xff] }
 0x1db   :  { %v5090_v28 = vmul.f32 0.17677669, %v1834_v3  ;;  %v2096_v15 = vadd.f32 %v7706_v51, %v2055_v40  ;;  %v2105_v11 = vadd.f32 %v7707_v4, %v2059_v23  ;;  %v2114_v18 = vadd.f32 %v7708_v45, %v2063_v16  ;;  %v7712_v4 = vld [vmem:[#allocation16_spill] sm:$0xff] }
 0x1dc   :  { %v975_v60 = vand.u32 2147483648, %v4943_v19  ;;  %v2079_v46 = vrot.slane %v2078_v12, 4  ;;  %v2088_v25 = vrot.slane %v2087_v20, 4  ;;  %v2123_v10 = vadd.f32 %v7709_v61, %v2067_v44 }
 0x1dd   :  { %v7710_v50 = vsub.f32 1.0, %v5001_v49  ;;  %v1586_v52 = vrot.slane %v1585_v53, 2  ;;  %v1846_v55 = vmax.f32 %v1838_v22, %v5090_v28  ;;  %v2097_v2 = vrot.slane %v2096_v15, 4 }
 0x1de   :  { %v5101_v3 = vpop.eup %3102  ;;  %v7711_v51 = vand.u32 2147483647, %v4860_v58  ;;  %v2080_v40 = vadd.f32 %v2079_v46, %v2078_v12  ;;  %v2106_v23 = vrot.slane %v2105_v11, 4  ;;  %v2115_v16 = vrot.slane %v2114_v18, 4 }
 0x1df   :  { %v967_v62 = vmul.f32 %v4977_v9, %v7710_v50  ;;  %v5107_v45 = vmul.f32 %v7712_v4, %v7645_v30  ;;  %v1848_v61 = vmax.f32 %v1845_v31, %v1846_v55  ;;  %vm970_vm11 = vweird.f32 %v4977_v9 }
 0x1e0   :  { %vm663_vm10 = vcmp.eq.f32.partialorder %v7711_v51, 8.507059e+37  ;;  %v5114_v50 = vor.u32 1.1754944e-38, %v975_v60  ;;  %v2089_v39 = vadd.f32 %v2088_v25, %v2087_v20  ;;  %v2098_v58 = vadd.f32 %v2097_v2, %v2096_v15 }
 0x1e1   :  { %v5110_v49 = vsel %vm663_vm10, %v4988_v17, %v661_v63  ;;  %v5117_v12 = vadd.f32 %v4977_v9, %v967_v62  ;;  %v5121_v46 = vmul.f32 %v5101_v3, %v5011_v27  ;;  %v1587_v30 = vadd.f32 %v1586_v52, %v1585_v53 }
 0x1e2   :  { %v1849_v51 = vmax.f32 %v1847_v48, %v1848_v61  ;;  %vm969_vm12 = vweird.f32 %v4943_v19  ;;  %v2081_v17 = vrot.slane %v2080_v40, 2  ;;  %v2107_v63 = vadd.f32 %v2106_v23, %v2105_v11 }
 0x1e3   :  { %v2116_v31 = vadd.f32 %v2115_v16, %v2114_v18  ;;  %v2124_v55 = vrot.slane %v2123_v10, 4  ;;  %v2090_v44 = vrot.slane %v2089_v39, 2  ;;  %v2099_v53 = vrot.slane %v2098_v58, 2  ;;  %vm5141_vm13 = vmor %vm969_vm12, %vm970_vm11 }
 0x1e4   :  { %v1850_v60 = vsub.f32 %v5037_v5, %v1849_v51  ;;  %v1851_v20 = vsub.f32 %v5045_v7, %v1849_v51  ;;  %v1852_v15 = vsub.f32 %v5048_v1, %v1849_v51  ;;  %v1853_v25 = vsub.f32 %v1838_v22, %v1849_v51 }
 0x1e5   :  { %v1854_v62 = vsub.f32 %v5050_v14, %v1849_v51  ;;  %v1855_v2 = vsub.f32 %v5053_v57, %v1849_v51  ;;  %v1856_v48 = vsub.f32 %v5068_v35, %v1849_v51  ;;  %v1857_v52 = vsub.f32 %v5090_v28, %v1849_v51 }
 0x1e6   :  { %v1858_v11 = vmul.f32 1.442695, %v1850_v60  ;;  %v1860_v18 = vmul.f32 1.442695, %v1851_v20  ;;  %v1588_v23 = vrot.slane %v1587_v30, 1  ;;  %v2071_v7 = vmul.f32 %v4947_v32, %v7641_v13 }
 0x1e7   :  { %v1862_v16 = vmul.f32 1.442695, %v1852_v15  ;;  %v1864_v5 = vmul.f32 1.442695, %v1853_v25  ;;  %v1866_v1 = vmul.f32 1.442695, %v1854_v62  ;;  %v2082_v22 = vadd.f32 %v2081_v17, %v2080_v40 }
 0x1e8   :  { %3104 = vpow2.f32 %v1858_v11  ;;  %v2117_v14 = vrot.slane %v2116_v31, 2  ;;  %v1868_v57 = vmul.f32 1.442695, %v1855_v2  ;;  %v2091_v61 = vadd.f32 %v2090_v44, %v2089_v39 }
 0x1e9   :  { %3106 = vpow2.f32 %v1860_v18  ;;  %v2125_v4 = vadd.f32 %v2124_v55, %v2123_v10  ;;  %v1870_v35 = vmul.f32 1.442695, %v1856_v48  ;;  %v2100_v59 = vadd.f32 %v2099_v53, %v2098_v58  ;;  %v7717_v48 = vld [vmem:[#allocation32_spill] sm:$0xff] }
 0x1ea   :  { %3108 = vpow2.f32 %v1862_v16  ;;  %v2108_v28 = vrot.slane %v2107_v63, 2  ;;  %v5133_v51 = vadd.f32 %v1588_v23, %v1587_v30  ;;  %v1872_v60 = vmul.f32 1.442695, %v1857_v52 }
 0x1eb   :  { %3110 = vpow2.f32 %v1864_v5  ;;  %v2075_v20 = vmul.f32 %v4947_v32, %v7642_v43  ;;  %v2083_v39 = vrot.slane %v2082_v22, 1  ;;  %v2092_v10 = vrot.slane %v2091_v61, 1 }
 0x1ec   :  { %3112 = vpow2.f32 %v1866_v1  ;;  %v2118_v44 = vadd.f32 %v2117_v14, %v2116_v31  ;;  %v2126_v32 = vrot.slane %v2125_v4, 2  ;;  %v2101_v55 = vrot.slane %v2100_v59, 1  ;;  %v7716_v31 = vld [vmem:[#allocation91_spill] sm:$0xff] }
 0x1ed   :  { %3114 = vpow2.f32 %v1868_v57  ;;  %v2109_v15 = vadd.f32 %v2108_v28, %v2107_v63  ;;  %v2132_v53 = vadd.f32 %v7716_v31, %v2071_v7  ;;  %v2141_v52 = vadd.f32 %v7717_v48, %v2075_v20 }
 0x1ee   :  { %v5150_v17 = vpop.eup %3104  ;;  %3116 = vpow2.f32 %v1870_v35  ;;  %v2119_v25 = vrot.slane %v2118_v44, 1  ;;  %v2127_v2 = vadd.f32 %v2126_v32, %v2125_v4  ;;  %v2084_v23 = vadd.f32 %v2083_v39, %v2082_v22 }
 0x1ef   :  { %v5152_v62 = vpop.eup %3106  ;;  %3118 = vpow2.f32 %v1872_v60  ;;  %v2093_v16 = vadd.f32 %v2092_v10, %v2091_v61  ;;  %v2133_v14 = vrot.slane %v2132_v53, 4  ;;  %v2142_v57 = vrot.slane %v2141_v52, 4 }
 0x1f0   :  { %7715 = vst [vmem:[#allocation47_spill] sm:$0xff] %v5152_v62  ;;  %v5156_v11 = vpop.eup %3108  ;;  %3120 = vrcp.f32 %v5133_v51  ;;  %v1882_v18 = vrot.slane %v5152_v62, 7  ;;  %v2128_v1 = vrot.slane %v2127_v2, 1  ;;  %v2102_v28 = vadd.f32 %v2101_v55, %v2100_v59 }
 0x1f1   :  { %7718 = vst [vmem:[#allocation85_spill] sm:$0xff] %v5156_v11  ;;  %v5160_v5 = vpop.eup %3110  ;;  %v1884_v63 = vrot.slane %v5156_v11, 6  ;;  %v2110_v60 = vrot.slane %v2109_v15, 1  ;;  %v2120_v39 = vadd.f32 %v2119_v25, %v2118_v44  ;;  %v2134_v58 = vadd.f32 %v2133_v14, %v2132_v53 }
 0x1f2   :  { %7719 = vst [vmem:[#allocation52_spill] sm:$0xff] %v5160_v5  ;;  %v5163_v4 = vpop.eup %3112  ;;  %v1883_v7 = vsel %vm626_vm0, %v1882_v18, %v5150_v17  ;;  %v1886_v35 = vrot.slane %v5160_v5, 5  ;;  %v2129_v10 = vadd.f32 %v2128_v1, %v2127_v2  ;;  %v5176_v18 = vmul.f32 0.17677669, %v2084_v23 }
 0x1f3   :  { %7720 = vst [vmem:[#allocation109_spill] sm:$0xff] %v5163_v4  ;;  %v5168_v20 = vpop.eup %3114  ;;  %v1885_v22 = vsel %vm629_vm1, %v1884_v63, %v1883_v7  ;;  %v1888_v61 = vrot.slane %v5163_v4, 4  ;;  %v2143_v63 = vadd.f32 %v2142_v57, %v2141_v52  ;;  %v5182_v7 = vmul.f32 0.17677669, %v2093_v16 }
 0x1f4   :  { %7721 = vst [vmem:[#allocation53_spill] sm:$0xff] %v5168_v20  ;;  %v5172_v32 = vpop.eup %3116  ;;  %v1887_v31 = vsel %vm632_vm2, %v1886_v35, %v1885_v22  ;;  %v1890_v48 = vrot.slane %v5168_v20, 3  ;;  %v2111_v1 = vadd.f32 %v2110_v60, %v2109_v15  ;;  %v2135_v35 = vrot.slane %v2134_v58, 2  ;;  %v7729_v20 = vld [vmem:[#allocation75_spill] sm:$0xff] }
 0x1f5   :  { %7722 = vst [vmem:[#allocation46_spill] sm:$0xff] %v5172_v32  ;;  %v5178_v30 = vpop.eup %3118  ;;  %v1889_v59 = vsel %vm635_vm3, %v1888_v61, %v1887_v31  ;;  %v1892_v55 = vrot.slane %v5172_v32, 2  ;;  %v2144_v23 = vrot.slane %v2143_v63, 2  ;;  %v5189_v14 = vmul.f32 0.17677669, %v2120_v39 }
 0x1f6   :  { %7723 = vst [vmem:[#allocation54_spill] sm:$0xff] %v5178_v30  ;;  %v5184_v44 = vpop.eup %3120  ;;  %v1891_v25 = vsel %vm638_vm4, %v1890_v48, %v1889_v59  ;;  %v1894_v2 = vrot.slane %v5178_v30, 1  ;;  %v5191_v22 = vmul.f32 0.17677669, %v2129_v10  ;;  %v2136_v52 = vadd.f32 %v2135_v35, %v2134_v58  ;;  %v7728_v30 = vld [vmem:[#allocation79_spill] sm:$0xff] }
 0x1f7   :  { %v1893_v53 = vsel %vm641_vm5, %v1892_v55, %v1891_v25  ;;  %v2348_v16 = vadd.f32 %v4975_v0, %v4609_v34  ;;  %v2661_v57 = vadd.f32 %v4981_v24, %v4609_v34  ;;  %v2145_v48 = vadd.f32 %v2144_v23, %v2143_v63 }
 0x1f8   :  { %v1895_v61 = vsel %vm644_vm6, %v1894_v2, %v1893_v53  ;;  %v2156_v15 = vmax.f32 %v5176_v18, %v5189_v14  ;;  %v2157_v60 = vmax.f32 %v5182_v7, %v5191_v22  ;;  %v2137_v39 = vrot.slane %v2136_v52, 1 }
 0x1f9   :  { %v1897_v31 = vrot.slane %v1895_v61, 4  ;;  %v5202_v10 = vmul.f32 0.17677669, %v2102_v28  ;;  %v5205_v59 = vadd.f32 %v4985_v6, %v2348_v16  ;;  %v5208_v58 = vadd.f32 %v5107_v45, %v2661_v57 }
 0x1fa   :  { %v2146_v55 = vrot.slane %v2145_v48, 1  ;;  %v5210_v34 = vmul.f32 0.17677669, %v2111_v1  ;;  %v2160_v24 = vmax.f32 %v2156_v15, %v2157_v60  ;;  %v2138_v63 = vadd.f32 %v2137_v39, %v2136_v52  ;;  %v7726_v60 = vld [vmem:[#allocation93_spill] sm:$0xff] }
 0x1fb   :  { %v1898_v0 = vadd.f32 %v1897_v31, %v1895_v61  ;;  %v2360_v25 = vmul.f32 %v5205_v59, %v7635_v38  ;;  %v2364_v2 = vmul.f32 %v5205_v59, %v7636_v21  ;;  %v2368_v28 = vmul.f32 %v5205_v59, %v7637_v33 }
 0x1fc   :  { %v2147_v35 = vadd.f32 %v2146_v55, %v2145_v48  ;;  %v2372_v45 = vmul.f32 %v5205_v59, %v7638_v56  ;;  %v2376_v1 = vmul.f32 %v5205_v59, %v7639_v37  ;;  %v7724_v53 = vsub.f32 1.0, %v5121_v46  ;;  %v7725_v48 = vld [vmem:[#allocation92_spill] sm:$0xff]  ;;  %v7727_v55 = vld [vmem:[#allocation22_spill] sm:$0xff] }
 0x1fd   :  { %v1899_v6 = vrot.slane %v1898_v0, 2  ;;  %v1591_v61 = vmul.f32 %v5184_v44, %v5133_v51  ;;  %v5227_v52 = vmul.f32 0.17677669, %v2138_v63  ;;  %v2380_v16 = vmul.f32 %v5205_v59, %v7640_v47 }
 0x1fe   :  { %v1280_v23 = vmul.f32 %v5101_v3, %v7724_v53  ;;  %v5231_v31 = vmul.f32 0.17677669, %v2147_v35  ;;  %v2391_v15 = vadd.f32 %v7725_v48, %v2360_v25  ;;  %v2400_v39 = vadd.f32 %v7726_v60, %v2364_v2  ;;  %v7730_v48 = vld [vmem:[#allocation80_spill] sm:$0xff] }
 0x1ff   :  { %v1900_v57 = vadd.f32 %v1899_v6, %v1898_v0  ;;  %v2158_v46 = vmax.f32 %v5202_v10, %v5227_v52  ;;  %v2409_v53 = vadd.f32 %v7727_v55, %v2368_v28  ;;  %v2418_v32 = vadd.f32 %v7728_v30, %v2372_v45 }
 0x200   :  { %v2427_v63 = vadd.f32 %v7729_v20, %v2376_v1  ;;  %v2159_v5 = vmax.f32 %v5210_v34, %v5231_v31  ;;  %v2392_v0 = vrot.slane %v2391_v15, 4  ;;  %v2401_v6 = vrot.slane %v2400_v39, 4 }
 0x201   :  { %v1901_v4 = vrot.slane %v1900_v57, 1  ;;  %v2410_v35 = vrot.slane %v2409_v53, 4  ;;  %v2419_v11 = vrot.slane %v2418_v32, 4  ;;  %v2436_v2 = vadd.f32 %v7730_v48, %v2380_v16 }
 0x202   :  { %v2428_v25 = vrot.slane %v2427_v63, 4  ;;  %v7731_v60 = vand.u32 2147483647, %v4943_v19  ;;  %v2161_v62 = vmax.f32 %v2158_v46, %v2159_v5  ;;  %v2393_v28 = vadd.f32 %v2392_v0, %v2391_v15  ;;  %v7746_v5 = vld [vmem:[#allocation42_spill] sm:$0xff] }
 0x203   :  { %v2402_v55 = vadd.f32 %v2401_v6, %v2400_v39  ;;  %v7732_v30 = vsel %vm5141_vm13, %v4977_v9, %v5117_v12  ;;  %vm1282_vm15 = vweird.f32 %v5011_v27  ;;  %v2411_v45 = vadd.f32 %v2410_v35, %v2409_v53 }
 0x204   :  { %vm974_vm14 = vcmp.eq.f32.partialorder %v7731_v60, 8.507059e+37  ;;  %v2420_v1 = vadd.f32 %v2419_v11, %v2418_v32  ;;  %v5255_v16 = vadd.f32 %v5101_v3, %v1280_v23  ;;  %vm1283_vm7 = vweird.f32 %v5101_v3 }
 0x205   :  { %v5251_v20 = vsel %vm974_vm14, %v5114_v50, %v7732_v30  ;;  %v1286_v19 = vand.u32 2147483647, %v5011_v27  ;;  %v1592_v40 = vsub.f32 1.0, %v1591_v61  ;;  %v5260_v15 = vadd.f32 %v1901_v4, %v1900_v57  ;;  %vm5270_vm8 = vmor %vm1282_vm15, %vm1283_vm7 }
 0x206   :  { %v2162_v9 = vmax.f32 %v2160_v24, %v2161_v62  ;;  %v2429_v12 = vadd.f32 %v2428_v25, %v2427_v63  ;;  %v2394_v50 = vrot.slane %v2393_v28, 2  ;;  %v2403_v39 = vrot.slane %v2402_v55, 2 }
 0x207   :  { %v2412_v46 = vrot.slane %v2411_v45, 2  ;;  %v2421_v0 = vrot.slane %v2420_v1, 2  ;;  %3122 = vrcp.f32 %v5260_v15  ;;  %v2384_v25 = vmul.f32 %v5205_v59, %v7641_v13 }
 0x208   :  { %v2163_v11 = vsub.f32 %v5176_v18, %v2162_v9  ;;  %v2164_v32 = vsub.f32 %v5182_v7, %v2162_v9  ;;  %v2165_v23 = vsub.f32 %v5202_v10, %v2162_v9  ;;  %v2166_v53 = vsub.f32 %v5210_v34, %v2162_v9 }
 0x209   :  { %v2167_v62 = vsub.f32 %v5189_v14, %v2162_v9  ;;  %v2168_v24 = vsub.f32 %v5191_v22, %v2162_v9  ;;  %v2169_v18 = vsub.f32 %v5227_v52, %v2162_v9  ;;  %v2170_v7 = vsub.f32 %v5231_v31, %v2162_v9 }
 0x20a   :  { %v2171_v34 = vmul.f32 1.442695, %v2163_v11  ;;  %v2173_v61 = vmul.f32 1.442695, %v2164_v32  ;;  %v2175_v57 = vmul.f32 1.442695, %v2165_v23  ;;  %v2395_v6 = vadd.f32 %v2394_v50, %v2393_v28 }
 0x20b   :  { %v2177_v63 = vmul.f32 1.442695, %v2166_v53  ;;  %v2430_v35 = vrot.slane %v2429_v12, 2  ;;  %v1593_v14 = vmul.f32 %v5184_v44, %v1592_v40  ;;  %v2179_v22 = vmul.f32 1.442695, %v2167_v62  ;;  %v7735_v62 = vld [vmem:[#allocation81_spill] sm:$0xff] }
 0x20c   :  { %3124 = vpow2.f32 %v2171_v34  ;;  %v2404_v52 = vadd.f32 %v2403_v39, %v2402_v55  ;;  %v2181_v31 = vmul.f32 1.442695, %v2168_v24  ;;  %v2437_v48 = vrot.slane %v2436_v2, 4 }
 0x20d   :  { %3126 = vpow2.f32 %v2173_v61  ;;  %v2183_v60 = vmul.f32 1.442695, %v2169_v18  ;;  %v2413_v30 = vadd.f32 %v2412_v46, %v2411_v45  ;;  %v2422_v9 = vadd.f32 %v2421_v0, %v2420_v1  ;;  %v5288_v39 = vpop.eup %3122 }
 0x20e   :  { %3128 = vpow2.f32 %v2175_v57  ;;  %v2185_v11 = vmul.f32 1.442695, %v2170_v7  ;;  %v2396_v32 = vrot.slane %v2395_v6, 1  ;;  %v2431_v28 = vadd.f32 %v2430_v35, %v2429_v12 }
 0x20f   :  { %3130 = vpow2.f32 %v2177_v63  ;;  %v2388_v40 = vmul.f32 %v5205_v59, %v7642_v43  ;;  %v2405_v50 = vrot.slane %v2404_v52, 1  ;;  %v2414_v55 = vrot.slane %v2413_v30, 1  ;;  %v7736_v63 = vld [vmem:[#allocation26_spill] sm:$0xff] }
 0x210   :  { %3132 = vpow2.f32 %v2179_v22  ;;  %v2423_v23 = vrot.slane %v2422_v9, 1  ;;  %v2438_v53 = vadd.f32 %v2437_v48, %v2436_v2  ;;  %v2445_v24 = vadd.f32 %v7735_v62, %v2384_v25 }
 0x211   :  { %3134 = vpow2.f32 %v2181_v31  ;;  %v5294_v45 = vadd.f32 %v5184_v44, %v1593_v14  ;;  %v2432_v12 = vrot.slane %v2431_v28, 1  ;;  %v2397_v59 = vadd.f32 %v2396_v32, %v2395_v6 }
 0x212   :  { %v5291_v18 = vpop.eup %3124  ;;  %3136 = vpow2.f32 %v2183_v60  ;;  %v2439_v0 = vrot.slane %v2438_v53, 2  ;;  %v2446_v7 = vrot.slane %v2445_v24, 4  ;;  %v2406_v61 = vadd.f32 %v2405_v50, %v2404_v52 }
 0x213   :  { %v5297_v46 = vpop.eup %3126  ;;  %3138 = vpow2.f32 %v2185_v11  ;;  %v2415_v57 = vadd.f32 %v2414_v55, %v2413_v30  ;;  %v2454_v35 = vadd.f32 %v7736_v63, %v2388_v40  ;;  %v2424_v31 = vadd.f32 %v2423_v23, %v2422_v9 }
 0x214   :  { %v5299_v34 = vpop.eup %3128  ;;  %v2195_v2 = vrot.slane %v5297_v46, 7  ;;  %v2440_v25 = vadd.f32 %v2439_v0, %v2438_v53  ;;  %v2447_v48 = vadd.f32 %v2446_v7, %v2445_v24  ;;  %v2433_v32 = vadd.f32 %v2432_v12, %v2431_v28 }
 0x215   :  { %v5303_v14 = vpop.eup %3130  ;;  %v2197_v22 = vrot.slane %v5299_v34, 6  ;;  %v2455_v62 = vrot.slane %v2454_v35, 4  ;;  %v5319_v0 = vmul.f32 0.17677669, %v2397_v59  ;;  %v5327_v10 = vmul.f32 0.17677669, %v2406_v61 }
 0x216   :  { %v5306_v60 = vpop.eup %3132  ;;  %v2196_v6 = vsel %vm626_vm0, %v2195_v2, %v5291_v18  ;;  %v2199_v11 = vrot.slane %v5303_v14, 5  ;;  %v2441_v50 = vrot.slane %v2440_v25, 1  ;;  %v2448_v55 = vrot.slane %v2447_v48, 2 }
 0x217   :  { %7737 = vst [vmem:[#allocation48_spill] sm:$0xff] %v5306_v60  ;;  %v5311_v52 = vpop.eup %3134  ;;  %v2198_v30 = vsel %vm629_vm1, %v2197_v22, %v2196_v6  ;;  %v2201_v40 = vrot.slane %v5306_v60, 4  ;;  %v2456_v24 = vadd.f32 %v2455_v62, %v2454_v35  ;;  %vm1596_vm9 = vweird.f32 %v5184_v44 }
 0x218   :  { %7738 = vst [vmem:[#allocation111_spill] sm:$0xff] %v5311_v52  ;;  %v5315_v9 = vpop.eup %3136  ;;  %v2200_v23 = vsel %vm632_vm2, %v2199_v11, %v2198_v30  ;;  %v2203_v53 = vrot.slane %v5311_v52, 3  ;;  %v2442_v2 = vadd.f32 %v2441_v50, %v2440_v25  ;;  %v2449_v63 = vadd.f32 %v2448_v55, %v2447_v48 }
 0x219   :  { %7739 = vst [vmem:[#allocation55_spill] sm:$0xff] %v5315_v9  ;;  %v5321_v7 = vpop.eup %3138  ;;  %v2202_v28 = vsel %vm635_vm3, %v2201_v40, %v2200_v23  ;;  %v2205_v12 = vrot.slane %v5315_v9, 2  ;;  %v2457_v1 = vrot.slane %v2456_v24, 2  ;;  %v5331_v11 = vmul.f32 0.17677669, %v2415_v57 }
 0x21a   :  { %7740 = vst [vmem:[#allocation112_spill] sm:$0xff] %v5321_v7  ;;  %v2204_v22 = vsel %vm638_vm4, %v2203_v53, %v2202_v28  ;;  %v2207_v6 = vrot.slane %v5321_v7, 1  ;;  %v2450_v35 = vrot.slane %v2449_v63, 1  ;;  %v5333_v62 = vmul.f32 0.17677669, %v2433_v32  ;;  %v7747_v7 = vld [vmem:[#allocation43_spill] sm:$0xff] }
 0x21b   :  { %v2206_v59 = vsel %vm641_vm5, %v2205_v12, %v2204_v22  ;;  %v2458_v25 = vadd.f32 %v2457_v1, %v2456_v24  ;;  %v5336_v48 = vmul.f32 0.17677669, %v2442_v2  ;;  %v2673_v40 = vmul.f32 %v5208_v58, %v7635_v38 }
 0x21c   :  { %v2208_v30 = vsel %vm644_vm6, %v2207_v6, %v2206_v59  ;;  %vm5342_vm10 = vcmp.eq.f32.partialorder %v1286_v19, 8.507059e+37  ;;  %v2451_v55 = vadd.f32 %v2450_v35, %v2449_v63  ;;  %v2469_v57 = vmax.f32 %v5319_v0, %v5333_v62  ;;  %v7744_v35 = vld [vmem:[#allocation77_spill] sm:$0xff] }
 0x21d   :  { %v2210_v50 = vrot.slane %v2208_v30, 4  ;;  %v2677_v32 = vmul.f32 %v5208_v58, %v7636_v21  ;;  %v2459_v1 = vrot.slane %v2458_v25, 1  ;;  %v2470_v23 = vmax.f32 %v5327_v10, %v5336_v48 }
 0x21e   :  { %v2681_v38 = vmul.f32 %v5208_v58, %v7637_v33  ;;  %v2685_v19 = vmul.f32 %v5208_v58, %v7638_v56  ;;  %v5356_v24 = vmul.f32 0.17677669, %v2451_v55  ;;  %v2689_v28 = vmul.f32 %v5208_v58, %v7639_v37  ;;  %v7743_v56 = vld [vmem:[#allocation76_spill] sm:$0xff]  ;;  %v7745_v37 = vld [vmem:[#allocation78_spill] sm:$0xff] }
 0x21f   :  { %v2211_v53 = vadd.f32 %v2210_v50, %v2208_v30  ;;  %v2693_v12 = vmul.f32 %v5208_v58, %v7640_v47  ;;  %v1904_v21 = vmul.f32 %v5288_v39, %v5260_v15  ;;  %v2460_v2 = vadd.f32 %v2459_v1, %v2458_v25 }
 0x220   :  { %v2464_v63 = vmul.f32 0.17677669, %v2424_v31  ;;  %v2473_v22 = vmax.f32 %v2469_v57, %v2470_v23  ;;  %v2471_v33 = vmax.f32 %v5331_v11, %v5356_v24  ;;  %v2704_v59 = vadd.f32 %v7743_v56, %v2673_v40  ;;  %v7748_v57 = vld [vmem:[#allocation29_spill] sm:$0xff] }
 0x221   :  { %v2212_v6 = vrot.slane %v2211_v53, 2  ;;  %v2713_v30 = vadd.f32 %v7744_v35, %v2677_v32  ;;  %v5368_v50 = vmul.f32 0.17677669, %v2460_v2  ;;  %v2722_v55 = vadd.f32 %v7745_v37, %v2681_v38 }
 0x222   :  { %v2731_v47 = vadd.f32 %v7746_v5, %v2685_v19  ;;  %v2740_v9 = vadd.f32 %v7747_v7, %v2689_v28  ;;  %v2705_v25 = vrot.slane %v2704_v59, 4  ;;  %v2749_v1 = vadd.f32 %v7748_v57, %v2693_v12 }
 0x223   :  { %v2213_v52 = vadd.f32 %v2212_v6, %v2211_v53  ;;  %v2714_v31 = vrot.slane %v2713_v30, 4  ;;  %v7749_v23 = vand.u32 2147483648, %v5011_v27  ;;  %vm1595_vm11 = vweird.f32 %v5133_v51 }
 0x224   :  { %v1905_v40 = vsub.f32 1.0, %v1904_v21  ;;  %v2472_v32 = vmax.f32 %v2464_v63, %v5368_v50  ;;  %v2706_v56 = vadd.f32 %v2705_v25, %v2704_v59  ;;  %v2723_v38 = vrot.slane %v2722_v55, 4  ;;  %vm5389_vm12 = vmor %vm1595_vm11, %vm1596_vm9 }
 0x225   :  { %v1289_v60 = vor.u32 1.1754944e-38, %v7749_v23  ;;  %v2214_v2 = vrot.slane %v2213_v52, 1  ;;  %v2741_v35 = vrot.slane %v2740_v9, 4  ;;  %v7750_v5 = vsel %vm5270_vm8, %v5101_v3, %v5255_v16 }
 0x226   :  { %v1599_v19 = vand.u32 2147483647, %v5133_v51  ;;  %v7753_v53 = vand.u32 2147483648, %v5133_v51  ;;  %v2474_v4 = vmax.f32 %v2471_v33, %v2472_v32  ;;  %v2732_v61 = vrot.slane %v2731_v47, 4 }
 0x227   :  { %v5385_v7 = vsel %vm5342_vm10, %v1289_v60, %v7750_v5  ;;  %v5402_v16 = vadd.f32 %v2214_v2, %v2213_v52  ;;  %v2715_v60 = vadd.f32 %v2714_v31, %v2713_v30  ;;  %v1906_v12 = vmul.f32 %v5288_v39, %v1905_v40 }
 0x228   :  { %v5396_v28 = vor.u32 1.1754944e-38, %v7753_v53  ;;  %v1914_v21 = vand.u32 2147483648, %v5260_v15  ;;  %v2475_v6 = vmax.f32 %v2473_v22, %v2474_v4  ;;  %v2750_v59 = vrot.slane %v2749_v1, 4 }
 0x229   :  { %3140 = vrcp.f32 %v5402_v16  ;;  %v2707_v37 = vrot.slane %v2706_v56, 2  ;;  %v2724_v25 = vadd.f32 %v2723_v38, %v2722_v55  ;;  %v2742_v33 = vadd.f32 %v2741_v35, %v2740_v9 }
 0x22a   :  { %v2476_v57 = vsub.f32 %v5319_v0, %v2475_v6  ;;  %v2477_v23 = vsub.f32 %v5327_v10, %v2475_v6  ;;  %v2478_v52 = vsub.f32 %v5331_v11, %v2475_v6  ;;  %v2479_v32 = vsub.f32 %v2464_v63, %v2475_v6 }
 0x22b   :  { %v2480_v30 = vsub.f32 %v5333_v62, %v2475_v6  ;;  %v2481_v31 = vsub.f32 %v5336_v48, %v2475_v6  ;;  %v2716_v40 = vrot.slane %v2715_v60, 2  ;;  %v2733_v2 = vadd.f32 %v2732_v61, %v2731_v47 }
 0x22c   :  { %v2482_v22 = vsub.f32 %v5356_v24, %v2475_v6  ;;  %v2483_v5 = vsub.f32 %v5368_v50, %v2475_v6  ;;  %v2484_v53 = vmul.f32 1.442695, %v2476_v57  ;;  %v2486_v55 = vmul.f32 1.442695, %v2477_v23 }
 0x22d   :  { %v2488_v9 = vmul.f32 1.442695, %v2478_v52  ;;  %v2490_v38 = vmul.f32 1.442695, %v2479_v32  ;;  %v2697_v10 = vmul.f32 %v5208_v58, %v7641_v13  ;;  %v2708_v0 = vadd.f32 %v2707_v37, %v2706_v56 }
 0x22e   :  { %3142 = vpow2.f32 %v2484_v53  ;;  %v2492_v11 = vmul.f32 1.442695, %v2480_v30  ;;  %v2725_v63 = vrot.slane %v2724_v25, 2  ;;  %v2743_v62 = vrot.slane %v2742_v33, 2 }
 0x22f   :  { %v5416_v35 = vpop.eup %3140  ;;  %3144 = vpow2.f32 %v2486_v55  ;;  %v2494_v48 = vmul.f32 1.442695, %v2481_v31  ;;  %v2717_v47 = vadd.f32 %v2716_v40, %v2715_v60  ;;  %v2751_v24 = vadd.f32 %v2750_v59, %v2749_v1 }
 0x230   :  { %v2217_v50 = vmul.f32 %v5416_v35, %v5402_v16  ;;  %3146 = vpow2.f32 %v2488_v9  ;;  %v2496_v4 = vmul.f32 1.442695, %v2482_v22  ;;  %v2734_v61 = vrot.slane %v2733_v2, 2 }
 0x231   :  { %3148 = vpow2.f32 %v2490_v38  ;;  %v2498_v6 = vmul.f32 1.442695, %v2483_v5  ;;  %v2701_v13 = vmul.f32 %v5208_v58, %v7642_v43  ;;  %v2709_v56 = vrot.slane %v2708_v0, 1  ;;  %v7754_v58 = vld [vmem:[#allocation30_spill] sm:$0xff] }
 0x232   :  { %3150 = vpow2.f32 %v2492_v11  ;;  %v2718_v37 = vrot.slane %v2717_v47, 1  ;;  %v2726_v57 = vadd.f32 %v2725_v63, %v2724_v25  ;;  %v2744_v23 = vadd.f32 %v2743_v62, %v2742_v33 }
 0x233   :  { %v5423_v52 = vadd.f32 %v5288_v39, %v1906_v12  ;;  %v2227_v1 = vand.u32 2147483648, %v5402_v16  ;;  %3152 = vpow2.f32 %v2494_v48  ;;  %v2752_v60 = vrot.slane %v2751_v24, 2  ;;  %v7755_v12 = vld [vmem:[#allocation56_spill] sm:$0xff] }
 0x234   :  { %v5426_v59 = vpop.eup %3142  ;;  %v2218_v32 = vsub.f32 1.0, %v2217_v50  ;;  %3154 = vpow2.f32 %v2496_v4  ;;  %v2735_v30 = vadd.f32 %v2734_v61, %v2733_v2  ;;  %v2745_v31 = vrot.slane %v2744_v23, 1  ;;  %v5447_v50 = vpop.permute.xlu2 %106 }
 0x235   :  { %v5428_v40 = vpop.eup %3144  ;;  %vm1909_vm13 = vweird.f32 %v5288_v39  ;;  %3156 = vpow2.f32 %v2498_v6  ;;  %v2753_v43 = vadd.f32 %v2752_v60, %v2751_v24  ;;  %v2758_v25 = vadd.f32 %v7754_v58, %v2697_v10 }
 0x236   :  { %v2767_v33 = vadd.f32 %v7755_v12, %v2701_v13  ;;  %v5433_v22 = vpop.eup %3146  ;;  %vm2222_vm14 = vweird.f32 %v5416_v35  ;;  %v2508_v5 = vrot.slane %v5428_v40, 7  ;;  %v2710_v53 = vadd.f32 %v2709_v56, %v2708_v0 }
 0x237   :  { %v2719_v55 = vadd.f32 %v2718_v37, %v2717_v47  ;;  %v2727_v2 = vrot.slane %v2726_v57, 1  ;;  %v5437_v9 = vpop.eup %3148  ;;  %vm1908_vm15 = vweird.f32 %v5260_v15  ;;  %v2510_v38 = vrot.slane %v5433_v22, 6 }
 0x238   :  { %v2754_v11 = vrot.slane %v2753_v43, 1  ;;  %v2759_v63 = vrot.slane %v2758_v25, 4  ;;  %v2768_v10 = vrot.slane %v2767_v33, 4  ;;  %v5441_v62 = vpop.eup %3150  ;;  %v2219_v48 = vmul.f32 %v5416_v35, %v2218_v32  ;;  %vm5488_vm8 = vmor %vm1908_vm15, %vm1909_vm13 }
 0x239   :  { %v2509_v24 = vsel %vm626_vm0, %v2508_v5, %v5426_v59  ;;  %v2512_v0 = vrot.slane %v5437_v9, 5  ;;  %v2736_v47 = vrot.slane %v2735_v30, 1  ;;  %v5449_v4 = vpop.eup %3152  ;;  %v2514_v6 = vrot.slane %v5441_v62, 4 }
 0x23a   :  { %v2511_v61 = vsel %vm629_vm1, %v2510_v38, %v2509_v24  ;;  %v2746_v13 = vadd.f32 %v2745_v31, %v2744_v23  ;;  %v2755_v56 = vadd.f32 %v2754_v11, %v2753_v43  ;;  %v5453_v37 = vpop.eup %3154  ;;  %v2516_v32 = vrot.slane %v5449_v4, 3 }
 0x23b   :  { %v2513_v60 = vsel %vm632_vm2, %v2512_v0, %v2511_v61  ;;  %v2760_v58 = vadd.f32 %v2759_v63, %v2758_v25  ;;  %v5457_v12 = vmul.f32 0.17677669, %v2710_v53  ;;  %v5459_v5 = vpop.eup %3156  ;;  %vm5463_vm7 = vcmp.eq.f32.partialorder %v1599_v19, 8.507059e+37 }
 0x23c   :  { %v2515_v23 = vsel %vm635_vm3, %v2514_v6, %v2513_v60  ;;  %v2518_v31 = vrot.slane %v5453_v37, 2  ;;  %v2769_v43 = vadd.f32 %v2768_v10, %v2767_v33  ;;  %v5469_v38 = vmul.f32 0.17677669, %v2719_v55 }
 0x23d   :  { %v2517_v11 = vsel %vm638_vm4, %v2516_v32, %v2515_v23  ;;  %v2520_v25 = vrot.slane %v5459_v5, 1  ;;  %v2728_v53 = vadd.f32 %v2727_v2, %v2726_v57  ;;  %v2761_v63 = vrot.slane %v2760_v58, 2 }
 0x23e   :  { %v2519_v24 = vsel %vm641_vm5, %v2518_v31, %v2517_v11  ;;  %v2770_v51 = vrot.slane %v2769_v43, 2  ;;  %v5474_v19 = vmul.f32 0.17677669, %v2746_v13  ;;  %v5476_v0 = vmul.f32 0.17677669, %v2755_v56 }
 0x23f   :  { %v2220_v61 = vadd.f32 %v5416_v35, %v2219_v48  ;;  %v2521_v6 = vsel %vm644_vm6, %v2520_v25, %v2519_v24  ;;  %v2737_v33 = vadd.f32 %v2736_v47, %v2735_v30  ;;  %v2762_v55 = vadd.f32 %v2761_v63, %v2760_v58  ;;  %v5510_v63 = vpop.permute.xlu2 %120 }
 0x240   :  { %v2523_v10 = vrot.slane %v2521_v6, 4  ;;  %v2771_v60 = vadd.f32 %v2770_v51, %v2769_v43  ;;  %v2782_v32 = vmax.f32 %v5457_v12, %v5474_v19  ;;  %v2783_v57 = vmax.f32 %v5469_v38, %v5476_v0  ;;  %v102_v43 = vpop.permute.xlu1 %101 }
 0x241   :  { %v1912_v48 = vand.u32 2147483647, %v5260_v15  ;;  %vm2221_vm9 = vweird.f32 %v5402_v16  ;;  %v2225_v30 = vand.u32 2147483647, %v5402_v16  ;;  %v2763_v47 = vrot.slane %v2762_v55, 1 }
 0x242   :  { %v1915_v13 = vor.u32 1.1754944e-38, %v1914_v21  ;;  %vm5499_vm10 = vmor %vm2221_vm9, %vm2222_vm14  ;;  %v2524_v58 = vadd.f32 %v2523_v10, %v2521_v6  ;;  %v2772_v23 = vrot.slane %v2771_v60, 1  ;;  %v2786_v31 = vmax.f32 %v2782_v32, %v2783_v57 }
 0x243   :  { %v1911_v11 = vsel %vm5488_vm8, %v5288_v39, %v5423_v52  ;;  %v2224_v15 = vsel %vm5499_vm10, %v5416_v35, %v2220_v61  ;;  %v2764_v21 = vadd.f32 %v2763_v47, %v2762_v55  ;;  %v2776_v25 = vmul.f32 0.17677669, %v2728_v53 }
 0x244   :  { %v2228_v24 = vor.u32 1.1754944e-38, %v2227_v1  ;;  %v2525_v51 = vrot.slane %v2524_v58, 2  ;;  %v2773_v6 = vadd.f32 %v2772_v23, %v2771_v60  ;;  %v2777_v10 = vmul.f32 0.17677669, %v2737_v33 }
 0x245   :  { %v7762_v32 = vsel %vm5389_vm12, %v5184_v44, %v5294_v45  ;;  %vm1913_vm11 = vcmp.eq.f32.partialorder %v1912_v48, 8.507059e+37  ;;  %vm2226_vm13 = vcmp.eq.f32.partialorder %v2225_v30, 8.507059e+37  ;;  %v5522_v35 = vmul.f32 0.17677669, %v2764_v21  ;;  %v7764_v48 = vld [vmem:[#allocation18_spill] sm:$0xff]  ;;  %v7765_v30 = vld [vmem:[#allocation19_spill] sm:$0xff] }
 0x246   :  { %v1603_v39 = vsel %vm5463_vm7, %v5396_v28, %v7762_v32  ;;  %v1916_v52 = vsel %vm1913_vm11, %v1915_v13, %v1911_v11  ;;  %v2229_v53 = vsel %vm2226_vm13, %v2228_v24, %v2224_v15  ;;  %v2526_v16 = vadd.f32 %v2525_v51, %v2524_v58 }
 0x247   :  { %v5524_v1 = vmul.f32 0.17677669, %v2773_v6  ;;  %v5527_v61 = vperm.slane %v5110_v49, 0  ;;  %v2784_v27 = vmax.f32 %v2776_v25, %v5522_v35  ;;  %v5531_v44 = vperm.slane %v5251_v20, 0  ;;  %v7763_v49 = vld [vmem:[#allocation17_spill] sm:$0xff] }
 0x248   :  { %v5534_v45 = vperm.slane %v5385_v7, 0  ;;  %v2527_v28 = vrot.slane %v2526_v16, 1  ;;  %v5537_v33 = vperm.slane %v1603_v39, 0  ;;  %v5539_v55 = vperm.slane %v1916_v52, 0  ;;  %v5584_v24 = vpop.permute.xlu1 %116 }
 0x249   :  { %v2785_v3 = vmax.f32 %v2777_v10, %v5524_v1  ;;  %v5541_v60 = vperm.slane %v2229_v53, 0  ;;  %v5545_v57 = vmul.f32 %v7763_v49, %v5447_v50  ;;  %v5551_v7 = vmul.f32 %v7764_v48, %v5447_v50  ;;  %7766 = vst [vmem:[#allocation113_spill] sm:$0xff] %v5584_v24 }
 0x24a   :  { %v5547_v2 = vadd.f32 %v2527_v28, %v2526_v16  ;;  %v5555_v47 = vmul.f32 %v7765_v30, %v5447_v50  ;;  %v5559_v13 = vmul.f32 %v7644_v36, %v5447_v50  ;;  %v5563_v56 = vmul.f32 %v7669_v54, %v5447_v50 }
 0x24b   :  { %v2787_v20 = vmax.f32 %v2784_v27, %v2785_v3  ;;  %v5567_v58 = vmul.f32 %v7670_v26, %v5447_v50  ;;  %v5571_v23 = vmul.f32 %v7689_v42, %v5447_v50  ;;  %v5576_v11 = vmul.f32 %v7690_v29, %v5447_v50  ;;  %v5595_v50 = vpop.permute.xlu2 %128 }
 0x24c   :  { %3158 = vrcp.f32 %v5547_v2  ;;  %v5579_v15 = vmul.f32 %v7763_v49, %v102_v43  ;;  %v5582_v21 = vmul.f32 %v7764_v48, %v102_v43  ;;  %v5587_v6 = vmul.f32 %v7765_v30, %v102_v43  ;;  %7770 = vst [vmem:[#allocation61_spill] sm:$0xff] %v5595_v50 }
 0x24d   :  { %v2788_v51 = vmax.f32 %v2786_v31, %v2787_v20  ;;  %v5590_v32 = vmul.f32 %v7644_v36, %v102_v43  ;;  %v5593_v39 = vmul.f32 %v7669_v54, %v102_v43  ;;  %v2538_v52 = vand.u32 2147483647, %v5547_v2 }
 0x24e   :  { %7767 = vst [vmem:[#allocation58_spill] sm:$0xff] %v5587_v6  ;;  %v2540_v53 = vand.u32 2147483648, %v5547_v2  ;;  %v5600_v16 = vmul.f32 %v7670_v26, %v102_v43  ;;  %v5603_v31 = vmul.f32 %v7689_v42, %v102_v43  ;;  %vm2534_vm12 = vweird.f32 %v5547_v2 }
 0x24f   :  { %7768 = vst [vmem:[#allocation59_spill] sm:$0xff] %v5590_v32  ;;  %v2789_v27 = vsub.f32 %v5457_v12, %v2788_v51  ;;  %v2790_v28 = vsub.f32 %v5469_v38, %v2788_v51  ;;  %v2791_v3 = vsub.f32 %v2776_v25, %v2788_v51  ;;  %v2792_v20 = vsub.f32 %v2777_v10, %v2788_v51  ;;  %v7774_v10 = vld [vmem:[#allocation8_spill] sm:$0xff] }
 0x250   :  { %7769 = vst [vmem:[#allocation60_spill] sm:$0xff] %v5593_v39  ;;  %v2793_v54 = vsub.f32 %v5474_v19, %v2788_v51  ;;  %v2794_v50 = vsub.f32 %v5476_v0, %v2788_v51  ;;  %v2795_v36 = vsub.f32 %v5522_v35, %v2788_v51  ;;  %v2796_v30 = vsub.f32 %v5524_v1, %v2788_v51  ;;  %v7776_v0 = vld [vmem:[#allocation9_spill] sm:$0xff] }
 0x251   :  { %7771 = vst [vmem:[#allocation62_spill] sm:$0xff] %v5600_v16  ;;  %v2797_v26 = vmul.f32 1.442695, %v2789_v27  ;;  %v2799_v48 = vmul.f32 1.442695, %v2790_v28  ;;  %v5613_v49 = vmul.f32 %v7690_v29, %v102_v43  ;;  %v2541_v38 = vor.u32 1.1754944e-38, %v2540_v53 }
 0x252   :  { %7772 = vst [vmem:[#allocation68_spill] sm:$0xff] %v5603_v31  ;;  %v2801_v42 = vmul.f32 1.442695, %v2791_v3  ;;  %v3159_v12 = vpop.eup %3158  ;;  %v2803_v25 = vmul.f32 1.442695, %v2792_v20  ;;  %v5617_v19 = vmul.f32 %v7774_v10, %v5510_v63  ;;  %v5621_v35 = vmul.f32 %v7776_v0, %v5510_v63  ;;  %v7778_v27 = vld [vmem:[#allocation10_spill] sm:$0xff]  ;;  %v125_v31 = vpop.permute.xlu1 %124 }
 0x253   :  { %7773 = vst [vmem:[#allocation69_spill] sm:$0xff] %v5613_v49  ;;  %v2530_v1 = vmul.f32 %v3159_v12, %v5547_v2  ;;  %3160 = vpow2.f32 %v2797_v26  ;;  %v2805_v51 = vmul.f32 1.442695, %v2793_v54  ;;  %v5626_v28 = vmul.f32 %v7778_v27, %v5510_v63  ;;  %v7784_v26 = vld [vmem:[#allocation14_spill] sm:$0xff] }
 0x254   :  { %7775 = vst [vmem:[#allocation70_spill] sm:$0xff] %v5617_v19  ;;  %3162 = vpow2.f32 %v2799_v48  ;;  %v2807_v43 = vmul.f32 1.442695, %v2794_v50  ;;  %v5630_v53 = vmul.f32 %v7647_v8, %v5510_v63  ;;  %v5634_v3 = vmul.f32 %v7672_v41, %v5510_v63  ;;  %v7786_v50 = vld [vmem:[#allocation15_spill] sm:$0xff] }
 0x255   :  { %7777 = vst [vmem:[#allocation71_spill] sm:$0xff] %v5621_v35  ;;  %v2531_v20 = vsub.f32 1.0, %v2530_v1  ;;  %vm5636_vm14 = vcmp.eq.f32.partialorder %v2538_v52, 8.507059e+37  ;;  %3164 = vpow2.f32 %v2801_v42  ;;  %v2809_v54 = vmul.f32 1.442695, %v2795_v36  ;;  %v7788_v52 = vld [vmem:[#allocation16_spill] sm:$0xff]  ;;  %v173_v42 = vpop.permute.xlu2 %172 }
 0x256   :  { %7779 = vst [vmem:[#allocation72_spill] sm:$0xff] %v5626_v28  ;;  %v5642_v24 = vmul.f32 %v7784_v26, %v5510_v63  ;;  %vm2535_vm15 = vweird.f32 %v3159_v12  ;;  %3166 = vpow2.f32 %v2803_v25  ;;  %v2811_v48 = vmul.f32 1.442695, %v2796_v30 }
 0x257   :  { %7780 = vst [vmem:[#allocation13_spill] sm:$0xff] %v5630_v53  ;;  %v5646_v49 = vmul.f32 %v7786_v50, %v5510_v63  ;;  %3168 = vpow2.f32 %v2805_v51  ;;  %v5650_v1 = vmul.f32 %v7788_v52, %v5510_v63  ;;  %v213_v36 = vmul.f32 %v7774_v10, %v125_v31  ;;  %vm5665_vm7 = vmor %vm2534_vm12, %vm2535_vm15  ;;  %v7810_v53 = vld [vmem:[#allocation94_spill] sm:$0xff] }
 0x258   :  { %7781 = vst [vmem:[#allocation38_spill] sm:$0xff] %v5634_v3  ;;  %v2532_v3 = vmul.f32 %v3159_v12, %v2531_v20  ;;  %3170 = vpow2.f32 %v2807_v43  ;;  %v281_v25 = vmul.f32 %v7778_v27, %v125_v31  ;;  %v201_v30 = vadd.f32 %v5545_v57, %v173_v42 }
 0x259   :  { %7785 = vst [vmem:[#allocation49_spill] sm:$0xff] %v5642_v24  ;;  %v247_v24 = vmul.f32 %v7776_v0, %v125_v31  ;;  %v5656_v16 = vpop.eup %3160  ;;  %3172 = vpow2.f32 %v2809_v54  ;;  %v235_v51 = vadd.f32 %v5551_v7, %v173_v42  ;;  %v269_v20 = vadd.f32 %v5555_v47, %v173_v42 }
 0x25a   :  { %7787 = vst [vmem:[#allocation114_spill] sm:$0xff] %v5646_v49  ;;  %v2533_v49 = vadd.f32 %v3159_v12, %v2532_v3  ;;  %v5660_v63 = vpop.eup %3162  ;;  %3174 = vpow2.f32 %v2811_v48  ;;  %v315_v57 = vmul.f32 %v7647_v8, %v125_v31  ;;  %v349_v27 = vmul.f32 %v7672_v41, %v125_v31 }
 0x25b   :  { %7789 = vst [vmem:[#allocation115_spill] sm:$0xff] %v5650_v1  ;;  %v303_v3 = vadd.f32 %v5559_v13, %v173_v42  ;;  %v5672_v54 = vpop.eup %3164  ;;  %v2821_v47 = vrot.slane %v5660_v63, 7  ;;  %v383_v2 = vmul.f32 %v7784_v26, %v125_v31  ;;  %v337_v0 = vadd.f32 %v5563_v56, %v173_v42 }
 0x25c   :  { %v2537_v7 = vsel %vm5665_vm7, %v3159_v12, %v2533_v49  ;;  %v5679_v10 = vpop.eup %3166  ;;  %v2823_v48 = vrot.slane %v5672_v54, 6  ;;  %v417_v8 = vmul.f32 %v7786_v50, %v125_v31  ;;  %v451_v41 = vmul.f32 %v7788_v52, %v125_v31 }
 0x25d   :  { %v5684_v13 = vadd.f32 %v213_v36, %v201_v30  ;;  %v5686_v1 = vpop.eup %3168  ;;  %v2822_v49 = vsel %vm626_vm0, %v2821_v47, %v5656_v16  ;;  %v2825_v12 = vrot.slane %v5679_v10, 5  ;;  %v5691_v43 = vadd.f32 %v247_v24, %v235_v51 }
 0x25e   :  { %v5693_v56 = vadd.f32 %v281_v25, %v269_v20  ;;  %v5695_v26 = vpop.eup %3170  ;;  %v2542_v50 = vsel %vm5636_vm14, %v2541_v38, %v2537_v7  ;;  %v2824_v31 = vsel %vm629_vm1, %v2823_v48, %v2822_v49  ;;  %v2827_v36 = vrot.slane %v5686_v1, 4  ;;  %v7792_v49 = vld [vmem:[#allocation57_spill] sm:$0xff] }
 0x25f   :  { %v5701_v30 = vadd.f32 %v315_v57, %v303_v3  ;;  %v5703_v52 = vpop.eup %3172  ;;  %v2826_v47 = vsel %vm632_vm2, %v2825_v12, %v2824_v31  ;;  %v2829_v24 = vrot.slane %v5695_v26, 3  ;;  %v5707_v51 = vadd.f32 %v349_v27, %v337_v0  ;;  %v7796_v31 = vld [vmem:[#allocation64_spill] sm:$0xff] }
 0x260   :  { %v371_v25 = vadd.f32 %v5567_v58, %v173_v42  ;;  %v5710_v20 = vpop.eup %3174  ;;  %v2828_v29 = vsel %vm635_vm3, %v2827_v36, %v2826_v47  ;;  %v2831_v38 = vrot.slane %v5703_v52, 2  ;;  %v405_v7 = vadd.f32 %v5571_v23, %v173_v42  ;;  %v7794_v58 = vld [vmem:[#allocation63_spill] sm:$0xff]  ;;  %v7798_v23 = vld [vmem:[#allocation65_spill] sm:$0xff] }
 0x261   :  { %v439_v57 = vadd.f32 %v5576_v11, %v173_v42  ;;  %v2830_v3 = vsel %vm638_vm4, %v2829_v24, %v2828_v29  ;;  %v2833_v48 = vrot.slane %v5710_v20, 1  ;;  %v5720_v0 = vmul.f32 %v7792_v49, %v5527_v61  ;;  %v7800_v42 = vld [vmem:[#allocation66_spill] sm:$0xff] }
 0x262   :  { %v5724_v27 = vmul.f32 %v7794_v58, %v5527_v61  ;;  %v2832_v12 = vsel %vm641_vm5, %v2831_v38, %v2830_v3  ;;  %v5729_v36 = vmul.f32 %v7796_v31, %v5527_v61  ;;  %v5733_v11 = vmul.f32 %v7798_v23, %v5527_v61  ;;  %v7802_v49 = vld [vmem:[#allocation110_spill] sm:$0xff]  ;;  %v7804_v38 = vld [vmem:[#allocation67_spill] sm:$0xff] }
 0x263   :  { %7793 = vst [vmem:[#allocation116_spill] sm:$0xff] %v5720_v0  ;;  %v5737_v47 = vmul.f32 %v7800_v42, %v5527_v61  ;;  %v5739_v24 = vperm.slane %v2542_v50, 0  ;;  %v2834_v29 = vsel %vm644_vm6, %v2833_v48, %v2832_v12  ;;  %v5744_v58 = vmul.f32 %v7802_v49, %v5527_v61 }
 0x264   :  { %7795 = vst [vmem:[#allocation117_spill] sm:$0xff] %v5724_v27  ;;  %v5748_v3 = vmul.f32 %v7804_v38, %v5527_v61  ;;  %v2836_v31 = vrot.slane %v2834_v29, 4  ;;  %v5751_v23 = vperm.slane %v5720_v0, 0  ;;  %v5754_v39 = vperm.slane %v5724_v27, 0 }
 0x265   :  { %7797 = vst [vmem:[#allocation118_spill] sm:$0xff] %v5729_v36  ;;  %v5757_v50 = vperm.slane %v5729_v36, 0  ;;  %v5759_v42 = vadd.f32 %v383_v2, %v371_v25  ;;  %v5761_v48 = vadd.f32 %v417_v8, %v405_v7  ;;  %v5763_v12 = vadd.f32 %v451_v41, %v439_v57  ;;  %v7815_v57 = vld [vmem:[#allocation44_spill] sm:$0xff] }
 0x266   :  { %7799 = vst [vmem:[#allocation33_spill] sm:$0xff] %v5733_v11  ;;  %v5766_v49 = vperm.slane %v5733_v11, 0  ;;  %v2837_v38 = vadd.f32 %v2836_v31, %v2834_v29  ;;  %v5770_v0 = vmul.f32 %v7810_v53, %v5527_v61  ;;  %v702_v27 = vmul.f32 %v5751_v23, %v5684_v13  ;;  %v7817_v31 = vld [vmem:[#allocation95_spill] sm:$0xff] }
 0x267   :  { %7801 = vst [vmem:[#allocation34_spill] sm:$0xff] %v5737_v47  ;;  %v5775_v36 = vperm.slane %v5737_v47, 0  ;;  %v711_v8 = vmul.f32 %v5754_v39, %v5691_v43  ;;  %v720_v41 = vmul.f32 %v5757_v50, %v5693_v56  ;;  %v5782_v2 = vperm.slane %v5744_v58, 0 }
 0x268   :  { %7803 = vst [vmem:[#allocation35_spill] sm:$0xff] %v5744_v58  ;;  %v5785_v25 = vperm.slane %v5748_v3, 0  ;;  %v2838_v61 = vrot.slane %v2837_v38, 2  ;;  %v706_v53 = vadd.f32 %v702_v27, %v5684_v13  ;;  %v729_v7 = vmul.f32 %v5766_v49, %v5701_v30  ;;  %v7819_v58 = vld [vmem:[#allocation96_spill] sm:$0xff]  ;;  %v7823_v27 = vld [vmem:[#allocation98_spill] sm:$0xff] }
 0x269   :  { %7805 = vst [vmem:[#allocation36_spill] sm:$0xff] %v5748_v3  ;;  %v5792_v29 = vmul.f32 %v7815_v57, %v5531_v44  ;;  %v5796_v47 = vmul.f32 %v7817_v31, %v5531_v44  ;;  %v5800_v11 = vmul.f32 %v7819_v58, %v5531_v44  ;;  %v7821_v3 = vld [vmem:[#allocation97_spill] sm:$0xff]  ;;  %v5811_v57 = vperm.slane %v5770_v0, 0  ;;  %v7826_v31 = vld [vmem:[#allocation99_spill] sm:$0xff]  ;;  %v7828_v58 = vld [vmem:[#allocation108_spill] sm:$0xff] }
 0x26a   :  { %7806 = vst [vmem:[#allocation41_spill] sm:$0xff] %v5751_v23  ;;  %v715_v23 = vadd.f32 %v711_v8, %v706_v53  ;;  %v5815_v28 = vmul.f32 %v7826_v31, %v5531_v44  ;;  %v5819_v35 = vmul.f32 %v7828_v58, %v5531_v44  ;;  %v738_v58 = vmul.f32 %v5775_v36, %v5707_v51 }
 0x26b   :  { %7807 = vst [vmem:[#allocation31_spill] sm:$0xff] %v5754_v39  ;;  %v5808_v39 = vmul.f32 %v7823_v27, %v5531_v44  ;;  %v5826_v27 = vperm.slane %v5792_v29, 0  ;;  %v5832_v53 = vperm.slane %v5800_v11, 0 }
 0x26c   :  { %7808 = vst [vmem:[#allocation37_spill] sm:$0xff] %v5757_v50  ;;  %v5804_v50 = vmul.f32 %v7821_v3, %v5531_v44  ;;  %v7830_v3 = vld [vmem:[#allocation100_spill] sm:$0xff] }
 0x26d   :  { %7809 = vst [vmem:[#allocation39_spill] sm:$0xff] %v5766_v49  ;;  %v2839_v49 = vadd.f32 %v2838_v61, %v2837_v38  ;;  %v5823_v19 = vmul.f32 %v7830_v3, %v5531_v44  ;;  %v5829_v38 = vperm.slane %v5796_v47, 0  ;;  %v724_v61 = vadd.f32 %v720_v41, %v715_v23 }
 0x26e   :  { %7811 = vst [vmem:[#allocation40_spill] sm:$0xff] %v5770_v0  ;;  %v5835_v31 = vperm.slane %v5804_v50, 0  ;;  %v1014_v44 = vmul.f32 %v5826_v27, %v5684_v13  ;;  %v5842_v3 = vperm.slane %v5808_v39, 0  ;;  %v747_v41 = vmul.f32 %v5782_v2, %v5759_v42 }
 0x26f   :  { %7812 = vst [vmem:[#allocation86_spill] sm:$0xff] %v5775_v36  ;;  %v2840_v8 = vrot.slane %v2839_v49, 1  ;;  %v733_v23 = vadd.f32 %v729_v7, %v724_v61 }
 0x270   :  { %7813 = vst [vmem:[#allocation87_spill] sm:$0xff] %v5782_v2  ;;  %v1041_v7 = vmul.f32 %v5835_v31, %v5701_v30 }
 0x271   :  { %7814 = vst [vmem:[#allocation88_spill] sm:$0xff] %v5785_v25  ;;  %v5847_v0 = vadd.f32 %v2840_v8, %v2839_v49  ;;  %v1032_v49 = vmul.f32 %v5832_v53, %v5693_v56  ;;  %v1050_v8 = vmul.f32 %v5842_v3, %v5707_v51 }
 0x272   :  { %7816 = vst [vmem:[#allocation82_spill] sm:$0xff] %v5792_v29  ;;  %v5845_v29 = vperm.slane %v5815_v28, 0 }
 0x273   :  { %7818 = vst [vmem:[#allocation89_spill] sm:$0xff] %v5796_v47  ;;  %v1018_v47 = vadd.f32 %v1014_v44, %v5691_v43  ;;  %3176 = vrcp.f32 %v5847_v0  ;;  %v2851_v61 = vand.u32 2147483647, %v5847_v0  ;;  %v742_v44 = vadd.f32 %v738_v58, %v733_v23  ;;  %v7846_v23 = vld [vmem:[#allocation103_spill] sm:$0xff] }
 0x274   :  { %7820 = vst [vmem:[#allocation90_spill] sm:$0xff] %v5800_v11  ;;  %v765_v11 = vmul.f32 %v5811_v57, %v5763_v12  ;;  %vm2847_vm8 = vweird.f32 %v5847_v0 }
 0x275   :  { %7822 = vst [vmem:[#allocation91_spill] sm:$0xff] %v5804_v50  ;;  %v756_v50 = vmul.f32 %v5785_v25, %v5761_v48  ;;  %vm5926_vm9 = vcmp.eq.f32.partialorder %v2851_v61, 8.507059e+37 }
 0x276   :  { %7824 = vst [vmem:[#allocation32_spill] sm:$0xff] %v5808_v39  ;;  %v1023_v39 = vmul.f32 %v5829_v38, %v5691_v43 }
 0x277   :  { %7825 = vst [vmem:[#allocation92_spill] sm:$0xff] %v5811_v57 }
 0x278   :  { %7827 = vst [vmem:[#allocation93_spill] sm:$0xff] %v5815_v28  ;;  %v5859_v28 = vperm.slane %v5819_v35, 0  ;;  %v1027_v57 = vadd.f32 %v1023_v39, %v1018_v47  ;;  %v5883_v39 = vperm.slane %v5823_v19, 0  ;;  %v7844_v47 = vld [vmem:[#allocation45_spill] sm:$0xff] }
 0x279   :  { %7829 = vst [vmem:[#allocation22_spill] sm:$0xff] %v5819_v35  ;;  %v2853_v35 = vand.u32 2147483648, %v5847_v0  ;;  %v5887_v58 = vmul.f32 %v7844_v47, %v5534_v45  ;;  %v7854_v47 = vld [vmem:[#allocation27_spill] sm:$0xff] }
 0x27a   :  { %7831 = vst [vmem:[#allocation79_spill] sm:$0xff] %v5823_v19  ;;  %v1068_v25 = vmul.f32 %v5859_v28, %v5761_v48  ;;  %v1036_v36 = vadd.f32 %v1032_v49, %v1027_v57  ;;  %v7852_v57 = vld [vmem:[#allocation106_spill] sm:$0xff] }
 0x27b   :  { %7832 = vst [vmem:[#allocation75_spill] sm:$0xff] %v5826_v27 }
 0x27c   :  { %7833 = vst [vmem:[#allocation80_spill] sm:$0xff] %v5829_v38  ;;  %v1059_v38 = vmul.f32 %v5845_v29, %v5759_v42 }
 0x27d   :  { %7834 = vst [vmem:[#allocation81_spill] sm:$0xff] %v5832_v53  ;;  %v7839_v53 = vld [vmem:[#allocation101_spill] sm:$0xff] }
 0x27e   :  { %7835 = vst [vmem:[#allocation26_spill] sm:$0xff] %v5835_v31  ;;  %v5876_v27 = vmul.f32 %v7839_v53, %v5534_v45  ;;  %v7841_v31 = vld [vmem:[#allocation102_spill] sm:$0xff]  ;;  %v7848_v53 = vld [vmem:[#allocation104_spill] sm:$0xff] }
 0x27f   :  { %7836 = vst [vmem:[#allocation76_spill] sm:$0xff] %v5842_v3  ;;  %v5880_v2 = vmul.f32 %v7841_v31, %v5534_v45  ;;  %v751_v3 = vadd.f32 %v747_v41, %v742_v44  ;;  %v7850_v31 = vld [vmem:[#allocation105_spill] sm:$0xff]  ;;  %v5903_v41 = vmul.f32 %v7852_v57, %v5534_v45  ;;  %v1045_v44 = vadd.f32 %v1041_v7, %v1036_v36 }
 0x280   :  { %7837 = vst [vmem:[#allocation77_spill] sm:$0xff] %v5845_v29  ;;  %v5895_v29 = vmul.f32 %v7848_v53, %v5534_v45  ;;  %v5899_v32 = vmul.f32 %v7850_v31, %v5534_v45  ;;  %v5911_v19 = vperm.slane %v5876_v27, 0  ;;  %v3177_v53 = vpop.eup %3176  ;;  %v5917_v31 = vperm.slane %v5887_v58, 0 }
 0x281   :  { %7838 = vst [vmem:[#allocation78_spill] sm:$0xff] %v5859_v28  ;;  %v5891_v28 = vmul.f32 %v7846_v23, %v5534_v45  ;;  %v760_v49 = vadd.f32 %v756_v50, %v751_v3  ;;  %v5908_v23 = vmul.f32 %v7854_v47, %v5534_v45  ;;  %v5914_v6 = vperm.slane %v5880_v2, 0 }
 0x282   :  { %7840 = vst [vmem:[#allocation42_spill] sm:$0xff] %v5876_v27  ;;  %v5923_v50 = vperm.slane %v5895_v29, 0  ;;  %v2843_v36 = vmul.f32 %v3177_v53, %v5847_v0  ;;  %v2854_v3 = vor.u32 1.1754944e-38, %v2853_v35  ;;  %v1054_v47 = vadd.f32 %v1050_v8, %v1045_v44  ;;  %v7864_v44 = vld [vmem:[#allocation73_spill] sm:$0xff] }
 0x283   :  { %7842 = vst [vmem:[#allocation43_spill] sm:$0xff] %v5880_v2  ;;  %v5920_v57 = vperm.slane %v5891_v28, 0  ;;  %v769_v7 = vadd.f32 %v765_v11, %v760_v49  ;;  %vm2848_vm10 = vweird.f32 %v3177_v53  ;;  %v1077_v27 = vmul.f32 %v5883_v39, %v5763_v12 }
 0x284   :  { %7843 = vst [vmem:[#allocation29_spill] sm:$0xff] %v5883_v39  ;;  %v1063_v2 = vadd.f32 %v1059_v38, %v1054_v47  ;;  %v1345_v61 = vmul.f32 %v5917_v31, %v5693_v56  ;;  %v5939_v35 = vperm.slane %v5899_v32, 0  ;;  %v1363_v49 = vmul.f32 %v5923_v50, %v5707_v51  ;;  %v7867_v47 = vld [vmem:[#allocation107_spill] sm:$0xff]  ;;  %vm2849_vm11 = vmor %vm2847_vm8, %vm2848_vm10 }
 0x285   :  { %7845 = vst [vmem:[#allocation30_spill] sm:$0xff] %v5887_v58  ;;  %v2844_v58 = vsub.f32 1.0, %v2843_v36  ;;  %v1354_v8 = vmul.f32 %v5920_v57, %v5701_v30 }
 0x286   :  { %7847 = vst [vmem:[#allocation56_spill] sm:$0xff] %v5891_v28  ;;  %v1327_v28 = vmul.f32 %v5911_v19, %v5684_v13  ;;  %v1072_v38 = vadd.f32 %v1068_v25, %v1063_v2  ;;  %v7872_v25 = vld [vmem:[#allocation74_spill] sm:$0xff] }
 0x287   :  { %7849 = vst [vmem:[#allocation57_spill] sm:$0xff] %v5895_v29  ;;  %v1336_v29 = vmul.f32 %v5914_v6, %v5691_v43  ;;  %v2845_v36 = vmul.f32 %v3177_v53, %v2844_v58 }
 0x288   :  { %7851 = vst [vmem:[#allocation63_spill] sm:$0xff] %v5899_v32  ;;  %v1331_v11 = vadd.f32 %v1327_v28, %v5693_v56  ;;  %v5955_v32 = vmul.f32 %v7867_v47, %v5537_v33  ;;  %v1081_v2 = vadd.f32 %v1077_v27, %v1072_v38  ;;  %v7874_v47 = vld [vmem:[#allocation83_spill] sm:$0xff] }
 0x289   :  { %7853 = vst [vmem:[#allocation64_spill] sm:$0xff] %v5903_v41  ;;  %v2846_v58 = vadd.f32 %v3177_v53, %v2845_v36  ;;  %v5972_v39 = vmul.f32 %v7874_v47, %v5537_v33  ;;  %v7880_v36 = vld [vmem:[#allocation51_spill] sm:$0xff] }
 0x28a   :  { %7855 = vst [vmem:[#allocation65_spill] sm:$0xff] %v5908_v23  ;;  %v1340_v28 = vadd.f32 %v1336_v29, %v1331_v11  ;;  %v7876_v11 = vld [vmem:[#allocation50_spill] sm:$0xff]  ;;  %v5987_v38 = vmul.f32 %v7880_v36, %v5537_v33  ;;  %v5993_v0 = vperm.slane %v5955_v32, 0 }
 0x28b   :  { %7856 = vst [vmem:[#allocation66_spill] sm:$0xff] %v5911_v19 }
 0x28c   :  { %7857 = vst [vmem:[#allocation110_spill] sm:$0xff] %v5914_v6  ;;  %v5948_v6 = vmul.f32 %v7864_v44, %v5537_v33  ;;  %v1349_v29 = vadd.f32 %v1345_v61, %v1340_v28 }
 0x28d   :  { %7858 = vst [vmem:[#allocation67_spill] sm:$0xff] %v5917_v31  ;;  %v5960_v31 = vperm.slane %v5908_v23, 0  ;;  %v5979_v23 = vmul.f32 %v7876_v11, %v5537_v33 }
 0x28e   :  { %7859 = vst [vmem:[#allocation94_spill] sm:$0xff] %v5920_v57  ;;  %v1372_v57 = vmul.f32 %v5939_v35, %v5759_v42  ;;  %v5990_v47 = vperm.slane %v5948_v6, 0  ;;  %v1358_v11 = vadd.f32 %v1354_v8, %v1349_v29 }
 0x28f   :  { %7860 = vst [vmem:[#allocation44_spill] sm:$0xff] %v5923_v50  ;;  %v7870_v50 = vld [vmem:[#allocation28_spill] sm:$0xff]  ;;  %v6019_v29 = vperm.slane %v5979_v23, 0 }
 0x290   :  { %773 = vst [vmem:[#allocation2 + $0x8] sm:$0xff] %v769_v7  ;;  %v5951_v7 = vperm.slane %v5903_v41, 0  ;;  %v5964_v44 = vmul.f32 %v7870_v50, %v5537_v33  ;;  %v5968_v41 = vmul.f32 %v7872_v25, %v5537_v33  ;;  %v7878_v50 = vld [vmem:[#allocation84_spill] sm:$0xff]  ;;  %v2850_v25 = vsel %vm2849_vm11, %v3177_v53, %v2846_v58 }
 0x291   :  { %7863 = vst [vmem:[#allocation95_spill] sm:$0xff] %v5939_v35  ;;  %v5983_v27 = vmul.f32 %v7878_v50, %v5537_v33  ;;  %v2855_v28 = vsel %vm5926_vm9, %v2854_v3, %v2850_v25  ;;  %v6004_v33 = vperm.slane %v5972_v39, 0  ;;  %v1640_v36 = vmul.f32 %v5990_v47, %v5684_v13 }
 0x292   :  { %7865 = vst [vmem:[#allocation96_spill] sm:$0xff] %v5948_v6  ;;  %v5996_v61 = vperm.slane %v5964_v44, 0  ;;  %v6001_v50 = vperm.slane %v5968_v41, 0  ;;  %v6006_v53 = vperm.slane %v2855_v28, 0  ;;  %v1381_v58 = vmul.f32 %v5951_v7, %v5761_v48 }
 0x293   :  { %7866 = vst [vmem:[#allocation97_spill] sm:$0xff] %v5951_v7  ;;  %v1367_v45 = vadd.f32 %v1363_v49, %v1358_v11  ;;  %v1649_v3 = vmul.f32 %v5993_v0, %v5691_v43  ;;  %v1644_v25 = vadd.f32 %v1640_v36, %v5701_v30  ;;  %v6028_v49 = vmul.f32 %v5150_v17, %v5539_v55  ;;  %v7892_v36 = vld [vmem:[#allocation85_spill] sm:$0xff]  ;;  %v7895_v17 = vld [vmem:[#allocation52_spill] sm:$0xff] }
 0x294   :  { %7868 = vst [vmem:[#allocation98_spill] sm:$0xff] %v5955_v32  ;;  %v1658_v8 = vmul.f32 %v5996_v61, %v5693_v56  ;;  %v1667_v28 = vmul.f32 %v6001_v50, %v5701_v30  ;;  %v6031_v6 = vperm.slane %v5983_v27, 0 }
 0x295   :  { %7869 = vst [vmem:[#allocation99_spill] sm:$0xff] %v5960_v31  ;;  %v1376_v11 = vadd.f32 %v1372_v57, %v1367_v45  ;;  %v1653_v32 = vadd.f32 %v1649_v3, %v1644_v25  ;;  %v6048_v57 = vmul.f32 %v7895_v17, %v5539_v55  ;;  %v7901_v3 = vld [vmem:[#allocation46_spill] sm:$0xff]  ;;  %v6067_v17 = vperm.slane %v6028_v49, 0 }
 0x296   :  { %7871 = vst [vmem:[#allocation108_spill] sm:$0xff] %v5964_v44  ;;  %v6039_v44 = vmul.f32 %v7892_v36, %v5539_v55  ;;  %v6060_v25 = vmul.f32 %v7901_v3, %v5539_v55 }
 0x297   :  { %7873 = vst [vmem:[#allocation100_spill] sm:$0xff] %v5968_v41  ;;  %v7890_v41 = vld [vmem:[#allocation47_spill] sm:$0xff]  ;;  %v1385_v45 = vadd.f32 %v1381_v58, %v1376_v11 }
 0x298   :  { %7875 = vst [vmem:[#allocation101_spill] sm:$0xff] %v5972_v39  ;;  %v1676_v39 = vmul.f32 %v6004_v33, %v5707_v51  ;;  %v6073_v11 = vperm.slane %v6039_v44, 0 }
 0x299   :  { %7877 = vst [vmem:[#allocation102_spill] sm:$0xff] %v5979_v23  ;;  %v6035_v23 = vmul.f32 %v7890_v41, %v5539_v55 }
 0x29a   :  { %7879 = vst [vmem:[#allocation45_spill] sm:$0xff] %v5983_v27  ;;  %v7897_v27 = vld [vmem:[#allocation109_spill] sm:$0xff] }
 0x29b   :  { %7881 = vst [vmem:[#allocation103_spill] sm:$0xff] %v5987_v38  ;;  %v6052_v41 = vmul.f32 %v7897_v27, %v5539_v55  ;;  %v6070_v58 = vperm.slane %v6035_v23, 0 }
 0x29c   :  { %1086 = vst [vmem:[#allocation2 + $0x28] sm:$0xff] %v1081_v2  ;;  %v1390_v2 = vmul.f32 %v5960_v31, %v5763_v12 }
 0x29d   :  { %7882 = vst [vmem:[#allocation104_spill] sm:$0xff] %v5990_v47  ;;  %v6079_v3 = vperm.slane %v6052_v41, 0 }
 0x29e   :  { %7883 = vst [vmem:[#allocation105_spill] sm:$0xff] %v5993_v0  ;;  %v1394_v27 = vadd.f32 %v1390_v2, %v1385_v45  ;;  %v1962_v45 = vmul.f32 %v6070_v58, %v5691_v43 }
 0x29f   :  { %7884 = vst [vmem:[#allocation106_spill] sm:$0xff] %v5996_v61  ;;  %v7899_v61 = vld [vmem:[#allocation53_spill] sm:$0xff] }
 0x2a0   :  { %7885 = vst [vmem:[#allocation27_spill] sm:$0xff] %v6001_v50  ;;  %v6044_v50 = vperm.slane %v5987_v38, 0  ;;  %v6056_v36 = vmul.f32 %v7899_v61, %v5539_v55  ;;  %v7903_v38 = vld [vmem:[#allocation54_spill] sm:$0xff]  ;;  %v6076_v61 = vperm.slane %v6048_v57, 0 }
 0x2a1   :  { %7886 = vst [vmem:[#allocation73_spill] sm:$0xff] %v6004_v33  ;;  %v1685_v33 = vmul.f32 %v6019_v29, %v5759_v42  ;;  %v6064_v0 = vmul.f32 %v7903_v38, %v5539_v55  ;;  %v1694_v55 = vmul.f32 %v6031_v6, %v5761_v48  ;;  %v1953_v38 = vmul.f32 %v6067_v17, %v5684_v13 }
 0x2a2   :  { %7887 = vst [vmem:[#allocation107_spill] sm:$0xff] %v6019_v29  ;;  %v1662_v29 = vadd.f32 %v1658_v8, %v1653_v32  ;;  %v6086_v8 = vperm.slane %v6056_v36, 0  ;;  %v1703_v2 = vmul.f32 %v6044_v50, %v5763_v12 }
 0x2a3   :  { %7888 = vst [vmem:[#allocation28_spill] sm:$0xff] %v6028_v49 }
 0x2a4   :  { %7889 = vst [vmem:[#allocation74_spill] sm:$0xff] %v6031_v6  ;;  %v1671_v32 = vadd.f32 %v1667_v28, %v1662_v29  ;;  %v1980_v29 = vmul.f32 %v6076_v61, %v5701_v30  ;;  %v1998_v49 = vmul.f32 %v6086_v8, %v5759_v42 }
 0x2a5   :  { %7891 = vst [vmem:[#allocation83_spill] sm:$0xff] %v6035_v23  ;;  %v6110_v23 = vmul.f32 %v5297_v46, %v5541_v60  ;;  %v7917_v46 = vld [vmem:[#allocation111_spill] sm:$0xff] }
 0x2a6   :  { %7893 = vst [vmem:[#allocation50_spill] sm:$0xff] %v6039_v44  ;;  %v1680_v28 = vadd.f32 %v1676_v39, %v1671_v32  ;;  %v6106_v44 = vmul.f32 %v5291_v18, %v5541_v60  ;;  %v6114_v39 = vmul.f32 %v5299_v34, %v5541_v60  ;;  %v7915_v18 = vld [vmem:[#allocation48_spill] sm:$0xff]  ;;  %v7919_v34 = vld [vmem:[#allocation55_spill] sm:$0xff] }
 0x2a7   :  { %7894 = vst [vmem:[#allocation84_spill] sm:$0xff] %v6044_v50 }
 0x2a8   :  { %7896 = vst [vmem:[#allocation51_spill] sm:$0xff] %v6048_v57  ;;  %v1957_v57 = vadd.f32 %v1953_v38, %v5707_v51  ;;  %v1689_v32 = vadd.f32 %v1685_v33, %v1680_v28  ;;  %v7921_v33 = vld [vmem:[#allocation112_spill] sm:$0xff] }
 0x2a9   :  { %7898 = vst [vmem:[#allocation47_spill] sm:$0xff] %v6052_v41  ;;  %v1971_v41 = vmul.f32 %v6073_v11, %v5693_v56 }
 0x2aa   :  { %7900 = vst [vmem:[#allocation85_spill] sm:$0xff] %v6056_v36  ;;  %v1989_v36 = vmul.f32 %v6079_v3, %v5707_v51  ;;  %v1966_v38 = vadd.f32 %v1962_v45, %v1957_v57  ;;  %v6137_v57 = vmul.f32 %v7921_v33, %v5541_v60  ;;  %v1698_v45 = vadd.f32 %v1694_v55, %v1689_v32 }
 0x2ab   :  { %7902 = vst [vmem:[#allocation52_spill] sm:$0xff] %v6060_v25 }
 0x2ac   :  { %7904 = vst [vmem:[#allocation109_spill] sm:$0xff] %v6064_v0  ;;  %v1975_v28 = vadd.f32 %v1971_v41, %v1966_v38  ;;  %v1707_v55 = vadd.f32 %v1703_v2, %v1698_v45 }
 0x2ad   :  { %7905 = vst [vmem:[#allocation53_spill] sm:$0xff] %v6067_v17 }
 0x2ae   :  { %7906 = vst [vmem:[#allocation46_spill] sm:$0xff] %v6070_v58  ;;  %v1984_v41 = vadd.f32 %v1980_v29, %v1975_v28 }
 0x2af   :  { %7907 = vst [vmem:[#allocation54_spill] sm:$0xff] %v6073_v11  ;;  %v6133_v11 = vmul.f32 %v7919_v34, %v5541_v60 }
 0x2b0   :  { %7908 = vst [vmem:[#allocation119_spill] sm:$0xff] %v6076_v61  ;;  %v6129_v61 = vmul.f32 %v7917_v46, %v5541_v60  ;;  %v1993_v2 = vadd.f32 %v1989_v36, %v1984_v41  ;;  %v6189_v36 = vmul.f32 %v5437_v9, %v5739_v24  ;;  %v6206_v9 = vmul.f32 %v5453_v37, %v5739_v24 }
 0x2b1   :  { %7909 = vst [vmem:[#allocation120_spill] sm:$0xff] %v6079_v3  ;;  %v6125_v3 = vmul.f32 %v7915_v18, %v5541_v60  ;;  %v6143_v18 = vperm.slane %v6110_v23, 0  ;;  %v6173_v28 = vperm.slane %v6133_v11, 0 }
 0x2b2   :  { %7910 = vst [vmem:[#allocation121_spill] sm:$0xff] %v6086_v8  ;;  %v6121_v8 = vmul.f32 %v5303_v14, %v5541_v60  ;;  %v6140_v14 = vperm.slane %v6106_v44, 0  ;;  %v6159_v38 = vperm.slane %v6129_v61, 0  ;;  %v2002_v41 = vadd.f32 %v1998_v49, %v1993_v2 }
 0x2b3   :  { %1399 = vst [vmem:[#allocation2 + $0x48] sm:$0xff] %v1394_v27  ;;  %v6100_v27 = vperm.slane %v6060_v25, 0  ;;  %v6117_v25 = vperm.slane %v6064_v0, 0  ;;  %v6148_v0 = vperm.slane %v6114_v39, 0  ;;  %v6154_v60 = vperm.slane %v6125_v3, 0 }
 0x2b4   :  { %7911 = vst [vmem:[#allocation122_spill] sm:$0xff] %v6106_v44  ;;  %v6151_v34 = vperm.slane %v6121_v8, 0  ;;  %v2266_v32 = vmul.f32 %v6140_v14, %v5684_v13  ;;  %v2275_v44 = vmul.f32 %v6143_v18, %v5691_v43  ;;  %v6224_v37 = vperm.slane %v6189_v36, 0 }
 0x2b5   :  { %7912 = vst [vmem:[#allocation123_spill] sm:$0xff] %v6110_v23  ;;  %v2007_v46 = vmul.f32 %v6100_v27, %v5761_v48  ;;  %v2016_v33 = vmul.f32 %v6117_v25, %v5763_v12  ;;  %v2302_v45 = vmul.f32 %v6154_v60, %v5707_v51 }
 0x2b6   :  { %7913 = vst [vmem:[#allocation124_spill] sm:$0xff] %v6114_v39  ;;  %v2270_v29 = vadd.f32 %v2266_v32, %v5759_v42  ;;  %v6181_v39 = vmul.f32 %v5428_v40, %v5739_v24  ;;  %v6198_v40 = vmul.f32 %v5441_v62, %v5739_v24 }
 0x2b7   :  { %7914 = vst [vmem:[#allocation125_spill] sm:$0xff] %v6121_v8  ;;  %v2284_v8 = vmul.f32 %v6148_v0, %v5693_v56  ;;  %v2011_v49 = vadd.f32 %v2007_v46, %v2002_v41 }
 0x2b8   :  { %7916 = vst [vmem:[#allocation48_spill] sm:$0xff] %v6125_v3  ;;  %v2293_v3 = vmul.f32 %v6151_v34, %v5701_v30  ;;  %v2279_v32 = vadd.f32 %v2275_v44, %v2270_v29  ;;  %v6210_v44 = vmul.f32 %v5459_v5, %v5739_v24  ;;  %v6216_v62 = vperm.slane %v6181_v39, 0 }
 0x2b9   :  { %7918 = vst [vmem:[#allocation111_spill] sm:$0xff] %v6129_v61  ;;  %v6177_v61 = vmul.f32 %v5426_v59, %v5739_v24  ;;  %v6194_v59 = vperm.slane %v6137_v57, 0  ;;  %v6227_v5 = vperm.slane %v6198_v40, 0 }
 0x2ba   :  { %7920 = vst [vmem:[#allocation55_spill] sm:$0xff] %v6133_v11  ;;  %v2311_v11 = vmul.f32 %v6159_v38, %v5759_v42  ;;  %v2288_v2 = vadd.f32 %v2284_v8, %v2279_v32 }
 0x2bb   :  { %7922 = vst [vmem:[#allocation112_spill] sm:$0xff] %v6137_v57  ;;  %v6213_v29 = vperm.slane %v6177_v61, 0  ;;  %v2329_v32 = vmul.f32 %v6194_v59, %v5763_v12 }
 0x2bc   :  { %1712 = vst [vmem:[#allocation2 + $0x68] sm:$0xff] %v1707_v55  ;;  %v6185_v55 = vmul.f32 %v5433_v22, %v5739_v24  ;;  %v6202_v22 = vmul.f32 %v5449_v4, %v5739_v24  ;;  %v2320_v4 = vmul.f32 %v6173_v28, %v5761_v48  ;;  %v2020_v24 = vadd.f32 %v2016_v33, %v2011_v49 }
 0x2bd   :  { %7923 = vst [vmem:[#allocation126_spill] sm:$0xff] %v6177_v61  ;;  %v2297_v8 = vadd.f32 %v2293_v3, %v2288_v2  ;;  %v2579_v46 = vmul.f32 %v6213_v29, %v5684_v13  ;;  %v2588_v61 = vmul.f32 %v6216_v62, %v5691_v43  ;;  %v2615_v49 = vmul.f32 %v6227_v5, %v5707_v51 }
 0x2be   :  { %7924 = vst [vmem:[#allocation127_spill] sm:$0xff] %v6181_v39  ;;  %v6221_v57 = vperm.slane %v6185_v55, 0  ;;  %v6232_v41 = vperm.slane %v6202_v22, 0  ;;  %v6246_v2 = vperm.slane %v6206_v9, 0 }
 0x2bf   :  { %7925 = vst [vmem:[#allocation128_spill] sm:$0xff] %v6185_v55  ;;  %v2306_v3 = vadd.f32 %v2302_v45, %v2297_v8  ;;  %v2583_v33 = vadd.f32 %v2579_v46, %v5761_v48  ;;  %v6254_v55 = vmul.f32 %v5660_v63, %v6006_v53  ;;  %v6262_v45 = vmul.f32 %v5679_v10, %v6006_v53 }
 0x2c0   :  { %7926 = vst [vmem:[#allocation129_spill] sm:$0xff] %v6189_v36  ;;  %v2597_v36 = vmul.f32 %v6221_v57, %v5693_v56  ;;  %v6271_v63 = vmul.f32 %v5686_v1, %v6006_v53  ;;  %v6279_v10 = vmul.f32 %v5703_v52, %v6006_v53 }
 0x2c1   :  { %7927 = vst [vmem:[#allocation130_spill] sm:$0xff] %v6198_v40  ;;  %v2606_v40 = vmul.f32 %v6224_v37, %v5701_v30  ;;  %v2315_v8 = vadd.f32 %v2311_v11, %v2306_v3  ;;  %v2592_v46 = vadd.f32 %v2588_v61, %v2583_v33  ;;  %v6283_v11 = vmul.f32 %v5710_v20, %v6006_v53 }
 0x2c2   :  { %7928 = vst [vmem:[#allocation131_spill] sm:$0xff] %v6202_v22  ;;  %v6250_v22 = vmul.f32 %v5656_v16, %v6006_v53  ;;  %v6267_v16 = vperm.slane %v6210_v44, 0  ;;  %v6289_v1 = vperm.slane %v6254_v55, 0  ;;  %v6297_v52 = vperm.slane %v6262_v45, 0 }
 0x2c3   :  { %7929 = vst [vmem:[#allocation132_spill] sm:$0xff] %v6206_v9  ;;  %v2624_v9 = vmul.f32 %v6232_v41, %v5759_v42  ;;  %v2324_v61 = vadd.f32 %v2320_v4, %v2315_v8  ;;  %v2601_v3 = vadd.f32 %v2597_v36, %v2592_v46  ;;  %v6300_v20 = vperm.slane %v6271_v63, 0  ;;  %v169_v46 = vpop.permute.xlu1 %168 }
 0x2c4   :  { %7930 = vst [vmem:[#allocation133_spill] sm:$0xff] %v6210_v44  ;;  %v6286_v33 = vperm.slane %v6250_v22, 0 }
 0x2c5   :  { %7931 = vst [vmem:[#allocation134_spill] sm:$0xff] %v6227_v5  ;;  %v2610_v36 = vadd.f32 %v2606_v40, %v2601_v3  ;;  %v6319_v3 = vperm.slane %v6279_v10, 0 }
 0x2c6   :  { %7932 = vst [vmem:[#allocation135_spill] sm:$0xff] %v6232_v41  ;;  %v2892_v4 = vmul.f32 %v6286_v33, %v5684_v13 }
 0x2c7   :  { %2025 = vst [vmem:[#allocation2 + $0x88] sm:$0xff] %v2020_v24  ;;  %v6258_v24 = vmul.f32 %v5672_v54, %v6006_v53  ;;  %v6275_v54 = vmul.f32 %v5695_v26, %v6006_v53  ;;  %v2633_v26 = vmul.f32 %v6246_v2, %v5761_v48  ;;  %v2333_v53 = vadd.f32 %v2329_v32, %v2324_v61 }
 0x2c8   :  { %7933 = vst [vmem:[#allocation136_spill] sm:$0xff] %v6246_v2  ;;  %v2919_v32 = vmul.f32 %v6297_v52, %v5701_v30  ;;  %v2619_v40 = vadd.f32 %v2615_v49, %v2610_v36  ;;  %v2896_v13 = vadd.f32 %v2892_v4, %v5763_v12  ;;  %v2928_v61 = vmul.f32 %v6300_v20, %v5707_v51  ;;  %v7953_v51 = vld [vmem:[#allocation70_spill] sm:$0xff]  ;;  %v7954_v4 = vld [vmem:[#allocation71_spill] sm:$0xff] }
 0x2c9   :  { %7934 = vst [vmem:[#allocation137_spill] sm:$0xff] %v6250_v22  ;;  %v6294_v44 = vperm.slane %v6258_v24, 0  ;;  %v6305_v8 = vperm.slane %v6275_v54, 0  ;;  %v2642_v22 = vmul.f32 %v6267_v16, %v5763_v12 }
 0x2ca   :  { %7935 = vst [vmem:[#allocation138_spill] sm:$0xff] %v6254_v55  ;;  %v2628_v23 = vadd.f32 %v2624_v9, %v2619_v40  ;;  %v7957_v40 = vld [vmem:[#allocation60_spill] sm:$0xff] }
 0x2cb   :  { %7936 = vst [vmem:[#allocation139_spill] sm:$0xff] %v6258_v24  ;;  %v2901_v24 = vmul.f32 %v6289_v1, %v5691_v43  ;;  %v234_v43 = vadd.f32 %v5582_v21, %v169_v46  ;;  %v2937_v49 = vmul.f32 %v6305_v8, %v5759_v42  ;;  %v7958_v42 = vld [vmem:[#allocation62_spill] sm:$0xff] }
 0x2cc   :  { %7937 = vst [vmem:[#allocation140_spill] sm:$0xff] %v6262_v45  ;;  %v2910_v45 = vmul.f32 %v6294_v44, %v5693_v56  ;;  %v7951_v56 = vld [vmem:[#allocation59_spill] sm:$0xff]  ;;  %v2637_v9 = vadd.f32 %v2633_v26, %v2628_v23  ;;  %v7963_v23 = vld [vmem:[#allocation49_spill] sm:$0xff]  ;;  %v7964_v26 = vld [vmem:[#allocation114_spill] sm:$0xff] }
 0x2cd   :  { %7938 = vst [vmem:[#allocation141_spill] sm:$0xff] %v6267_v16  ;;  %v302_v39 = vadd.f32 %v7951_v56, %v169_v46  ;;  %v2905_v30 = vadd.f32 %v2901_v24, %v2896_v13  ;;  %v336_v13 = vadd.f32 %v7957_v40, %v169_v46  ;;  %v370_v56 = vadd.f32 %v7958_v42, %v169_v46  ;;  %v7965_v40 = vld [vmem:[#allocation115_spill] sm:$0xff] }
 0x2ce   :  { %7939 = vst [vmem:[#allocation142_spill] sm:$0xff] %v6271_v63  ;;  %v7950_v63 = vld [vmem:[#allocation58_spill] sm:$0xff] }
 0x2cf   :  { %7940 = vst [vmem:[#allocation143_spill] sm:$0xff] %v6275_v54  ;;  %v200_v54 = vadd.f32 %v5579_v15, %v169_v46  ;;  %v268_v55 = vadd.f32 %v7950_v63, %v169_v46  ;;  %v7955_v15 = vld [vmem:[#allocation72_spill] sm:$0xff]  ;;  %v7956_v63 = vld [vmem:[#allocation13_spill] sm:$0xff]  ;;  %v2914_v24 = vadd.f32 %v2910_v45, %v2905_v30  ;;  %v6354_v45 = vadd.f32 %v7963_v23, %v370_v56  ;;  %v7971_v23 = vld [vmem:[#allocation75_spill] sm:$0xff] }
 0x2d0   :  { %7941 = vst [vmem:[#allocation144_spill] sm:$0xff] %v6279_v10  ;;  %v6334_v10 = vadd.f32 %v7954_v4, %v234_v43  ;;  %v7961_v4 = vld [vmem:[#allocation41_spill] sm:$0xff] }
 0x2d1   :  { %7942 = vst [vmem:[#allocation145_spill] sm:$0xff] %v6283_v11  ;;  %v6331_v36 = vadd.f32 %v7953_v51, %v200_v54  ;;  %v6337_v21 = vadd.f32 %v7955_v15, %v268_v55  ;;  %v7959_v54 = vld [vmem:[#allocation68_spill] sm:$0xff]  ;;  %v2646_v15 = vadd.f32 %v2642_v22, %v2637_v9  ;;  %v7967_v9 = vld [vmem:[#allocation37_spill] sm:$0xff] }
 0x2d2   :  { %7943 = vst [vmem:[#allocation146_spill] sm:$0xff] %v6286_v33  ;;  %v404_v51 = vadd.f32 %v7959_v54, %v169_v46 }
 0x2d3   :  { %7944 = vst [vmem:[#allocation147_spill] sm:$0xff] %v6289_v1  ;;  %v701_v55 = vmul.f32 %v7961_v4, %v6331_v36 }
 0x2d4   :  { %7945 = vst [vmem:[#allocation148_spill] sm:$0xff] %v6294_v44  ;;  %v6357_v30 = vadd.f32 %v7964_v26, %v404_v51  ;;  %v7969_v51 = vld [vmem:[#allocation86_spill] sm:$0xff]  ;;  %v7973_v26 = vld [vmem:[#allocation92_spill] sm:$0xff] }
 0x2d5   :  { %7946 = vst [vmem:[#allocation149_spill] sm:$0xff] %v6297_v52  ;;  %v2923_v52 = vadd.f32 %v2919_v32, %v2914_v24  ;;  %v705_v42 = vadd.f32 %v701_v55, %v6331_v36  ;;  %v719_v24 = vmul.f32 %v7967_v9, %v6337_v21  ;;  %v7970_v55 = vld [vmem:[#allocation87_spill] sm:$0xff]  ;;  %v7974_v9 = vld [vmem:[#allocation80_spill] sm:$0xff] }
 0x2d6   :  { %7947 = vst [vmem:[#allocation150_spill] sm:$0xff] %v6300_v20  ;;  %v6340_v20 = vadd.f32 %v7956_v63, %v302_v39  ;;  %v7962_v39 = vld [vmem:[#allocation38_spill] sm:$0xff] }
 0x2d7   :  { %7948 = vst [vmem:[#allocation151_spill] sm:$0xff] %v6305_v8  ;;  %v7960_v8 = vld [vmem:[#allocation69_spill] sm:$0xff]  ;;  %v6351_v63 = vadd.f32 %v7962_v39, %v336_v13  ;;  %v2932_v22 = vadd.f32 %v2928_v61, %v2923_v52  ;;  %v7968_v13 = vld [vmem:[#allocation39_spill] sm:$0xff]  ;;  %v746_v39 = vmul.f32 %v7970_v55, %v6354_v45  ;;  %v7972_v61 = vld [vmem:[#allocation88_spill] sm:$0xff] }
 0x2d8   :  { %2338 = vst [vmem:[#allocation2 + $0xa8] sm:$0xff] %v2333_v53  ;;  %v6328_v53 = vperm.slane %v6283_v11, 0  ;;  %v2946_v11 = vmul.f32 %v6319_v3, %v5761_v48  ;;  %v438_v43 = vadd.f32 %v7960_v8, %v169_v46  ;;  %v7966_v8 = vld [vmem:[#allocation31_spill] sm:$0xff]  ;;  %v728_v56 = vmul.f32 %v7968_v13, %v6340_v20  ;;  %v7976_v55 = vld [vmem:[#allocation26_spill] sm:$0xff] }
 0x2d9   :  { %7949 = vst [vmem:[#allocation152_spill] sm:$0xff] %v6319_v3  ;;  %v710_v46 = vmul.f32 %v7966_v8, %v6334_v10  ;;  %v2941_v52 = vadd.f32 %v2937_v49, %v2932_v22  ;;  %v1022_v13 = vmul.f32 %v7974_v9, %v6334_v10  ;;  %v1040_v4 = vmul.f32 %v7976_v55, %v6340_v20  ;;  %v7977_v49 = vld [vmem:[#allocation76_spill] sm:$0xff]  ;;  %v7982_v55 = vld [vmem:[#allocation67_spill] sm:$0xff] }
 0x2da   :  { %7952 = vst [vmem:[#allocation58_spill] sm:$0xff] %v6328_v53  ;;  %v6360_v48 = vadd.f32 %v7965_v40, %v438_v43  ;;  %v2955_v32 = vmul.f32 %v6328_v53, %v5763_v12  ;;  %v737_v43 = vmul.f32 %v7969_v51, %v6351_v63  ;;  %v755_v12 = vmul.f32 %v7972_v61, %v6357_v30  ;;  %v7975_v51 = vld [vmem:[#allocation81_spill] sm:$0xff] }
 0x2db   :  { %2651 = vst [vmem:[#allocation2 + $0xc8] sm:$0xff] %v2646_v15  ;;  %v714_v54 = vadd.f32 %v710_v46, %v705_v42  ;;  %v1013_v15 = vmul.f32 %v7971_v23, %v6331_v36  ;;  %v1031_v8 = vmul.f32 %v7975_v51, %v6337_v21  ;;  %v2950_v23 = vadd.f32 %v2946_v11, %v2941_v52  ;;  %v7978_v61 = vld [vmem:[#allocation77_spill] sm:$0xff]  ;;  %v7981_v52 = vld [vmem:[#allocation110_spill] sm:$0xff] }
 0x2dc   :  { %v764_v40 = vmul.f32 %v7973_v26, %v6360_v48  ;;  %v1049_v22 = vmul.f32 %v7977_v49, %v6351_v63  ;;  %v1058_v53 = vmul.f32 %v7978_v61, %v6354_v45  ;;  %v1326_v26 = vmul.f32 %v5911_v19, %v6331_v36  ;;  %v7980_v51 = vld [vmem:[#allocation29_spill] sm:$0xff] }
 0x2dd   :  { %v723_v42 = vadd.f32 %v719_v24, %v714_v54  ;;  %v1017_v46 = vadd.f32 %v1013_v15, %v6334_v10  ;;  %v7979_v54 = vld [vmem:[#allocation78_spill] sm:$0xff]  ;;  %v1076_v3 = vmul.f32 %v7980_v51, %v6360_v48  ;;  %v2959_v44 = vadd.f32 %v2955_v32, %v2950_v23 }
 0x2de   :  { %v1067_v15 = vmul.f32 %v7979_v54, %v6357_v30  ;;  %v1330_v11 = vadd.f32 %v1326_v26, %v6337_v21  ;;  %v1335_v49 = vmul.f32 %v7981_v52, %v6334_v10  ;;  %v1344_v61 = vmul.f32 %v7982_v55, %v6337_v21 }
 0x2df   :  { %v732_v9 = vadd.f32 %v728_v56, %v723_v42  ;;  %v1026_v24 = vadd.f32 %v1022_v13, %v1017_v46  ;;  %v7983_v56 = vld [vmem:[#allocation94_spill] sm:$0xff]  ;;  %v7984_v42 = vld [vmem:[#allocation44_spill] sm:$0xff]  ;;  %2964 = vst [vmem:[#allocation2 + $0xe8] sm:$0xff] %v2959_v44  ;;  %v1371_v32 = vmul.f32 %v5939_v35, %v6354_v45  ;;  %v1380_v23 = vmul.f32 %v5951_v7, %v6357_v30  ;;  %v7987_v35 = vld [vmem:[#allocation27_spill] sm:$0xff] }
 0x2e0   :  { %v1353_v13 = vmul.f32 %v7983_v56, %v6340_v20  ;;  %v1362_v46 = vmul.f32 %v7984_v42, %v6351_v63  ;;  %v1339_v54 = vadd.f32 %v1335_v49, %v1330_v11  ;;  %v1639_v26 = vmul.f32 %v5990_v47, %v6331_v36  ;;  %v7986_v49 = vld [vmem:[#allocation106_spill] sm:$0xff] }
 0x2e1   :  { %v741_v1 = vadd.f32 %v737_v43, %v732_v9  ;;  %v1035_v16 = vadd.f32 %v1031_v8, %v1026_v24  ;;  %v1389_v8 = vmul.f32 %v5960_v31, %v6360_v48  ;;  %v7985_v43 = vld [vmem:[#allocation105_spill] sm:$0xff]  ;;  %v1657_v11 = vmul.f32 %v7986_v49, %v6337_v21 }
 0x2e2   :  { %v1648_v24 = vmul.f32 %v7985_v43, %v6334_v10  ;;  %v1348_v42 = vadd.f32 %v1344_v61, %v1339_v54  ;;  %v1643_v44 = vadd.f32 %v1639_v26, %v6340_v20  ;;  %v1666_v7 = vmul.f32 %v7987_v35, %v6340_v20 }
 0x2e3   :  { %v750_v55 = vadd.f32 %v746_v39, %v741_v1  ;;  %v1044_v9 = vadd.f32 %v1040_v4, %v1035_v16  ;;  %v7988_v1 = vld [vmem:[#allocation73_spill] sm:$0xff]  ;;  %v7989_v4 = vld [vmem:[#allocation107_spill] sm:$0xff]  ;;  %v1693_v61 = vmul.f32 %v6031_v6, %v6357_v30  ;;  %v1952_v54 = vmul.f32 %v6067_v17, %v6331_v36 }
 0x2e4   :  { %v1675_v16 = vmul.f32 %v7988_v1, %v6351_v63  ;;  %v1684_v39 = vmul.f32 %v7989_v4, %v6354_v45  ;;  %v1357_v47 = vadd.f32 %v1353_v13, %v1348_v42  ;;  %v1652_v31 = vadd.f32 %v1648_v24, %v1643_v44  ;;  %v7990_v13 = vld [vmem:[#allocation54_spill] sm:$0xff]  ;;  %v7991_v44 = vld [vmem:[#allocation119_spill] sm:$0xff] }
 0x2e5   :  { %v759_v56 = vadd.f32 %v755_v12, %v750_v55  ;;  %v1053_v52 = vadd.f32 %v1049_v22, %v1044_v9  ;;  %v1702_v55 = vmul.f32 %v6044_v50, %v6360_v48  ;;  %v1961_v12 = vmul.f32 %v6070_v58, %v6334_v10 }
 0x2e6   :  { %v1366_v22 = vadd.f32 %v1362_v46, %v1357_v47  ;;  %v1661_v9 = vadd.f32 %v1657_v11, %v1652_v31  ;;  %v1956_v4 = vadd.f32 %v1952_v54, %v6351_v63  ;;  %v1970_v42 = vmul.f32 %v7990_v13, %v6337_v21 }
 0x2e7   :  { %v768_v26 = vadd.f32 %v764_v40, %v759_v56  ;;  %v1062_v49 = vadd.f32 %v1058_v53, %v1053_v52  ;;  %v1979_v6 = vmul.f32 %v7991_v44, %v6340_v20  ;;  %v7992_v53 = vld [vmem:[#allocation120_spill] sm:$0xff]  ;;  %v7993_v52 = vld [vmem:[#allocation121_spill] sm:$0xff]  ;;  %v2265_v31 = vmul.f32 %v6140_v14, %v6331_v36 }
 0x2e8   :  { %v1988_v40 = vmul.f32 %v7992_v53, %v6351_v63  ;;  %v1997_v56 = vmul.f32 %v7993_v52, %v6354_v45  ;;  %v1375_v50 = vadd.f32 %v1371_v32, %v1366_v22  ;;  %v1670_v58 = vadd.f32 %v1666_v7, %v1661_v9 }
 0x2e9   :  { %772 = vst [vmem:[#allocation2] sm:$0xff] %v768_v26  ;;  %v1071_v24 = vadd.f32 %v1067_v15, %v1062_v49  ;;  %v1965_v47 = vadd.f32 %v1961_v12, %v1956_v4  ;;  %v2006_v11 = vmul.f32 %v6100_v27, %v6357_v30  ;;  %v2015_v15 = vmul.f32 %v6117_v25, %v6360_v48 }
 0x2ea   :  { %v2274_v49 = vmul.f32 %v6143_v18, %v6334_v10  ;;  %v1384_v54 = vadd.f32 %v1380_v23, %v1375_v50  ;;  %v1679_v26 = vadd.f32 %v1675_v16, %v1670_v58  ;;  %v2269_v32 = vadd.f32 %v2265_v31, %v6354_v45  ;;  %v6460_v23 = vpop.permute.xlu0 %111 }
 0x2eb   :  { %v1080_v46 = vadd.f32 %v1076_v3, %v1071_v24  ;;  %v1974_v53 = vadd.f32 %v1970_v42, %v1965_v47  ;;  %v2283_v7 = vmul.f32 %v6148_v0, %v6337_v21  ;;  %v2292_v3 = vmul.f32 %v6151_v34, %v6340_v20  ;;  %7994 = vst [vmem:[#allocation59_spill] sm:$0xff] %v6460_v23 }
 0x2ec   :  { %v2301_v4 = vmul.f32 %v6154_v60, %v6351_v63  ;;  %v2310_v12 = vmul.f32 %v6159_v38, %v6354_v45  ;;  %v1393_v22 = vadd.f32 %v1389_v8, %v1384_v54  ;;  %v1688_v9 = vadd.f32 %v1684_v39, %v1679_v26 }
 0x2ed   :  { %1085 = vst [vmem:[#allocation2 + $0x20] sm:$0xff] %v1080_v46  ;;  %v1983_v50 = vadd.f32 %v1979_v6, %v1974_v53  ;;  %v2278_v58 = vadd.f32 %v2274_v49, %v2269_v32  ;;  %v2319_v16 = vmul.f32 %v6173_v28, %v6357_v30  ;;  %v2328_v42 = vmul.f32 %v6194_v59, %v6360_v48 }
 0x2ee   :  { %v2578_v24 = vmul.f32 %v6213_v29, %v6331_v36  ;;  %v2587_v47 = vmul.f32 %v6216_v62, %v6334_v10  ;;  %1398 = vst [vmem:[#allocation2 + $0x40] sm:$0xff] %v1393_v22  ;;  %v1697_v31 = vadd.f32 %v1693_v61, %v1688_v9  ;;  %v2596_v6 = vmul.f32 %v6221_v57, %v6337_v21  ;;  %v7995_v9 = vld [vmem:[#allocation141_spill] sm:$0xff] }
 0x2ef   :  { %v1992_v8 = vadd.f32 %v1988_v40, %v1983_v50  ;;  %v2287_v39 = vadd.f32 %v2283_v7, %v2278_v58  ;;  %v2605_v46 = vmul.f32 %v6224_v37, %v6340_v20  ;;  %v2614_v49 = vmul.f32 %v6227_v5, %v6351_v63  ;;  %v7996_v58 = vld [vmem:[#allocation147_spill] sm:$0xff] }
 0x2f0   :  { %v2582_v53 = vadd.f32 %v2578_v24, %v6357_v30  ;;  %v2623_v54 = vmul.f32 %v6232_v41, %v6354_v45  ;;  %v1706_v26 = vadd.f32 %v1702_v55, %v1697_v31  ;;  %v2891_v61 = vmul.f32 %v6286_v33, %v6331_v36  ;;  %v7998_v36 = vld [vmem:[#allocation149_spill] sm:$0xff]  ;;  %v8014_v33 = vld [vmem:[#allocation10_spill] sm:$0xff] }
 0x2f1   :  { %v2001_v32 = vadd.f32 %v1997_v56, %v1992_v8  ;;  %v2296_v22 = vadd.f32 %v2292_v3, %v2287_v39  ;;  %v2632_v7 = vmul.f32 %v6246_v2, %v6357_v30  ;;  %v2641_v50 = vmul.f32 %v7995_v9, %v6360_v48  ;;  %v7997_v56 = vld [vmem:[#allocation148_spill] sm:$0xff]  ;;  %v7999_v8 = vld [vmem:[#allocation150_spill] sm:$0xff] }
 0x2f2   :  { %v2591_v40 = vadd.f32 %v2587_v47, %v2582_v53  ;;  %v2900_v24 = vmul.f32 %v7996_v58, %v6334_v10  ;;  %1711 = vst [vmem:[#allocation2 + $0x60] sm:$0xff] %v1706_v26  ;;  %v2895_v55 = vadd.f32 %v2891_v61, %v6360_v48  ;;  %v2909_v3 = vmul.f32 %v7997_v56, %v6337_v21  ;;  %v8000_v53 = vld [vmem:[#allocation151_spill] sm:$0xff]  ;;  %v8003_v61 = vld [vmem:[#allocation18_spill] sm:$0xff]  ;;  %v8012_v56 = vld [vmem:[#allocation8_spill] sm:$0xff] }
 0x2f3   :  { %v2010_v23 = vadd.f32 %v2006_v11, %v2001_v32  ;;  %v2305_v5 = vadd.f32 %v2301_v4, %v2296_v22  ;;  %v2918_v47 = vmul.f32 %v7998_v36, %v6340_v20  ;;  %v2927_v39 = vmul.f32 %v7999_v8, %v6351_v63  ;;  %v8001_v11 = vld [vmem:[#allocation113_spill] sm:$0xff]  ;;  %v8005_v20 = vld [vmem:[#allocation20_spill] sm:$0xff]  ;;  %v181_v63 = vpop.permute.xlu2 %180 }
 0x2f4   :  { %v2600_v31 = vadd.f32 %v2596_v6, %v2591_v40  ;;  %v2936_v9 = vmul.f32 %v8000_v53, %v6354_v45  ;;  %v2904_v26 = vadd.f32 %v2900_v24, %v2895_v55  ;;  %v8002_v4 = vld [vmem:[#allocation17_spill] sm:$0xff]  ;;  %v233_v21 = vmul.f32 %v8003_v61, %v8001_v11  ;;  %v8004_v6 = vld [vmem:[#allocation19_spill] sm:$0xff]  ;;  %v8008_v24 = vld [vmem:[#allocation152_spill] sm:$0xff] }
 0x2f5   :  { %v2019_v2 = vadd.f32 %v2015_v15, %v2010_v23  ;;  %v2314_v10 = vadd.f32 %v2310_v12, %v2305_v5  ;;  %v199_v32 = vmul.f32 %v8002_v4, %v8001_v11  ;;  %v267_v40 = vmul.f32 %v8004_v6, %v8001_v11  ;;  %v8006_v5 = vld [vmem:[#allocation21_spill] sm:$0xff]  ;;  %v8007_v12 = vld [vmem:[#allocation23_spill] sm:$0xff]  ;;  %v8010_v61 = vld [vmem:[#allocation24_spill] sm:$0xff]  ;;  %v133_v4 = vpop.permute.xlu0 %132 }
 0x2f6   :  { %v2609_v22 = vadd.f32 %v2605_v46, %v2600_v31  ;;  %v301_v36 = vmul.f32 %v8005_v20, %v8001_v11  ;;  %v2913_v45 = vadd.f32 %v2909_v3, %v2904_v26  ;;  %v335_v15 = vmul.f32 %v8006_v5, %v8001_v11  ;;  %v8009_v31 = vld [vmem:[#allocation58_spill] sm:$0xff]  ;;  %v8011_v3 = vld [vmem:[#allocation25_spill] sm:$0xff] }
 0x2f7   :  { %2024 = vst [vmem:[#allocation2 + $0x80] sm:$0xff] %v2019_v2  ;;  %v2323_v8 = vadd.f32 %v2319_v16, %v2314_v10  ;;  %v369_v23 = vmul.f32 %v8007_v12, %v8001_v11  ;;  %v2945_v55 = vmul.f32 %v8008_v24, %v6357_v30  ;;  %v2954_v6 = vmul.f32 %v8009_v31, %v6360_v48  ;;  %v8013_v58 = vld [vmem:[#allocation9_spill] sm:$0xff] }
 0x2f8   :  { %v2618_v46 = vadd.f32 %v2614_v49, %v2609_v22  ;;  %v403_v20 = vmul.f32 %v8010_v61, %v8001_v11  ;;  %v2922_v16 = vadd.f32 %v2918_v47, %v2913_v45  ;;  %v437_v10 = vmul.f32 %v8011_v3, %v8001_v11  ;;  %v8015_v47 = vld [vmem:[#allocation11_spill] sm:$0xff] }
 0x2f9   :  { %v2332_v2 = vadd.f32 %v2328_v42, %v2323_v8  ;;  %v203_v26 = vadd.f32 %v199_v32, %v181_v63  ;;  %v237_v53 = vadd.f32 %v233_v21, %v181_v63  ;;  %v271_v12 = vadd.f32 %v267_v40, %v181_v63  ;;  %v8016_v32 = vld [vmem:[#allocation12_spill] sm:$0xff]  ;;  %v8017_v21 = vld [vmem:[#allocation14_spill] sm:$0xff] }
 0x2fa   :  { %v2627_v5 = vadd.f32 %v2623_v54, %v2618_v46  ;;  %v305_v49 = vadd.f32 %v301_v36, %v181_v63  ;;  %v2931_v22 = vadd.f32 %v2927_v39, %v2922_v16  ;;  %v339_v30 = vadd.f32 %v335_v15, %v181_v63 }
 0x2fb   :  { %2337 = vst [vmem:[#allocation2 + $0xa0] sm:$0xff] %v2332_v2  ;;  %v373_v24 = vadd.f32 %v369_v23, %v181_v63  ;;  %v215_v48 = vmul.f32 %v8012_v56, %v133_v4  ;;  %v249_v61 = vmul.f32 %v8013_v58, %v133_v4  ;;  %v283_v42 = vmul.f32 %v8014_v33, %v133_v4  ;;  %v8018_v2 = vld [vmem:[#allocation15_spill] sm:$0xff] }
 0x2fc   :  { %v2636_v31 = vadd.f32 %v2632_v7, %v2627_v5  ;;  %v317_v8 = vmul.f32 %v8015_v47, %v133_v4  ;;  %v2940_v45 = vadd.f32 %v2936_v9, %v2931_v22  ;;  %v407_v11 = vadd.f32 %v403_v20, %v181_v63  ;;  %v8019_v22 = vld [vmem:[#allocation16_spill] sm:$0xff] }
 0x2fd   :  { %v351_v54 = vmul.f32 %v8016_v32, %v133_v4  ;;  %v385_v40 = vmul.f32 %v8017_v21, %v133_v4  ;;  %v441_v46 = vadd.f32 %v437_v10, %v181_v63  ;;  %v6522_v39 = vadd.f32 %v215_v48, %v203_v26  ;;  %v8025_v48 = vld [vmem:[#allocation75_spill] sm:$0xff] }
 0x2fe   :  { %v2645_v36 = vadd.f32 %v2641_v50, %v2636_v31  ;;  %v6524_v15 = vadd.f32 %v249_v61, %v237_v53  ;;  %v2949_v23 = vadd.f32 %v2945_v55, %v2940_v45  ;;  %v6526_v7 = vadd.f32 %v283_v42, %v271_v12  ;;  %v8020_v50 = vld [vmem:[#allocation41_spill] sm:$0xff]  ;;  %v8021_v61 = vld [vmem:[#allocation31_spill] sm:$0xff] }
 0x2ff   :  { %v6528_v5 = vadd.f32 %v317_v8, %v305_v49  ;;  %v419_v16 = vmul.f32 %v8018_v2, %v133_v4  ;;  %v6531_v9 = vadd.f32 %v351_v54, %v339_v30  ;;  %v6533_v20 = vadd.f32 %v385_v40, %v373_v24  ;;  %v8022_v55 = vld [vmem:[#allocation37_spill] sm:$0xff]  ;;  %v8023_v49 = vld [vmem:[#allocation39_spill] sm:$0xff]  ;;  %v8024_v30 = vld [vmem:[#allocation86_spill] sm:$0xff] }
 0x300   :  { %2650 = vst [vmem:[#allocation2 + $0xc0] sm:$0xff] %v2645_v36  ;;  %v453_v3 = vmul.f32 %v8019_v22, %v133_v4  ;;  %v704_v63 = vmul.f32 %v8020_v50, %v6522_v39  ;;  %v2958_v31 = vadd.f32 %v2954_v6, %v2949_v23  ;;  %v713_v12 = vmul.f32 %v8021_v61, %v6524_v15  ;;  %v8026_v8 = vld [vmem:[#allocation87_spill] sm:$0xff]  ;;  %v8028_v40 = vld [vmem:[#allocation80_spill] sm:$0xff] }
 0x301   :  { %v6538_v53 = vadd.f32 %v419_v16, %v407_v11  ;;  %v722_v10 = vmul.f32 %v8022_v55, %v6526_v7  ;;  %v731_v24 = vmul.f32 %v8023_v49, %v6528_v5  ;;  %v740_v4 = vmul.f32 %v8024_v30, %v6531_v9  ;;  %v8027_v11 = vld [vmem:[#allocation88_spill] sm:$0xff] }
 0x302   :  { %v708_v26 = vadd.f32 %v704_v63, %v6522_v39  ;;  %v1016_v42 = vmul.f32 %v8025_v48, %v6522_v39  ;;  %2963 = vst [vmem:[#allocation2 + $0xe0] sm:$0xff] %v2958_v31  ;;  %v6551_v6 = vadd.f32 %v453_v3, %v441_v46  ;;  %v749_v45 = vmul.f32 %v8026_v8, %v6533_v20  ;;  %v8029_v63 = vld [vmem:[#allocation81_spill] sm:$0xff]  ;;  %v8030_v48 = vld [vmem:[#allocation26_spill] sm:$0xff]  ;;  %v8031_v3 = vld [vmem:[#allocation92_spill] sm:$0xff] }
 0x303   :  { %v758_v54 = vmul.f32 %v8027_v11, %v6538_v53  ;;  %v1025_v36 = vmul.f32 %v8028_v40, %v6524_v15  ;;  %v1034_v30 = vmul.f32 %v8029_v63, %v6526_v7  ;;  %v1043_v31 = vmul.f32 %v8030_v48, %v6528_v5  ;;  %v8032_v8 = vld [vmem:[#allocation76_spill] sm:$0xff]  ;;  %v8033_v11 = vld [vmem:[#allocation77_spill] sm:$0xff]  ;;  %v8034_v40 = vld [vmem:[#allocation78_spill] sm:$0xff] }
 0x304   :  { %v717_v23 = vadd.f32 %v713_v12, %v708_v26  ;;  %v1020_v16 = vadd.f32 %v1016_v42, %v6524_v15  ;;  %v767_v46 = vmul.f32 %v8031_v3, %v6551_v6  ;;  %v1052_v49 = vmul.f32 %v8032_v8, %v6531_v9  ;;  %v8035_v3 = vld [vmem:[#allocation110_spill] sm:$0xff]  ;;  %v8036_v8 = vld [vmem:[#allocation67_spill] sm:$0xff] }
 0x305   :  { %v1061_v55 = vmul.f32 %v8033_v11, %v6533_v20  ;;  %v1329_v12 = vmul.f32 %v5911_v19, %v6522_v39  ;;  %v1070_v63 = vmul.f32 %v8034_v40, %v6538_v53  ;;  %v1079_v48 = vmul.f32 %v7980_v51, %v6551_v6  ;;  %v8037_v11 = vld [vmem:[#allocation94_spill] sm:$0xff] }
 0x306   :  { %v726_v26 = vadd.f32 %v722_v10, %v717_v23  ;;  %v1029_v42 = vadd.f32 %v1025_v36, %v1020_v16  ;;  %v1338_v50 = vmul.f32 %v8035_v3, %v6524_v15  ;;  %v1347_v22 = vmul.f32 %v8036_v8, %v6526_v7  ;;  %v8038_v36 = vld [vmem:[#allocation44_spill] sm:$0xff]  ;;  %v8039_v16 = vld [vmem:[#allocation95_spill] sm:$0xff] }
 0x307   :  { %v1333_v61 = vadd.f32 %v1329_v12, %v6526_v7  ;;  %v1356_v2 = vmul.f32 %v8037_v11, %v6528_v5  ;;  %v1365_v23 = vmul.f32 %v8038_v36, %v6531_v9  ;;  %v1374_v40 = vmul.f32 %v8039_v16, %v6533_v20  ;;  %v8040_v12 = vld [vmem:[#allocation97_spill] sm:$0xff]  ;;  %v8041_v3 = vld [vmem:[#allocation99_spill] sm:$0xff]  ;;  %v8042_v8 = vld [vmem:[#allocation104_spill] sm:$0xff] }
 0x308   :  { %v735_v19 = vadd.f32 %v731_v24, %v726_v26  ;;  %v1038_v10 = vadd.f32 %v1034_v30, %v1029_v42  ;;  %v1383_v21 = vmul.f32 %v8040_v12, %v6538_v53  ;;  %v1392_v32 = vmul.f32 %v8041_v3, %v6551_v6  ;;  %v8043_v30 = vld [vmem:[#allocation106_spill] sm:$0xff] }
 0x309   :  { %v1342_v51 = vadd.f32 %v1338_v50, %v1333_v61  ;;  %v1642_v47 = vmul.f32 %v8042_v8, %v6522_v39  ;;  %v1651_v24 = vmul.f32 %v7985_v43, %v6524_v15  ;;  %v1660_v26 = vmul.f32 %v8043_v30, %v6526_v7 }
 0x30a   :  { %v744_v33 = vadd.f32 %v740_v4, %v735_v19  ;;  %v1047_v11 = vadd.f32 %v1043_v31, %v1038_v10  ;;  %v1669_v61 = vmul.f32 %v7987_v35, %v6528_v5  ;;  %v1678_v3 = vmul.f32 %v7988_v1, %v6531_v9  ;;  %v8044_v19 = vld [vmem:[#allocation107_spill] sm:$0xff] }
 0x30b   :  { %v1351_v42 = vadd.f32 %v1347_v22, %v1342_v51  ;;  %v1646_v50 = vadd.f32 %v1642_v47, %v6528_v5  ;;  %v1687_v4 = vmul.f32 %v8044_v19, %v6533_v20  ;;  %v1955_v31 = vmul.f32 %v6067_v17, %v6522_v39  ;;  %v8045_v51 = vld [vmem:[#allocation74_spill] sm:$0xff]  ;;  %v8046_v47 = vld [vmem:[#allocation84_spill] sm:$0xff] }
 0x30c   :  { %v753_v12 = vadd.f32 %v749_v45, %v744_v33  ;;  %v1056_v16 = vadd.f32 %v1052_v49, %v1047_v11  ;;  %v1696_v22 = vmul.f32 %v8045_v51, %v6538_v53  ;;  %v1705_v30 = vmul.f32 %v8046_v47, %v6551_v6  ;;  %v8047_v33 = vld [vmem:[#allocation46_spill] sm:$0xff]  ;;  %v8048_v47 = vld [vmem:[#allocation120_spill] sm:$0xff] }
 0x30d   :  { %v1360_v10 = vadd.f32 %v1356_v2, %v1351_v42  ;;  %v1655_v43 = vadd.f32 %v1651_v24, %v1646_v50  ;;  %v1959_v1 = vadd.f32 %v1955_v31, %v6531_v9  ;;  %v1964_v49 = vmul.f32 %v8047_v33, %v6524_v15 }
 0x30e   :  { %v762_v35 = vadd.f32 %v758_v54, %v753_v12  ;;  %v1065_v8 = vadd.f32 %v1061_v55, %v1056_v16  ;;  %v1973_v17 = vmul.f32 %v7990_v13, %v6526_v7  ;;  %v1982_v2 = vmul.f32 %v7991_v44, %v6528_v5 }
 0x30f   :  { %v1369_v45 = vadd.f32 %v1365_v23, %v1360_v10  ;;  %v1664_v11 = vadd.f32 %v1660_v26, %v1655_v43  ;;  %v1968_v50 = vadd.f32 %v1964_v49, %v1959_v1  ;;  %v1991_v54 = vmul.f32 %v8048_v47, %v6531_v9 }
 0x310   :  { %v771_v24 = vadd.f32 %v767_v46, %v762_v35  ;;  %v1074_v42 = vadd.f32 %v1070_v63, %v1065_v8  ;;  %v2000_v12 = vmul.f32 %v7993_v52, %v6533_v20  ;;  %v2268_v43 = vmul.f32 %v6140_v14, %v6522_v39 }
 0x311   :  { %v1378_v55 = vadd.f32 %v1374_v40, %v1369_v45  ;;  %v1673_v16 = vadd.f32 %v1669_v61, %v1664_v11  ;;  %v1977_v26 = vadd.f32 %v1973_v17, %v1968_v50  ;;  %v2009_v31 = vmul.f32 %v6100_v27, %v6538_v53 }
 0x312   :  { %775 = vst [vmem:[#allocation2 + $0x18] sm:$0xff] %v771_v24  ;;  %v1083_v23 = vadd.f32 %v1079_v48, %v1074_v42  ;;  %v2018_v35 = vmul.f32 %v6117_v25, %v6551_v6  ;;  %v2272_v40 = vadd.f32 %v2268_v43, %v6533_v20  ;;  %v2277_v63 = vmul.f32 %v6143_v18, %v6524_v15  ;;  %v8049_v43 = vld [vmem:[#allocation134_spill] sm:$0xff] }
 0x313   :  { %v1387_v1 = vadd.f32 %v1383_v21, %v1378_v55  ;;  %v1682_v8 = vadd.f32 %v1678_v3, %v1673_v16  ;;  %v1986_v46 = vadd.f32 %v1982_v2, %v1977_v26  ;;  %v2286_v61 = vmul.f32 %v6148_v0, %v6526_v7 }
 0x314   :  { %1088 = vst [vmem:[#allocation2 + $0x38] sm:$0xff] %v1083_v23  ;;  %v2295_v17 = vmul.f32 %v6151_v34, %v6528_v5  ;;  %v2304_v48 = vmul.f32 %v6154_v60, %v6531_v9  ;;  %v2281_v21 = vadd.f32 %v2277_v63, %v2272_v40  ;;  %v2313_v3 = vmul.f32 %v6159_v38, %v6533_v20 }
 0x315   :  { %v1396_v10 = vadd.f32 %v1392_v32, %v1387_v1  ;;  %v1691_v49 = vadd.f32 %v1687_v4, %v1682_v8  ;;  %v1995_v45 = vadd.f32 %v1991_v54, %v1986_v46  ;;  %v2322_v11 = vmul.f32 %v6173_v28, %v6538_v53  ;;  %v8050_v8 = vld [vmem:[#allocation146_spill] sm:$0xff] }
 0x316   :  { %v2331_v2 = vmul.f32 %v6194_v59, %v6551_v6  ;;  %v2581_v24 = vmul.f32 %v6213_v29, %v6522_v39  ;;  %v2290_v50 = vadd.f32 %v2286_v61, %v2281_v21  ;;  %v2590_v32 = vmul.f32 %v6216_v62, %v6524_v15 }
 0x317   :  { %1401 = vst [vmem:[#allocation2 + $0x58] sm:$0xff] %v1396_v10  ;;  %v1700_v42 = vadd.f32 %v1696_v22, %v1691_v49  ;;  %v2599_v4 = vmul.f32 %v6221_v57, %v6526_v7  ;;  %v2004_v55 = vadd.f32 %v2000_v12, %v1995_v45  ;;  %v2608_v16 = vmul.f32 %v6224_v37, %v6528_v5  ;;  %v8051_v12 = vld [vmem:[#allocation136_spill] sm:$0xff]  ;;  %v8052_v10 = vld [vmem:[#allocation141_spill] sm:$0xff] }
 0x318   :  { %v2585_v54 = vadd.f32 %v2581_v24, %v6538_v53  ;;  %v2617_v23 = vmul.f32 %v8049_v43, %v6531_v9  ;;  %v2299_v1 = vadd.f32 %v2295_v17, %v2290_v50  ;;  %v2626_v22 = vmul.f32 %v6232_v41, %v6533_v20  ;;  %v8054_v24 = vld [vmem:[#allocation148_spill] sm:$0xff] }
 0x319   :  { %v1709_v26 = vadd.f32 %v1705_v30, %v1700_v42  ;;  %v2894_v40 = vmul.f32 %v8050_v8, %v6522_v39  ;;  %v2013_v63 = vadd.f32 %v2009_v31, %v2004_v55  ;;  %v2635_v61 = vmul.f32 %v8051_v12, %v6538_v53  ;;  %v8053_v30 = vld [vmem:[#allocation147_spill] sm:$0xff]  ;;  %v8055_v31 = vld [vmem:[#allocation149_spill] sm:$0xff]  ;;  %v8056_v55 = vld [vmem:[#allocation150_spill] sm:$0xff]  ;;  %v177_v8 = vpop.permute.xlu1 %176 }
 0x31a   :  { %v2594_v46 = vadd.f32 %v2590_v32, %v2585_v54  ;;  %v2644_v49 = vmul.f32 %v8052_v10, %v6551_v6  ;;  %v2308_v21 = vadd.f32 %v2304_v48, %v2299_v1  ;;  %v2903_v17 = vmul.f32 %v8053_v30, %v6524_v15  ;;  %v8057_v48 = vld [vmem:[#allocation151_spill] sm:$0xff]  ;;  %v8059_v12 = vld [vmem:[#allocation17_spill] sm:$0xff] }
 0x31b   :  { %1714 = vst [vmem:[#allocation2 + $0x78] sm:$0xff] %v1709_v26  ;;  %v2898_v45 = vadd.f32 %v2894_v40, %v6551_v6  ;;  %v2912_v42 = vmul.f32 %v8054_v24, %v6526_v7  ;;  %v2022_v50 = vadd.f32 %v2018_v35, %v2013_v63  ;;  %v2921_v32 = vmul.f32 %v8055_v31, %v6528_v5  ;;  %v8058_v40 = vld [vmem:[#allocation59_spill] sm:$0xff]  ;;  %v8060_v7 = vld [vmem:[#allocation61_spill] sm:$0xff] }
 0x31c   :  { %v2603_v39 = vadd.f32 %v2599_v4, %v2594_v46  ;;  %v2930_v54 = vmul.f32 %v8056_v55, %v6531_v9  ;;  %v2317_v10 = vadd.f32 %v2313_v3, %v2308_v21  ;;  %v2939_v1 = vmul.f32 %v8057_v48, %v6533_v20  ;;  %v8061_v4 = vld [vmem:[#allocation18_spill] sm:$0xff]  ;;  %v8062_v21 = vld [vmem:[#allocation19_spill] sm:$0xff] }
 0x31d   :  { %v2907_v26 = vadd.f32 %v2903_v17, %v2898_v45  ;;  %v198_v15 = vmul.f32 %v8059_v12, %v8058_v40  ;;  %2027 = vst [vmem:[#allocation2 + $0x98] sm:$0xff] %v2022_v50  ;;  %v214_v35 = vmul.f32 %v8012_v56, %v8060_v7  ;;  %v232_v5 = vmul.f32 %v8061_v4, %v8058_v40  ;;  %v8063_v12 = vld [vmem:[#allocation152_spill] sm:$0xff]  ;;  %v8065_v4 = vld [vmem:[#allocation58_spill] sm:$0xff] }
 0x31e   :  { %v2612_v30 = vadd.f32 %v2608_v16, %v2603_v39  ;;  %v248_v9 = vmul.f32 %v8013_v58, %v8060_v7  ;;  %v2326_v63 = vadd.f32 %v2322_v11, %v2317_v10  ;;  %v266_v20 = vmul.f32 %v8062_v21, %v8058_v40  ;;  %v8064_v50 = vld [vmem:[#allocation20_spill] sm:$0xff]  ;;  %v8066_v58 = vld [vmem:[#allocation10_spill] sm:$0xff] }
 0x31f   :  { %v2916_v3 = vadd.f32 %v2912_v42, %v2907_v26  ;;  %v202_v46 = vadd.f32 %v198_v15, %v177_v8  ;;  %v2948_v17 = vmul.f32 %v8063_v12, %v6538_v53  ;;  %v236_v16 = vadd.f32 %v232_v5, %v177_v8  ;;  %v8067_v15 = vld [vmem:[#allocation11_spill] sm:$0xff] }
 0x320   :  { %v2621_v45 = vadd.f32 %v2617_v23, %v2612_v30  ;;  %v300_v56 = vmul.f32 %v8064_v50, %v8058_v40  ;;  %v2335_v39 = vadd.f32 %v2331_v2, %v2326_v63  ;;  %v2957_v55 = vmul.f32 %v8065_v4, %v6551_v6  ;;  %v8068_v2 = vld [vmem:[#allocation21_spill] sm:$0xff]  ;;  %v8069_v6 = vld [vmem:[#allocation12_spill] sm:$0xff] }
 0x321   :  { %v2925_v48 = vadd.f32 %v2921_v32, %v2916_v3  ;;  %v282_v11 = vmul.f32 %v8066_v58, %v8060_v7  ;;  %v6690_v42 = vadd.f32 %v214_v35, %v202_v46  ;;  %v6692_v26 = vadd.f32 %v248_v9, %v236_v16  ;;  %v8071_v9 = vld [vmem:[#allocation14_spill] sm:$0xff]  ;;  %v8075_v58 = vld [vmem:[#allocation16_spill] sm:$0xff] }
 0x322   :  { %v2630_v10 = vadd.f32 %v2626_v22, %v2621_v45  ;;  %v270_v23 = vadd.f32 %v266_v20, %v177_v8  ;;  %2340 = vst [vmem:[#allocation2 + $0xb8] sm:$0xff] %v2335_v39  ;;  %v304_v30 = vadd.f32 %v300_v56, %v177_v8  ;;  %v316_v5 = vmul.f32 %v8067_v15, %v8060_v7  ;;  %v8070_v22 = vld [vmem:[#allocation23_spill] sm:$0xff] }
 0x323   :  { %v2934_v53 = vadd.f32 %v2930_v54, %v2925_v48  ;;  %v334_v32 = vmul.f32 %v8068_v2, %v8058_v40  ;;  %v350_v3 = vmul.f32 %v8069_v6, %v8060_v7  ;;  %v368_v35 = vmul.f32 %v8070_v22, %v8058_v40  ;;  %v8072_v54 = vld [vmem:[#allocation24_spill] sm:$0xff]  ;;  %v8073_v45 = vld [vmem:[#allocation15_spill] sm:$0xff] }
 0x324   :  { %v2639_v63 = vadd.f32 %v2635_v61, %v2630_v10  ;;  %v384_v46 = vmul.f32 %v8071_v9, %v8060_v7  ;;  %v402_v48 = vmul.f32 %v8072_v54, %v8058_v40  ;;  %v418_v16 = vmul.f32 %v8073_v45, %v8060_v7  ;;  %v8074_v61 = vld [vmem:[#allocation25_spill] sm:$0xff]  ;;  %v8082_v54 = vld [vmem:[#allocation87_spill] sm:$0xff]  ;;  %v8083_v45 = vld [vmem:[#allocation88_spill] sm:$0xff] }
 0x325   :  { %v2943_v21 = vadd.f32 %v2939_v1, %v2934_v53  ;;  %v338_v20 = vadd.f32 %v334_v32, %v177_v8  ;;  %v372_v56 = vadd.f32 %v368_v35, %v177_v8  ;;  %v436_v39 = vmul.f32 %v8074_v61, %v8058_v40  ;;  %v8076_v1 = vld [vmem:[#allocation41_spill] sm:$0xff] }
 0x326   :  { %v2648_v50 = vadd.f32 %v2644_v49, %v2639_v63  ;;  %v452_v10 = vmul.f32 %v8075_v58, %v8060_v7  ;;  %v6712_v2 = vadd.f32 %v282_v11, %v270_v23  ;;  %v406_v6 = vadd.f32 %v402_v48, %v177_v8  ;;  %v8078_v9 = vld [vmem:[#allocation37_spill] sm:$0xff] }
 0x327   :  { %v2952_v15 = vadd.f32 %v2948_v17, %v2943_v21  ;;  %v703_v53 = vmul.f32 %v8076_v1, %v6690_v42  ;;  %v6716_v32 = vadd.f32 %v316_v5, %v304_v30  ;;  %v6718_v22 = vadd.f32 %v350_v3, %v338_v20  ;;  %v8077_v17 = vld [vmem:[#allocation31_spill] sm:$0xff]  ;;  %v8087_v1 = vld [vmem:[#allocation26_spill] sm:$0xff] }
 0x328   :  { %2653 = vst [vmem:[#allocation2 + $0xd8] sm:$0xff] %v2648_v50  ;;  %v6720_v49 = vadd.f32 %v384_v46, %v372_v56  ;;  %v440_v63 = vadd.f32 %v436_v39, %v177_v8  ;;  %v6722_v40 = vadd.f32 %v418_v16, %v406_v6  ;;  %v712_v11 = vmul.f32 %v8077_v17, %v6692_v26  ;;  %v8079_v30 = vld [vmem:[#allocation39_spill] sm:$0xff]  ;;  %v8084_v50 = vld [vmem:[#allocation92_spill] sm:$0xff] }
 0x329   :  { %v2961_v35 = vadd.f32 %v2957_v55, %v2952_v15  ;;  %v707_v7 = vadd.f32 %v703_v53, %v6690_v42  ;;  %v721_v21 = vmul.f32 %v8078_v9, %v6712_v2  ;;  %v730_v5 = vmul.f32 %v8079_v30, %v6716_v32  ;;  %v8080_v3 = vld [vmem:[#allocation75_spill] sm:$0xff]  ;;  %v8081_v55 = vld [vmem:[#allocation86_spill] sm:$0xff]  ;;  %v8085_v39 = vld [vmem:[#allocation80_spill] sm:$0xff] }
 0x32a   :  { %v6727_v23 = vadd.f32 %v452_v10, %v440_v63  ;;  %v1015_v46 = vmul.f32 %v8080_v3, %v6690_v42  ;;  %v739_v20 = vmul.f32 %v8081_v55, %v6718_v22  ;;  %v748_v48 = vmul.f32 %v8082_v54, %v6720_v49  ;;  %v8086_v10 = vld [vmem:[#allocation81_spill] sm:$0xff]  ;;  %v8088_v63 = vld [vmem:[#allocation76_spill] sm:$0xff]  ;;  %v8090_v9 = vld [vmem:[#allocation78_spill] sm:$0xff] }
 0x32b   :  { %2966 = vst [vmem:[#allocation2 + $0xf8] sm:$0xff] %v2961_v35  ;;  %v716_v8 = vadd.f32 %v712_v11, %v707_v7  ;;  %v757_v16 = vmul.f32 %v8083_v45, %v6722_v40  ;;  %v1024_v58 = vmul.f32 %v8085_v39, %v6692_v26  ;;  %v1033_v15 = vmul.f32 %v8086_v10, %v6712_v2  ;;  %v8089_v7 = vld [vmem:[#allocation77_spill] sm:$0xff]  ;;  %v8092_v55 = vld [vmem:[#allocation66_spill] sm:$0xff] }
 0x32c   :  { %v766_v56 = vmul.f32 %v8084_v50, %v6727_v23  ;;  %v1019_v61 = vadd.f32 %v1015_v46, %v6692_v26  ;;  %v1042_v53 = vmul.f32 %v8087_v1, %v6716_v32  ;;  %v1051_v35 = vmul.f32 %v8088_v63, %v6718_v22  ;;  %v8091_v3 = vld [vmem:[#allocation29_spill] sm:$0xff]  ;;  %v8094_v50 = vld [vmem:[#allocation67_spill] sm:$0xff]  ;;  %v8095_v10 = vld [vmem:[#allocation94_spill] sm:$0xff] }
 0x32d   :  { %v725_v6 = vadd.f32 %v721_v21, %v716_v8  ;;  %v1060_v17 = vmul.f32 %v8089_v7, %v6720_v49  ;;  %v1069_v30 = vmul.f32 %v8090_v9, %v6722_v40  ;;  %v1078_v46 = vmul.f32 %v8091_v3, %v6727_v23  ;;  %v8093_v8 = vld [vmem:[#allocation110_spill] sm:$0xff]  ;;  %v8096_v7 = vld [vmem:[#allocation95_spill] sm:$0xff] }
 0x32e   :  { %v1028_v11 = vadd.f32 %v1024_v58, %v1019_v61  ;;  %v1328_v54 = vmul.f32 %v8092_v55, %v6690_v42  ;;  %v1337_v45 = vmul.f32 %v8093_v8, %v6692_v26  ;;  %v1346_v39 = vmul.f32 %v8094_v50, %v6712_v2  ;;  %v8098_v55 = vld [vmem:[#allocation99_spill] sm:$0xff]  ;;  %v8099_v50 = vld [vmem:[#allocation104_spill] sm:$0xff] }
 0x32f   :  { %v734_v21 = vadd.f32 %v730_v5, %v725_v6  ;;  %v1355_v1 = vmul.f32 %v8095_v10, %v6716_v32  ;;  %v1364_v63 = vmul.f32 %v8038_v36, %v6718_v22  ;;  %v1373_v9 = vmul.f32 %v8096_v7, %v6720_v49  ;;  %v8097_v5 = vld [vmem:[#allocation97_spill] sm:$0xff]  ;;  %v8101_v36 = vld [vmem:[#allocation106_spill] sm:$0xff] }
 0x330   :  { %v1037_v61 = vadd.f32 %v1033_v15, %v1028_v11  ;;  %v1332_v58 = vadd.f32 %v1328_v54, %v6712_v2  ;;  %v1382_v6 = vmul.f32 %v8097_v5, %v6722_v40  ;;  %v1391_v8 = vmul.f32 %v8098_v55, %v6727_v23  ;;  %v8100_v11 = vld [vmem:[#allocation105_spill] sm:$0xff] }
 0x331   :  { %v743_v3 = vadd.f32 %v739_v20, %v734_v21  ;;  %v1641_v4 = vmul.f32 %v8099_v50, %v6690_v42  ;;  %v1650_v54 = vmul.f32 %v8100_v11, %v6692_v26  ;;  %v1659_v12 = vmul.f32 %v8101_v36, %v6712_v2  ;;  %v8102_v21 = vld [vmem:[#allocation27_spill] sm:$0xff]  ;;  %v8103_v5 = vld [vmem:[#allocation73_spill] sm:$0xff] }
 0x332   :  { %v1046_v10 = vadd.f32 %v1042_v53, %v1037_v61  ;;  %v1341_v15 = vadd.f32 %v1337_v45, %v1332_v58  ;;  %v1668_v7 = vmul.f32 %v8102_v21, %v6716_v32  ;;  %v1677_v55 = vmul.f32 %v8103_v5, %v6718_v22  ;;  %v8104_v45 = vld [vmem:[#allocation53_spill] sm:$0xff] }
 0x333   :  { %v752_v31 = vadd.f32 %v748_v48, %v743_v3  ;;  %v1645_v20 = vadd.f32 %v1641_v4, %v6716_v32  ;;  %v1686_v53 = vmul.f32 %v8044_v19, %v6720_v49  ;;  %v1954_v61 = vmul.f32 %v8104_v45, %v6690_v42  ;;  %v8105_v4 = vld [vmem:[#allocation84_spill] sm:$0xff] }
 0x334   :  { %v1055_v24 = vadd.f32 %v1051_v35, %v1046_v10  ;;  %v1350_v41 = vadd.f32 %v1346_v39, %v1341_v15  ;;  %v1695_v48 = vmul.f32 %v8045_v51, %v6722_v40  ;;  %v1704_v3 = vmul.f32 %v8105_v4, %v6727_v23 }
 0x335   :  { %v761_v58 = vadd.f32 %v757_v16, %v752_v31  ;;  %v1654_v50 = vadd.f32 %v1650_v54, %v1645_v20  ;;  %v1958_v21 = vadd.f32 %v1954_v61, %v6718_v22  ;;  %v1963_v35 = vmul.f32 %v8047_v33, %v6692_v26 }
 0x336   :  { %v1064_v11 = vadd.f32 %v1060_v17, %v1055_v24  ;;  %v1359_v36 = vadd.f32 %v1355_v1, %v1350_v41  ;;  %v1972_v10 = vmul.f32 %v7990_v13, %v6712_v2  ;;  %v1981_v31 = vmul.f32 %v7991_v44, %v6716_v32 }
 0x337   :  { %v770_v39 = vadd.f32 %v766_v56, %v761_v58  ;;  %v1663_v19 = vadd.f32 %v1659_v12, %v1654_v50  ;;  %v1967_v15 = vadd.f32 %v1963_v35, %v1958_v21  ;;  %v1990_v24 = vmul.f32 %v8048_v47, %v6718_v22  ;;  %v8106_v58 = vld [vmem:[#allocation135_spill] sm:$0xff] }
 0x338   :  { %v1073_v16 = vadd.f32 %v1069_v30, %v1064_v11  ;;  %v1368_v51 = vadd.f32 %v1364_v63, %v1359_v36  ;;  %v1999_v17 = vmul.f32 %v7993_v52, %v6720_v49  ;;  %v2008_v33 = vmul.f32 %v6100_v27, %v6722_v40  ;;  %v8108_v11 = vld [vmem:[#allocation141_spill] sm:$0xff] }
 0x339   :  { %774 = vst [vmem:[#allocation2 + $0x10] sm:$0xff] %v770_v39  ;;  %v1672_v41 = vadd.f32 %v1668_v7, %v1663_v19  ;;  %v2267_v13 = vmul.f32 %v6140_v14, %v6690_v42  ;;  %v1976_v44 = vadd.f32 %v1972_v10, %v1967_v15  ;;  %v2017_v30 = vmul.f32 %v6117_v25, %v6727_v23  ;;  %v8111_v39 = vld [vmem:[#allocation148_spill] sm:$0xff]  ;;  %v8113_v15 = vld [vmem:[#allocation150_spill] sm:$0xff] }
 0x33a   :  { %v1082_v12 = vadd.f32 %v1078_v46, %v1073_v16  ;;  %v1377_v56 = vadd.f32 %v1373_v9, %v1368_v51  ;;  %v2276_v63 = vmul.f32 %v6143_v18, %v6692_v26  ;;  %v2285_v52 = vmul.f32 %v6148_v0, %v6712_v2  ;;  %v8112_v16 = vld [vmem:[#allocation149_spill] sm:$0xff] }
 0x33b   :  { %v1681_v1 = vadd.f32 %v1677_v55, %v1672_v41  ;;  %v2271_v47 = vadd.f32 %v2267_v13, %v6720_v49  ;;  %v1985_v54 = vadd.f32 %v1981_v31, %v1976_v44  ;;  %v2294_v14 = vmul.f32 %v6151_v34, %v6716_v32  ;;  %v8115_v13 = vld [vmem:[#allocation117_spill] sm:$0xff]  ;;  %v8117_v44 = vld [vmem:[#allocation118_spill] sm:$0xff] }
 0x33c   :  { %1087 = vst [vmem:[#allocation2 + $0x30] sm:$0xff] %v1082_v12  ;;  %v1386_v27 = vadd.f32 %v1382_v6, %v1377_v56  ;;  %v2303_v46 = vmul.f32 %v6154_v60, %v6718_v22  ;;  %v2312_v20 = vmul.f32 %v6159_v38, %v6720_v49  ;;  %v2580_v18 = vmul.f32 %v6213_v29, %v6690_v42 }
 0x33d   :  { %v1690_v9 = vadd.f32 %v1686_v53, %v1681_v1  ;;  %v2280_v25 = vadd.f32 %v2276_v63, %v2271_v47  ;;  %v1994_v5 = vadd.f32 %v1990_v24, %v1985_v54  ;;  %v2321_v0 = vmul.f32 %v6173_v28, %v6722_v40  ;;  %v8118_v1 = vld [vmem:[#allocation33_spill] sm:$0xff] }
 0x33e   :  { %v1395_v7 = vadd.f32 %v1391_v8, %v1386_v27  ;;  %v2330_v6 = vmul.f32 %v6194_v59, %v6727_v23  ;;  %v2584_v60 = vadd.f32 %v2580_v18, %v6722_v40  ;;  %v2589_v53 = vmul.f32 %v6216_v62, %v6692_v26  ;;  %v8107_v62 = vld [vmem:[#allocation136_spill] sm:$0xff]  ;;  %v8120_v27 = vld [vmem:[#allocation34_spill] sm:$0xff] }
 0x33f   :  { %v1699_v34 = vadd.f32 %v1695_v48, %v1690_v9  ;;  %v2289_v55 = vadd.f32 %v2285_v52, %v2280_v25  ;;  %v2003_v38 = vadd.f32 %v1999_v17, %v1994_v5  ;;  %v2598_v29 = vmul.f32 %v6221_v57, %v6712_v2  ;;  %v8109_v57 = vld [vmem:[#allocation146_spill] sm:$0xff]  ;;  %v8114_v17 = vld [vmem:[#allocation151_spill] sm:$0xff]  ;;  %v8119_v52 = vld [vmem:[#allocation116_spill] sm:$0xff] }
 0x340   :  { %1400 = vst [vmem:[#allocation2 + $0x50] sm:$0xff] %v1395_v7  ;;  %v2607_v8 = vmul.f32 %v6224_v37, %v6716_v32  ;;  %v2616_v28 = vmul.f32 %v8049_v43, %v6718_v22  ;;  %v2593_v61 = vadd.f32 %v2589_v53, %v2584_v60  ;;  %v2625_v50 = vmul.f32 %v8106_v58, %v6720_v49  ;;  %v8110_v43 = vld [vmem:[#allocation147_spill] sm:$0xff]  ;;  %v8122_v25 = vld [vmem:[#allocation36_spill] sm:$0xff]  ;;  %v8123_v5 = vld [vmem:[#allocation89_spill] sm:$0xff] }
 0x341   :  { %v1708_v45 = vadd.f32 %v1704_v3, %v1699_v34  ;;  %v2298_v59 = vadd.f32 %v2294_v14, %v2289_v55  ;;  %v2012_v48 = vadd.f32 %v2008_v33, %v2003_v38  ;;  %v2634_v4 = vmul.f32 %v8107_v62, %v6722_v40  ;;  %v8124_v60 = vld [vmem:[#allocation40_spill] sm:$0xff]  ;;  %v8125_v38 = vld [vmem:[#allocation90_spill] sm:$0xff] }
 0x342   :  { %v2643_v36 = vmul.f32 %v8108_v11, %v6727_v23  ;;  %v2893_v21 = vmul.f32 %v8109_v57, %v6690_v42  ;;  %v2602_v35 = vadd.f32 %v2598_v29, %v2593_v61  ;;  %v2902_v3 = vmul.f32 %v8110_v43, %v6692_v26  ;;  %v8128_v62 = vld [vmem:[#allocation32_spill] sm:$0xff] }
 0x343   :  { %1713 = vst [vmem:[#allocation2 + $0x70] sm:$0xff] %v1708_v45  ;;  %v2307_v37 = vadd.f32 %v2303_v46, %v2298_v59  ;;  %v2911_v19 = vmul.f32 %v8111_v39, %v6712_v2  ;;  %v2021_v10 = vadd.f32 %v2017_v30, %v2012_v48  ;;  %v2920_v51 = vmul.f32 %v8112_v16, %v6716_v32  ;;  %v8116_v2 = vld [vmem:[#allocation152_spill] sm:$0xff]  ;;  %v8121_v46 = vld [vmem:[#allocation35_spill] sm:$0xff]  ;;  %v8126_v45 = vld [vmem:[#allocation82_spill] sm:$0xff] }
 0x344   :  { %v2897_v31 = vadd.f32 %v2893_v21, %v6727_v23  ;;  %v2929_v24 = vmul.f32 %v8113_v15, %v6718_v22  ;;  %v2611_v42 = vadd.f32 %v2607_v8, %v2602_v35  ;;  %v2938_v33 = vmul.f32 %v8114_v17, %v6720_v49  ;;  %v8130_v39 = vld [vmem:[#allocation22_spill] sm:$0xff]  ;;  %v8133_v15 = vld [vmem:[#allocation79_spill] sm:$0xff] }
 0x345   :  { %v2316_v41 = vadd.f32 %v2312_v20, %v2307_v37  ;;  %v684_v12 = vrot.slane %v8115_v13, 7  ;;  %2026 = vst [vmem:[#allocation2 + $0x90] sm:$0xff] %v2021_v10  ;;  %v2947_v56 = vmul.f32 %v8116_v2, %v6722_v40  ;;  %v686_v30 = vrot.slane %v8117_v44, 6  ;;  %v8135_v13 = vld [vmem:[#allocation42_spill] sm:$0xff] }
 0x346   :  { %v2906_v26 = vadd.f32 %v2902_v3, %v2897_v31  ;;  %v688_v47 = vrot.slane %v8118_v1, 5  ;;  %v2620_v63 = vadd.f32 %v2616_v28, %v2611_v42  ;;  %v690_v54 = vrot.slane %v8120_v27, 4  ;;  %v8132_v31 = vld [vmem:[#allocation58_spill] sm:$0xff]  ;;  %v8140_v27 = vld [vmem:[#allocation108_spill] sm:$0xff] }
 0x347   :  { %v2325_v32 = vadd.f32 %v2321_v0, %v2316_v41  ;;  %v685_v22 = vsel %vm626_vm0, %v684_v12, %v8119_v52  ;;  %v692_v9 = vrot.slane %v8121_v46, 3  ;;  %v694_v20 = vrot.slane %v8122_v25, 2  ;;  %v8134_v41 = vld [vmem:[#allocation30_spill] sm:$0xff] }
 0x348   :  { %v2915_v14 = vadd.f32 %v2911_v19, %v2906_v26  ;;  %v687_v49 = vsel %vm629_vm1, %v686_v30, %v685_v22  ;;  %v2629_v40 = vadd.f32 %v2625_v50, %v2620_v63  ;;  %v995_v34 = vrot.slane %v8123_v5, 7  ;;  %v8131_v19 = vld [vmem:[#allocation43_spill] sm:$0xff]  ;;  %v8136_v26 = vld [vmem:[#allocation56_spill] sm:$0xff]  ;;  %v8137_v30 = vld [vmem:[#allocation57_spill] sm:$0xff] }
 0x349   :  { %v2334_v18 = vadd.f32 %v2330_v6, %v2325_v32  ;;  %v689_v7 = vsel %vm632_vm2, %v688_v47, %v687_v49  ;;  %v696_v53 = vrot.slane %v8124_v60, 1  ;;  %v997_v29 = vrot.slane %v8125_v38, 6  ;;  %v8127_v6 = vld [vmem:[#allocation91_spill] sm:$0xff]  ;;  %v8139_v52 = vld [vmem:[#allocation98_spill] sm:$0xff]  ;;  %v8141_v49 = vld [vmem:[#allocation64_spill] sm:$0xff] }
 0x34a   :  { %v2924_v0 = vadd.f32 %v2920_v51, %v2915_v14  ;;  %v691_v55 = vsel %vm635_vm3, %v690_v54, %v689_v7  ;;  %v2638_v8 = vadd.f32 %v2634_v4, %v2629_v40  ;;  %v996_v59 = vsel %vm626_vm0, %v995_v34, %v8126_v45  ;;  %v8129_v4 = vld [vmem:[#allocation93_spill] sm:$0xff]  ;;  %v8138_v47 = vld [vmem:[#allocation63_spill] sm:$0xff]  ;;  %v8144_v7 = vld [vmem:[#allocation96_spill] sm:$0xff] }
 0x34b   :  { %2339 = vst [vmem:[#allocation2 + $0xb0] sm:$0xff] %v2334_v18  ;;  %v693_v28 = vsel %vm638_vm4, %v692_v9, %v691_v55  ;;  %v999_v61 = vrot.slane %v8127_v6, 5  ;;  %v998_v48 = vsel %vm629_vm1, %v997_v29, %v996_v59  ;;  %v1001_v11 = vrot.slane %v8128_v62, 4  ;;  %v8142_v9 = vld [vmem:[#allocation65_spill] sm:$0xff]  ;;  %v8146_v55 = vld [vmem:[#allocation102_spill] sm:$0xff]  ;;  %v8147_v29 = vld [vmem:[#allocation83_spill] sm:$0xff] }
 0x34c   :  { %v2933_v58 = vadd.f32 %v2929_v24, %v2924_v0  ;;  %v695_v50 = vsel %vm641_vm5, %v694_v20, %v693_v28  ;;  %v2647_v57 = vadd.f32 %v2643_v36, %v2638_v8  ;;  %v1003_v35 = vrot.slane %v8129_v4, 3  ;;  %v8143_v20 = vld [vmem:[#allocation100_spill] sm:$0xff]  ;;  %v8145_v34 = vld [vmem:[#allocation101_spill] sm:$0xff]  ;;  %v8148_v28 = vld [vmem:[#allocation50_spill] sm:$0xff] }
 0x34d   :  { %v697_v21 = vsel %vm644_vm6, %v696_v53, %v695_v50  ;;  %v1000_v37 = vsel %vm632_vm2, %v999_v61, %v998_v48  ;;  %v1005_v36 = vrot.slane %v8130_v39, 2  ;;  %v1308_v10 = vrot.slane %v8131_v19, 7  ;;  %v8149_v61 = vld [vmem:[#allocation45_spill] sm:$0xff]  ;;  %v8150_v50 = vld [vmem:[#allocation103_spill] sm:$0xff] }
 0x34e   :  { %v2942_v43 = vadd.f32 %v2938_v33, %v2933_v58  ;;  %699 = vst [vmem:[#allocation4] sm:$0xff] %v697_v21  ;;  %v1002_v3 = vsel %vm635_vm3, %v1001_v11, %v1000_v37  ;;  %v2956_v16 = vmul.f32 %v8132_v31, %v6727_v23  ;;  %v1007_v24 = vrot.slane %v8133_v15, 1  ;;  %v8151_v11 = vld [vmem:[#allocation28_spill] sm:$0xff]  ;;  %v8152_v21 = vld [vmem:[#allocation51_spill] sm:$0xff]  ;;  %v8154_v39 = vld [vmem:[#allocation85_spill] sm:$0xff] }
 0x34f   :  { %2652 = vst [vmem:[#allocation2 + $0xd0] sm:$0xff] %v2647_v57  ;;  %v1004_v51 = vsel %vm638_vm4, %v1003_v35, %v1002_v3  ;;  %v1310_v42 = vrot.slane %v8134_v41, 6  ;;  %v1309_v12 = vsel %vm626_vm0, %v1308_v10, %v8135_v13  ;;  %v1312_v2 = vrot.slane %v8136_v26, 5  ;;  %v8153_v4 = vld [vmem:[#allocation47_spill] sm:$0xff] }
 0x350   :  { %v2951_v17 = vadd.f32 %v2947_v56, %v2942_v43  ;;  %v1006_v33 = vsel %vm641_vm5, %v1005_v36, %v1004_v51  ;;  %v1314_v1 = vrot.slane %v8137_v30, 4  ;;  %v1316_v32 = vrot.slane %v8138_v47, 3  ;;  %v8155_v19 = vld [vmem:[#allocation123_spill] sm:$0xff]  ;;  %v8156_v51 = vld [vmem:[#allocation52_spill] sm:$0xff] }
 0x351   :  { %v1008_v44 = vsel %vm644_vm6, %v1007_v24, %v1006_v33  ;;  %v1311_v23 = vsel %vm629_vm1, %v1310_v42, %v1309_v12  ;;  %v1621_v22 = vrot.slane %v8139_v52, 7  ;;  %v1623_v54 = vrot.slane %v8140_v27, 6  ;;  %v8157_v24 = vld [vmem:[#allocation124_spill] sm:$0xff]  ;;  %v8158_v33 = vld [vmem:[#allocation122_spill] sm:$0xff]  ;;  %v8159_v12 = vld [vmem:[#allocation125_spill] sm:$0xff] }
 0x352   :  { %v2960_v63 = vadd.f32 %v2956_v16, %v2951_v17  ;;  %1011 = vst [vmem:[#allocation4 + $0x8] sm:$0xff] %v1008_v44  ;;  %v1313_v56 = vsel %vm632_vm2, %v1312_v2, %v1311_v23  ;;  %v1318_v46 = vrot.slane %v8141_v49, 2  ;;  %v1320_v25 = vrot.slane %v8142_v9, 1  ;;  %v8160_v44 = vld [vmem:[#allocation109_spill] sm:$0xff]  ;;  %v8164_v49 = vld [vmem:[#allocation55_spill] sm:$0xff]  ;;  %v8165_v9 = vld [vmem:[#allocation128_spill] sm:$0xff] }
 0x353   :  { %v1315_v14 = vsel %vm635_vm3, %v1314_v1, %v1313_v56  ;;  %v1625_v18 = vrot.slane %v8143_v20, 5  ;;  %v1622_v5 = vsel %vm626_vm0, %v1621_v22, %v8144_v7  ;;  %v1627_v0 = vrot.slane %v8145_v34, 4  ;;  %v8161_v1 = vld [vmem:[#allocation48_spill] sm:$0xff]  ;;  %v8162_v56 = vld [vmem:[#allocation111_spill] sm:$0xff]  ;;  %v8167_v7 = vld [vmem:[#allocation126_spill] sm:$0xff] }
 0x354   :  { %2965 = vst [vmem:[#allocation2 + $0xf0] sm:$0xff] %v2960_v63  ;;  %v1317_v40 = vsel %vm638_vm4, %v1316_v32, %v1315_v14  ;;  %v1629_v60 = vrot.slane %v8146_v55, 3  ;;  %v1624_v38 = vsel %vm629_vm1, %v1623_v54, %v1622_v5  ;;  %v1934_v8 = vrot.slane %v8147_v29, 7  ;;  %v8163_v22 = vld [vmem:[#allocation127_spill] sm:$0xff]  ;;  %v8168_v34 = vld [vmem:[#allocation129_spill] sm:$0xff] }
 0x355   :  { %2979 = dma.vmem_to_hbm [thread:$0]  %s2972_s12, 4096, %s2974_s15, [#allocation3], %s3234_s2, %s3234_s2, %s3235_s16   ;;  %v1319_v53 = vsel %vm641_vm5, %v1318_v46, %v1317_v40  ;;  %v1936_v45 = vrot.slane %v8148_v28, 6  ;;  %v1626_v6 = vsel %vm632_vm2, %v1625_v18, %v1624_v38  ;;  %v1631_v58 = vrot.slane %v8149_v61, 2  ;;  %v8166_v18 = vld [vmem:[#allocation112_spill] sm:$0xff]  ;;  %v8170_v29 = vld [vmem:[#allocation131_spill] sm:$0xff] }
 0x356   :  { %v1321_v59 = vsel %vm644_vm6, %v1320_v25, %v1319_v53  ;;  %v1633_v48 = vrot.slane %v8150_v50, 1  ;;  %v1628_v62 = vsel %vm635_vm3, %v1627_v0, %v1626_v6  ;;  %v1935_v57 = vsel %vm626_vm0, %v1934_v8, %v8151_v11  ;;  %v8169_v53 = vld [vmem:[#allocation130_spill] sm:$0xff]  ;;  %v8172_v61 = vld [vmem:[#allocation139_spill] sm:$0xff] }
 0x357   :  { %1324 = vst [vmem:[#allocation4 + $0x10] sm:$0xff] %v1321_v59  ;;  %v1938_v37 = vrot.slane %v8152_v21, 5  ;;  %v1940_v35 = vrot.slane %v8153_v4, 4  ;;  %v1630_v43 = vsel %vm638_vm4, %v1629_v60, %v1628_v62  ;;  %v1937_v3 = vsel %vm629_vm1, %v1936_v45, %v1935_v57  ;;  %v8171_v59 = vld [vmem:[#allocation138_spill] sm:$0xff]  ;;  %v8174_v57 = vld [vmem:[#allocation133_spill] sm:$0xff] }
 0x358   :  { %v1942_v36 = vrot.slane %v8154_v39, 3  ;;  %v2247_v10 = vrot.slane %v8155_v19, 7  ;;  %v1632_v31 = vsel %vm641_vm5, %v1631_v58, %v1630_v43  ;;  %v1944_v15 = vrot.slane %v8156_v51, 2 }
 0x359   :  { %v1939_v16 = vsel %vm632_vm2, %v1938_v37, %v1937_v3  ;;  %v2249_v41 = vrot.slane %v8157_v24, 6  ;;  %v1634_v42 = vsel %vm644_vm6, %v1633_v48, %v1632_v31  ;;  %v2251_v26 = vrot.slane %v8159_v12, 5  ;;  %v8173_v48 = vld [vmem:[#allocation132_spill] sm:$0xff]  ;;  %v8175_v37 = vld [vmem:[#allocation137_spill] sm:$0xff] }
 0x35a   :  { %v1941_v17 = vsel %vm635_vm3, %v1940_v35, %v1939_v16  ;;  %v2248_v13 = vsel %vm626_vm0, %v2247_v10, %v8158_v33  ;;  %1637 = vst [vmem:[#allocation4 + $0x18] sm:$0xff] %v1634_v42  ;;  %v1946_v23 = vrot.slane %v8160_v44, 1  ;;  %v2253_v47 = vrot.slane %v8161_v1, 4  ;;  %v8176_v35 = vld [vmem:[#allocation140_spill] sm:$0xff]  ;;  %v8178_v16 = vld [vmem:[#allocation143_spill] sm:$0xff] }
 0x35b   :  { %v1943_v2 = vsel %vm638_vm4, %v1942_v36, %v1941_v17  ;;  %v2250_v30 = vsel %vm629_vm1, %v2249_v41, %v2248_v13  ;;  %v2255_v52 = vrot.slane %v8162_v56, 3  ;;  %v2560_v27 = vrot.slane %v8163_v22, 7  ;;  %v8177_v36 = vld [vmem:[#allocation142_spill] sm:$0xff]  ;;  %v8179_v24 = vld [vmem:[#allocation144_spill] sm:$0xff]  ;;  %v8180_v17 = vld [vmem:[#allocation145_spill] sm:$0xff] }
 0x35c   :  { %v1945_v32 = vsel %vm641_vm5, %v1944_v15, %v1943_v2  ;;  %v2252_v63 = vsel %vm632_vm2, %v2251_v26, %v2250_v30  ;;  %v2257_v46 = vrot.slane %v8164_v49, 2  ;;  %v2562_v25 = vrot.slane %v8165_v9, 6 }
 0x35d   :  { %v1947_v54 = vsel %vm644_vm6, %v1946_v23, %v1945_v32  ;;  %v2254_v14 = vsel %vm635_vm3, %v2253_v47, %v2252_v63  ;;  %v2259_v40 = vrot.slane %v8166_v18, 1  ;;  %v2561_v5 = vsel %vm626_vm0, %v2560_v27, %v8167_v7 }
 0x35e   :  { %1950 = vst [vmem:[#allocation4 + $0x20] sm:$0xff] %v1947_v54  ;;  %v2256_v20 = vsel %vm638_vm4, %v2255_v52, %v2254_v14  ;;  %v2564_v0 = vrot.slane %v8168_v34, 5  ;;  %v2563_v60 = vsel %vm629_vm1, %v2562_v25, %v2561_v5  ;;  %v2566_v38 = vrot.slane %v8169_v53, 4 }
 0x35f   :  { %v2258_v55 = vsel %vm641_vm5, %v2257_v46, %v2256_v20  ;;  %v2568_v8 = vrot.slane %v8170_v29, 3  ;;  %v2873_v6 = vrot.slane %v8171_v59, 7  ;;  %v2875_v58 = vrot.slane %v8172_v61, 6 }
 0x360   :  { %v2260_v28 = vsel %vm644_vm6, %v2259_v40, %v2258_v55  ;;  %v2565_v45 = vsel %vm632_vm2, %v2564_v0, %v2563_v60  ;;  %v2570_v62 = vrot.slane %v8173_v48, 2  ;;  %v2572_v21 = vrot.slane %v8174_v57, 1 }
 0x361   :  { %2263 = vst [vmem:[#allocation4 + $0x28] sm:$0xff] %v2260_v28  ;;  %v2567_v50 = vsel %vm635_vm3, %v2566_v38, %v2565_v45  ;;  %v2874_v4 = vsel %vm626_vm0, %v2873_v6, %v8175_v37  ;;  %v2877_v43 = vrot.slane %v8176_v35, 5  ;;  %v2879_v19 = vrot.slane %v8177_v36, 4 }
 0x362   :  { %v2569_v11 = vsel %vm638_vm4, %v2568_v8, %v2567_v50  ;;  %v2876_v39 = vsel %vm629_vm1, %v2875_v58, %v2874_v4  ;;  %v2881_v51 = vrot.slane %v8178_v16, 3  ;;  %v2883_v41 = vrot.slane %v8179_v24, 2 }
 0x363   :  { %v2571_v3 = vsel %vm641_vm5, %v2570_v62, %v2569_v11  ;;  %v2878_v31 = vsel %vm632_vm2, %v2877_v43, %v2876_v39  ;;  %v2885_v33 = vrot.slane %v8180_v17, 1 }
 0x364   :  { %v2573_v10 = vsel %vm644_vm6, %v2572_v21, %v2571_v3  ;;  %v2880_v15 = vsel %vm635_vm3, %v2879_v19, %v2878_v31 }
 0x365   :  { %2576 = vst [vmem:[#allocation4 + $0x30] sm:$0xff] %v2573_v10  ;;  %v2882_v42 = vsel %vm638_vm4, %v2881_v51, %v2880_v15 }
 0x366   :  { %v2884_v13 = vsel %vm641_vm5, %v2883_v41, %v2882_v42 }
 0x367   :  { %v2886_v12 = vsel %vm644_vm6, %v2885_v33, %v2884_v13 }
 0x368   :  { %2889 = vst [vmem:[#allocation4 + $0x38] sm:$0xff] %v2886_v12 }
 0x369   :  { %2992 = dma.vmem_to_hbm [thread:$0]  %s2985_s18, 1024, %s2987_s21, [#allocation5], %s3234_s2, %s3234_s2, %s3235_s16  }
 0x36a   :  { %3226 = dma.done.wait [#allocation3], 4096  }
 0x36b   :  { %3227 = vsyncadd [#allocation3], 4294963200 }
 0x36c   :  { %3228 = dma.done.wait [#allocation5], 1024  }
 0x36d   :  { %3229 = vsyncadd [#allocation5], 4294966272 }
 0x36e   :  { %3001 = vsyncpa [#allocation3], 1 }
 0x36f   :  { %3002 = vsyncpa [#allocation5], 1 }

</bundles_post_ra>
